<compile_context>
chip_gen: v5e
topology: v5e:2x2
jax: 0.10.0
libtpu: 0.0.40
codegen_flags: <defaults>
</compile_context>

<pallas_src>
import functools
import math

import jax
import jax.numpy as jnp
from jax.experimental import pallas as pl
from jax.experimental.pallas import tpu as pltpu


def _round_up(a, b):
    return (a + b - 1) // b * b


# ----------------------------------------------------------------------------
# Kernel: fused MoE feed-forward stack for one row tile.
# refs layout: x_ref, [wg_0, W_0, b_0, ..., wg_{L-1}, W_{L-1}, b_{L-1}],
#              out_ref, [gates_0, ..., gates_{L-1}]
# ----------------------------------------------------------------------------
def _moe_ffn_kernel(x_ref, *refs, n_layers, k, num_experts, apply_swish):
    w_refs = refs[: 3 * n_layers]
    out_ref = refs[3 * n_layers]
    gate_refs = refs[3 * n_layers + 1:]

    h = x_ref[...].astype(jnp.float32)          # (tile_m, D0_pad)
    inv_e = 1.0 / float(num_experts)

    for l in range(n_layers):
        wg_ref = w_refs[3 * l + 0]              # (D_in_pad, E)   fp32
        w_ref = w_refs[3 * l + 1]               # (E, D_in_pad, D_out_pad) bf16
        b_ref = w_refs[3 * l + 2]               # (E, D_out_pad)  fp32

        # ---- gating (fp32, tiny matmul) ----
        logits = jnp.dot(h, wg_ref[...], preferred_element_type=jnp.float32)
        col = jax.lax.broadcasted_iota(jnp.int32, logits.shape, 1)
        rank = jnp.zeros_like(logits)
        for j in range(num_experts):            # rank = #experts beating expert e
            lj = logits[:, j:j + 1]
            beats = (lj > logits) | ((lj == logits) & (j < col))
            rank = rank + beats.astype(jnp.float32)
        selected = rank < k                     # top-k mask (ties -> lower index)
        m = jnp.max(jnp.where(selected, logits, -jnp.inf), axis=-1, keepdims=True)
        ex = jnp.where(selected, jnp.exp(logits - m), 0.0)
        gates = ex / jnp.sum(ex, axis=-1, keepdims=True)   # (tile_m, E) fp32
        gate_refs[l][...] = gates.astype(gate_refs[l].dtype)

        # ---- experts: bf16 MXU matmuls, fp32 accumulate ----
        h_bf = h.astype(jnp.bfloat16)
        acc = jnp.zeros((h.shape[0], w_ref.shape[-1]), jnp.float32)
        for e in range(num_experts):
            oe = jnp.dot(h_bf, w_ref[e], preferred_element_type=jnp.float32)
            oe = oe + b_ref[e:e + 1, :]
            acc = acc + gates[:, e:e + 1] * oe
        h = acc * inv_e                         # torch: y.mean(dim=1)

        if apply_swish and l < n_layers - 1:    # dropout path applies swish (eval: dropout=id)
            h = h * jax.nn.sigmoid(h)

    out_ref[...] = h.astype(out_ref.dtype)


def _moe_ffn_pallas(x_p, layers, *, tile_m, k, num_experts, apply_swish):
    """x_p: (M_pad, D0_pad) fp32 (already padded). layers: list of (wg, W, b)."""
    M_pad, d0_p = x_p.shape
    n_layers = len(layers)
    grid = (M_pad // tile_m,)
    E = num_experts

    in_specs = [pl.BlockSpec((tile_m, d0_p), lambda i: (i, 0))]
    inputs = [x_p]
    for (wg, w, b) in layers:
        d_in_p = wg.shape[0]
        d_out_p = w.shape[-1]
        in_specs += [
            pl.BlockSpec((d_in_p, E), lambda i: (0, 0)),           # gate weights
            pl.BlockSpec((E, d_in_p, d_out_p), lambda i: (0, 0, 0)),  # expert weights
            pl.BlockSpec((E, d_out_p), lambda i: (0, 0)),          # expert biases
        ]
        inputs += [wg, w, b]

    d_last_p = layers[-1][1].shape[-1]
    out_shape = [jax.ShapeDtypeStruct((M_pad, d_last_p), jnp.float32)] + \
                [jax.ShapeDtypeStruct((M_pad, E), jnp.float32) for _ in range(n_layers)]
    out_specs = [pl.BlockSpec((tile_m, d_last_p), lambda i: (i, 0))] + \
                [pl.BlockSpec((tile_m, E), lambda i: (i, 0)) for _ in range(n_layers)]

    kernel = functools.partial(
        _moe_ffn_kernel, n_layers=n_layers, k=k,
        num_experts=num_experts, apply_swish=apply_swish)

    outs = pl.pallas_call(
        kernel,
        out_shape=out_shape,
        grid_spec=pltpu.PrefetchScalarGridSpec(
            num_scalar_prefetch=0,
            grid=grid,
            in_specs=in_specs,
            out_specs=out_specs,
        ),
        compiler_params=pltpu.CompilerParams(
            dimension_semantics=("parallel",)),
    )(*inputs)
    return outs[0], list(outs[1:])


def _cv_squared(v):
    eps = 1e-10
    if v.shape[0] == 1:
        return jnp.zeros((), jnp.float32)
    return jnp.var(v.astype(jnp.float32), ddof=1) / (jnp.mean(v.astype(jnp.float32)) ** 2 + eps)


class MoEFeedForwardPallas:
    """JAX/Pallas port of the PyTorch MoEFeedForward module (inference path)."""

    def __init__(self, dims, key, dropout=None, reshape=False, use_bias=True,
                 num_experts=3, JK='last', residual=False, k=1, coef=0.01,
                 tile_m=256):
        assert k <= num_experts
        self.dims = list(dims)
        self.k = k
        self.num_experts = num_experts
        self.coef = coef
        self.reshape = reshape
        # dropout is identity at inference; the dropout!=None branch of the torch
        # forward additionally applies swish between layers — we keep that.
        self.apply_swish = dropout is not None
        self.tile_m = tile_m
        self.load_balance_loss = None

        self.layers = []   # (w_gate fp32 (Din_p,E), W bf16 (E,Din_p,Dout_p), b fp32 (E,Dout_p))
        for i in range(len(dims) - 1):
            d_in, d_out = dims[i], dims[i + 1]
            d_in_p, d_out_p = _round_up(d_in, 128), _round_up(d_out, 128)
            key, kg, kw, kb = jax.random.split(key, 4)
            bound = 1.0 / math.sqrt(d_in)
            w = jax.random.uniform(kw, (num_experts, d_in, d_out), jnp.float32, -bound, bound)
            if use_bias:
                b = jax.random.uniform(kb, (num_experts, d_out), jnp.float32, -bound, bound)
            else:
                b = jnp.zeros((num_experts, d_out), jnp.float32)
            # NOTE: torch inits w_gate to zeros (learned); random init here so routing
            # is actually exercised by the test.
            wg = jax.random.normal(kg, (d_in, num_experts), jnp.float32) * 0.2
            wg_p = jnp.zeros((d_in_p, num_experts), jnp.float32).at[:d_in].set(wg)
            w_p = (jnp.zeros((num_experts, d_in_p, d_out_p), jnp.float32)
                   .at[:, :d_in, :d_out].set(w).astype(jnp.bfloat16))
            b_p = jnp.zeros((num_experts, d_out_p), jnp.float32).at[:, :d_out].set(b)
            self.layers.append((wg_p, w_p, b_p))

    def __call__(self, x):
        M, d0 = x.shape
        assert d0 == self.dims[0]
        d0_p = self.layers[0][0].shape[0]
        tile_m = min(self.tile_m, _round_up(M, 8))
        M_pad = _round_up(M, tile_m)
        x_p = jnp.zeros((M_pad, d0_p), jnp.float32).at[:M, :d0].set(x.astype(jnp.float32))

        out_p, gates_list = _moe_ffn_pallas(
            x_p, self.layers, tile_m=tile_m, k=self.k,
            num_experts=self.num_experts, apply_swish=self.apply_swish)

        out = out_p[:M, : self.dims[-1]]

        # Auxiliary load-balance loss (cheap, computed from the kernel's gates).
        losses = []
        for g in gates_list:
            g = g[:M]
            importance = g.sum(0)
            load = (g > 0).sum(0).astype(jnp.float32)
            losses.append(self.coef * (_cv_squared(importance) + _cv_squared(load)))
        self.load_balance_loss = sum(losses) / len(losses)

        if self.reshape:
            out = out.reshape(out.shape[0], -1, 1)
        return out


# ----------------------------------------------------------------------------
# Pure-JAX reference (same precision policy: bf16 expert matmuls, fp32 gating).
# ----------------------------------------------------------------------------
def _gates_ref(logits, kk):
    E = logits.shape[-1]
    topv, topi = jax.lax.top_k(logits, kk)
    gv = jax.nn.softmax(topv, axis=-1)
    return jnp.sum(jax.nn.one_hot(topi, E, dtype=logits.dtype) * gv[..., None], axis=1)


def _reference(x, module):
    d0 = module.dims[0]
    d0_p = module.layers[0][0].shape[0]
    h = jnp.zeros((x.shape[0], d0_p), jnp.float32).at[:, :d0].set(x.astype(jnp.float32))
    n_layers = len(module.layers)
    total_loss = 0.0
    for l, (wg, w, b) in enumerate(module.layers):
        logits = h @ wg
        gates = _gates_ref(logits, module.k)
        importance = gates.sum(0)
        load = (gates > 0).sum(0).astype(jnp.float32)
        total_loss = total_loss + module.coef * (_cv_squared(importance) + _cv_squared(load))
        h_bf = h.astype(jnp.bfloat16)
        acc = jnp.zeros((h.shape[0], w.shape[-1]), jnp.float32)
        for e in range(module.num_experts):
            oe = jnp.dot(h_bf, w[e], preferred_element_type=jnp.float32) + b[e][None, :]
            acc = acc + gates[:, e:e + 1] * oe
        h = acc / module.num_experts
        if module.apply_swish and l < n_layers - 1:
            h = h * jax.nn.sigmoid(h)
    total_loss = total_loss / n_layers
    return h[:, : module.dims[-1]], total_loss


if __name__ == "__main__":
    key = jax.random.PRNGKey(0)
    key, xk, p1, p2 = jax.random.split(key, 4)

    # MoE gating operates on 2D (tokens, features): small test = 512 tokens, dims[0]=32.
    batch = 512
    dims = [32, 64, 16]
    x = jax.random.normal(xk, (batch, dims[0]), jnp.float32)

    # Config 1: module defaults (dropout=None -> no inter-layer activation, k=1, 3 experts).
    m1 = MoEFeedForwardPallas(dims, p1, dropout=None, k=1, num_experts=3)
    out1 = jax.block_until_ready(m1(x))
    ref1, ref_loss1 = _reference(x, m1)
    assert out1.shape == (batch, dims[-1]), out1.shape
    assert jnp.allclose(out1, ref1, atol=1e-2, rtol=1e-2), "config1: output mismatch"
    assert jnp.allclose(m1.load_balance_loss, ref_loss1, atol=1e-3, rtol=1e-3), "config1: loss mismatch"

    # Config 2: dropout given (identity at inference -> swish between layers), k=2, 4 experts.
    m2 = MoEFeedForwardPallas(dims, p2, dropout=0.1, k=2, num_experts=4)
    out2 = jax.block_until_ready(m2(x))
    ref2, ref_loss2 = _reference(x, m2)
    assert out2.shape == (batch, dims[-1]), out2.shape
    assert jnp.allclose(out2, ref2, atol=1e-2, rtol=1e-2), "config2: output mismatch"
    assert jnp.allclose(m2.load_balance_loss, ref_loss2, atol=1e-3, rtol=1e-3), "config2: loss mismatch"

    print("KERNEL_OK")
</pallas_src>

<mosaic_0001>
module attributes {stable_mosaic.version = 11 : i64} {
  func.func @_moe_ffn_kernel(%arg0: i32, %arg1: memref<256x128xf32, #tpu.memory_space<vmem>>, %arg2: memref<128x3xf32, #tpu.memory_space<vmem>>, %arg3: memref<3x128x128xbf16, #tpu.memory_space<vmem>>, %arg4: memref<3x128xf32, #tpu.memory_space<vmem>>, %arg5: memref<128x3xf32, #tpu.memory_space<vmem>>, %arg6: memref<3x128x128xbf16, #tpu.memory_space<vmem>>, %arg7: memref<3x128xf32, #tpu.memory_space<vmem>>, %arg8: memref<256x128xf32, #tpu.memory_space<vmem>>, %arg9: memref<256x3xf32, #tpu.memory_space<vmem>>, %arg10: memref<256x3xf32, #tpu.memory_space<vmem>>) attributes {dimension_semantics = [#tpu.dimension_semantics<parallel>], iteration_bounds = array<i64: 2>, scalar_prefetch = 0 : i64, scratch_operands = 0 : i64, tpu.core_type = #tpu.core_type<tc>, window_params = [{transform_indices = @transform_0, window_bounds = array<i64: 256, 128>}, {pipeline_mode = #tpu.pipeline_mode<synchronous>, transform_indices = @transform_1, window_bounds = array<i64: 128, 3>}, {pipeline_mode = #tpu.pipeline_mode<synchronous>, transform_indices = @transform_2, window_bounds = array<i64: 3, 128, 128>}, {pipeline_mode = #tpu.pipeline_mode<synchronous>, transform_indices = @transform_3, window_bounds = array<i64: 3, 128>}, {pipeline_mode = #tpu.pipeline_mode<synchronous>, transform_indices = @transform_4, window_bounds = array<i64: 128, 3>}, {pipeline_mode = #tpu.pipeline_mode<synchronous>, transform_indices = @transform_5, window_bounds = array<i64: 3, 128, 128>}, {pipeline_mode = #tpu.pipeline_mode<synchronous>, transform_indices = @transform_6, window_bounds = array<i64: 3, 128>}, {transform_indices = @transform_7, window_bounds = array<i64: 256, 128>}, {transform_indices = @transform_8, window_bounds = array<i64: 256, 3>}, {transform_indices = @transform_9, window_bounds = array<i64: 256, 3>}]} {
    %c0 = arith.constant 0 : index
    %c0_0 = arith.constant 0 : index
    %0 = vector.load %arg1[%c0, %c0_0] : memref<256x128xf32, #tpu.memory_space<vmem>>, vector<256x128xf32>
    %c0_1 = arith.constant 0 : index
    %c0_2 = arith.constant 0 : index
    %1 = vector.load %arg2[%c0_1, %c0_2] : memref<128x3xf32, #tpu.memory_space<vmem>>, vector<128x3xf32>
    %cst = arith.constant dense<0.000000e+00> : vector<256x3xf32>
    %2 = tpu.matmul %0, %1, %cst {dimension_numbers = #tpu.dot_dimension_numbers<[1], [0], [0], [1], [0, 0, 1, 1], [], []>} : vector<256x128xf32>, vector<128x3xf32>, vector<256x3xf32> -> vector<256x3xf32>
    %3 = tpu.iota {dimensions = array<i32: 1>} : vector<256x3xi32>
    %cst_3 = arith.constant 0.000000e+00 : f32
    %4 = vector.broadcast %cst_3 : f32 to vector<256x3xf32>
    %5 = vector.extract_strided_slice %2 {offsets = [0, 0], sizes = [256, 1], strides = [1, 1]} : vector<256x3xf32> to vector<256x1xf32>
    %6 = vector.broadcast %5 : vector<256x1xf32> to vector<256x3xf32>
    %7 = arith.cmpf ogt, %6, %2 : vector<256x3xf32>
    %8 = vector.broadcast %5 : vector<256x1xf32> to vector<256x3xf32>
    %9 = arith.cmpf oeq, %8, %2 : vector<256x3xf32>
    %c0_i32 = arith.constant 0 : i32
    %10 = vector.broadcast %c0_i32 : i32 to vector<256x3xi32>
    %11 = arith.cmpi sgt, %3, %10 : vector<256x3xi32>
    %12 = arith.andi %9, %11 : vector<256x3xi1>
    %13 = arith.ori %7, %12 : vector<256x3xi1>
    %14 = arith.extui %13 : vector<256x3xi1> to vector<256x3xi32>
    %15 = arith.sitofp %14 : vector<256x3xi32> to vector<256x3xf32>
    %16 = arith.addf %4, %15 : vector<256x3xf32>
    %17 = vector.extract_strided_slice %2 {offsets = [0, 1], sizes = [256, 1], strides = [1, 1]} : vector<256x3xf32> to vector<256x1xf32>
    %18 = vector.broadcast %17 : vector<256x1xf32> to vector<256x3xf32>
    %19 = arith.cmpf ogt, %18, %2 : vector<256x3xf32>
    %20 = vector.broadcast %17 : vector<256x1xf32> to vector<256x3xf32>
    %21 = arith.cmpf oeq, %20, %2 : vector<256x3xf32>
    %c1_i32 = arith.constant 1 : i32
    %22 = vector.broadcast %c1_i32 : i32 to vector<256x3xi32>
    %23 = arith.cmpi sgt, %3, %22 : vector<256x3xi32>
    %24 = arith.andi %21, %23 : vector<256x3xi1>
    %25 = arith.ori %19, %24 : vector<256x3xi1>
    %26 = arith.extui %25 : vector<256x3xi1> to vector<256x3xi32>
    %27 = arith.sitofp %26 : vector<256x3xi32> to vector<256x3xf32>
    %28 = arith.addf %16, %27 : vector<256x3xf32>
    %29 = vector.extract_strided_slice %2 {offsets = [0, 2], sizes = [256, 1], strides = [1, 1]} : vector<256x3xf32> to vector<256x1xf32>
    %30 = vector.broadcast %29 : vector<256x1xf32> to vector<256x3xf32>
    %31 = arith.cmpf ogt, %30, %2 : vector<256x3xf32>
    %32 = vector.broadcast %29 : vector<256x1xf32> to vector<256x3xf32>
    %33 = arith.cmpf oeq, %32, %2 : vector<256x3xf32>
    %c2_i32 = arith.constant 2 : i32
    %34 = vector.broadcast %c2_i32 : i32 to vector<256x3xi32>
    %35 = arith.cmpi sgt, %3, %34 : vector<256x3xi32>
    %36 = arith.andi %33, %35 : vector<256x3xi1>
    %37 = arith.ori %31, %36 : vector<256x3xi1>
    %38 = arith.extui %37 : vector<256x3xi1> to vector<256x3xi32>
    %39 = arith.sitofp %38 : vector<256x3xi32> to vector<256x3xf32>
    %40 = arith.addf %28, %39 : vector<256x3xf32>
    %cst_4 = arith.constant 1.000000e+00 : f32
    %41 = vector.broadcast %cst_4 : f32 to vector<256x3xf32>
    %42 = arith.cmpf olt, %40, %41 : vector<256x3xf32>
    %cst_5 = arith.constant 0xFF800000 : f32
    %43 = vector.broadcast %cst_5 : f32 to vector<256x3xf32>
    %44 = arith.select %42, %2, %43 : vector<256x3xi1>, vector<256x3xf32>
    %cst_6 = arith.constant dense<0xFF800000> : vector<256xf32>
    %45 = vector.multi_reduction <maximumf>, %44, %cst_6 [1] : vector<256x3xf32> to vector<256xf32>
    %46 = vector.shape_cast %45 : vector<256xf32> to vector<256x1xf32>
    %47 = vector.broadcast %46 : vector<256x1xf32> to vector<256x3xf32>
    %48 = arith.subf %2, %47 : vector<256x3xf32>
    %49 = math.exp %48 : vector<256x3xf32>
    %cst_7 = arith.constant 0.000000e+00 : f32
    %50 = vector.broadcast %cst_7 : f32 to vector<256x3xf32>
    %51 = arith.select %42, %49, %50 : vector<256x3xi1>, vector<256x3xf32>
    %cst_8 = arith.constant dense<0.000000e+00> : vector<256xf32>
    %52 = vector.multi_reduction <add>, %51, %cst_8 [1] : vector<256x3xf32> to vector<256xf32>
    %53 = vector.shape_cast %52 : vector<256xf32> to vector<256x1xf32>
    %54 = vector.broadcast %53 : vector<256x1xf32> to vector<256x3xf32>
    %55 = arith.divf %51, %54 : vector<256x3xf32>
    %c0_9 = arith.constant 0 : index
    %c0_10 = arith.constant 0 : index
    %56 = vector.load %arg9[%c0_9, %c0_10] : memref<256x3xf32, #tpu.memory_space<vmem>>, vector<256x3xf32>
    tpu.vector_store %arg9[%c0_9, %c0_10], %55 {strides = array<i32>} : memref<256x3xf32, #tpu.memory_space<vmem>>, vector<256x3xf32>,
    %57 = arith.truncf %0 : vector<256x128xf32> to vector<256x128xbf16>
    %cst_11 = arith.constant 0.000000e+00 : f32
    %58 = vector.broadcast %cst_11 : f32 to vector<256x128xf32>
    %c0_12 = arith.constant 0 : index
    %c0_13 = arith.constant 0 : index
    %c0_14 = arith.constant 0 : index
    %59 = vector.load %arg3[%c0_12, %c0_13, %c0_14] : memref<3x128x128xbf16, #tpu.memory_space<vmem>>, vector<1x128x128xbf16>
    %60 = vector.shape_cast %59 : vector<1x128x128xbf16> to vector<128x128xbf16>
    %cst_15 = arith.constant dense<0.000000e+00> : vector<256x128xf32>
    %61 = tpu.matmul %57, %60, %cst_15 {dimension_numbers = #tpu.dot_dimension_numbers<[1], [0], [0], [1], [0, 0, 1, 1], [], []>} : vector<256x128xbf16>, vector<128x128xbf16>, vector<256x128xf32> -> vector<256x128xf32>
    %c0_16 = arith.constant 0 : index
    %c0_17 = arith.constant 0 : index
    %62 = vector.load %arg4[%c0_16, %c0_17] : memref<3x128xf32, #tpu.memory_space<vmem>>, vector<1x128xf32>
    %63 = vector.broadcast %62 : vector<1x128xf32> to vector<256x128xf32>
    %64 = arith.addf %61, %63 : vector<256x128xf32>
    %65 = vector.extract_strided_slice %55 {offsets = [0, 0], sizes = [256, 1], strides = [1, 1]} : vector<256x3xf32> to vector<256x1xf32>
    %66 = vector.broadcast %65 : vector<256x1xf32> to vector<256x128xf32>
    %67 = arith.mulf %66, %64 : vector<256x128xf32>
    %68 = arith.addf %58, %67 : vector<256x128xf32>
    %c1 = arith.constant 1 : index
    %c0_18 = arith.constant 0 : index
    %c0_19 = arith.constant 0 : index
    %69 = vector.load %arg3[%c1, %c0_18, %c0_19] : memref<3x128x128xbf16, #tpu.memory_space<vmem>>, vector<1x128x128xbf16>
    %70 = vector.shape_cast %69 : vector<1x128x128xbf16> to vector<128x128xbf16>
    %cst_20 = arith.constant dense<0.000000e+00> : vector<256x128xf32>
    %71 = tpu.matmul %57, %70, %cst_20 {dimension_numbers = #tpu.dot_dimension_numbers<[1], [0], [0], [1], [0, 0, 1, 1], [], []>} : vector<256x128xbf16>, vector<128x128xbf16>, vector<256x128xf32> -> vector<256x128xf32>
    %c1_21 = arith.constant 1 : index
    %c0_22 = arith.constant 0 : index
    %72 = vector.load %arg4[%c1_21, %c0_22] : memref<3x128xf32, #tpu.memory_space<vmem>>, vector<1x128xf32>
    %73 = vector.broadcast %72 : vector<1x128xf32> to vector<256x128xf32>
    %74 = arith.addf %71, %73 : vector<256x128xf32>
    %75 = vector.extract_strided_slice %55 {offsets = [0, 1], sizes = [256, 1], strides = [1, 1]} : vector<256x3xf32> to vector<256x1xf32>
    %76 = vector.broadcast %75 : vector<256x1xf32> to vector<256x128xf32>
    %77 = arith.mulf %76, %74 : vector<256x128xf32>
    %78 = arith.addf %68, %77 : vector<256x128xf32>
    %c2 = arith.constant 2 : index
    %c0_23 = arith.constant 0 : index
    %c0_24 = arith.constant 0 : index
    %79 = vector.load %arg3[%c2, %c0_23, %c0_24] : memref<3x128x128xbf16, #tpu.memory_space<vmem>>, vector<1x128x128xbf16>
    %80 = vector.shape_cast %79 : vector<1x128x128xbf16> to vector<128x128xbf16>
    %cst_25 = arith.constant dense<0.000000e+00> : vector<256x128xf32>
    %81 = tpu.matmul %57, %80, %cst_25 {dimension_numbers = #tpu.dot_dimension_numbers<[1], [0], [0], [1], [0, 0, 1, 1], [], []>} : vector<256x128xbf16>, vector<128x128xbf16>, vector<256x128xf32> -> vector<256x128xf32>
    %c2_26 = arith.constant 2 : index
    %c0_27 = arith.constant 0 : index
    %82 = vector.load %arg4[%c2_26, %c0_27] : memref<3x128xf32, #tpu.memory_space<vmem>>, vector<1x128xf32>
    %83 = vector.broadcast %82 : vector<1x128xf32> to vector<256x128xf32>
    %84 = arith.addf %81, %83 : vector<256x128xf32>
    %85 = vector.extract_strided_slice %55 {offsets = [0, 2], sizes = [256, 1], strides = [1, 1]} : vector<256x3xf32> to vector<256x1xf32>
    %86 = vector.broadcast %85 : vector<256x1xf32> to vector<256x128xf32>
    %87 = arith.mulf %86, %84 : vector<256x128xf32>
    %88 = arith.addf %78, %87 : vector<256x128xf32>
    %cst_28 = arith.constant 0.333333343 : f32
    %89 = vector.broadcast %cst_28 : f32 to vector<256x128xf32>
    %90 = arith.mulf %88, %89 : vector<256x128xf32>
    %c0_29 = arith.constant 0 : index
    %c0_30 = arith.constant 0 : index
    %91 = vector.load %arg5[%c0_29, %c0_30] : memref<128x3xf32, #tpu.memory_space<vmem>>, vector<128x3xf32>
    %cst_31 = arith.constant dense<0.000000e+00> : vector<256x3xf32>
    %92 = tpu.matmul %90, %91, %cst_31 {dimension_numbers = #tpu.dot_dimension_numbers<[1], [0], [0], [1], [0, 0, 1, 1], [], []>} : vector<256x128xf32>, vector<128x3xf32>, vector<256x3xf32> -> vector<256x3xf32>
    %93 = tpu.iota {dimensions = array<i32: 1>} : vector<256x3xi32>
    %cst_32 = arith.constant 0.000000e+00 : f32
    %94 = vector.broadcast %cst_32 : f32 to vector<256x3xf32>
    %95 = vector.extract_strided_slice %92 {offsets = [0, 0], sizes = [256, 1], strides = [1, 1]} : vector<256x3xf32> to vector<256x1xf32>
    %96 = vector.broadcast %95 : vector<256x1xf32> to vector<256x3xf32>
    %97 = arith.cmpf ogt, %96, %92 : vector<256x3xf32>
    %98 = vector.broadcast %95 : vector<256x1xf32> to vector<256x3xf32>
    %99 = arith.cmpf oeq, %98, %92 : vector<256x3xf32>
    %c0_i32_33 = arith.constant 0 : i32
    %100 = vector.broadcast %c0_i32_33 : i32 to vector<256x3xi32>
    %101 = arith.cmpi sgt, %93, %100 : vector<256x3xi32>
    %102 = arith.andi %99, %101 : vector<256x3xi1>
    %103 = arith.ori %97, %102 : vector<256x3xi1>
    %104 = arith.extui %103 : vector<256x3xi1> to vector<256x3xi32>
    %105 = arith.sitofp %104 : vector<256x3xi32> to vector<256x3xf32>
    %106 = arith.addf %94, %105 : vector<256x3xf32>
    %107 = vector.extract_strided_slice %92 {offsets = [0, 1], sizes = [256, 1], strides = [1, 1]} : vector<256x3xf32> to vector<256x1xf32>
    %108 = vector.broadcast %107 : vector<256x1xf32> to vector<256x3xf32>
    %109 = arith.cmpf ogt, %108, %92 : vector<256x3xf32>
    %110 = vector.broadcast %107 : vector<256x1xf32> to vector<256x3xf32>
    %111 = arith.cmpf oeq, %110, %92 : vector<256x3xf32>
    %c1_i32_34 = arith.constant 1 : i32
    %112 = vector.broadcast %c1_i32_34 : i32 to vector<256x3xi32>
    %113 = arith.cmpi sgt, %93, %112 : vector<256x3xi32>
    %114 = arith.andi %111, %113 : vector<256x3xi1>
    %115 = arith.ori %109, %114 : vector<256x3xi1>
    %116 = arith.extui %115 : vector<256x3xi1> to vector<256x3xi32>
    %117 = arith.sitofp %116 : vector<256x3xi32> to vector<256x3xf32>
    %118 = arith.addf %106, %117 : vector<256x3xf32>
    %119 = vector.extract_strided_slice %92 {offsets = [0, 2], sizes = [256, 1], strides = [1, 1]} : vector<256x3xf32> to vector<256x1xf32>
    %120 = vector.broadcast %119 : vector<256x1xf32> to vector<256x3xf32>
    %121 = arith.cmpf ogt, %120, %92 : vector<256x3xf32>
    %122 = vector.broadcast %119 : vector<256x1xf32> to vector<256x3xf32>
    %123 = arith.cmpf oeq, %122, %92 : vector<256x3xf32>
    %c2_i32_35 = arith.constant 2 : i32
    %124 = vector.broadcast %c2_i32_35 : i32 to vector<256x3xi32>
    %125 = arith.cmpi sgt, %93, %124 : vector<256x3xi32>
    %126 = arith.andi %123, %125 : vector<256x3xi1>
    %127 = arith.ori %121, %126 : vector<256x3xi1>
    %128 = arith.extui %127 : vector<256x3xi1> to vector<256x3xi32>
    %129 = arith.sitofp %128 : vector<256x3xi32> to vector<256x3xf32>
    %130 = arith.addf %118, %129 : vector<256x3xf32>
    %cst_36 = arith.constant 1.000000e+00 : f32
    %131 = vector.broadcast %cst_36 : f32 to vector<256x3xf32>
    %132 = arith.cmpf olt, %130, %131 : vector<256x3xf32>
    %cst_37 = arith.constant 0xFF800000 : f32
    %133 = vector.broadcast %cst_37 : f32 to vector<256x3xf32>
    %134 = arith.select %132, %92, %133 : vector<256x3xi1>, vector<256x3xf32>
    %cst_38 = arith.constant dense<0xFF800000> : vector<256xf32>
    %135 = vector.multi_reduction <maximumf>, %134, %cst_38 [1] : vector<256x3xf32> to vector<256xf32>
    %136 = vector.shape_cast %135 : vector<256xf32> to vector<256x1xf32>
    %137 = vector.broadcast %136 : vector<256x1xf32> to vector<256x3xf32>
    %138 = arith.subf %92, %137 : vector<256x3xf32>
    %139 = math.exp %138 : vector<256x3xf32>
    %cst_39 = arith.constant 0.000000e+00 : f32
    %140 = vector.broadcast %cst_39 : f32 to vector<256x3xf32>
    %141 = arith.select %132, %139, %140 : vector<256x3xi1>, vector<256x3xf32>
    %cst_40 = arith.constant dense<0.000000e+00> : vector<256xf32>
    %142 = vector.multi_reduction <add>, %141, %cst_40 [1] : vector<256x3xf32> to vector<256xf32>
    %143 = vector.shape_cast %142 : vector<256xf32> to vector<256x1xf32>
    %144 = vector.broadcast %143 : vector<256x1xf32> to vector<256x3xf32>
    %145 = arith.divf %141, %144 : vector<256x3xf32>
    %c0_41 = arith.constant 0 : index
    %c0_42 = arith.constant 0 : index
    %146 = vector.load %arg10[%c0_41, %c0_42] : memref<256x3xf32, #tpu.memory_space<vmem>>, vector<256x3xf32>
    tpu.vector_store %arg10[%c0_41, %c0_42], %145 {strides = array<i32>} : memref<256x3xf32, #tpu.memory_space<vmem>>, vector<256x3xf32>,
    %147 = arith.truncf %90 : vector<256x128xf32> to vector<256x128xbf16>
    %cst_43 = arith.constant 0.000000e+00 : f32
    %148 = vector.broadcast %cst_43 : f32 to vector<256x128xf32>
    %c0_44 = arith.constant 0 : index
    %c0_45 = arith.constant 0 : index
    %c0_46 = arith.constant 0 : index
    %149 = vector.load %arg6[%c0_44, %c0_45, %c0_46] : memref<3x128x128xbf16, #tpu.memory_space<vmem>>, vector<1x128x128xbf16>
    %150 = vector.shape_cast %149 : vector<1x128x128xbf16> to vector<128x128xbf16>
    %cst_47 = arith.constant dense<0.000000e+00> : vector<256x128xf32>
    %151 = tpu.matmul %147, %150, %cst_47 {dimension_numbers = #tpu.dot_dimension_numbers<[1], [0], [0], [1], [0, 0, 1, 1], [], []>} : vector<256x128xbf16>, vector<128x128xbf16>, vector<256x128xf32> -> vector<256x128xf32>
    %c0_48 = arith.constant 0 : index
    %c0_49 = arith.constant 0 : index
    %152 = vector.load %arg7[%c0_48, %c0_49] : memref<3x128xf32, #tpu.memory_space<vmem>>, vector<1x128xf32>
    %153 = vector.broadcast %152 : vector<1x128xf32> to vector<256x128xf32>
    %154 = arith.addf %151, %153 : vector<256x128xf32>
    %155 = vector.extract_strided_slice %145 {offsets = [0, 0], sizes = [256, 1], strides = [1, 1]} : vector<256x3xf32> to vector<256x1xf32>
    %156 = vector.broadcast %155 : vector<256x1xf32> to vector<256x128xf32>
    %157 = arith.mulf %156, %154 : vector<256x128xf32>
    %158 = arith.addf %148, %157 : vector<256x128xf32>
    %c1_50 = arith.constant 1 : index
    %c0_51 = arith.constant 0 : index
    %c0_52 = arith.constant 0 : index
    %159 = vector.load %arg6[%c1_50, %c0_51, %c0_52] : memref<3x128x128xbf16, #tpu.memory_space<vmem>>, vector<1x128x128xbf16>
    %160 = vector.shape_cast %159 : vector<1x128x128xbf16> to vector<128x128xbf16>
    %cst_53 = arith.constant dense<0.000000e+00> : vector<256x128xf32>
    %161 = tpu.matmul %147, %160, %cst_53 {dimension_numbers = #tpu.dot_dimension_numbers<[1], [0], [0], [1], [0, 0, 1, 1], [], []>} : vector<256x128xbf16>, vector<128x128xbf16>, vector<256x128xf32> -> vector<256x128xf32>
    %c1_54 = arith.constant 1 : index
    %c0_55 = arith.constant 0 : index
    %162 = vector.load %arg7[%c1_54, %c0_55] : memref<3x128xf32, #tpu.memory_space<vmem>>, vector<1x128xf32>
    %163 = vector.broadcast %162 : vector<1x128xf32> to vector<256x128xf32>
    %164 = arith.addf %161, %163 : vector<256x128xf32>
    %165 = vector.extract_strided_slice %145 {offsets = [0, 1], sizes = [256, 1], strides = [1, 1]} : vector<256x3xf32> to vector<256x1xf32>
    %166 = vector.broadcast %165 : vector<256x1xf32> to vector<256x128xf32>
    %167 = arith.mulf %166, %164 : vector<256x128xf32>
    %168 = arith.addf %158, %167 : vector<256x128xf32>
    %c2_56 = arith.constant 2 : index
    %c0_57 = arith.constant 0 : index
    %c0_58 = arith.constant 0 : index
    %169 = vector.load %arg6[%c2_56, %c0_57, %c0_58] : memref<3x128x128xbf16, #tpu.memory_space<vmem>>, vector<1x128x128xbf16>
    %170 = vector.shape_cast %169 : vector<1x128x128xbf16> to vector<128x128xbf16>
    %cst_59 = arith.constant dense<0.000000e+00> : vector<256x128xf32>
    %171 = tpu.matmul %147, %170, %cst_59 {dimension_numbers = #tpu.dot_dimension_numbers<[1], [0], [0], [1], [0, 0, 1, 1], [], []>} : vector<256x128xbf16>, vector<128x128xbf16>, vector<256x128xf32> -> vector<256x128xf32>
    %c2_60 = arith.constant 2 : index
    %c0_61 = arith.constant 0 : index
    %172 = vector.load %arg7[%c2_60, %c0_61] : memref<3x128xf32, #tpu.memory_space<vmem>>, vector<1x128xf32>
    %173 = vector.broadcast %172 : vector<1x128xf32> to vector<256x128xf32>
    %174 = arith.addf %171, %173 : vector<256x128xf32>
    %175 = vector.extract_strided_slice %145 {offsets = [0, 2], sizes = [256, 1], strides = [1, 1]} : vector<256x3xf32> to vector<256x1xf32>
    %176 = vector.broadcast %175 : vector<256x1xf32> to vector<256x128xf32>
    %177 = arith.mulf %176, %174 : vector<256x128xf32>
    %178 = arith.addf %168, %177 : vector<256x128xf32>
    %cst_62 = arith.constant 0.333333343 : f32
    %179 = vector.broadcast %cst_62 : f32 to vector<256x128xf32>
    %180 = arith.mulf %178, %179 : vector<256x128xf32>
    %c0_63 = arith.constant 0 : index
    %c0_64 = arith.constant 0 : index
    %181 = vector.load %arg8[%c0_63, %c0_64] : memref<256x128xf32, #tpu.memory_space<vmem>>, vector<256x128xf32>
    tpu.vector_store %arg8[%c0_63, %c0_64], %180 {strides = array<i32>} : memref<256x128xf32, #tpu.memory_space<vmem>>, vector<256x128xf32>,
    return
  }
  func.func @transform_0(%arg0: i32) -> (i32, i32) {
    %c0_i32 = arith.constant 0 : i32
    %c0_i32_0 = arith.constant 0 : i32
    return %arg0, %c0_i32 : i32, i32
  }
  func.func @transform_1(%arg0: i32) -> (i32, i32) {
    %c0_i32 = arith.constant 0 : i32
    %c0_i32_0 = arith.constant 0 : i32
    %c0_i32_1 = arith.constant 0 : i32
    return %c0_i32, %c0_i32_0 : i32, i32
  }
  func.func @transform_2(%arg0: i32) -> (i32, i32, i32) {
    %c0_i32 = arith.constant 0 : i32
    %c0_i32_0 = arith.constant 0 : i32
    %c0_i32_1 = arith.constant 0 : i32
    %c0_i32_2 = arith.constant 0 : i32
    return %c0_i32, %c0_i32_0, %c0_i32_1 : i32, i32, i32
  }
  func.func @transform_3(%arg0: i32) -> (i32, i32) {
    %c0_i32 = arith.constant 0 : i32
    %c0_i32_0 = arith.constant 0 : i32
    %c0_i32_1 = arith.constant 0 : i32
    return %c0_i32, %c0_i32_0 : i32, i32
  }
  func.func @transform_4(%arg0: i32) -> (i32, i32) {
    %c0_i32 = arith.constant 0 : i32
    %c0_i32_0 = arith.constant 0 : i32
    %c0_i32_1 = arith.constant 0 : i32
    return %c0_i32, %c0_i32_0 : i32, i32
  }
  func.func @transform_5(%arg0: i32) -> (i32, i32, i32) {
    %c0_i32 = arith.constant 0 : i32
    %c0_i32_0 = arith.constant 0 : i32
    %c0_i32_1 = arith.constant 0 : i32
    %c0_i32_2 = arith.constant 0 : i32
    return %c0_i32, %c0_i32_0, %c0_i32_1 : i32, i32, i32
  }
  func.func @transform_6(%arg0: i32) -> (i32, i32) {
    %c0_i32 = arith.constant 0 : i32
    %c0_i32_0 = arith.constant 0 : i32
    %c0_i32_1 = arith.constant 0 : i32
    return %c0_i32, %c0_i32_0 : i32, i32
  }
  func.func @transform_7(%arg0: i32) -> (i32, i32) {
    %c0_i32 = arith.constant 0 : i32
    %c0_i32_0 = arith.constant 0 : i32
    return %arg0, %c0_i32 : i32, i32
  }
  func.func @transform_8(%arg0: i32) -> (i32, i32) {
    %c0_i32 = arith.constant 0 : i32
    %c0_i32_0 = arith.constant 0 : i32
    return %arg0, %c0_i32 : i32, i32
  }
  func.func @transform_9(%arg0: i32) -> (i32, i32) {
    %c0_i32 = arith.constant 0 : i32
    %c0_i32_0 = arith.constant 0 : i32
    return %arg0, %c0_i32 : i32, i32
  }
}

</mosaic_0001>

<bundles_post_ra>
// kernel: tpu_custom_call.1
= control target key start
LH: loop header
LB: loop body
LE: loop exit
PB: predicated region body
PF: predicated region fallthrough
CT: control target
= control target key end

     0   :  { %s14730_s0 = inlined_call_operand.hbm [shape: f32[512,128], index: 0, kind: input, shape index: {}]   ;;  %s14731_s1 = inlined_call_operand.vmem [shape: f32[128,3], index: 1, kind: input, shape index: {}]   ;;  %s14732_s2 = inlined_call_operand.vmem [shape: bf16[3,128,128], index: 2, kind: input, shape index: {}]   ;;  %s14733_s3 = inlined_call_operand.vmem [shape: f32[3,128], index: 3, kind: input, shape index: {}]   ;;  %s14734_s4 = inlined_call_operand.vmem [shape: f32[128,3], index: 4, kind: input, shape index: {}]   ;;  %s14735_s5 = inlined_call_operand.hbm [shape: bf16[3,128,128], index: 5, kind: input, shape index: {}]   ;;  %s14736_s6 = inlined_call_operand.vmem [shape: f32[3,128], index: 6, kind: input, shape index: {}]   ;;  %s14737_s7 = inlined_call_operand.hbm [shape: f32[512,128], index: 7, kind: output, shape index: {0}]   ;;  %s14738_s8 = inlined_call_operand.vmem [shape: f32[512,3], index: 8, kind: output, shape index: {1}]   ;;  %s14739_s9 = inlined_call_operand.vmem [shape: f32[512,3], index: 9, kind: output, shape index: {2}]  }
   0x1   :  { %14954 = sst [smem:[#allocation74_spill]] %s14735_s5 }
   0x2   :  { %15 = vsyncpa [#allocation3], 0 }
   0x3   :  { %17 = vsyncpa [#allocation3 + $0x1], 0 }
   0x4   :  { %18 = vsyncpa [#allocation6], 0 }
   0x5   :  { %19 = vsyncpa [#allocation4], 0 }
   0x6   :  { %21 = vsyncpa [#allocation4 + $0x1], 0  ;;  %s8454_s30 = smov 0   ;;  %s8456_s10 = smov 0  }
   0x7   :  { %s8458_s11 = smov 0   ;;  %s8460_s12 = smov 0  }
   0x8 LB: > { %14955 = sst [smem:[#allocation11_spill]] %s8387_s11  ;;  %s8475_s13 = sadd.s32 4294967295, %s8391_s12   ;;  %s8391_s12 = sphi %s8460_s12, %s16002_s12   ;;  %s8387_s11 = sphi %s8458_s11, %s15999_s11   ;;  %s8383_s10 = sphi %s8456_s10, %s16001_s10   ;;  %s8379_s30 = sphi %s8454_s30, %s16000_s30  }
   0x9   : > { %s7108_s14 = sadd.s32 4294967294, %s8391_s12   ;;  %p47_p0 = scmp.ne.s32.totalorder %s8383_s10, %s8379_s30 }
   0xa   : > { %p48_p1 = scmp.eq.s32.totalorder %s8475_s13, 0  ;;  %p197_p2 = scmp.eq.s32.totalorder %s8475_s13, 1 }
   0xb   : > { %p203_p3 = scmp.eq.s32.totalorder %s7108_s14, 1  ;;  %p7109_p5 = scmp.ge.s32.totalorder %s8391_s12, 1 }
   0xc   : > { %p8484_p4 = por %p48_p1, %p47_p0  ;;  %p262_p7 = scmp.lt.s32.totalorder %s8391_s12, 3 }
   0xd   : > { %p8489_p6 = por %p203_p3, %p47_p0  ;;  %s14958_s5 = sld [smem:[#allocation74_spill]] }
   0xe   : > { %p8497_p8 = pnand %p7109_p5, %p262_p7  ;;  %s8393_s21 = smov [#allocation5]  }
   0xf   : > { %s287_s22 = sshll.u32 %s8393_s21, 4  ;;  %s8507_s23 = sadd.s32 1, %s8391_s12   ;;  %s288_s22 = int_to_ptr.vmem [resolvable:$true] %s287_s22 }
  0x10   : > { %p7602_p9 = pneg %p8497_p8  ;;  %s8394_s24 = smov 64  }
  0x11   : > { %s8395_s25 = smov 4   ;;  %s31_s26 = ssub.s32 %s8391_s12, %s8507_s23 }
  0x12   : > { %p7603_p10 = pnand %p7602_p9, %p48_p1  ;;  %s34_s27 = sadd.s32 1, %s8387_s11 }
  0x13   : > { %s285_s19 = sshll.u32 %s14958_s5, 4  ;;  %p32_p12 = scmp.eq.s32.totalorder %s31_s26, 0  ;;  %s286_s19 = int_to_ptr.hbm [resolvable:$true] %s285_s19 }
  0x14   : > { %7605 = dma.hbm_to_vmem [thread:$0]  (!%p7603_p10), %s286_s19, 3072, %s288_s22, [#allocation6], %s8394_s24, %s8394_s24, %s8395_s25  }
  0x15   : > { %p41_p13 = scmp.ne.s32.totalorder %s8387_s11, %s8383_s10  ;;  %p42_p0 = scmp.eq.s32.totalorder %s8391_s12, 0 }
  0x16   : > { %p7615_p3 = scmp.lt.s32.totalorder %s8391_s12, 2  ;;  %s304_s14 = sand.u32 1, %s8387_s11  }
  0x17   : > { %s8517_s28 = scalar_select %p32_p12, %s8387_s11, %s34_s27  }
  0x18   : > { %p43_p5 = por %p42_p0, %p41_p13  ;;  %p8521_p7 = por %p197_p2, %p41_p13 }
  0x19   : > { %14960 = sst [smem:[#allocation12_spill]] %s8517_s28  ;;  %s7544_s17 = sshll.u32 %s8391_s12, 8 }
  0x1a   : > { %s7112_s18 = sshll.u32 %s304_s14, 8  ;;  %s313_s22 = scalar_lea.hbm %s14730_s0, %s7544_s17 }
  0x1b   : > { %s314_s24 = sshll.u32 %s313_s22, 4  ;;  %s308_s25 = scalar_lea.vmem [#allocation2], %s7112_s18  ;;  %s315_s24 = int_to_ptr.hbm [resolvable:$true] %s314_s24 }
  0x1c   : > { %s316_s26 = sshll.u32 %s308_s25, 4  ;;  %p8532_p9 = pnand %p7615_p3, %p43_p5  ;;  %s317_s26 = int_to_ptr.vmem [resolvable:$true] %s316_s26 }
  0x1d   : > { %s305_s5 = scalar_lea.sflag [#allocation3], %s304_s14  ;;  %s8291_s28 = sshra.s32 %s315_s24, 4  ;;  %s8292_s28 = int_to_ptr.hbm [resolvable:$true] %s8291_s28 }
  0x1e   : > { %s8293_s11 = scalar_lea.hbm %s8292_s28, 256  ;;  %p8295_p10 = pneg %p8532_p9 }
  0x1f   : > { %p8294_p2 = scmp.ne.s32.totalorder %s8292_s28, %s8293_s11  ;;  %s8298_s21 = scalar_lea.hbm %s14730_s0, 512 }
  0x20   : > { %p8299_p0 = scmp.lt.s32.totalorder %s8292_s28, %s14730_s0  ;;  %p8300_p3 = scmp.lt.s32.totalorder %s8298_s21, %s8293_s11 }
  0x21   : > { %p8296_p12 = pnand %p8295_p10, %p8294_p2 }
  0x22   : > { %p8301_p5 = por %p8300_p3, %p8299_p0 }
  0x23   : > { %p8297_p13 = pneg %p8296_p12 }
  0x25   : > { %p8302_p11 = pnand %p8301_p5, %p8297_p13 }
  0x27   : > { %8305 = shalt.err (!%p8302_p11)
}
  0x28   : > { %s8396_s14 = smov 128   ;;  %s8397_s25 = smov 8  }
  0x29   : > { %7609 = dma.hbm_to_vmem [thread:$0]  (!%p8532_p9), %s315_s24, 4096, %s317_s26, %s305_s5, %s8396_s14, %s8396_s14, %s8397_s25  }
  0x2a   : > { %328 = sbr.rel (%p8497_p8) target bundleno = 2868 (0xb34), region = 48 }
  0x2f   : > { %s8549_s17 = sand.u32 1, %s8383_s10  }
  0x30   : > { %s7116_s28 = sshll.u32 %s8549_s17, 8  ;;  %s331_s11 = scalar_lea.sflag [#allocation3], %s8549_s17 }
  0x31   : > { %s8555_s18 = scalar_lea.vmem [#allocation2], %s7116_s28 }
  0x32   : > { %8366 = dma.done.wait (%p8484_p4), %s331_s11, 4096  }
  0x33   : > { %8368 = vsyncadd (%p8484_p4), %s331_s11, 4294963200 }
  0x34   : > { %8370 = dma.done.wait (%p48_p1), [#allocation6], 3072  }
  0x35   : > { %8372 = vsyncadd (%p48_p1), [#allocation6], 4294964224  ;;  %v446_v0 = vld [vmem:[%s14731_s1 + $0x78] sm:$0xff]  ;;  %v445_v1 = vld [vmem:[%s14731_s1 + $0x70] sm:$0xff]  ;;  %v14758_v37 = vmov 1   ;;  %v14765_v38 = vmov 0  }
  0x36   : > { %447 = vmatpush.msra.mxu0 %v446_v0  ;;  %v444_v2 = vld [vmem:[%s14731_s1 + $0x68] sm:$0xff]  ;;  %v443_v3 = vld [vmem:[%s14731_s1 + $0x60] sm:$0xff]  ;;  %v442_v4 = vld [vmem:[%s14731_s1 + $0x58] sm:$0xff]  ;;  %7662 = vset.pattern.permute.xlu2 %v14758_v37  ;;  %v14753_v45 = vmov 2   ;;  %s7119_s27 = sshll.u32 %s8475_s13, 5  ;;  %s14320_s20 = scalar_lea.vmem [#allocation7], %s7116_s28 }
  0x37   : > { %v399_v5 = vld [vmem:[%s8555_s18] sm:$0xff]  ;;  %v400_v6 = vld [vmem:[%s8555_s18 + $0x8] sm:$0xff]  ;;  %v441_v7 = vld [vmem:[%s14731_s1 + $0x50] sm:$0xff]  ;;  %7661 = vset.pattern.permute.xlu0 %v14765_v38  ;;  %7666 = vset.pattern.permute.xlu1 %v14765_v38  ;;  %p388_p1 = scmp.lt.s32.totalorder %s7119_s27, 63  ;;  %s7593_s19 = sshll.u32 %s8475_s13, 8 }
  0x38   : > { %448 = vmatpush.msra.mxu0 %v445_v1  ;;  %v8585_v8 = vpack.c.bf16 %v400_v6, %v399_v5  ;;  %v440_v9 = vld [vmem:[%s14731_s1 + $0x48] sm:$0xff]  ;;  %v439_v10 = vld [vmem:[%s14731_s1 + $0x40] sm:$0xff]  ;;  %v438_v11 = vld [vmem:[%s14731_s1 + $0x38] sm:$0xff]  ;;  %s6964_s13 = sshll.u32 %s14320_s20, 4  ;;  %s6942_s25 = scalar_lea.sflag [#allocation4], %s8549_s17  ;;  %s6965_s13 = int_to_ptr.vmem [resolvable:$true] %s6964_s13 }
  0x39   : > { %v437_v12 = vld [vmem:[%s14731_s1 + $0x30] sm:$0xff]  ;;  %v436_v13 = vld [vmem:[%s14731_s1 + $0x28] sm:$0xff]  ;;  %v435_v14 = vld [vmem:[%s14731_s1 + $0x20] sm:$0xff]  ;;  %s16004_s27 = smov (!%p388_p1, %s7119_s27), 63  ;;  %s8341_s24 = scalar_lea.hbm %s14737_s7, 512 }
  0x3a   : > { %449 = vmatpush.msra.mxu0 %v444_v2  ;;  %v434_v15 = vld [vmem:[%s14731_s1 + $0x18] sm:$0xff]  ;;  %v401_v16 = vld [vmem:[%s8555_s18 + $0x10] sm:$0xff]  ;;  %v432_v20 = vld [vmem:[%s14731_s1 + $0x8] sm:$0xff]  ;;  %s7120_s15 = sshll.u32 %s16004_s27, 3  ;;  %s6963_s27 = scalar_lea.hbm %s14737_s7, %s7593_s19 }
  0x3b   : > { %v402_v17 = vld [vmem:[%s8555_s18 + $0x18] sm:$0xff]  ;;  %v433_v18 = vld [vmem:[%s14731_s1 + $0x10] sm:$0xff]  ;;  %v431_v21 = vld [vmem:[%s14731_s1] sm:$0xff]  ;;  %s13688_s14 = scalar_lea.vmem %s14739_s9, %s7120_s15 }
  0x3c   : > { %450 = vmatpush.msra.mxu0 %v443_v3  ;;  %v8613_v19 = vpack.c.bf16 %v402_v17, %v401_v16  ;;  %v403_v22 = vld [vmem:[%s8555_s18 + $0x20] sm:$0xff]  ;;  %v404_v23 = vld [vmem:[%s8555_s18 + $0x28] sm:$0xff]  ;;  %v405_v25 = vld [vmem:[%s8555_s18 + $0x30] sm:$0xff] }
  0x3d   : > { %v8623_v24 = vpack.c.bf16 %v404_v23, %v403_v22  ;;  %v406_v26 = vld [vmem:[%s8555_s18 + $0x38] sm:$0xff]  ;;  %v407_v28 = vld [vmem:[%s8555_s18 + $0x40] sm:$0xff]  ;;  %v408_v29 = vld [vmem:[%s8555_s18 + $0x48] sm:$0xff] }
  0x3e   : > { %451 = vmatpush.msra.mxu0 %v442_v4  ;;  %14963 = vst [vmem:[#allocation13_spill] sm:$0xff] %v8613_v19  ;;  %v8627_v27 = vpack.c.bf16 %v406_v26, %v405_v25  ;;  %v8631_v30 = vpack.c.bf16 %v408_v29, %v407_v28  ;;  %v409_v31 = vld [vmem:[%s8555_s18 + $0x50] sm:$0xff]  ;;  %v410_v32 = vld [vmem:[%s8555_s18 + $0x58] sm:$0xff]  ;;  %v411_v34 = vld [vmem:[%s8555_s18 + $0x60] sm:$0xff] }
  0x3f   : > { %14964 = vst [vmem:[#allocation14_spill] sm:$0xff] %v8623_v24  ;;  %v8635_v33 = vpack.c.bf16 %v410_v32, %v409_v31  ;;  %v412_v35 = vld [vmem:[%s8555_s18 + $0x68] sm:$0xff]  ;;  %v413_v39 = vld [vmem:[%s8555_s18 + $0x70] sm:$0xff]  ;;  %v414_v40 = vld [vmem:[%s8555_s18 + $0x78] sm:$0xff] }
  0x40   : > { %452 = vmatpush.msra.mxu0 %v441_v7  ;;  %14965 = vst [vmem:[#allocation15_spill] sm:$0xff] %v8627_v27  ;;  %v8639_v36 = vpack.c.bf16 %v412_v35, %v411_v34  ;;  %v8646_v41 = vpack.c.bf16 %v414_v40, %v413_v39  ;;  %v415_v43 = vld [vmem:[%s8555_s18 + $0x80] sm:$0xff]  ;;  %v416_v50 = vld [vmem:[%s8555_s18 + $0x88] sm:$0xff]  ;;  %v417_v53 = vld [vmem:[%s8555_s18 + $0x90] sm:$0xff] }
  0x41   : > { %14966 = vst [vmem:[#allocation16_spill] sm:$0xff] %v8631_v30  ;;  %v8685_v51 = vpack.c.bf16 %v416_v50, %v415_v43  ;;  %v418_v57 = vld [vmem:[%s8555_s18 + $0x98] sm:$0xff]  ;;  %v419_v0 = vld [vmem:[%s8555_s18 + $0xa0] sm:$0xff]  ;;  %v420_v3 = vld [vmem:[%s8555_s18 + $0xa8] sm:$0xff] }
  0x42   : > { %453 = vmatpush.msra.mxu0 %v440_v9  ;;  %14967 = vst [vmem:[#allocation17_spill] sm:$0xff] %v8635_v33  ;;  %v8715_v58 = vpack.c.bf16 %v418_v57, %v417_v53  ;;  %v8771_v4 = vpack.c.bf16 %v420_v3, %v419_v0  ;;  %v560_v9 = vlaneseq }
  0x43   : > { %14968 = vst [vmem:[#allocation18_spill] sm:$0xff] %v8639_v36 }
  0x44   : > { %454 = vmatpush.msra.mxu0 %v439_v10  ;;  %14969 = vst [vmem:[#allocation19_spill] sm:$0xff] %v8646_v41 }
  0x45   : > { %14970 = vst [vmem:[#allocation20_spill] sm:$0xff] %v8685_v51 }
  0x46   : > { %455 = vmatpush.msra.mxu0 %v438_v11  ;;  %14973 = vst [vmem:[#allocation23_spill] sm:$0xff] %v8715_v58  ;;  %v8787_v11 = vand.u32 127, %v560_v9 }
  0x47   : > { %14980 = vst [vmem:[#allocation30_spill] sm:$0xff] %v8771_v4  ;;  %v15041_v4 = vmov 1  }
  0x48   : > { %456 = vmatpush.msra.mxu0 %v437_v12  ;;  %14981 = vst [vmem:[#allocation31_spill] sm:$0xff] %v8787_v11  ;;  %vm14742_vm0 = vcmp.gt.s32.totalorder %v8787_v11, 1  ;;  %vm14741_vm2 = vcmp.gt.s32.totalorder %v8787_v11, 0  ;;  %vm14822_vm6 = vcmp.gt.s32.totalorder %v8787_v11, 2 }
  0x4a   : > { %457 = vmatpush.msra.mxu0 %v436_v13 }
  0x4c   : > { %458 = vmatpush.msra.mxu0 %v435_v14  ;;  %v14982_v14 = vmov 0 }
  0x4e   : > { %459 = vmatpush.msra.mxu0 %v434_v15  ;;  %v14984_v15 = vmov 0 }
  0x50   : > { %460 = vmatpush.msra.mxu0 %v433_v18  ;;  %v14769_v18 = vmov 0.0  }
  0x52   : > { %461 = vmatpush.msra.mxu0 %v432_v20 }
  0x54   : > { %462 = vmatpush.msra.mxu0 %v431_v21 }
  0x55   : > { %463 = vmatmul.f32.vlgmr.msra.gmra.mxu0 %v399_v5 }
  0x5d   : > { %466 = vmatmul.f32.gmra.mxu0 %v400_v6 }
  0x65   : > { %469 = vmatmul.f32.gmra.mxu0 %v401_v16 }
  0x6d   : > { %472 = vmatmul.f32.gmra.mxu0 %v402_v17  ;;  %v8818_v17 = vld [vmem:[%s8555_s18 + $0xb0] sm:$0xff] }
  0x75   : > { %475 = vmatmul.f32.gmra.mxu0 %v403_v22 }
  0x7d   : > { %478 = vmatmul.f32.gmra.mxu0 %v404_v23 }
  0x85   : > { %481 = vmatmul.f32.gmra.mxu0 %v405_v25 }
  0x8d   : > { %484 = vmatmul.f32.gmra.mxu0 %v406_v26 }
  0x95   : > { %487 = vmatmul.f32.gmra.mxu0 %v407_v28 }
  0x9d   : > { %490 = vmatmul.f32.gmra.mxu0 %v408_v29 }
  0xa5   : > { %493 = vmatmul.f32.gmra.mxu0 %v409_v31 }
  0xad   : > { %496 = vmatmul.f32.gmra.mxu0 %v410_v32 }
  0xb5   : > { %499 = vmatmul.f32.gmra.mxu0 %v411_v34 }
  0xbd   : > { %502 = vmatmul.f32.gmra.mxu0 %v412_v35 }
  0xc5   : > { %505 = vmatmul.f32.gmra.mxu0 %v413_v39 }
  0xcd   : > { %508 = vmatmul.f32.gmra.mxu0 %v414_v40 }
  0xd2   : > { %v8648_v42 = vpop.f32.mrf.mxu0 }
  0xd3   : > { %948 = vperm.xlu2 %7662, %v8648_v42   ;;  %564 = vperm.xlu0 %7661, %v8648_v42  }
  0xd5   : > { %511 = vmatmul.f32.gmra.mxu0 %v415_v43 }
  0xda   : > { %v8653_v44 = vpop.f32.mrf.mxu0 }
  0xdb   : > { %7663 = vset.pattern.permute.xlu2 %v14753_v45  ;;  %569 = vperm.xlu0 %7661, %v8653_v44  }
  0xdc   : > { %1301 = vperm.xlu2 %7663, %v8648_v42  }
  0xdd   : > { %514 = vmatmul.f32.gmra.mxu0 %v416_v50 }
  0xe2   : > { %v8658_v46 = vpop.f32.mrf.mxu0 }
  0xe3   : > { %7664 = vset.pattern.permute.xlu0 %v14758_v37  ;;  %574 = vperm.xlu1 %7666, %v8658_v46  }
  0xe4   : > { %952 = vperm.xlu0 %7664, %v8653_v44   ;;  %7670 = vset.pattern.permute.xlu2 %v14758_v37 }
  0xe5   : > { %517 = vmatmul.f32.gmra.mxu0 %v417_v53 }
  0xea   : > { %v8664_v47 = vpop.f32.mrf.mxu0 }
  0xeb   : > { %7667 = vset.pattern.permute.xlu1 %v14758_v37  ;;  %960 = vperm.xlu2 %7670, %v8664_v47  }
  0xec   : > { %7665 = vset.pattern.permute.xlu0 %v14753_v45  ;;  %956 = vperm.xlu1 %7667, %v8658_v46  }
  0xed   : > { %1305 = vperm.xlu0 %7665, %v8653_v44   ;;  %520 = vmatmul.f32.gmra.mxu0 %v418_v57 }
  0xf2   : > { %v8671_v48 = vpop.f32.mrf.mxu0 }
  0xf3   : > { %7671 = vset.pattern.permute.xlu2 %v14753_v45 }
  0xf4   : > { %7668 = vset.pattern.permute.xlu1 %v14753_v45  ;;  %1313 = vperm.xlu2 %7671, %v8664_v47  }
  0xf5   : > { %1309 = vperm.xlu1 %7668, %v8658_v46   ;;  %7677 = vset.pattern.permute.xlu0 %v14765_v38 }
  0xf6   : > { %523 = vmatmul.f32.gmra.mxu0 %v419_v0 }
  0xfa   : > { %v8678_v49 = vpop.f32.mrf.mxu0 }
  0xfc   : > { %7672 = vset.pattern.permute.xlu2 %v14765_v38 }
  0xfd   : > { %7669 = vset.pattern.permute.xlu1 %v14765_v38  ;;  %584 = vperm.xlu2 %7672, %v8671_v48  }
  0xfe   : > { %579 = vperm.xlu1 %7669, %v8664_v47   ;;  %526 = vmatmul.f32.gmra.mxu0 %v420_v3 }
 0x102   : > { %v8687_v52 = vpop.f32.mrf.mxu0 }
 0x103   : > { %594 = vperm.xlu0 %7677, %v8687_v52  }
 0x105   : > { %589 = vperm.xlu2 %7672, %v8678_v49  }
 0x106   : > { %7673 = vset.pattern.permute.xlu1 %v14758_v37  ;;  %529 = vmatmul.f32.gmra.mxu0 %v8818_v17 }
 0x107   : > { %964 = vperm.xlu1 %7673, %v8671_v48  }
 0x10a   : > { %v8694_v54 = vpop.f32.mrf.mxu0 }
 0x10b   : > { %14971 = vst [vmem:[#allocation21_spill] sm:$0xff] %v8694_v54  ;;  %7678 = vset.pattern.permute.xlu0 %v14758_v37 }
 0x10c   : > { %972 = vperm.xlu0 %7678, %v8687_v52  }
 0x10d   : > { %7675 = vset.pattern.permute.xlu2 %v14758_v37 }
 0x10e   : > { %968 = vperm.xlu2 %7675, %v8678_v49  }
 0x10f   : > { %7674 = vset.pattern.permute.xlu1 %v14753_v45 }
 0x110   : > { %1317 = vperm.xlu1 %7674, %v8671_v48  }
 0x112   : > { %v8702_v55 = vpop.f32.mrf.mxu0 }
 0x113   : > { %14972 = vst [vmem:[#allocation22_spill] sm:$0xff] %v8702_v55 }
 0x114   : > { %7679 = vset.pattern.permute.xlu0 %v14753_v45 }
 0x115   : > { %1325 = vperm.xlu0 %7679, %v8687_v52  }
 0x116   : > { %7676 = vset.pattern.permute.xlu2 %v14753_v45 }
 0x117   : > { %1321 = vperm.xlu2 %7676, %v8678_v49  }
 0x118   : > { %7680 = vset.pattern.permute.xlu1 %v14765_v38 }
 0x119   : > { %599 = vperm.xlu1 %7680, %v8694_v54  }
 0x11a   : > { %v8710_v56 = vpop.f32.mrf.mxu0 }
 0x11d   : > { %7686 = vset.pattern.permute.xlu0 %v14765_v38 }
 0x11e   : > { %609 = vperm.xlu0 %7686, %v8710_v56  }
 0x11f   : > { %7683 = vset.pattern.permute.xlu2 %v14765_v38 }
 0x120   : > { %604 = vperm.xlu2 %7683, %v8702_v55  }
 0x121   : > { %7681 = vset.pattern.permute.xlu1 %v14758_v37 }
 0x122   : > { %976 = vperm.xlu1 %7681, %v8694_v54   ;;  %v8721_v59 = vpop.f32.mrf.mxu0 }
 0x123   : > { %14974 = vst [vmem:[#allocation24_spill] sm:$0xff] %v8721_v59 }
 0x126   : > { %7687 = vset.pattern.permute.xlu0 %v14758_v37 }
 0x127   : > { %984 = vperm.xlu0 %7687, %v8710_v56  }
 0x128   : > { %7684 = vset.pattern.permute.xlu2 %v14758_v37 }
 0x129   : > { %980 = vperm.xlu2 %7684, %v8702_v55  }
 0x12a   : > { %7682 = vset.pattern.permute.xlu1 %v14753_v45  ;;  %v8729_v60 = vpop.f32.mrf.mxu0 }
 0x12b   : > { %1329 = vperm.xlu1 %7682, %v8694_v54   ;;  %14975 = vst [vmem:[#allocation25_spill] sm:$0xff] %v8729_v60 }
 0x12d   : > { %v949_v7 = vpop.permute.xlu2 %948 }
 0x12e   : > { %vm1107_vm1 = vcmp.eq.f32.partialorder %v949_v7, %v8648_v42  ;;  %vm1075_vm4 = vcmp.gt.f32.partialorder %v949_v7, %v8648_v42 }
 0x12f   : > { %7688 = vset.pattern.permute.xlu0 %v14753_v45  ;;  %vm1140_vm5 = vmand %vm1107_vm1, %vm14742_vm0 }
 0x130   : > { %1337 = vperm.xlu0 %7688, %v8710_v56   ;;  %vm8805_vm10 = vmor %vm1075_vm4, %vm1140_vm5 }
 0x131   : > { %7685 = vset.pattern.permute.xlu2 %v14753_v45  ;;  %v14983_v14 = vsel %vm8805_vm10, 4294967295, %v14982_v14 }
 0x132   : > { %1333 = vperm.xlu2 %7685, %v8702_v55   ;;  %v8737_v61 = vpop.f32.mrf.mxu0 }
 0x133   : > { %7689 = vset.pattern.permute.xlu1 %v14765_v38  ;;  %14976 = vst [vmem:[#allocation26_spill] sm:$0xff] %v8737_v61 }
 0x134   : > { %614 = vperm.xlu1 %7689, %v8721_v59  }
 0x136   : > { %v1302_v12 = vpop.permute.xlu2 %1301 }
 0x137   : > { %vm1460_vm7 = vcmp.eq.f32.partialorder %v1302_v12, %v8648_v42  ;;  %vm1428_vm10 = vcmp.gt.f32.partialorder %v1302_v12, %v8648_v42 }
 0x138   : > { %7695 = vset.pattern.permute.xlu0 %v14765_v38  ;;  %vm8812_vm12 = vmand %vm1460_vm7, %vm14822_vm6 }
 0x139   : > { %624 = vperm.xlu0 %7695, %v8737_v61   ;;  %v14985_v15 = vsel %vm8812_vm12, 4294967295, %v14984_v15 }
 0x13a   : > { %7692 = vset.pattern.permute.xlu2 %v14765_v38  ;;  %v8745_v62 = vpop.f32.mrf.mxu0 }
 0x13b   : > { %619 = vperm.xlu2 %7692, %v8729_v60   ;;  %14977 = vst [vmem:[#allocation27_spill] sm:$0xff] %v8745_v62 }
 0x13c   : > { %7690 = vset.pattern.permute.xlu1 %v14758_v37 }
 0x13d   : > { %988 = vperm.xlu1 %7690, %v8721_v59  }
 0x141   : > { %7696 = vset.pattern.permute.xlu0 %v14758_v37 }
 0x142   : > { %996 = vperm.xlu0 %7696, %v8737_v61   ;;  %v8753_v63 = vpop.f32.mrf.mxu0 }
 0x143   : > { %7693 = vset.pattern.permute.xlu2 %v14758_v37  ;;  %14978 = vst [vmem:[#allocation28_spill] sm:$0xff] %v8753_v63 }
 0x144   : > { %992 = vperm.xlu2 %7693, %v8729_v60  }
 0x145   : > { %7691 = vset.pattern.permute.xlu1 %v14753_v45  ;;  %v565_v2 = vpop.permute.xlu0 %564  ;;  %v8871_v53 = vpop.permute.xlu2 %960 }
 0x146   : > { %1341 = vperm.xlu1 %7691, %v8721_v59   ;;  %vm754_vm3 = vcmp.eq.f32.partialorder %v565_v2, %v8648_v42  ;;  %vm722_vm8 = vcmp.gt.f32.partialorder %v565_v2, %v8648_v42 }
 0x147   : > { %vm787_vm9 = vmand %vm754_vm3, %vm14741_vm2 }
 0x148   : > { %vm819_vm14 = vmor %vm722_vm8, %vm787_vm9 }
 0x149   : > { %v7123_v20 = vsel %vm819_vm14, 1.0, %v14769_v18 }
 0x14a   : > { %7697 = vset.pattern.permute.xlu0 %v14753_v45  ;;  %v8762_v1 = vpop.f32.mrf.mxu0 }
 0x14b   : > { %1349 = vperm.xlu0 %7697, %v8737_v61   ;;  %14979 = vst [vmem:[#allocation29_spill] sm:$0xff] %v8762_v1 }
 0x14c   : > { %7694 = vset.pattern.permute.xlu2 %v14753_v45 }
 0x14d   : > { %1345 = vperm.xlu2 %7694, %v8729_v60   ;;  %v570_v5 = vpop.permute.xlu0 %569 }
 0x14e   : > { %7698 = vset.pattern.permute.xlu1 %v14765_v38  ;;  %vm755_vm13 = vcmp.eq.f32.partialorder %v570_v5, %v8653_v44  ;;  %vm723_vm4 = vcmp.gt.f32.partialorder %v570_v5, %v8653_v44  ;;  %v8880_v9 = vpop.permute.xlu2 %1313 }
 0x14f   : > { %629 = vperm.xlu1 %7698, %v8745_v62   ;;  %vm788_vm5 = vmand %vm755_vm13, %vm14741_vm2  ;;  %vm14986_vm13 = vnez %v14983_v14  ;;  %vm14987_vm2 = vnez %v14985_v15 }
 0x150   : > { %vm820_vm12 = vmor %vm723_vm4, %vm788_vm5  ;;  %v7155_v22 = vsel %vm14986_vm13, 1.0, %v14769_v18 }
 0x151   : > { %v7124_v23 = vsel %vm820_vm12, 1.0, %v14769_v18  ;;  %v1268_v28 = vadd.f32 %v7155_v22, %v7123_v20 }
 0x152   : > { %v8782_v6 = vpop.f32.mrf.mxu0 }
 0x153   : > { %7704 = vset.pattern.permute.xlu0 %v14765_v38 }
 0x154   : > { %639 = vperm.xlu0 %7704, %v8762_v1  }
 0x155   : > { %7701 = vset.pattern.permute.xlu2 %v14765_v38  ;;  %v575_v16 = vpop.permute.xlu1 %574 }
 0x156   : > { %634 = vperm.xlu2 %7701, %v8753_v63   ;;  %v953_v10 = vpop.permute.xlu0 %952  ;;  %vm724_vm5 = vcmp.gt.f32.partialorder %v575_v16, %v8658_v46 }
 0x157   : > { %7699 = vset.pattern.permute.xlu1 %v14758_v37  ;;  %vm1108_vm11 = vcmp.eq.f32.partialorder %v953_v10, %v8653_v44  ;;  %vm1076_vm1 = vcmp.gt.f32.partialorder %v953_v10, %v8653_v44  ;;  %v422_v10 = vld [vmem:[%s8555_s18 + $0xb8] sm:$0xff]  ;;  %v8895_v20 = vpop.permute.xlu2 %584 }
 0x158   : > { %1000 = vperm.xlu1 %7699, %v8745_v62   ;;  %vm1141_vm3 = vmand %vm1108_vm11, %vm14742_vm0  ;;  %532 = vmatmul.f32.gmra.mxu0 %v422_v10 }
 0x159   : > { %vm1173_vm9 = vmor %vm1076_vm1, %vm1141_vm3  ;;  %vm14988_vm3 = vcmp.gt.s32.totalorder %v8787_v11, 1 }
 0x15a   : > { %v7156_v21 = vsel %vm1173_vm9, 1.0, %v14769_v18  ;;  %vm1525_vm0 = vmor %vm1428_vm10, %vm14987_vm2  ;;  %vm14746_vm10 = vcmask 23552   ;;  %v8874_v0 = vpop.f32.mrf.mxu0 }
 0x15b   : > { %v1269_v29 = vadd.f32 %v7156_v21, %v7124_v23  ;;  %v7187_v32 = vsel %vm1525_vm0, 1.0, %v14769_v18  ;;  %vm756_vm0 = vcmp.eq.f32.partialorder %v575_v16, %v8658_v46  ;;  %14990 = vst [vmem:[#allocation32_spill] sm:$0xff] %v8874_v0  ;;  %v423_v16 = vld [vmem:[%s8555_s18 + $0xc0] sm:$0xff] }
 0x15c   : > { %7705 = vset.pattern.permute.xlu0 %v14758_v37  ;;  %v8847_v34 = vadd.f32 %v7187_v32, %v1268_v28  ;;  %v424_v32 = vld [vmem:[%s8555_s18 + $0xc8] sm:$0xff] }
 0x15d   : > { %1008 = vperm.xlu0 %7705, %v8762_v1  }
 0x15e   : > { %7702 = vset.pattern.permute.xlu2 %v14758_v37  ;;  %v957_v25 = vpop.permute.xlu1 %956 }
 0x15f   : > { %1004 = vperm.xlu2 %7702, %v8753_v63   ;;  %v1306_v13 = vpop.permute.xlu0 %1305  ;;  %vm1109_vm2 = vcmp.eq.f32.partialorder %v957_v25, %v8658_v46  ;;  %vm1077_vm1 = vcmp.gt.f32.partialorder %v957_v25, %v8658_v46 }
 0x160   : > { %7700 = vset.pattern.permute.xlu1 %v14753_v45  ;;  %vm1461_vm15 = vcmp.eq.f32.partialorder %v1306_v13, %v8653_v44  ;;  %vm1429_vm7 = vcmp.gt.f32.partialorder %v1306_v13, %v8653_v44  ;;  %vm1142_vm4 = vmand %vm1109_vm2, %vm14988_vm3  ;;  %v8887_v13 = vpack.c.bf16 %v422_v10, %v8818_v17  ;;  %535 = vmatmul.f32.gmra.mxu0 %v423_v16  ;;  %v590_v17 = vpop.permute.xlu2 %589 }
 0x161   : > { %1353 = vperm.xlu1 %7700, %v8745_v62   ;;  %vm1494_vm8 = vmand %vm1461_vm15, %vm14822_vm6  ;;  %vm14745_vm15 = vcmp.lt.f32.partialorder %v8847_v34, 1.0 }
 0x162   : > { %vm1526_vm11 = vmor %vm1429_vm7, %vm1494_vm8  ;;  %v1685_v40 = vsel %vm14745_vm15, %v8648_v42, -inf  ;;  %vm14989_vm7 = vcmp.gt.s32.totalorder %v8787_v11, 0  ;;  %v8884_v12 = vpop.f32.mrf.mxu0  ;;  %14991 = vst [vmem:[#allocation33_spill] sm:$0xff] %v8887_v13 }
 0x163   : > { %v7188_v26 = vsel %vm1526_vm11, 1.0, %v14769_v18  ;;  %v1718_v50 = vsel %vm14746_vm10, %v1685_v40, -inf  ;;  %vm789_vm8 = vmand %vm756_vm0, %vm14989_vm7 }
 0x164   : > { %v8844_v31 = vadd.f32 %v7188_v26, %v1269_v29  ;;  %vm1174_vm13 = vmor %vm1077_vm1, %vm1142_vm4  ;;  %vm727_vm1 = vcmp.gt.f32.partialorder %v590_v17, %v8678_v49  ;;  %v14996_v29 = vmov 0 }
 0x165   : > { %7706 = vset.pattern.permute.xlu0 %v14753_v45  ;;  %v7157_v57 = vsel %vm1174_vm13, 1.0, %v14769_v18  ;;  %vm14992_vm3 = vmmov %vm14989_vm7  ;;  %vm14993_vm7 = vcmp.gt.s32.totalorder %v8787_v11, 1 }
 0x166   : > { %1361 = vperm.xlu0 %7706, %v8762_v1   ;;  %vm14743_vm14 = vcmp.lt.f32.partialorder %v8844_v31, 1.0 }
 0x167   : > { %7703 = vset.pattern.permute.xlu2 %v14753_v45  ;;  %v1310_v35 = vpop.permute.xlu1 %1309  ;;  %v1686_v39 = vsel %vm14743_vm14, %v8653_v44, -inf  ;;  %vm821_vm14 = vmor %vm724_vm5, %vm789_vm8 }
 0x168   : > { %1357 = vperm.xlu2 %7703, %v8753_v63   ;;  %vm1462_vm12 = vcmp.eq.f32.partialorder %v1310_v35, %v8658_v46  ;;  %v1721_v43 = vsel %vm14746_vm10, %v1686_v39, -inf  ;;  %vm1430_vm9 = vcmp.gt.f32.partialorder %v1310_v35, %v8658_v46  ;;  %v7125_v2 = vsel %vm821_vm14, 1.0, %v14769_v18  ;;  %v969_v21 = vpop.permute.xlu2 %968  ;;  %538 = vmatmul.f32.gmra.mxu0 %v424_v32 }
 0x169   : > { %7707 = vset.pattern.permute.xlu1 %v14765_v38  ;;  %vm1495_vm11 = vmand %vm1462_vm12, %vm14822_vm6  ;;  %v1270_v5 = vadd.f32 %v7157_v57, %v7125_v2  ;;  %vm759_vm14 = vcmp.eq.f32.partialorder %v590_v17, %v8678_v49  ;;  %vm1110_vm12 = vcmp.eq.f32.partialorder %v8871_v53, %v8664_v47  ;;  %vm1112_vm5 = vcmp.eq.f32.partialorder %v969_v21, %v8678_v49 }
 0x16a   : > { %644 = vperm.xlu1 %7707, %v8782_v6   ;;  %vm1527_vm2 = vmor %vm1430_vm9, %vm1495_vm11  ;;  %v8906_v22 = vpop.f32.mrf.mxu0  ;;  %v8936_v35 = vpack.c.bf16 %v424_v32, %v423_v16 }
 0x16b   : > { %v7189_v3 = vsel %vm1527_vm2, 1.0, %v14769_v18  ;;  %vm792_vm4 = vmand %vm759_vm14, %vm14992_vm3  ;;  %vm1080_vm2 = vcmp.gt.f32.partialorder %v969_v21, %v8678_v49 }
 0x16c   : > { %v8878_v7 = vadd.f32 %v7189_v3, %v1270_v5  ;;  %vm8921_vm8 = vmand %vm1110_vm12, %vm14993_vm7  ;;  %14999 = vst [vmem:[#allocation34_spill] sm:$0xff] %v8936_v35 }
 0x16d   : > { %vm8927_vm11 = vmor %vm727_vm1, %vm792_vm4 }
 0x16e   : > { %7713 = vset.pattern.permute.xlu0 %v14765_v38  ;;  %vm14744_vm0 = vcmp.lt.f32.partialorder %v8878_v7, 1.0  ;;  %v14997_v29 = vsel %vm8927_vm11, 4294967295, %v14996_v29  ;;  %vm14998_vm14 = vmmov %vm14993_vm7  ;;  %vm15000_vm7 = vcmp.gt.s32.totalorder %v8787_v11, 0 }
 0x16f   : > { %v1687_v14 = vsel %vm14744_vm0, %v8658_v46, -inf  ;;  %vm1145_vm12 = vmand %vm1112_vm5, %vm14998_vm14  ;;  %vm1463_vm14 = vcmp.eq.f32.partialorder %v8880_v9, %v8664_v47 }
 0x170   : > { %7710 = vset.pattern.permute.xlu2 %v14765_v38  ;;  %v1724_v15 = vsel %vm14746_vm10, %v1687_v14, -inf  ;;  %v580_v23 = vpop.permute.xlu1 %579  ;;  %vm1177_vm15 = vmor %vm1080_vm2, %vm1145_vm12  ;;  %vm1078_vm10 = vcmp.gt.f32.partialorder %v8871_v53, %v8664_v47 }
 0x171   : > { %v1322_v25 = vpop.permute.xlu2 %1321  ;;  %vm757_vm9 = vcmp.eq.f32.partialorder %v580_v23, %v8664_v47  ;;  %vm725_vm3 = vcmp.gt.f32.partialorder %v580_v23, %v8664_v47  ;;  %v7160_v40 = vsel %vm1177_vm15, 1.0, %v14769_v18  ;;  %vm1496_vm2 = vmand %vm1463_vm14, %vm14822_vm6 }
 0x172   : > { %7708 = vset.pattern.permute.xlu1 %v14758_v37  ;;  %vm1465_vm13 = vcmp.eq.f32.partialorder %v1322_v25, %v8678_v49  ;;  %vm790_vm0 = vmand %vm757_vm9, %vm15000_vm7  ;;  %vm1433_vm1 = vcmp.gt.f32.partialorder %v1322_v25, %v8678_v49  ;;  %vm15003_vm7 = vcmp.gt.s32.totalorder %v8787_v11, 1 }
 0x173   : > { %1012 = vperm.xlu1 %7708, %v8782_v6   ;;  %vm1498_vm4 = vmand %vm1465_vm13, %vm14822_vm6  ;;  %vm1431_vm13 = vcmp.gt.f32.partialorder %v8880_v9, %v8664_v47 }
 0x174   : > { %vm822_vm5 = vmor %vm725_vm3, %vm790_vm0  ;;  %vm15001_vm0 = vnez %v14997_v29 }
 0x175   : > { %v8944_v39 = vpop.permute.xlu0 %594  ;;  %vm1530_vm11 = vmor %vm1433_vm1, %vm1498_vm4  ;;  %vm15004_vm4 = vcmp.gt.s32.totalorder %v8787_v11, 0 }
 0x176   : > { %vm1175_vm9 = vmor %vm1078_vm10, %vm8921_vm8  ;;  %v7192_v57 = vsel %vm1530_vm11, 1.0, %v14769_v18  ;;  %vm758_vm10 = vcmp.eq.f32.partialorder %v8895_v20, %v8671_v48  ;;  %vm726_vm11 = vcmp.gt.f32.partialorder %v8895_v20, %v8671_v48 }
 0x177   : > { %v7158_v3 = vsel %vm1175_vm9, 1.0, %v14769_v18  ;;  %vm1528_vm8 = vmor %vm1431_vm13, %vm1496_vm2 }
 0x178   : > { %v7190_v14 = vsel %vm1528_vm8, 1.0, %v14769_v18  ;;  %vm15005_vm8 = vcmask 23552  }
 0x179   : > { %v965_v28 = vpop.permute.xlu1 %964 }
 0x17a   : > { %vm1111_vm15 = vcmp.eq.f32.partialorder %v965_v28, %v8671_v48  ;;  %vm1079_vm3 = vcmp.gt.f32.partialorder %v965_v28, %v8671_v48 }
 0x17b   : > { %7709 = vset.pattern.permute.xlu1 %v14753_v45  ;;  %vm1144_vm1 = vmand %vm1111_vm15, %vm15003_vm7 }
 0x17c   : > { %1365 = vperm.xlu1 %7709, %v8782_v6   ;;  %vm1176_vm13 = vmor %vm1079_vm3, %vm1144_vm1  ;;  %vm760_vm3 = vcmp.eq.f32.partialorder %v8944_v39, %v8687_v52 }
 0x17d   : > { %v7159_v16 = vsel %vm1176_vm13, 1.0, %v14769_v18  ;;  %vm15007_vm7 = vmmov %vm15005_vm8  ;;  %vm15009_vm13 = vcmp.gt.s32.totalorder %v8787_v11, 0 }
 0x17e   : > { %v973_v10 = vpop.permute.xlu0 %972 }
 0x182   : > { %v1318_v53 = vpop.permute.xlu1 %1317 }
 0x183   : > { %vm1464_vm12 = vcmp.eq.f32.partialorder %v1318_v53, %v8671_v48  ;;  %vm1432_vm14 = vcmp.gt.f32.partialorder %v1318_v53, %v8671_v48 }
 0x184   : > { %7716 = vset.pattern.permute.xlu1 %v14765_v38  ;;  %vm1497_vm9 = vmand %vm1464_vm12, %vm14822_vm6  ;;  %vm1113_vm12 = vcmp.eq.f32.partialorder %v973_v10, %v8687_v52 }
 0x185   : > { %vm1529_vm15 = vmor %vm1432_vm14, %vm1497_vm9  ;;  %vm728_vm9 = vcmp.gt.f32.partialorder %v8944_v39, %v8687_v52 }
 0x186   : > { %v7191_v21 = vsel %vm1529_vm15, 1.0, %v14769_v18 }
 0x187   : > { %v1326_v28 = vpop.permute.xlu0 %1325 }
 0x188   : > { %vm1466_vm1 = vcmp.eq.f32.partialorder %v1326_v28, %v8687_v52  ;;  %vm1434_vm15 = vcmp.gt.f32.partialorder %v1326_v28, %v8687_v52 }
 0x190   : > { %1722 = vmax.xlane.f32.xlu0 %v1721_v43  ;;  %v7128_v43 = vsel %vm15001_vm0, 1.0, %v14769_v18 }
 0x191   : > { %1719 = vmax.xlane.f32.xlu2 %v1718_v50  ;;  %v7126_v50 = vsel %vm822_vm5, 1.0, %v14769_v18  ;;  %v1273_v2 = vadd.f32 %v7160_v40, %v7128_v43  ;;  %vm791_vm5 = vmand %vm758_vm10, %vm15004_vm4  ;;  %vm15008_vm4 = vcmp.gt.s32.totalorder %v8787_v11, 1  ;;  %v9015_v40 = vpop.f32.mrf.mxu0 }
 0x192   : > { %v1271_v9 = vadd.f32 %v7158_v3, %v7126_v50  ;;  %vm823_vm0 = vmor %vm726_vm11, %vm791_vm5  ;;  %vm1081_vm11 = vcmp.gt.f32.partialorder %v973_v10, %v8687_v52 }
 0x193   : > { %v8969_v5 = vadd.f32 %v7192_v57, %v1273_v2  ;;  %v7127_v17 = vsel %vm823_vm0, 1.0, %v14769_v18  ;;  %vm1146_vm5 = vmand %vm1113_vm12, %vm15008_vm4 }
 0x194   : > { %v1272_v25 = vadd.f32 %v7159_v16, %v7127_v17  ;;  %vm793_vm0 = vmand %vm760_vm3, %vm15009_vm13  ;;  %v426_v16 = vld [vmem:[%s8555_s18 + $0xd8] sm:$0xff]  ;;  %vm15012_vm13 = vcmp.gt.s32.totalorder %v8787_v11, 1 }
 0x195   : > { %15002 = vst [vmem:[#allocation35_spill] sm:$0xff] %v8969_v5  ;;  %vm14747_vm2 = vcmp.lt.f32.partialorder %v8969_v5, 1.0  ;;  %vm825_vm12 = vmor %vm728_vm9, %vm793_vm0 }
 0x196   : > { %v1690_v20 = vsel %vm14747_vm2, %v8678_v49, -inf  ;;  %v8997_v29 = vadd.f32 %v7191_v21, %v1272_v25  ;;  %vm15010_vm2 = vcmask 23552   ;;  %v7129_v53 = vsel %vm825_vm12, 1.0, %v14769_v18  ;;  %v605_v21 = vpop.permute.xlu2 %604  ;;  %v600_v25 = vpop.permute.xlu1 %599 }
 0x197   : > { %v1733_v23 = vsel %vm15005_vm8, %v1690_v20, -inf  ;;  %vm1499_vm8 = vmand %vm1466_vm1, %vm14822_vm6 }
 0x198   : > { %15006 = vst [vmem:[#allocation36_spill] sm:$0xff] %v8997_v29  ;;  %vm14748_vm14 = vcmp.lt.f32.partialorder %v8997_v29, 1.0  ;;  %vm1531_vm4 = vmor %vm1434_vm15, %vm1499_vm8  ;;  %vm730_vm15 = vcmp.gt.f32.partialorder %v605_v21, %v8702_v55  ;;  %vm15013_vm8 = vcmp.gt.s32.totalorder %v8787_v11, 0 }
 0x199   : > { %v1689_v43 = vsel %vm14748_vm14, %v8671_v48, -inf  ;;  %v7193_v57 = vsel %vm1531_vm4, 1.0, %v14769_v18  ;;  %v9027_v10 = vpop.f32.mrf.mxu0 }
 0x19a   : > { %v1730_v50 = vsel %vm15010_vm2, %v1689_v43, -inf  ;;  %v427_v43 = vld [vmem:[%s8555_s18 + $0xe0] sm:$0xff] }
 0x1a4   : > { %654 = vperm.xlu0 %7713, %v8884_v12  }
 0x1a6   : > { %1725 = vmax.xlane.f32.xlu1 %v1724_v15  ;;  %v8983_v15 = vadd.f32 %v7190_v14, %v1271_v9  ;;  %v425_v9 = vld [vmem:[%s8555_s18 + $0xd0] sm:$0xff] }
 0x1a7   : > { %541 = vmatmul.f32.gmra.mxu0 %v425_v9  ;;  %v9035_v20 = vpack.c.bf16 %v426_v16, %v425_v9 }
 0x1a8   : > { %vm14760_vm10 = vcmp.lt.f32.partialorder %v8983_v15, 1.0 }
 0x1a9   : > { %649 = vperm.xlu2 %7710, %v8874_v0   ;;  %v1688_v26 = vsel %vm14760_vm10, %v8664_v47, -inf  ;;  %15011 = vst [vmem:[#allocation37_spill] sm:$0xff] %v9035_v20 }
 0x1aa   : > { %v1727_v32 = vsel %vm15007_vm7, %v1688_v26, -inf  ;;  %vm1178_vm7 = vmor %vm1081_vm11, %vm1146_vm5  ;;  %v9046_v26 = vpop.f32.mrf.mxu0  ;;  %vm762_vm11 = vcmp.eq.f32.partialorder %v605_v21, %v8702_v55 }
 0x1ab   : > { %v7161_v39 = vsel %vm1178_vm7, 1.0, %v14769_v18  ;;  %vm795_vm7 = vmand %vm762_vm11, %vm15013_vm8  ;;  %vm729_vm8 = vcmp.gt.f32.partialorder %v600_v25, %v8694_v54 }
 0x1ac   : > { %7714 = vset.pattern.permute.xlu0 %v14758_v37  ;;  %v1274_v2 = vadd.f32 %v7161_v39, %v7129_v53  ;;  %vm827_vm14 = vmor %vm730_vm15, %vm795_vm7  ;;  %v610_v53 = vpop.permute.xlu0 %609  ;;  %vm15016_vm7 = vcmp.gt.s32.totalorder %v8787_v11, 0 }
 0x1ad   : > { %1020 = vperm.xlu0 %7714, %v8884_v12  }
 0x1ae   : > { %v9024_v3 = vadd.f32 %v7193_v57, %v1274_v2 }
 0x1af   : > { %544 = vmatmul.f32.gmra.mxu0 %v426_v16 }
 0x1b0   : > { %vm14749_vm3 = vcmp.lt.f32.partialorder %v9024_v3, 1.0 }
 0x1b1   : > { %7711 = vset.pattern.permute.xlu2 %v14758_v37  ;;  %v1691_v14 = vsel %vm14749_vm3, %v8687_v52, -inf }
 0x1b2   : > { %1016 = vperm.xlu2 %7711, %v8874_v0   ;;  %v1736_v17 = vsel %vm15010_vm2, %v1691_v14, -inf }
 0x1b4   : > { %v985_v16 = vpop.permute.xlu0 %984 }
 0x1b5   : > { %7715 = vset.pattern.permute.xlu0 %v14753_v45 }
 0x1b6   : > { %1373 = vperm.xlu0 %7715, %v8884_v12  }
 0x1b7   : > { %547 = vmatmul.f32.gmra.mxu0 %v427_v43 }
 0x1ba   : > { %7712 = vset.pattern.permute.xlu2 %v14753_v45 }
 0x1bb   : > { %1369 = vperm.xlu2 %7712, %v8874_v0  }
 0x1be   : > { %7722 = vset.pattern.permute.xlu0 %v14765_v38 }
 0x1bf   : > { %659 = vperm.xlu1 %7716, %v8906_v22  }
 0x1c3   : > { %7719 = vset.pattern.permute.xlu2 %v14765_v38 }
 0x1c7   : > { %7717 = vset.pattern.permute.xlu1 %v14758_v37 }
 0x1c8   : > { %1024 = vperm.xlu1 %7717, %v8906_v22  }
 0x1d0   : > { %7718 = vset.pattern.permute.xlu1 %v14753_v45 }
 0x1d1   : > { %1377 = vperm.xlu1 %7718, %v8906_v22  }
 0x1d9   : > { %7725 = vset.pattern.permute.xlu1 %v14765_v38 }
 0x1e0   : > { %1734 = vmax.xlane.f32.xlu0 %v1733_v23  ;;  %v981_v23 = vpop.permute.xlu2 %980 }
 0x1e1   : > { %vm1115_vm1 = vcmp.eq.f32.partialorder %v981_v23, %v8702_v55  ;;  %vm1083_vm9 = vcmp.gt.f32.partialorder %v981_v23, %v8702_v55 }
 0x1e2   : > { %vm1148_vm0 = vmand %vm1115_vm1, %vm15012_vm13 }
 0x1e3   : > { %vm1180_vm2 = vmor %vm1083_vm9, %vm1148_vm0 }
 0x1e4   : > { %1728 = vmax.xlane.f32.xlu2 %v1727_v32  ;;  %v977_v32 = vpop.permute.xlu1 %976  ;;  %v7163_v39 = vsel %vm1180_vm2, 1.0, %v14769_v18 }
 0x1e5   : > { %vm1114_vm11 = vcmp.eq.f32.partialorder %v977_v32, %v8694_v54  ;;  %vm1082_vm13 = vcmp.gt.f32.partialorder %v977_v32, %v8694_v54 }
 0x1e8   : > { %v1334_v28 = vpop.permute.xlu2 %1333 }
 0x1e9   : > { %vm1468_vm5 = vcmp.eq.f32.partialorder %v1334_v28, %v8702_v55  ;;  %vm1436_vm12 = vcmp.gt.f32.partialorder %v1334_v28, %v8702_v55 }
 0x1ea   : > { %vm1501_vm4 = vmand %vm1468_vm5, %vm14822_vm6  ;;  %vm761_vm5 = vcmp.eq.f32.partialorder %v600_v25, %v8694_v54 }
 0x1eb   : > { %vm1533_vm1 = vmor %vm1436_vm12, %vm1501_vm4 }
 0x1ec   : > { %1731 = vmax.xlane.f32.xlu2 %v1730_v50  ;;  %v7131_v50 = vsel %vm827_vm14, 1.0, %v14769_v18  ;;  %v7195_v57 = vsel %vm1533_vm1, 1.0, %v14769_v18  ;;  %v1330_v9 = vpop.permute.xlu1 %1329  ;;  %vm15015_vm14 = vcmp.gt.s32.totalorder %v8787_v11, 1  ;;  %vm794_vm12 = vmand %vm761_vm5, %vm15016_vm7  ;;  %vm1116_vm5 = vcmp.eq.f32.partialorder %v985_v16, %v8710_v56 }
 0x1ed   : > { %v1276_v2 = vadd.f32 %v7163_v39, %v7131_v50  ;;  %vm1467_vm9 = vcmp.eq.f32.partialorder %v1330_v9, %v8694_v54  ;;  %vm1147_vm0 = vmand %vm1114_vm11, %vm15015_vm14  ;;  %vm1435_vm4 = vcmp.gt.f32.partialorder %v1330_v9, %v8694_v54  ;;  %vm15017_vm14 = vcmask 23552   ;;  %v1338_v50 = vpop.permute.xlu0 %1337  ;;  %v428_v9 = vld [vmem:[%s8555_s18 + $0xe8] sm:$0xff] }
 0x1ee   : > { %vm1500_vm2 = vmand %vm1467_vm9, %vm14822_vm6  ;;  %vm763_vm9 = vcmp.eq.f32.partialorder %v610_v53, %v8710_v56  ;;  %550 = vmatmul.f32.gmra.mxu0 %v428_v9 }
 0x1ef   : > { %v9071_v14 = vadd.f32 %v7195_v57, %v1276_v2  ;;  %vm1179_vm1 = vmor %vm1082_vm13, %vm1147_vm0  ;;  %v9098_v57 = vpop.f32.mrf.mxu0  ;;  %vm1469_vm0 = vcmp.eq.f32.partialorder %v1338_v50, %v8710_v56 }
 0x1f0   : > { %vm826_vm3 = vmor %vm729_vm8, %vm794_vm12  ;;  %v7162_v21 = vsel %vm1179_vm1, 1.0, %v14769_v18  ;;  %vm1084_vm8 = vcmp.gt.f32.partialorder %v985_v16, %v8710_v56  ;;  %vm731_vm12 = vcmp.gt.f32.partialorder %v610_v53, %v8710_v56  ;;  %vm1437_vm1 = vcmp.gt.f32.partialorder %v1338_v50, %v8710_v56 }
 0x1f1   : > { %15014 = vst [vmem:[#allocation38_spill] sm:$0xff] %v9071_v14  ;;  %vm14750_vm15 = vcmp.lt.f32.partialorder %v9071_v14, 1.0  ;;  %vm1532_vm11 = vmor %vm1435_vm4, %vm1500_vm2  ;;  %v7130_v25 = vsel %vm826_vm3, 1.0, %v14769_v18  ;;  %vm15019_vm3 = vcmp.gt.s32.totalorder %v8787_v11, 1  ;;  %vm15020_vm4 = vcmp.gt.s32.totalorder %v8787_v11, 0 }
 0x1f2   : > { %v7194_v28 = vsel %vm1532_vm11, 1.0, %v14769_v18  ;;  %v1275_v32 = vadd.f32 %v7162_v21, %v7130_v25  ;;  %vm1149_vm7 = vmand %vm1116_vm5, %vm15019_vm3  ;;  %v9116_v16 = vpack.c.bf16 %v428_v9, %v427_v43  ;;  %vm15022_vm3 = vcmask 23552   ;;  %v620_v9 = vpop.permute.xlu2 %619 }
 0x1f3   : > { %vm796_vm2 = vmand %vm763_vm9, %vm15020_vm4  ;;  %vm15027_vm4 = vcmp.gt.s32.totalorder %v8787_v11, 1 }
 0x1f4   : > { %669 = vperm.xlu0 %7722, %v9027_v10   ;;  %v9095_v39 = vadd.f32 %v7194_v28, %v1275_v32  ;;  %vm1502_vm11 = vmand %vm1469_vm0, %vm14822_vm6  ;;  %15021 = vst [vmem:[#allocation40_spill] sm:$0xff] %v9116_v16  ;;  %v429_v32 = vld [vmem:[%s8555_s18 + $0xf0] sm:$0xff] }
 0x1f5   : > { %vm828_vm5 = vmor %vm731_vm12, %vm796_vm2  ;;  %v625_v20 = vpop.permute.xlu0 %624 }
 0x1f6   : > { %15018 = vst [vmem:[#allocation39_spill] sm:$0xff] %v9095_v39  ;;  %vm14751_vm13 = vcmp.lt.f32.partialorder %v9095_v39, 1.0  ;;  %553 = vmatmul.f32.gmra.mxu0 %v429_v32  ;;  %vm15025_vm0 = vmmov %vm15022_vm3 }
 0x1f7   : > { %v1692_v2 = vsel %vm14751_vm13, %v8694_v54, -inf  ;;  %v9120_v21 = vpop.f32.mrf.mxu0 }
 0x1f8   : > { %v1739_v53 = vsel %vm15022_vm3, %v1692_v2, -inf  ;;  %15023 = vst [vmem:[#allocation41_spill] sm:$0xff] %v9120_v21 }
 0x1fb   : > { %1737 = vmax.xlane.f32.xlu1 %v1736_v17  ;;  %v1693_v17 = vsel %vm14750_vm15, %v8702_v55, -inf  ;;  %vm1534_vm15 = vmor %vm1437_vm1, %vm1502_vm11  ;;  %vm733_vm1 = vcmp.gt.f32.partialorder %v620_v9, %v8729_v60  ;;  %vm15028_vm11 = vcmp.gt.s32.totalorder %v8787_v11, 0  ;;  %v7551_v55 = vld [vmem:[%s14732_s2 + $0x30] sm:$0xff] }
 0x1fc   : > { %7723 = vset.pattern.permute.xlu0 %v14758_v37  ;;  %v1742_v23 = vsel %vm15017_vm14, %v1693_v17, -inf  ;;  %vm1181_vm14 = vmor %vm1084_vm8, %vm1149_vm7  ;;  %v7196_v25 = vsel %vm1534_vm15, 1.0, %v14769_v18  ;;  %vm765_vm8 = vcmp.eq.f32.partialorder %v620_v9, %v8729_v60 }
 0x1fd   : > { %1032 = vperm.xlu0 %7723, %v9027_v10   ;;  %v7164_v17 = vsel %vm1181_vm14, 1.0, %v14769_v18  ;;  %vm798_vm14 = vmand %vm765_vm8, %vm15028_vm11 }
 0x1fe   : > { %vm830_vm13 = vmor %vm733_vm1, %vm798_vm14 }
 0x1ff   : > { %vm15033_vm1 = vmmov %vm15028_vm11 }
 0x204   : > { %664 = vperm.xlu2 %7719, %v9015_v40  }
 0x205   : > { %7724 = vset.pattern.permute.xlu0 %v14753_v45 }
 0x206   : > { %1385 = vperm.xlu0 %7724, %v9027_v10  }
 0x20c   : > { %7720 = vset.pattern.permute.xlu2 %v14758_v37 }
 0x20d   : > { %1028 = vperm.xlu2 %7720, %v9015_v40  }
 0x20e   : > { %7731 = vset.pattern.permute.xlu0 %v14765_v38 }
 0x214   : > { %674 = vperm.xlu1 %7725, %v9046_v26  }
 0x215   : > { %7721 = vset.pattern.permute.xlu2 %v14753_v45 }
 0x216   : > { %1381 = vperm.xlu2 %7721, %v9015_v40  }
 0x21c   : > { %7726 = vset.pattern.permute.xlu1 %v14758_v37 }
 0x21d   : > { %1036 = vperm.xlu1 %7726, %v9046_v26  }
 0x21e   : > { %7728 = vset.pattern.permute.xlu2 %v14765_v38 }
 0x225   : > { %7727 = vset.pattern.permute.xlu1 %v14753_v45 }
 0x226   : > { %1389 = vperm.xlu1 %7727, %v9046_v26  }
 0x22e   : > { %7734 = vset.pattern.permute.xlu1 %v14765_v38 }
 0x230   : > { %1743 = vmax.xlane.f32.xlu0 %v1742_v23  ;;  %v7132_v23 = vsel %vm828_vm5, 1.0, %v14769_v18 }
 0x231   : > { %v1277_v28 = vadd.f32 %v7164_v17, %v7132_v23  ;;  %v615_v17 = vpop.permute.xlu1 %614 }
 0x233   : > { %v9126_v50 = vadd.f32 %v7196_v25, %v1277_v28  ;;  %v9141_v25 = vpop.f32.mrf.mxu0 }
 0x234   : > { %15026 = vst [vmem:[#allocation43_spill] sm:$0xff] %v9141_v25 }
 0x235   : > { %15024 = vst [vmem:[#allocation42_spill] sm:$0xff] %v9126_v50  ;;  %vm14752_vm9 = vcmp.lt.f32.partialorder %v9126_v50, 1.0  ;;  %v7549_v50 = vld [vmem:[%s14732_s2 + $0x20] sm:$0xff] }
 0x236   : > { %v1694_v43 = vsel %vm14752_vm9, %v8710_v56, -inf }
 0x237   : > { %v1745_v2 = vsel %vm15025_vm0, %v1694_v43, -inf }
 0x239   : > { %v989_v28 = vpop.permute.xlu1 %988 }
 0x23f   : > { %1740 = vmax.xlane.f32.xlu2 %v1739_v53  ;;  %v993_v53 = vpop.permute.xlu2 %992 }
 0x240   : > { %vm1118_vm15 = vcmp.eq.f32.partialorder %v993_v53, %v8729_v60  ;;  %vm1086_vm12 = vcmp.gt.f32.partialorder %v993_v53, %v8729_v60 }
 0x241   : > { %vm1151_vm2 = vmand %vm1118_vm15, %vm15027_vm4  ;;  %v1342_v35 = vpop.permute.xlu1 %1341  ;;  %vm1117_vm15 = vcmp.eq.f32.partialorder %v989_v28, %v8721_v59 }
 0x242   : > { %vm1183_vm0 = vmor %vm1086_vm12, %vm1151_vm2  ;;  %vm732_vm2 = vcmp.gt.f32.partialorder %v615_v17, %v8721_v59  ;;  %vm1438_vm14 = vcmp.gt.f32.partialorder %v1342_v35, %v8721_v59 }
 0x243   : > { %v7166_v43 = vsel %vm1183_vm0, 1.0, %v14769_v18  ;;  %vm15032_vm12 = vmmov %vm15027_vm4  ;;  %vm15034_vm0 = vcmask 23552  }
 0x244   : > { %684 = vperm.xlu0 %7731, %v9120_v21   ;;  %vm1150_vm4 = vmand %vm1117_vm15, %vm15032_vm12 }
 0x247   : > { %v1346_v23 = vpop.permute.xlu2 %1345 }
 0x248   : > { %vm1471_vm7 = vcmp.eq.f32.partialorder %v1346_v23, %v8729_v60  ;;  %vm1439_vm5 = vcmp.gt.f32.partialorder %v1346_v23, %v8729_v60  ;;  %v430_v23 = vld [vmem:[%s8555_s18 + $0xf8] sm:$0xff]  ;;  %s10545_s18 = scalar_lea.vmem %s14738_s8, %s7120_s15  ;;  %s6966_s15 = sshll.u32 %s6963_s27, 4  ;;  %s6967_s15 = int_to_ptr.hbm [resolvable:$true] %s6966_s15 }
 0x249   : > { %vm1504_vm3 = vmand %vm1471_vm7, %vm14822_vm6  ;;  %556 = vmatmul.f32.gmra.mxu0 %v430_v23  ;;  %v9167_v16 = vpack.c.bf16 %v430_v23, %v429_v32  ;;  %vm764_vm7 = vcmp.eq.f32.partialorder %v615_v17, %v8721_v59  ;;  %s8335_s11 = sshra.s32 %s6967_s15, 4  ;;  %s8336_s11 = int_to_ptr.hbm [resolvable:$true] %s8335_s11 }
 0x24a   : > { %vm1536_vm9 = vmor %vm1439_vm5, %vm1504_vm3  ;;  %p8342_p9 = scmp.lt.s32.totalorder %s8336_s11, %s14737_s7 }
 0x24b   : > { %v7198_v9 = vsel %vm1536_vm9, 1.0, %v14769_v18  ;;  %15030 = vst [vmem:[#allocation45_spill] sm:$0xff] %v9167_v16  ;;  %vm1085_vm9 = vcmp.gt.f32.partialorder %v989_v28, %v8721_v59  ;;  %vm797_vm11 = vmand %vm764_vm7, %vm15033_vm1  ;;  %vm734_vm1 = vcmp.gt.f32.partialorder %v625_v20, %v8737_v61 }
 0x24c   : > { %7732 = vset.pattern.permute.xlu0 %v14758_v37  ;;  %vm1182_vm3 = vmor %vm1085_vm9, %vm1150_vm4  ;;  %vm766_vm9 = vcmp.eq.f32.partialorder %v625_v20, %v8737_v61  ;;  %vm15037_vm4 = vcmp.gt.s32.totalorder %v8787_v11, 1 }
 0x24d   : > { %1044 = vperm.xlu0 %7732, %v9120_v21   ;;  %vm829_vm10 = vmor %vm732_vm2, %vm797_vm11  ;;  %vm15038_vm11 = vcmp.gt.s32.totalorder %v8787_v11, 0 }
 0x24e   : > { %v7133_v17 = vsel %vm829_vm10, 1.0, %v14769_v18 }
 0x24f   : > { %v635_v16 = vpop.permute.xlu2 %634 }
 0x250   : > { %1746 = vmax.xlane.f32.xlu1 %v1745_v2  ;;  %v7134_v2 = vsel %vm830_vm13, 1.0, %v14769_v18  ;;  %vm1470_vm13 = vcmp.eq.f32.partialorder %v1342_v35, %v8721_v59  ;;  %v9192_v35 = vpop.f32.mrf.mxu0 }
 0x251   : > { %v1279_v53 = vadd.f32 %v7166_v43, %v7134_v2  ;;  %vm1503_vm5 = vmand %vm1470_vm13, %vm14822_vm6  ;;  %v997_v43 = vpop.permute.xlu0 %996  ;;  %v7165_v2 = vsel %vm1182_vm3, 1.0, %v14769_v18  ;;  %15035 = vst [vmem:[#allocation46_spill] sm:$0xff] %v9192_v35 }
 0x252   : > { %vm1535_vm15 = vmor %vm1438_vm14, %vm1503_vm5  ;;  %vm1119_vm13 = vcmp.eq.f32.partialorder %v997_v43, %v8737_v61  ;;  %vm1087_vm10 = vcmp.gt.f32.partialorder %v997_v43, %v8737_v61 }
 0x253   : > { %vm1152_vm2 = vmand %vm1119_vm13, %vm15037_vm4 }
 0x254   : > { %vm799_vm14 = vmand %vm766_vm9, %vm15038_vm11  ;;  %vm768_vm9 = vcmp.eq.f32.partialorder %v635_v16, %v8753_v63 }
 0x255   : > { %7733 = vset.pattern.permute.xlu0 %v14753_v45 }
 0x256   : > { %1397 = vperm.xlu0 %7733, %v9120_v21  }
 0x257   : > { %679 = vperm.xlu2 %7728, %v9098_v57  }
 0x259   : > { %v1350_v13 = vpop.permute.xlu0 %1349 }
 0x25a   : > { %vm1472_vm12 = vcmp.eq.f32.partialorder %v1350_v13, %v8737_v61  ;;  %vm1440_vm5 = vcmp.gt.f32.partialorder %v1350_v13, %v8737_v61 }
 0x25b   : > { %vm1505_vm3 = vmand %vm1472_vm12, %vm14822_vm6 }
 0x25e   : > { %7740 = vset.pattern.permute.xlu0 %v14765_v38 }
 0x25f   : > { %7729 = vset.pattern.permute.xlu2 %v14758_v37 }
 0x260   : > { %1040 = vperm.xlu2 %7729, %v9098_v57  }
 0x261   : > { %v9240_v51 = vpop.permute.xlu0 %639 }
 0x268   : > { %7730 = vset.pattern.permute.xlu2 %v14753_v45  ;;  %v9165_v45 = vadd.f32 %v7198_v9, %v1279_v53  ;;  %v7197_v9 = vsel %vm1535_vm15, 1.0, %v14769_v18  ;;  %v1278_v53 = vadd.f32 %v7165_v2, %v7133_v17  ;;  %v9213_v2 = vpop.f32.mrf.mxu0  ;;  %vm1184_vm15 = vmor %vm1087_vm10, %vm1152_vm2  ;;  %v1005_v17 = vpop.permute.xlu2 %1004 }
 0x269   : > { %1393 = vperm.xlu2 %7730, %v9098_v57   ;;  %689 = vperm.xlu1 %7734, %v9141_v25   ;;  %15039 = vst [vmem:[#allocation48_spill] sm:$0xff] %v9213_v2  ;;  %v7167_v20 = vsel %vm1184_vm15, 1.0, %v14769_v18  ;;  %vm1089_vm10 = vcmp.gt.f32.partialorder %v1005_v17, %v8753_v63 }
 0x26a   : > { %15029 = vst [vmem:[#allocation44_spill] sm:$0xff] %v9165_v45  ;;  %vm14764_vm8 = vcmp.lt.f32.partialorder %v9165_v45, 1.0  ;;  %v9194_v23 = vadd.f32 %v7197_v9, %v1278_v53 }
 0x26b   : > { %v1696_v32 = vsel %vm14764_vm8, %v8729_v60, -inf  ;;  %vm1537_vm8 = vmor %vm1440_vm5, %vm1505_vm3 }
 0x26c   : > { %v1751_v28 = vsel %vm15034_vm0, %v1696_v32, -inf  ;;  %15036 = vst [vmem:[#allocation47_spill] sm:$0xff] %v9194_v23  ;;  %vm14763_vm7 = vcmp.lt.f32.partialorder %v9194_v23, 1.0  ;;  %v7199_v13 = vsel %vm1537_vm8, 1.0, %v14769_v18  ;;  %vm1121_vm8 = vcmp.eq.f32.partialorder %v1005_v17, %v8753_v63 }
 0x26d   : > { %v1695_v32 = vsel %vm14763_vm7, %v8721_v59, -inf  ;;  %vm831_vm7 = vmor %vm734_vm1, %vm799_vm14  ;;  %vm736_vm1 = vcmp.gt.f32.partialorder %v635_v16, %v8753_v63  ;;  %v1009_v16 = vpop.permute.xlu0 %1008  ;;  %v15045_v17 = vmov 0.0  }
 0x26e   : > { %v7135_v43 = vsel %vm831_vm7, 1.0, %v14769_v18  ;;  %vm15042_vm7 = vmmov %vm15034_vm0 }
 0x26f   : > { %v1280_v9 = vadd.f32 %v7167_v20, %v7135_v43  ;;  %vm1154_vm2 = vmand %vm1121_vm8, %vm15037_vm4 }
 0x270   : > { %vm801_vm14 = vmand %vm768_vm9, %vm15038_vm11  ;;  %v9256_v41 = vpop.f32.mrf.mxu0  ;;  %vm15048_vm11 = vcmask 23552  }
 0x271   : > { %7735 = vset.pattern.permute.xlu1 %v14758_v37  ;;  %7737 = vset.pattern.permute.xlu2 %v14765_v38  ;;  %v15031_v37 = vmov 2   ;;  %v9219_v53 = vadd.f32 %v7199_v13, %v1280_v9  ;;  %v15043_v13 = vmov 0   ;;  %15044 = vst [vmem:[#allocation50_spill] sm:$0xff] %v9256_v41  ;;  %vm833_vm15 = vmor %vm736_vm1, %vm801_vm14 }
 0x272   : > { %1048 = vperm.xlu1 %7735, %v9141_v25   ;;  %v7137_v33 = vsel %vm833_vm15, 1.0, %v15045_v17 }
 0x273   : > { %15040 = vst [vmem:[#allocation49_spill] sm:$0xff] %v9219_v53  ;;  %vm14819_vm13 = vcmp.lt.f32.partialorder %v9219_v53, 1.0 }
 0x275   : > { %v1362_v39 = vpop.permute.xlu0 %1361 }
 0x27a   : > { %7736 = vset.pattern.permute.xlu1 %v15031_v37 }
 0x27b   : > { %1401 = vperm.xlu1 %7736, %v9141_v25  }
 0x280   : > { %1752 = vmax.xlane.f32.xlu0 %v1751_v28  ;;  %v1748_v28 = vsel %vm15034_vm0, %v1695_v32, -inf  ;;  %v1358_v32 = vpop.permute.xlu2 %1357  ;;  %vm1186_vm0 = vmor %vm1089_vm10, %vm1154_vm2  ;;  %vm15047_vm2 = vcmp.gt.s32.totalorder %v8787_v11, 1 }
 0x281   : > { %vm1474_vm12 = vcmp.eq.f32.partialorder %v1358_v32, %v8753_v63  ;;  %vm1442_vm5 = vcmp.gt.f32.partialorder %v1358_v32, %v8753_v63  ;;  %v7169_v36 = vsel %vm1186_vm0, 1.0, %v15045_v17 }
 0x282   : > { %vm1507_vm3 = vmand %vm1474_vm12, %vm14822_vm6  ;;  %v1282_v32 = vadd.f32 %v7169_v36, %v7137_v33 }
 0x283   : > { %7743 = vset.pattern.permute.xlu1 %v14765_v38  ;;  %v9221_v38 = vpop.permute.xlu1 %629 }
 0x284   : > { %vm767_vm12 = vcmp.eq.f32.partialorder %v9221_v38, %v8745_v62  ;;  %vm735_vm14 = vcmp.gt.f32.partialorder %v9221_v38, %v8745_v62 }
 0x288   : > { %v9229_v58 = vpop.xlane.xlu2 %1719 }
 0x28b   : > { %v1001_v20 = vpop.permute.xlu1 %1000 }
 0x28c   : > { %vm1120_vm9 = vcmp.eq.f32.partialorder %v1001_v20, %v8745_v62  ;;  %vm1088_vm4 = vcmp.gt.f32.partialorder %v1001_v20, %v8745_v62  ;;  %v9300_v20 = vpop.xlane.xlu0 %1722 }
 0x28d   : > { %vm1153_vm1 = vmand %vm1120_vm9, %vm15047_vm2 }
 0x290   : > { %v9235_v43 = vpop.permute.xlu2 %649 }
 0x292   : > { %1749 = vmax.xlane.f32.xlu2 %v1748_v28  ;;  %v1697_v28 = vsel %vm14819_vm13, %v8737_v61, -inf }
 0x293   : > { %v1754_v18 = vsel %vm15042_vm7, %v1697_v28, -inf  ;;  %v1354_v9 = vpop.permute.xlu1 %1353  ;;  %vm1539_vm7 = vmor %vm1442_vm5, %vm1507_vm3  ;;  %vm15049_vm5 = vcmp.gt.s32.totalorder %v8787_v11, 0 }
 0x294   : > { %699 = vperm.xlu0 %7740, %v9213_v2   ;;  %v7201_v23 = vsel %vm1539_vm7, 1.0, %v15045_v17  ;;  %vm1473_vm10 = vcmp.eq.f32.partialorder %v1354_v9, %v8745_v62  ;;  %vm800_vm3 = vmand %vm767_vm12, %vm15049_vm5  ;;  %vm1441_vm0 = vcmp.gt.f32.partialorder %v1354_v9, %v8745_v62  ;;  %v9312_v59 = vpop.permute.xlu0 %654 }
 0x295   : > { %v9271_v45 = vadd.f32 %v7201_v23, %v1282_v32  ;;  %vm1506_vm15 = vmand %vm1473_vm10, %vm14822_vm6  ;;  %vm1122_vm10 = vcmp.eq.f32.partialorder %v1009_v16, %v8762_v1 }
 0x296   : > { %vm1185_vm7 = vmor %vm1088_vm4, %vm1153_vm1  ;;  %vm769_vm4 = vcmp.eq.f32.partialorder %v9240_v51, %v8762_v1  ;;  %vm1475_vm1 = vcmp.eq.f32.partialorder %v1362_v39, %v8762_v1 }
 0x297   : > { %15046 = vst [vmem:[#allocation51_spill] sm:$0xff] %v9271_v45  ;;  %vm14791_vm8 = vcmp.lt.f32.partialorder %v9271_v45, 1.0  ;;  %vm832_vm9 = vmor %vm735_vm14, %vm800_vm3  ;;  %v7168_v38 = vsel %vm1185_vm7, 1.0, %v15045_v17  ;;  %v9308_v45 = vpop.f32.mrf.mxu0  ;;  %vm15053_vm14 = vcmp.gt.s32.totalorder %v8787_v11, 1  ;;  %vm15054_vm3 = vcmask 23552  }
 0x298   : > { %v1699_v33 = vsel %vm14791_vm8, %v8753_v63, -inf  ;;  %vm1538_vm2 = vmor %vm1441_vm0, %vm1506_vm15  ;;  %15050 = vst [vmem:[#allocation52_spill] sm:$0xff] %v9308_v45  ;;  %vm737_vm0 = vcmp.gt.f32.partialorder %v9240_v51, %v8762_v1  ;;  %vm15055_vm15 = vcmp.gt.s32.totalorder %v8787_v11, 0 }
 0x299   : > { %v1760_v23 = vsel %vm15048_vm11, %v1699_v33, -inf  ;;  %v7200_v9 = vsel %vm1538_vm2, 1.0, %v15045_v17  ;;  %vm1090_vm11 = vcmp.gt.f32.partialorder %v1009_v16, %v8762_v1  ;;  %vm1155_vm5 = vmand %vm1122_vm10, %vm15053_vm14 }
 0x29a   : > { %vm802_vm7 = vmand %vm769_vm4, %vm15055_vm15 }
 0x29b   : > { %v9250_v28 = vpop.permute.xlu1 %644  ;;  %vm1508_vm2 = vmand %vm1475_vm1, %vm14822_vm6  ;;  %vm771_vm1 = vcmp.eq.f32.partialorder %v9235_v43, %v8874_v0 }
 0x29c   : > { %7741 = vset.pattern.permute.xlu0 %v15041_v4  ;;  %vm834_vm8 = vmor %vm737_vm0, %vm802_vm7  ;;  %vm739_vm0 = vcmp.gt.f32.partialorder %v9235_v43, %v8874_v0 }
 0x29d   : > { %1056 = vperm.xlu0 %7741, %v9213_v2   ;;  %v7138_v51 = vsel %vm834_vm8, 1.0, %v15045_v17  ;;  %vm15057_vm8 = vmmov %vm15054_vm3 }
 0x29e   : > { %vm804_vm7 = vmand %vm771_vm1, %vm15055_vm15 }
 0x29f   : > { %v9322_v14 = vpop.f32.mrf.mxu0 }
 0x2a0   : > { %15052 = vst [vmem:[#allocation54_spill] sm:$0xff] %v9322_v14 }
 0x2a3   : > { %v9268_v27 = vpop.permute.xlu1 %1012 }
 0x2a4   : > { %vm1123_vm1 = vcmp.eq.f32.partialorder %v9268_v27, %v8782_v6 }
 0x2a5   : > { %1755 = vmax.xlane.f32.xlu1 %v1754_v18  ;;  %7742 = vset.pattern.permute.xlu0 %v15031_v37  ;;  %v9244_v18 = vpop.permute.xlu2 %1016 }
 0x2a6   : > { %1409 = vperm.xlu0 %7742, %v9213_v2   ;;  %vm1092_vm14 = vcmp.gt.f32.partialorder %v9244_v18, %v8874_v0 }
 0x2aa   : > { %694 = vperm.xlu2 %7737, %v9192_v35  }
 0x2ab   : > { %v9285_v36 = vpop.permute.xlu1 %1365 }
 0x2ad   : > { %v9265_v30 = vpop.permute.xlu2 %1369 }
 0x2ae   : > { %7749 = vset.pattern.permute.xlu0 %v15043_v13 }
 0x2b2   : > { %7738 = vset.pattern.permute.xlu2 %v15041_v4 }
 0x2b3   : > { %1052 = vperm.xlu2 %7738, %v9192_v35   ;;  %v9305_v33 = vpop.xlane.xlu1 %1725 }
 0x2b5   : > { %v9276_v2 = vpop.xlane.xlu2 %1728 }
 0x2b6   : > { %v1817_v5 = vsub.f32 %v8664_v47, %v9276_v2  ;;  %v7560_v47 = vld [vmem:[%s14732_s2 + $0x78] sm:$0xff] }
 0x2b7   : > { %v7568_v2 = vld [vmem:[%s14732_s2 + $0xb8] sm:$0xff]  ;;  %3012 = vmatpush.bf16.msra.mxu2 %v7560_v47  ;;  %v7567_v47 = vld [vmem:[%s14732_s2 + $0xb0] sm:$0xff] }
 0x2b8   : > { %3360 = vmatpush.bf16.msra.mxu3 %v7568_v2  ;;  %v7566_v2 = vld [vmem:[%s14732_s2 + $0xa8] sm:$0xff] }
 0x2bb   : > { %7739 = vset.pattern.permute.xlu2 %v15031_v37  ;;  %v9316_v24 = vpop.permute.xlu1 %659 }
 0x2bc   : > { %1405 = vperm.xlu2 %7739, %v9192_v35   ;;  %3361 = vmatpush.bf16.msra.mxu3 %v7567_v47 }
 0x2bd   : > { %v9302_v32 = vpop.xlane.xlu2 %1731 }
 0x2be   : > { %704 = vperm.xlu1 %7743, %v9256_v41  }
 0x2c0   : > { %3362 = vmatpush.bf16.msra.mxu3 %v7566_v2 }
 0x2c3   : > { %v9344_v16 = vpop.permute.xlu1 %1024 }
 0x2c4   : > { %7746 = vset.pattern.permute.xlu2 %v15043_v13 }
 0x2c5   : > { %v9318_v53 = vpop.permute.xlu2 %664 }
 0x2c6   : > { %7744 = vset.pattern.permute.xlu1 %v15041_v4  ;;  %v9398_v19 = vpop.f32.mrf.mxu0 }
 0x2c7   : > { %1060 = vperm.xlu1 %7744, %v9256_v41   ;;  %15059 = vst [vmem:[#allocation57_spill] sm:$0xff] %v9398_v19 }
 0x2cb   : > { %v9357_v29 = vpop.permute.xlu1 %1377 }
 0x2cf   : > { %7745 = vset.pattern.permute.xlu1 %v15031_v37 }
 0x2d0   : > { %1761 = vmax.xlane.f32.xlu0 %v1760_v23  ;;  %1413 = vperm.xlu1 %7745, %v9256_v41   ;;  %v7136_v23 = vsel %vm832_vm9, 1.0, %v15045_v17  ;;  %vm1443_vm9 = vcmp.gt.f32.partialorder %v1362_v39, %v8762_v1 }
 0x2d1   : > { %v1281_v63 = vadd.f32 %v7168_v38, %v7136_v23  ;;  %vm1540_vm10 = vmor %vm1443_vm9, %vm1508_vm2  ;;  %vm1445_vm9 = vcmp.gt.f32.partialorder %v9265_v30, %v8874_v0 }
 0x2d3   : > { %v9314_v41 = vadd.f32 %v7200_v9, %v1281_v63  ;;  %v9330_v63 = vpop.permute.xlu0 %1020  ;;  %v9346_v9 = vpop.permute.xlu2 %1028 }
 0x2d5   : > { %15051 = vst [vmem:[#allocation53_spill] sm:$0xff] %v9314_v41  ;;  %vm14790_vm12 = vcmp.lt.f32.partialorder %v9314_v41, 1.0 }
 0x2d6   : > { %v1698_v38 = vsel %vm14790_vm12, %v8745_v62, -inf  ;;  %vm1187_vm12 = vmor %vm1090_vm11, %vm1155_vm5  ;;  %vm1477_vm11 = vcmp.eq.f32.partialorder %v9265_v30, %v8874_v0  ;;  %vm15061_vm5 = vcmp.gt.s32.totalorder %v8787_v11, 1 }
 0x2d7   : > { %v1757_v23 = vsel %vm15054_vm3, %v1698_v38, -inf  ;;  %v7170_v38 = vsel %vm1187_vm12, 1.0, %v15045_v17  ;;  %vm1124_vm12 = vcmp.eq.f32.partialorder %v9244_v18, %v8874_v0  ;;  %vm1510_vm2 = vmand %vm1477_vm11, %vm14822_vm6 }
 0x2d8   : > { %7752 = vset.pattern.permute.xlu1 %v15043_v13  ;;  %v1283_v39 = vadd.f32 %v7170_v38, %v7138_v51  ;;  %v9370_v51 = vpop.xlane.xlu1 %1737  ;;  %vm1157_vm3 = vmand %vm1124_vm12, %vm15061_vm5  ;;  %vm770_vm12 = vcmp.eq.f32.partialorder %v9250_v28, %v8782_v6 }
 0x2d9   : > { %vm1542_vm5 = vmor %vm1445_vm9, %vm1510_vm2  ;;  %vm1091_vm9 = vcmp.gt.f32.partialorder %v9268_v27, %v8782_v6  ;;  %vm15068_vm2 = vcmp.lt.f32.partialorder %v8847_v34, 1.0  ;;  %v7548_v27 = vld [vmem:[%s14732_s2 + $0x18] sm:$0xff] }
 0x2da   : > { %vm15062_vm11 = vmmov %vm15055_vm15  ;;  %vm15065_vm15 = vcmp.gt.s32.totalorder %v8787_v11, 1 }
 0x2db   : > { %v9352_v41 = vpop.permute.xlu0 %1373  ;;  %v9359_v60 = vpop.permute.xlu2 %1381 }
 0x2e0   : > { %v9378_v25 = vpop.permute.xlu1 %674 }
 0x2e3   : > { %v9362_v54 = vpop.xlane.xlu0 %1734 }
 0x2e4   : > { %714 = vperm.xlu0 %7749, %v9322_v14  }
 0x2e5   : > { %1758 = vmax.xlane.f32.xlu2 %v1757_v23  ;;  %v7202_v23 = vsel %vm1540_vm10, 1.0, %v15045_v17  ;;  %vm1189_vm10 = vmor %vm1092_vm14, %vm1157_vm3  ;;  %vm1476_vm3 = vcmp.eq.f32.partialorder %v9285_v36, %v8782_v6 }
 0x2e6   : > { %v9355_v62 = vadd.f32 %v7202_v23, %v1283_v39  ;;  %v9372_v23 = vpop.xlane.xlu2 %1740  ;;  %vm9431_vm14 = vmand %vm770_vm12, %vm15062_vm11  ;;  %vm1127_vm11 = vcmp.eq.f32.partialorder %v9346_v9, %v9015_v40 }
 0x2e7   : > { %15058 = vst [vmem:[#allocation56_spill] sm:$0xff] %v9372_v23 }
 0x2e8   : > { %15056 = vst [vmem:[#allocation55_spill] sm:$0xff] %v9355_v62  ;;  %vm14818_vm4 = vcmp.lt.f32.partialorder %v9355_v62, 1.0  ;;  %v1814_v62 = vsub.f32 %v8648_v42, %v9229_v58 }
 0x2e9   : > { %v1700_v21 = vsel %vm14818_vm4, %v8762_v1, -inf }
 0x2ea   : > { %v1763_v38 = vsel %vm15057_vm8, %v1700_v21, -inf  ;;  %v1846_v23 = vmul.f32 1.442695, %v1814_v62  ;;  %vm836_vm8 = vmor %vm739_vm0, %vm804_vm7  ;;  %v7172_v62 = vsel %vm1189_vm10, 1.0, %v15045_v17  ;;  %vm738_vm0 = vcmp.gt.f32.partialorder %v9250_v28, %v8782_v6 }
 0x2eb   : > { %v9374_v39 = vpop.permute.xlu0 %669  ;;  %vm9443_vm7 = vmand %vm1123_vm1, %vm15065_vm15  ;;  %vm1444_vm10 = vcmp.gt.f32.partialorder %v9285_v36, %v8782_v6  ;;  %vm15079_vm15 = vcmp.gt.s32.totalorder %v8787_v11, 0 }
 0x2ec   : > { %7750 = vset.pattern.permute.xlu0 %v15041_v4  ;;  %7997 = vpow2.f32 %v1846_v23  ;;  %vm9481_vm12 = vmor %vm738_vm0, %vm9431_vm14  ;;  %v1852_v23 = vmul.f32 1.442695, %v1817_v5  ;;  %vm15076_vm14 = vcmask 23552   ;;  %vm1480_vm0 = vcmp.eq.f32.partialorder %v9359_v60, %v9015_v40 }
 0x2ed   : > { %1068 = vperm.xlu0 %7750, %v9322_v14   ;;  %vm9500_vm1 = vmor %vm1091_vm9, %vm9443_vm7 }
 0x2ee   : > { %7999 = vpow2.f32 %v1852_v23 }
 0x2f2   : > { %v7998_v30 = vpop.eup %7997 }
 0x2f3   : > { %v9384_v21 = vpop.permute.xlu0 %1032  ;;  %v9455_v28 = vsel %vm15068_vm2, %v7998_v30, 0.0  ;;  %vm1095_vm2 = vcmp.gt.f32.partialorder %v9346_v9, %v9015_v40 }
 0x2f5   : > { %7751 = vset.pattern.permute.xlu0 %v15031_v37 }
 0x2f6   : > { %1421 = vperm.xlu0 %7751, %v9322_v14   ;;  %v9380_v14 = vpop.permute.xlu2 %679 }
 0x2fa   : > { %1764 = vmax.xlane.f32.xlu1 %v1763_v38  ;;  %v9388_v38 = vpop.permute.xlu1 %1036 }
 0x2fb   : > { %v9402_v42 = vpop.permute.xlu0 %1385 }
 0x2fc   : > { %15060 = vst [vmem:[#allocation58_spill] sm:$0xff] %v9402_v42  ;;  %v7552_v42 = vld [vmem:[%s14732_s2 + $0x38] sm:$0xff] }
 0x2fd   : > { %709 = vperm.xlu2 %7746, %v9308_v45   ;;  %2632 = vmatpush.bf16.msra.mxu1 %v7552_v42  ;;  %v1942_v42 = vsel %vm15076_vm14, %v9455_v28, 0.0  ;;  %vm742_vm14 = vcmp.gt.f32.partialorder %v9318_v53, %v9015_v40 }
 0x2fe   : > { %7756 = vset.pattern.permute.xlu0 %v15041_v4  ;;  %v9390_v1 = vpop.permute.xlu2 %1040 }
 0x301   : > { %2633 = vmatpush.bf16.msra.mxu1 %v7551_v55  ;;  %v7550_v55 = vld [vmem:[%s14732_s2 + $0x28] sm:$0xff] }
 0x302   : > { %v9417_v58 = vpop.permute.xlu1 %1389 }
 0x303   : > { %v9427_v18 = vpop.xlane.xlu0 %1743 }
 0x305   : > { %7747 = vset.pattern.permute.xlu2 %v15041_v4  ;;  %2634 = vmatpush.bf16.msra.mxu1 %v7550_v55  ;;  %v7557_v55 = vld [vmem:[%s14732_s2 + $0x60] sm:$0xff] }
 0x306   : > { %1064 = vperm.xlu2 %7747, %v9308_v45   ;;  %v9425_v43 = vpop.permute.xlu2 %1393 }
 0x307   : > { %vm1451_vm4 = vcmp.gt.f32.partialorder %v9425_v43, %v9098_v57 }
 0x309   : > { %2635 = vmatpush.bf16.msra.mxu1 %v7549_v50  ;;  %v7564_v50 = vld [vmem:[%s14732_s2 + $0x98] sm:$0xff] }
 0x30a   : > { %v9487_v30 = vpop.xlane.xlu1 %1746 }
 0x30b   : > { %v9533_v36 = vpop.permute.xlu0 %684 }
 0x30d   : > { %2636 = vmatpush.bf16.msra.mxu1 %v7548_v27 }
 0x30e   : > { %7748 = vset.pattern.permute.xlu2 %v15031_v37  ;;  %v9522_v5 = vpop.xlane.xlu2 %1749 }
 0x30f   : > { %1417 = vperm.xlu2 %7748, %v9308_v45   ;;  %v7204_v45 = vsel %vm1542_vm5, 1.0, %v15045_v17  ;;  %vm774_vm5 = vcmp.eq.f32.partialorder %v9318_v53, %v9015_v40  ;;  %v7558_v53 = vld [vmem:[%s14732_s2 + $0x68] sm:$0xff] }
 0x310   : > { %vm9529_vm7 = vmand %vm774_vm5, %vm15079_vm15  ;;  %vm1448_vm15 = vcmp.gt.f32.partialorder %v9359_v60, %v9015_v40 }
 0x311   : > { %vm1513_vm5 = vmand %vm1480_vm0, %vm14822_vm6 }
 0x312   : > { %vm9562_vm0 = vmor %vm742_vm14, %vm9529_vm7  ;;  %v9566_v34 = vpop.permute.xlu1 %689  ;;  %vm1126_vm7 = vcmp.eq.f32.partialorder %v9344_v16, %v8906_v22  ;;  %vm1125_vm14 = vcmp.eq.f32.partialorder %v9330_v63, %v8884_v12 }
 0x313   : > { %719 = vperm.xlu1 %7752, %v9398_v19   ;;  %v9616_v60 = vpop.permute.xlu0 %1044 }
 0x317   : > { %7755 = vset.pattern.permute.xlu2 %v15043_v13  ;;  %v7140_v13 = vsel %vm836_vm8, 1.0, %v15045_v17  ;;  %vm9473_vm8 = vmand %vm1476_vm3, %vm14822_vm6 }
 0x318   : > { %v1285_v61 = vadd.f32 %v7172_v62, %v7140_v13  ;;  %vm9516_vm3 = vmor %vm1444_vm10, %vm9473_vm8  ;;  %vm15082_vm10 = vcmp.gt.s32.totalorder %v8787_v11, 1 }
 0x319   : > { %vm1160_vm8 = vmand %vm1127_vm11, %vm15082_vm10  ;;  %v7203_v2 = vsel %vm9516_vm3, 1.0, %v15045_v17  ;;  %vm741_vm3 = vcmp.gt.f32.partialorder %v9316_v24, %v8906_v22 }
 0x31a   : > { %v9477_v13 = vadd.f32 %v7204_v45, %v1285_v61  ;;  %v7559_v45 = vld [vmem:[%s14732_s2 + $0x70] sm:$0xff]  ;;  %vm1192_vm11 = vmor %vm1095_vm2, %vm1160_vm8  ;;  %v7139_v61 = vsel %vm9481_vm12, 1.0, %v15045_v17  ;;  %vm1479_vm12 = vcmp.eq.f32.partialorder %v9357_v29, %v8906_v22  ;;  %vm15091_vm8 = vcmp.lt.f32.partialorder %v8983_v15, 1.0  ;;  %v9707_v27 = vpop.permute.xlu1 %1048 }
 0x31b   : > { %7753 = vset.pattern.permute.xlu1 %v15041_v4  ;;  %3013 = vmatpush.bf16.msra.mxu2 %v7559_v45  ;;  %vm9568_vm10 = vmor %vm1448_vm15, %vm1513_vm5  ;;  %v7175_v47 = vsel %vm1192_vm11, 1.0, %v15045_v17  ;;  %vm1094_vm5 = vcmp.gt.f32.partialorder %v9344_v16, %v8906_v22  ;;  %vm15092_vm15 = vcmp.gt.s32.totalorder %v8787_v11, 1  ;;  %v7546_v16 = vld [vmem:[%s14732_s2 + $0x8] sm:$0xff] }
 0x31c   : > { %1072 = vperm.xlu1 %7753, %v9398_v19   ;;  %15071 = vst [vmem:[#allocation59_spill] sm:$0xff] %v9477_v13  ;;  %vm14814_vm9 = vcmp.lt.f32.partialorder %v9477_v13, 1.0  ;;  %v7143_v13 = vsel %vm9562_vm0, 1.0, %v15045_v17  ;;  %v7207_v62 = vsel %vm9568_vm10, 1.0, %v15045_v17  ;;  %vm9645_vm11 = vmand %vm1126_vm7, %vm15092_vm15  ;;  %vm1447_vm0 = vcmp.gt.f32.partialorder %v9357_v29, %v8906_v22  ;;  %v7553_v29 = vld [vmem:[%s14732_s2 + $0x40] sm:$0xff] }
 0x31d   : > { %v1702_v9 = vsel %vm14814_vm9, %v8874_v0, -inf  ;;  %vm15087_vm9 = vcmask 23552   ;;  %v9601_v0 = vpop.permute.xlu2 %694  ;;  %vm9661_vm10 = vmand %vm1479_vm12, %vm14822_vm6  ;;  %vm1130_vm7 = vcmp.eq.f32.partialorder %v9390_v1, %v9098_v57  ;;  %vm15099_vm12 = vcmask 23552  }
 0x31e   : > { %v1769_v23 = vsel %vm15087_vm9, %v1702_v9, -inf  ;;  %v7565_v9 = vld [vmem:[%s14732_s2 + $0xa0] sm:$0xff]  ;;  %vm15088_vm9 = vcmp.gt.s32.totalorder %v8787_v11, 0 }
 0x31f   : > { %3014 = vmatpush.bf16.msra.mxu2 %v7558_v53  ;;  %v8000_v53 = vpop.eup %7999  ;;  %3363 = vmatpush.bf16.msra.mxu3 %v7565_v9  ;;  %v7555_v9 = vld [vmem:[%s14732_s2 + $0x50] sm:$0xff] }
 0x320   : > { %1943 = vadd.xlane.f32.xlu0 %v1942_v42  ;;  %v7171_v42 = vsel %vm9500_vm1, 1.0, %v15045_v17  ;;  %vm773_vm1 = vcmp.eq.f32.partialorder %v9316_v24, %v8906_v22  ;;  %v15132_v24 = vmov 0 }
 0x321   : > { %v1284_v45 = vadd.f32 %v7171_v42, %v7139_v61  ;;  %vm9628_vm2 = vmand %vm773_vm1, %vm15088_vm9 }
 0x322   : > { %vm9676_vm1 = vmor %vm741_vm3, %vm9628_vm2 }
 0x323   : > { %3015 = vmatpush.bf16.msra.mxu2 %v7557_v55  ;;  %3364 = vmatpush.bf16.msra.mxu3 %v7564_v50  ;;  %vm15100_vm9 = vmmov %vm15092_vm15  ;;  %v7562_v50 = vld [vmem:[%s14732_s2 + $0x88] sm:$0xff] }
 0x324   : > { %7754 = vset.pattern.permute.xlu1 %v15031_v37  ;;  %v1288_v37 = vadd.f32 %v7175_v47, %v7143_v13  ;;  %v9649_v13 = vadd.f32 %v7203_v2, %v1284_v45  ;;  %vm9692_vm3 = vmand %vm1125_vm14, %vm15100_vm9  ;;  %v1815_v45 = vsub.f32 %v8653_v44, %v9300_v20 }
 0x325   : > { %1425 = vperm.xlu1 %7754, %v9398_v19   ;;  %vm9701_vm2 = vmor %vm1094_vm5, %vm9645_vm11  ;;  %vm1483_vm5 = vcmp.eq.f32.partialorder %v9425_v43, %v9098_v57  ;;  %v9758_v44 = vpop.permute.xlu2 %1052  ;;  %v9775_v43 = vpop.permute.xlu0 %1397 }
 0x326   : > { %v9651_v15 = vadd.f32 %v7207_v62, %v1288_v37  ;;  %v7547_v37 = vld [vmem:[%s14732_s2 + $0x10] sm:$0xff]  ;;  %vm9714_vm14 = vmor %vm1447_vm0, %vm9661_vm10  ;;  %vm14821_vm15 = vcmp.lt.f32.partialorder %v9649_v13, 1.0  ;;  %vm745_vm10 = vcmp.gt.f32.partialorder %v9380_v14, %v9098_v57 }
 0x327   : > { %vm9729_vm0 = vmand %vm1130_vm7, %vm15100_vm9  ;;  %2637 = vmatpush.bf16.msra.mxu1 %v7547_v37  ;;  %vm15109_vm7 = vcmp.gt.s32.totalorder %v8787_v11, 0 }
 0x328   : > { %1770 = vmax.xlane.f32.xlu0 %v1769_v23  ;;  %v1816_v23 = vsub.f32 %v8658_v46, %v9305_v33  ;;  %v7556_v46 = vld [vmem:[%s14732_s2 + $0x58] sm:$0xff]  ;;  %v1820_v33 = vsub.f32 %v8687_v52, %v9370_v51  ;;  %v9634_v52 = vsel %vm15091_vm8, %v8000_v53, 0.0  ;;  %vm777_vm8 = vcmp.eq.f32.partialorder %v9380_v14, %v9098_v57  ;;  %vm1516_vm13 = vmand %vm1483_vm5, %vm14822_vm6 }
 0x329   : > { %3016 = vmatpush.bf16.msra.mxu2 %v7556_v46  ;;  %v1951_v2 = vsel %vm15099_vm12, %v9634_v52, 0.0  ;;  %vm14820_vm11 = vcmp.lt.f32.partialorder %v9651_v15, 1.0  ;;  %vm1098_vm12 = vcmp.gt.f32.partialorder %v9390_v1, %v9098_v57  ;;  %vm810_vm9 = vmand %vm777_vm8, %vm15109_vm7  ;;  %v1701_v14 = vsel %vm14821_vm15, %v8782_v6, -inf }
 0x32a   : > { %v1850_v42 = vmul.f32 1.442695, %v1816_v23  ;;  %v1858_v61 = vmul.f32 1.442695, %v1820_v33  ;;  %v7563_v23 = vld [vmem:[%s14732_s2 + $0x90] sm:$0xff]  ;;  %v7554_v33 = vld [vmem:[%s14732_s2 + $0x48] sm:$0xff]  ;;  %vm9771_vm8 = vmor %vm1098_vm12, %vm9729_vm0  ;;  %vm772_vm5 = vcmp.eq.f32.partialorder %v9312_v59, %v8884_v12  ;;  %v1819_v53 = vsub.f32 %v8678_v49, %v9362_v54 }
 0x32b   : > { %3365 = vmatpush.bf16.msra.mxu3 %v7563_v23  ;;  %v1705_v20 = vsel %vm14820_vm11, %v9015_v40, -inf  ;;  %vm9779_vm7 = vmor %vm745_vm10, %vm810_vm9  ;;  %2638 = vmatpush.bf16.msra.mxu1 %v7546_v16  ;;  %vm1478_vm11 = vcmp.eq.f32.partialorder %v9352_v41, %v8884_v12  ;;  %vm15116_vm12 = vcmask 23552   ;;  %vm740_vm10 = vcmp.gt.f32.partialorder %v9312_v59, %v8884_v12  ;;  %v7545_v23 = vld [vmem:[%s14732_s2] sm:$0xff] }
 0x32c   : > { %8001 = vpow2.f32 %v1850_v42  ;;  %v1848_v42 = vmul.f32 1.442695, %v1815_v45  ;;  %vm9785_vm15 = vmor %vm1451_vm4, %vm1516_vm13  ;;  %v1766_v47 = vsel %vm15116_vm12, %v1701_v14, -inf  ;;  %vm1093_vm9 = vcmp.gt.f32.partialorder %v9330_v63, %v8884_v12  ;;  %v7561_v16 = vld [vmem:[%s14732_s2 + $0x80] sm:$0xff] }
 0x32d   : > { %7759 = vset.pattern.permute.xlu1 %v15041_v4  ;;  %3017 = vmatpush.bf16.msra.mxu2 %v7555_v9  ;;  %8003 = vpow2.f32 %v1858_v61  ;;  %vm15117_vm0 = vmmov %vm15116_vm12  ;;  %v7174_v61 = vsel %vm9701_vm2, 1.0, %v15045_v17  ;;  %vm15118_vm13 = vcmp.gt.s32.totalorder %v8787_v11, 0  ;;  %vm1446_vm2 = vcmp.gt.f32.partialorder %v9352_v41, %v8884_v12 }
 0x32e   : > { %v1778_v37 = vsel %vm15117_vm0, %v1705_v20, -inf  ;;  %vm9815_vm4 = vmand %vm772_vm5, %vm15118_vm13  ;;  %v7142_v45 = vsel %vm9676_vm1, 1.0, %v15045_v17  ;;  %vm1129_vm1 = vcmp.eq.f32.partialorder %v9388_v38, %v9046_v26  ;;  %v7146_v46 = vsel %vm9779_vm7, 1.0, %v15045_v17  ;;  %v9845_v20 = vpop.permute.xlu1 %1401 }
 0x32f   : > { %3366 = vmatpush.bf16.msra.mxu3 %v7562_v50  ;;  %v7206_v50 = vsel %vm9714_vm14, 1.0, %v15045_v17  ;;  %vm9834_vm5 = vmand %vm1478_vm11, %vm14822_vm6  ;;  %v7210_v55 = vsel %vm9785_vm15, 1.0, %v15045_v17  ;;  %2639 = vmatpush.bf16.msra.mxu1 %v7545_v23  ;;  %vm1482_vm11 = vcmp.eq.f32.partialorder %v9417_v58, %v9046_v26  ;;  %v1823_v54 = vsub.f32 %v8710_v56, %v9487_v30  ;;  %v15159_v56 = vld [vmem:[#allocation22_spill] sm:$0xff] }
 0x330   : > { %1952 = vadd.xlane.f32.xlu0 %v1951_v2  ;;  %v7178_v2 = vsel %vm9771_vm8, 1.0, %v15045_v17  ;;  %vm776_vm8 = vcmp.eq.f32.partialorder %v9378_v25, %v9046_v26  ;;  %vm9855_vm14 = vmor %vm1093_vm9, %vm9692_vm3  ;;  %v1287_v51 = vadd.f32 %v7174_v61, %v7142_v45  ;;  %vm744_vm3 = vcmp.gt.f32.partialorder %v9378_v25, %v9046_v26  ;;  %v15174_v45 = vld [vmem:[#allocation13_spill] sm:$0xff] }
 0x331   : > { %3018 = vmatpush.bf16.msra.mxu2 %v7554_v33  ;;  %v1291_v1 = vadd.f32 %v7178_v2, %v7146_v46  ;;  %vm9868_vm15 = vmor %vm740_vm10, %vm9815_vm4  ;;  %vm15130_vm0 = vcmp.lt.f32.partialorder %v8878_v7, 1.0  ;;  %vm15131_vm10 = vcmp.lt.f32.partialorder %v9024_v3, 1.0  ;;  %vm15134_vm4 = vcmp.gt.s32.totalorder %v8787_v11, 1  ;;  %v9911_v3 = vpop.xlane.xlu0 %1752 }
 0x332   : > { %v8002_v9 = vpop.eup %8001  ;;  %vm15127_vm7 = vmmov %vm15118_vm13  ;;  %vm1097_vm13 = vcmp.gt.f32.partialorder %v9388_v38, %v9046_v26  ;;  %2640 = vmatmul.bf16.vlgmr.msra.gmra.mxu1 %v8585_v8  ;;  %8005 = vpow2.f32 %v1848_v42  ;;  %v15137_v42 = vmov 0  ;;  %v1864_v61 = vmul.f32 1.442695, %v1823_v54 }
 0x333   : > { %v8004_v62 = vpop.eup %8003  ;;  %3367 = vmatpush.bf16.msra.mxu3 %v7561_v16  ;;  %vm9879_vm12 = vmand %vm776_vm8, %vm15127_vm7  ;;  %v9885_v30 = vsel %vm15130_vm0, %v8002_v9, 0.0  ;;  %v9915_v41 = vadd.f32 %v7210_v55, %v1291_v1  ;;  %v1406_v9 = vpop.permute.xlu2 %1405  ;;  %vm1133_vm7 = vcmp.eq.f32.partialorder %v9758_v44, %v9192_v35  ;;  %vm15139_vm0 = vcmask 23552  }
 0x334   : > { %v9889_v59 = vsel %vm15131_vm10, %v8004_v62, 0.0  ;;  %vm9896_vm9 = vmor %vm1446_vm2, %vm9834_vm5  ;;  %vm1450_vm2 = vcmp.gt.f32.partialorder %v9417_v58, %v9046_v26  ;;  %v1948_v58 = vsel %vm15139_vm0, %v9885_v30, 0.0  ;;  %v15143_v25 = vmov 0 }
 0x335   : > { %3019 = vmatpush.bf16.msra.mxu2 %v7553_v29  ;;  %v15133_v24 = vsel %vm9896_vm9, 4294967295, %v15132_v24  ;;  %vm9907_vm8 = vmand %vm1129_vm1, %vm15134_vm4  ;;  %vm1486_vm4 = vcmp.eq.f32.partialorder %v1406_v9, %v9192_v35  ;;  %v7141_v33 = vsel %vm9868_vm15, 1.0, %v15045_v17  ;;  %vm775_vm15 = vcmp.eq.f32.partialorder %v9374_v39, %v9027_v10 }
 0x336   : > { %vm1515_vm5 = vmand %vm1482_vm11, %vm14822_vm6  ;;  %3368 = vmatmul.bf16.vlgmr.msra.gmra.mxu3 %v8585_v8  ;;  %v1756_v38 = vpop.xlane.xlu1 %1755  ;;  %v1822_v7 = vsub.f32 %v15159_v56, %v9427_v18 }
 0x337   : > { %vm9932_vm1 = vmor %vm744_vm3, %vm9879_vm12  ;;  %vm780_vm3 = vcmp.eq.f32.partialorder %v9601_v0, %v9192_v35 }
 0x338   : > { %1767 = vmax.xlane.f32.xlu2 %v1766_v47  ;;  %1779 = vmax.xlane.f32.xlu0 %v1778_v37  ;;  %v9913_v47 = vadd.f32 %v7206_v50, %v1287_v51  ;;  %v1856_v37 = vmul.f32 1.442695, %v1819_v53  ;;  %v15138_v42 = vsel %vm9932_vm1, 4294967295, %v15137_v42  ;;  %vm15140_vm11 = vmmov %vm15139_vm0  ;;  %v8006_v23 = vpop.eup %8005  ;;  %vm1454_vm0 = vcmp.gt.f32.partialorder %v1406_v9, %v9192_v35  ;;  %v15161_v9 = vld [vmem:[#allocation58_spill] sm:$0xff] }
 0x339   : > { %3020 = vmatmul.bf16.vlgmr.msra.gmra.mxu2 %v8585_v8  ;;  %v1960_v2 = vsel %vm15140_vm11, %v9889_v59, 0.0  ;;  %vm9947_vm10 = vmor %vm1097_vm13, %vm9907_vm8  ;;  %vm1101_vm13 = vcmp.gt.f32.partialorder %v9758_v44, %v9192_v35  ;;  %vm15145_vm8 = vcmp.gt.s32.totalorder %v8787_v11, 1  ;;  %vm15147_vm11 = vcmp.gt.s32.totalorder %v8787_v11, 2  ;;  %v9980_v16 = vpop.permute.xlu0 %699  ;;  %v15166_v8 = vld [vmem:[#allocation35_spill] sm:$0xff] }
 0x33a   : > { %vm9953_vm12 = vmor %vm1450_vm2, %vm1515_vm5  ;;  %8007 = vpow2.f32 %v1856_v37  ;;  %vm748_vm2 = vcmp.gt.f32.partialorder %v9601_v0, %v9192_v35  ;;  %vm15146_vm5 = vcmp.gt.s32.totalorder %v8787_v11, 0  ;;  %vm15148_vm9 = vcmp.lt.f32.partialorder %v9913_v47, 1.0 }
 0x33b   : > { %v15144_v25 = vsel %vm9953_vm12, 4294967295, %v15143_v25  ;;  %vm1166_vm6 = vmand %vm1133_vm7, %vm15145_vm8  ;;  %8009 = vpow2.f32 %v1864_v61  ;;  %v1704_v44 = vsel %vm15148_vm9, %v8906_v22, -inf  ;;  %vm15149_vm7 = vcmp.lt.f32.partialorder %v9915_v41, 1.0 }
 0x33c   : > { %vm813_vm12 = vmand %vm780_vm3, %vm15146_vm5  ;;  %v1708_v29 = vsel %vm15149_vm7, %v9098_v57, -inf  ;;  %v7173_v0 = vsel %vm9855_vm14, 1.0, %v15045_v17  ;;  %vm15156_vm14 = vcmp.lt.f32.partialorder %v8844_v31, 1.0  ;;  %v7177_v55 = vsel %vm9947_vm10, 1.0, %v15045_v17 }
 0x33d   : > { %vm1519_vm1 = vmand %vm1486_vm4, %vm15147_vm11  ;;  %vm15154_vm4 = vcmask 23552   ;;  %v9997_v53 = vsel %vm15156_vm14, %v8006_v23, 0.0  ;;  %v1286_v54 = vadd.f32 %v7173_v0, %v7141_v33  ;;  %v1818_v31 = vsub.f32 %v8671_v48, %v9302_v32  ;;  %v15168_v23 = vld [vmem:[#allocation42_spill] sm:$0xff] }
 0x33e   : > { %vm1198_vm3 = vmor %vm1101_vm13, %vm1166_vm6  ;;  %v1775_v50 = vsel %vm15154_vm4, %v1704_v44, -inf  ;;  %vm15157_vm6 = vnez %v15133_v24  ;;  %vm15158_vm10 = vnez %v15138_v42  ;;  %v10020_v37 = vpop.permute.xlu1 %704  ;;  %v15162_v42 = vld [vmem:[#allocation26_spill] sm:$0xff]  ;;  %vm743_vm13 = vcmp.gt.f32.partialorder %v9374_v39, %v9027_v10  ;;  %v15204_v39 = vld [vmem:[#allocation36_spill] sm:$0xff] }
 0x33f   : > { %vm9982_vm8 = vmor %vm748_vm2, %vm813_vm12  ;;  %v7181_v49 = vsel %vm1198_vm3, 1.0, %v15045_v17  ;;  %v7205_v51 = vsel %vm15157_vm6, 1.0, %v15045_v17  ;;  %v7145_v63 = vsel %vm15158_vm10, 1.0, %v15045_v17  ;;  %vm15160_vm12 = vnez %v15144_v25 }
 0x340   : > { %1949 = vadd.xlane.f32.xlu2 %v1948_v58  ;;  %1961 = vadd.xlane.f32.xlu0 %v1960_v2  ;;  %vm9989_vm9 = vmor %vm1454_vm0, %vm1519_vm1  ;;  %v8008_v46 = vpop.eup %8007  ;;  %vm1128_vm1 = vcmp.eq.f32.partialorder %v9384_v21, %v9027_v10  ;;  %v7149_v24 = vsel %vm9982_vm8, 1.0, %v15045_v17  ;;  %v7209_v48 = vsel %vm15160_vm12, 1.0, %v15045_v17  ;;  %vm1481_vm0 = vcmp.eq.f32.partialorder %v15161_v9, %v9027_v10 }
 0x341   : > { %vm15155_vm11 = vmmov %vm15154_vm4  ;;  %v8010_v1 = vpop.eup %8009  ;;  %v7213_v32 = vsel %vm9989_vm9, 1.0, %v15045_v17  ;;  %v1826_v61 = vsub.f32 %v15162_v42, %v1756_v38  ;;  %v1290_v18 = vadd.f32 %v7177_v55, %v7145_v63  ;;  %v1294_v58 = vadd.f32 %v7181_v49, %v7149_v24  ;;  %v15181_v49 = vld [vmem:[#allocation43_spill] sm:$0xff] }
 0x342   : > { %v1787_v14 = vsel %vm15155_vm11, %v1708_v29, -inf  ;;  %vm15163_vm2 = vmmov %vm15146_vm5  ;;  %vm15167_vm7 = vcmp.lt.f32.partialorder %v15166_v8, 1.0  ;;  %vm15169_vm3 = vcmp.lt.f32.partialorder %v15168_v23, 1.0  ;;  %v10047_v38 = vadd.f32 %v7205_v51, %v1286_v54  ;;  %2645 = vmatmul.bf16.gmra.mxu1 %v15174_v45  ;;  %v10091_v54 = vpop.permute.xlu0 %1056  ;;  %v15200_v23 = vld [vmem:[#allocation41_spill] sm:$0xff] }
 0x343   : > { %vm10035_vm5 = vmand %vm775_vm15, %vm15163_vm2  ;;  %v10041_v25 = vsel %vm15167_vm7, %v8008_v46, 0.0  ;;  %v10045_v44 = vsel %vm15169_vm3, %v8010_v1, 0.0  ;;  %v1854_v29 = vmul.f32 1.442695, %v1818_v31  ;;  %vm1096_vm8 = vcmp.gt.f32.partialorder %v9384_v21, %v9027_v10 }
 0x344   : > { %vm15170_vm9 = vcmp.gt.s32.totalorder %v8787_v11, 1  ;;  %v10060_v62 = vadd.f32 %v7209_v48, %v1290_v18  ;;  %v10062_v33 = vadd.f32 %v7213_v32, %v1294_v58  ;;  %vm1449_vm11 = vcmp.gt.f32.partialorder %v15161_v9, %v9027_v10 }
 0x345   : > { %vm10056_vm4 = vmand %vm1128_vm1, %vm15170_vm9  ;;  %vm15175_vm14 = vcmp.gt.s32.totalorder %v8787_v11, 2  ;;  %vm15178_vm15 = vcmask 23552   ;;  %vm1132_vm10 = vcmp.eq.f32.partialorder %v9707_v27, %v15181_v49  ;;  %v1870_v51 = vmul.f32 1.442695, %v1826_v61 }
 0x346   : > { %15173 = vst [vmem:[#allocation22_spill] sm:$0xff] %v10062_v33  ;;  %vm10073_vm6 = vmand %vm1481_vm0, %vm15175_vm14  ;;  %v1945_v46 = vsel %vm15178_vm15, %v9997_v53, 0.0  ;;  %3373 = vmatmul.bf16.gmra.mxu3 %v15174_v45  ;;  %vm779_vm2 = vcmp.eq.f32.partialorder %v9566_v34, %v15181_v49  ;;  %8011 = vpow2.f32 %v1854_v29  ;;  %vm1485_vm3 = vcmp.eq.f32.partialorder %v9845_v20, %v15181_v49  ;;  %v10140_v56 = vpop.permute.xlu1 %1060 }
 0x347   : > { %vm10085_vm1 = vmor %vm743_vm13, %vm10035_vm5  ;;  %vm14823_vm5 = vcmp.lt.f32.partialorder %v10047_v38, 1.0 }
 0x348   : > { %1776 = vmax.xlane.f32.xlu2 %v1775_v50  ;;  %1788 = vmax.xlane.f32.xlu0 %v1787_v14  ;;  %v1862_v14 = vmul.f32 1.442695, %v1822_v7  ;;  %vm15182_vm12 = vmmov %vm15178_vm15  ;;  %vm15189_vm15 = vcmp.gt.s32.totalorder %v8787_v11, 0  ;;  %v1703_v21 = vsel %vm14823_vm5, %v8884_v12, -inf  ;;  %v7144_v18 = vsel %vm10085_vm1, 1.0, %v15045_v17  ;;  %v15201_v50 = vld [vmem:[#allocation56_spill] sm:$0xff] }
 0x349   : > { %3025 = vmatmul.bf16.gmra.mxu2 %v15174_v45  ;;  %v1957_v1 = vsel %vm15182_vm12, %v10041_v25, 0.0  ;;  %vm15183_vm0 = vmmov %vm15182_vm12  ;;  %vm1131_vm1 = vcmp.eq.f32.partialorder %v9616_v60, %v15200_v23  ;;  %vm15233_vm5 = vcmp.gt.s32.totalorder %v8787_v11, 2 }
 0x34a   : > { %v1969_v31 = vsel %vm15183_vm0, %v10045_v44, 0.0  ;;  %vm10102_vm13 = vmor %vm1096_vm8, %vm10056_vm4  ;;  %8013 = vpow2.f32 %v1862_v14  ;;  %vm1100_vm4 = vcmp.gt.f32.partialorder %v9707_v27, %v15181_v49  ;;  %vm1453_vm0 = vcmp.gt.f32.partialorder %v9845_v20, %v15181_v49  ;;  %v10170_v29 = vpop.permute.xlu0 %1409  ;;  %v15202_v14 = vld [vmem:[#allocation21_spill] sm:$0xff] }
 0x34b   : > { %vm10114_vm7 = vmor %vm1449_vm11, %vm10073_vm6  ;;  %vm747_vm6 = vcmp.gt.f32.partialorder %v9566_v34, %v15181_v49  ;;  %8015 = vpow2.f32 %v1870_v51  ;;  %v7176_v7 = vsel %vm10102_vm13, 1.0, %v15045_v17  ;;  %vm778_vm13 = vcmp.eq.f32.partialorder %v9533_v36, %v15200_v23  ;;  %v15211_v20 = vld [vmem:[#allocation49_spill] sm:$0xff] }
 0x34c   : > { %vm15188_vm14 = vmmov %vm15170_vm9  ;;  %vm15190_vm9 = vcmp.gt.s32.totalorder %v8787_v11, 2  ;;  %v8012_v48 = vpop.eup %8011  ;;  %v1289_v0 = vadd.f32 %v7176_v7, %v7144_v18  ;;  %v7208_v45 = vsel %vm10114_vm7, 1.0, %v15045_v17  ;;  %vm15205_vm7 = vcmp.lt.f32.partialorder %v15204_v39, 1.0 }
 0x34d   : > { %vm1165_vm11 = vmand %vm1132_vm10, %vm15188_vm14  ;;  %vm15191_vm10 = vcmp.lt.f32.partialorder %v10060_v62, 1.0  ;;  %v10191_v63 = vsel %vm15205_vm7, %v8012_v48, 0.0 }
 0x34e   : > { %vm812_vm12 = vmand %vm779_vm2, %vm15189_vm15  ;;  %v1707_v34 = vsel %vm15191_vm10, %v9046_v26, -inf  ;;  %vm15192_vm2 = vcmp.lt.f32.partialorder %v10062_v33, 1.0  ;;  %v1414_v18 = vpop.permute.xlu1 %1413 }
 0x34f   : > { %1946 = vadd.xlane.f32.xlu1 %v1945_v46  ;;  %vm1518_vm8 = vmand %vm1485_vm3, %vm15190_vm9  ;;  %v1711_v27 = vsel %vm15192_vm2, %v9192_v35, -inf  ;;  %vm15195_vm3 = vcmask 23552   ;;  %v1821_v46 = vsub.f32 %v15202_v14, %v15201_v50 }
 0x350   : > { %1958 = vadd.xlane.f32.xlu2 %v1957_v1  ;;  %1970 = vadd.xlane.f32.xlu0 %v1969_v31  ;;  %vm1197_vm14 = vmor %vm1100_vm4, %vm1165_vm11  ;;  %v1772_v24 = vsel %vm15195_vm3, %v1703_v21, -inf  ;;  %v8014_v61 = vpop.eup %8013  ;;  %v15203_v1 = vld [vmem:[#allocation25_spill] sm:$0xff]  ;;  %vm746_vm4 = vcmp.gt.f32.partialorder %v9533_v36, %v15200_v23  ;;  %vm15206_vm11 = vcmp.gt.s32.totalorder %v8787_v11, 0  ;;  %v15246_v36 = vld [vmem:[#allocation28_spill] sm:$0xff] }
 0x351   : > { %vm10151_vm15 = vmor %vm747_vm6, %vm812_vm12  ;;  %v7180_v58 = vsel %vm1197_vm14, 1.0, %v15045_v17  ;;  %v8016_v8 = vpop.eup %8015  ;;  %v1825_v31 = vsub.f32 %v15203_v1, %v9911_v3  ;;  %vm1099_vm14 = vcmp.gt.f32.partialorder %v9616_v60, %v15200_v23 }
 0x352   : > { %vm10156_vm9 = vmor %vm1453_vm0, %vm1518_vm8  ;;  %v7148_v55 = vsel %vm10151_vm15, 1.0, %v15045_v17  ;;  %vm1484_vm8 = vcmp.eq.f32.partialorder %v9775_v43, %v15200_v23  ;;  %vm15212_vm0 = vcmp.lt.f32.partialorder %v15211_v20, 1.0  ;;  %vm15213_vm15 = vcmp.gt.s32.totalorder %v8787_v11, 1  ;;  %v1762_v60 = vpop.xlane.xlu0 %1761 }
 0x353   : > { %vm15198_vm10 = vmmov %vm15195_vm3  ;;  %v7212_v51 = vsel %vm10156_vm9, 1.0, %v15045_v17  ;;  %v1293_v21 = vadd.f32 %v7180_v58, %v7148_v55  ;;  %v10207_v3 = vsel %vm15212_vm0, %v8016_v8, 0.0  ;;  %vm1452_vm9 = vcmp.gt.f32.partialorder %v9775_v43, %v15200_v23 }
 0x354   : > { %v1784_v9 = vsel %vm15198_vm10, %v1707_v34, -inf  ;;  %vm15199_vm2 = vmmov %vm15195_vm3  ;;  %vm15218_vm10 = vcmp.gt.s32.totalorder %v8787_v11, 2  ;;  %v15229_v55 = vmov 0 }
 0x355   : > { %v1796_v42 = vsel %vm15199_vm2, %v1711_v27, -inf  ;;  %vm10197_vm6 = vmand %vm778_vm13, %vm15206_vm11  ;;  %v15209_v27 = vld [vmem:[#allocation38_spill] sm:$0xff]  ;;  %v10219_v32 = vadd.f32 %v7212_v51, %v1293_v21  ;;  %vm15221_vm13 = vcmask 23552   ;;  %v15252_v51 = vld [vmem:[#allocation44_spill] sm:$0xff] }
 0x356   : > { %vm15210_vm12 = vcmp.lt.f32.partialorder %v15209_v27, 1.0  ;;  %vm10215_vm3 = vmand %vm1131_vm1, %vm15213_vm15  ;;  %v1954_v58 = vsel %vm15221_vm13, %v10191_v63, 0.0 }
 0x357   : > { %1773 = vmax.xlane.f32.xlu1 %v1772_v24  ;;  %v10203_v7 = vsel %vm15210_vm12, %v8014_v61, 0.0  ;;  %v10209_v24 = vadd.f32 %v7208_v45, %v1289_v0  ;;  %15216 = vst [vmem:[#allocation58_spill] sm:$0xff] %v10219_v32  ;;  %vm10230_vm2 = vmand %vm1484_vm8, %vm15218_vm10  ;;  %v1868_v0 = vmul.f32 1.442695, %v1825_v31  ;;  %v15224_v45 = vld [vmem:[#allocation50_spill] sm:$0xff] }
 0x358   : > { %v10166_v2 = vpop.xlane.xlu2 %1758  ;;  %1785 = vmax.xlane.f32.xlu2 %v1784_v9  ;;  %1797 = vmax.xlane.f32.xlu0 %v1796_v42  ;;  %v15217_v9 = vld [vmem:[#allocation14_spill] sm:$0xff]  ;;  %v1860_v42 = vmul.f32 1.442695, %v1821_v46  ;;  %vm10242_vm1 = vmor %vm746_vm4, %vm10197_vm6  ;;  %vm1135_vm8 = vcmp.eq.f32.partialorder %v10140_v56, %v15224_v45  ;;  %vm782_vm6 = vcmp.eq.f32.partialorder %v10020_v37, %v15224_v45 }
 0x359   : > { %2650 = vmatmul.bf16.gmra.mxu1 %v15217_v9  ;;  %3030 = vmatmul.bf16.gmra.mxu2 %v15217_v9  ;;  %vm15225_vm7 = vmmov %vm15221_vm13  ;;  %vm1674_vm12 = vcmp.lt.f32.partialorder %v10209_v24, 1.0  ;;  %v7147_v34 = vsel %vm10242_vm1, 1.0, %v15045_v17 }
 0x35a   : > { %3378 = vmatmul.bf16.gmra.mxu3 %v15217_v9  ;;  %v1966_v50 = vsel %vm15225_vm7, %v10203_v7, 0.0  ;;  %vm15226_vm11 = vmmov %vm15225_vm7  ;;  %8017 = vpow2.f32 %v1860_v42  ;;  %v1706_v43 = vsel %vm1674_vm12, %v9027_v10, -inf  ;;  %v10312_v9 = vpop.permute.xlu0 %714  ;;  %v15241_v42 = vld [vmem:[#allocation52_spill] sm:$0xff] }
 0x35b   : > { %v1978_v14 = vsel %vm15226_vm11, %v10207_v3, 0.0  ;;  %vm10257_vm4 = vmor %vm1099_vm14, %vm10215_vm3  ;;  %vm1488_vm14 = vcmp.eq.f32.partialorder %v1414_v18, %v15224_v45  ;;  %vm1103_vm3 = vcmp.gt.f32.partialorder %v10140_v56, %v15224_v45  ;;  %8019 = vpow2.f32 %v1868_v0 }
 0x35c   : > { %vm10269_vm0 = vmor %vm1452_vm9, %vm10230_vm2  ;;  %vm750_vm9 = vcmp.gt.f32.partialorder %v10020_v37, %v15224_v45  ;;  %vm15232_vm2 = vcmp.gt.s32.totalorder %v8787_v11, 0  ;;  %vm1456_vm11 = vcmp.gt.f32.partialorder %v1414_v18, %v15224_v45  ;;  %v7179_v37 = vsel %vm10257_vm4, 1.0, %v15045_v17 }
 0x35d   : > { %v15230_v55 = vsel %vm10269_vm0, 4294967295, %v15229_v55  ;;  %vm15231_vm10 = vmmov %vm15213_vm15  ;;  %vm15234_vm0 = vcmp.lt.f32.partialorder %v10219_v32, 1.0  ;;  %v1292_v61 = vadd.f32 %v7179_v37, %v7147_v34  ;;  %v15257_v34 = vld [vmem:[#allocation15_spill] sm:$0xff] }
 0x35e   : > { %vm1168_vm13 = vmand %vm1135_vm8, %vm15231_vm10  ;;  %v1710_v56 = vsel %vm15234_vm0, %v15181_v49, -inf  ;;  %v3678_v49 = vld [vmem:[%s14734_s4 + $0x28] sm:$0xff] }
 0x35f   : > { %1955 = vadd.xlane.f32.xlu1 %v1954_v58  ;;  %vm815_vm7 = vmand %vm782_vm6, %vm15232_vm2  ;;  %vm15237_vm6 = vcmask 23552   ;;  %v15243_v58 = vld [vmem:[#allocation24_spill] sm:$0xff] }
 0x360   : > { %1967 = vadd.xlane.f32.xlu2 %v1966_v50  ;;  %v710_v46 = vpop.permute.xlu2 %709  ;;  %1979 = vadd.xlane.f32.xlu0 %v1978_v14  ;;  %vm1521_vm15 = vmand %vm1488_vm14, %vm15233_vm5  ;;  %v1781_v1 = vsel %vm15237_vm6, %v1706_v43, -inf  ;;  %v8018_v21 = vpop.eup %8017  ;;  %vm15242_vm14 = vnez %v15230_v55  ;;  %v1824_v8 = vsub.f32 %v15243_v58, %v9522_v5  ;;  %v15245_v14 = vld [vmem:[#allocation48_spill] sm:$0xff]  ;;  %v1828_v55 = vsub.f32 %v15246_v36, %v1762_v60  ;;  %v15247_v43 = vld [vmem:[#allocation39_spill] sm:$0xff] }
 0x361   : > { %vm1200_vm8 = vmor %vm1103_vm3, %vm1168_vm13  ;;  %v8020_v48 = vpop.eup %8019  ;;  %vm783_vm4 = vcmp.eq.f32.partialorder %v710_v46, %v15241_v42  ;;  %v7211_v18 = vsel %vm15242_vm14, 1.0, %v15045_v17  ;;  %vm781_vm13 = vcmp.eq.f32.partialorder %v9980_v16, %v15245_v14  ;;  %vm15262_vm14 = vcmask 23552  }
 0x362   : > { %vm10298_vm10 = vmor %vm750_vm9, %vm815_vm7  ;;  %v7183_v27 = vsel %vm1200_vm8, 1.0, %v15045_v17  ;;  %vm15248_vm9 = vcmp.lt.f32.partialorder %v15247_v43, 1.0  ;;  %vm751_vm7 = vcmp.gt.f32.partialorder %v710_v46, %v15241_v42  ;;  %v10348_v31 = vadd.f32 %v7211_v18, %v1292_v61  ;;  %v1069_v37 = vpop.permute.xlu0 %1068 }
 0x363   : > { %vm10303_vm2 = vmor %vm1456_vm11, %vm1521_vm15  ;;  %v7151_v0 = vsel %vm10298_vm10, 1.0, %v15045_v17  ;;  %vm15244_vm15 = vcmp.gt.s32.totalorder %v8787_v11, 1  ;;  %v10335_v5 = vsel %vm15248_vm9, %v8018_v21, 0.0  ;;  %vm15249_vm11 = vcmp.gt.s32.totalorder %v8787_v11, 0 }
 0x364   : > { %vm15240_vm5 = vmmov %vm15237_vm6  ;;  %v7215_v50 = vsel %vm10303_vm2, 1.0, %v15045_v17  ;;  %vm15253_vm10 = vcmp.lt.f32.partialorder %v15252_v51, 1.0  ;;  %vm1134_vm6 = vcmp.eq.f32.partialorder %v10091_v54, %v15245_v14  ;;  %v1963_v18 = vsel %vm15262_vm14, %v10335_v5, 0.0 }
 0x365   : > { %v1793_v39 = vsel %vm15240_vm5, %v1710_v56, -inf  ;;  %v1296_v56 = vadd.f32 %v7183_v27, %v7151_v0  ;;  %vm10340_vm8 = vmand %vm783_vm4, %vm15249_vm11  ;;  %v1866_v27 = vmul.f32 1.442695, %v1824_v8  ;;  %v1874_v58 = vmul.f32 1.442695, %v1828_v55  ;;  %v15278_v55 = vld [vmem:[#allocation47_spill] sm:$0xff] }
 0x366   : > { %vm15258_vm5 = vmmov %vm15249_vm11  ;;  %vm15269_vm11 = vcmp.gt.s32.totalorder %v8787_v11, 2 }
 0x367   : > { %1782 = vmax.xlane.f32.xlu1 %v1781_v1  ;;  %v10346_v1 = vsel %vm15253_vm10, %v8020_v48, 0.0  ;;  %v10356_v21 = vadd.f32 %v7215_v50, %v1296_v56  ;;  %vm10365_vm4 = vmand %vm781_vm13, %vm15258_vm5  ;;  %v15261_v48 = vld [vmem:[#allocation29_spill] sm:$0xff]  ;;  %vm15266_vm13 = vcmp.gt.s32.totalorder %v8787_v11, 1  ;;  %8021 = vpow2.f32 %v1866_v27 }
 0x368   : > { %1794 = vmax.xlane.f32.xlu2 %v1793_v39  ;;  %v1065_v20 = vpop.permute.xlu2 %1064  ;;  %vm10392_vm9 = vmand %vm1134_vm6, %vm15266_vm13  ;;  %8023 = vpow2.f32 %v1874_v58 }
 0x369   : > { %vm1136_vm0 = vcmp.eq.f32.partialorder %v1065_v20, %v15241_v42  ;;  %vm1104_vm1 = vcmp.gt.f32.partialorder %v1065_v20, %v15241_v42  ;;  %15256 = vst [vmem:[#allocation26_spill] sm:$0xff] %v10356_v21  ;;  %2655 = vmatmul.bf16.gmra.mxu1 %v15257_v34  ;;  %3035 = vmatmul.bf16.gmra.mxu2 %v15257_v34  ;;  %vm14825_vm5 = vcmp.lt.f32.partialorder %v10356_v21, 1.0 }
 0x36a   : > { %vm1169_vm3 = vmand %vm1136_vm0, %vm15244_vm15  ;;  %vm1487_vm0 = vcmp.eq.f32.partialorder %v10170_v29, %v15245_v14  ;;  %3383 = vmatmul.bf16.gmra.mxu3 %v15257_v34 }
 0x36b   : > { %vm10352_vm2 = vmor %vm1104_vm1, %vm1169_vm3  ;;  %vm1102_vm3 = vcmp.gt.f32.partialorder %v10091_v54, %v15245_v14 }
 0x36c   : > { %vm10379_vm1 = vmor %vm751_vm7, %vm10340_vm8  ;;  %v7184_v46 = vsel %vm10352_vm2, 1.0, %v15045_v17  ;;  %vm14826_vm7 = vcmp.lt.f32.partialorder %v10348_v31, 1.0  ;;  %vm749_vm2 = vcmp.gt.f32.partialorder %v9980_v16, %v15245_v14  ;;  %v1713_v16 = vsel %vm14825_vm5, %v15224_v45, -inf }
 0x36d   : > { %v1765_v39 = vpop.xlane.xlu1 %1764  ;;  %vm15265_vm15 = vmmov %vm15262_vm14  ;;  %v7152_v56 = vsel %vm10379_vm1, 1.0, %v15045_v17  ;;  %v1709_v51 = vsel %vm14826_vm7, %v15200_v23, -inf  ;;  %vm15293_vm7 = vcmask 23552  }
 0x36e   : > { %v1829_v61 = vsub.f32 %v15261_v48, %v1765_v39  ;;  %v1975_v0 = vsel %vm15265_vm15, %v10346_v1, 0.0  ;;  %vm10402_vm8 = vmand %vm1487_vm0, %vm15269_vm11  ;;  %vm1455_vm15 = vcmp.gt.f32.partialorder %v10170_v29, %v15245_v14  ;;  %v1297_v60 = vadd.f32 %v7184_v46, %v7152_v56  ;;  %v8022_v48 = vpop.eup %8021  ;;  %v15280_v56 = vld [vmem:[#allocation51_spill] sm:$0xff] }
 0x36f   : > { %1964 = vadd.xlane.f32.xlu1 %v1963_v18  ;;  %vm15272_vm0 = vmmov %vm15269_vm11 }
 0x370   : > { %1976 = vadd.xlane.f32.xlu2 %v1975_v0  ;;  %v1418_v36 = vpop.permute.xlu2 %1417  ;;  %v1876_v43 = vmul.f32 1.442695, %v1829_v61  ;;  %vm1199_vm1 = vmor %vm1102_vm3, %vm10392_vm9  ;;  %v8024_v61 = vpop.eup %8023  ;;  %v15277_v0 = vld [vmem:[#allocation27_spill] sm:$0xff] }
 0x371   : > { %vm1457_vm10 = vcmp.gt.f32.partialorder %v1418_v36, %v15241_v42  ;;  %vm1489_vm6 = vcmp.eq.f32.partialorder %v1418_v36, %v15241_v42  ;;  %vm846_vm11 = vmor %vm749_vm2, %vm10365_vm4  ;;  %v7182_v54 = vsel %vm1199_vm1, 1.0, %v15045_v17  ;;  %v1827_v50 = vsub.f32 %v15277_v0, %v10166_v2  ;;  %v15284_v2 = vld [vmem:[#allocation54_spill] sm:$0xff] }
 0x372   : > { %vm1522_vm14 = vmand %vm1489_vm6, %vm15272_vm0  ;;  %8025 = vpow2.f32 %v1876_v43  ;;  %vm15274_vm6 = vcmask 23552   ;;  %v7150_v18 = vsel %vm846_vm11, 1.0, %v15045_v17  ;;  %vm15281_vm2 = vcmp.lt.f32.partialorder %v15280_v56, 1.0 }
 0x373   : > { %vm1554_vm13 = vmor %vm1457_vm10, %vm1522_vm14  ;;  %v1790_v34 = vsel %vm15274_vm6, %v1709_v51, -inf  ;;  %v1295_v46 = vadd.f32 %v7182_v54, %v7150_v18  ;;  %v10454_v51 = vsel %vm15281_vm2, %v8024_v61, 0.0  ;;  %vm1137_vm0 = vcmp.eq.f32.partialorder %v1069_v37, %v15284_v2 }
 0x374   : > { %v7216_v29 = vsel %vm1554_vm13, 1.0, %v15045_v17  ;;  %vm1552_vm10 = vmor %vm1455_vm15, %vm10402_vm8  ;;  %vm15279_vm8 = vcmp.lt.f32.partialorder %v15278_v55, 1.0  ;;  %vm784_vm13 = vcmp.eq.f32.partialorder %v10312_v9, %v15284_v2  ;;  %vm752_vm2 = vcmp.gt.f32.partialorder %v10312_v9, %v15284_v2 }
 0x375   : > { %v10432_v39 = vadd.f32 %v7216_v29, %v1297_v60  ;;  %vm15275_vm3 = vmmov %vm15274_vm6  ;;  %v7214_v8 = vsel %vm1552_vm10, 1.0, %v15045_v17  ;;  %v10450_v43 = vsel %vm15279_vm8, %v8022_v48, 0.0  ;;  %v15283_v29 = vld [vmem:[#allocation16_spill] sm:$0xff]  ;;  %vm1105_vm6 = vcmp.gt.f32.partialorder %v1069_v37, %v15284_v2 }
 0x376   : > { %v1802_v27 = vsel %vm15275_vm3, %v1713_v16, -inf  ;;  %vm15276_vm4 = vmmov %vm15275_vm3  ;;  %v10456_v60 = vadd.f32 %v7214_v8, %v1295_v46  ;;  %v1422_v16 = vpop.permute.xlu0 %1421 }
 0x377   : > { %15273 = vst [vmem:[#allocation35_spill] sm:$0xff] %v10432_v39  ;;  %1791 = vmax.xlane.f32.xlu1 %v1790_v34  ;;  %vm14824_vm9 = vcmp.lt.f32.partialorder %v10432_v39, 1.0  ;;  %v1872_v34 = vmul.f32 1.442695, %v1827_v50  ;;  %vm15285_vm14 = vmmov %vm15275_vm3  ;;  %vm1490_vm11 = vcmp.eq.f32.partialorder %v1422_v16, %v15284_v2 }
 0x378   : > { %1803 = vmax.xlane.f32.xlu2 %v1802_v27  ;;  %v1714_v20 = vsel %vm14824_vm9, %v15241_v42, -inf  ;;  %v8026_v36 = vpop.eup %8025  ;;  %15282 = vst [vmem:[#allocation42_spill] sm:$0xff] %v10456_v60  ;;  %v1972_v54 = vsel %vm15285_vm14, %v10450_v43, 0.0  ;;  %v15286_v27 = vld [vmem:[#allocation55_spill] sm:$0xff]  ;;  %vm15288_vm1 = vmmov %vm15275_vm3  ;;  %vm1680_vm10 = vcmp.lt.f32.partialorder %v10456_v60, 1.0  ;;  %vm15289_vm3 = vcmp.gt.s32.totalorder %v8787_v11, 1 }
 0x379   : > { %v1805_v58 = vsel %vm15276_vm4, %v1714_v20, -inf  ;;  %2660 = vmatmul.bf16.gmra.mxu1 %v15283_v29  ;;  %3040 = vmatmul.bf16.gmra.mxu2 %v15283_v29  ;;  %vm15287_vm15 = vcmp.lt.f32.partialorder %v15286_v27, 1.0  ;;  %v1984_v20 = vsel %vm15288_vm1, %v10454_v51, 0.0  ;;  %vm1170_vm4 = vmand %vm1137_vm0, %vm15289_vm3  ;;  %vm15291_vm14 = vcmp.gt.s32.totalorder %v8787_v11, 0 }
 0x37a   : > { %1806 = vmax.xlane.f32.xlu0 %v1805_v58  ;;  %v10465_v48 = vsel %vm15287_vm15, %v8026_v36, 0.0  ;;  %3388 = vmatmul.bf16.gmra.mxu3 %v15283_v29  ;;  %vm15290_vm8 = vmmov %vm15288_vm1  ;;  %8027 = vpow2.f32 %v1872_v34  ;;  %vm1458_vm1 = vcmp.gt.f32.partialorder %v1422_v16, %v15284_v2  ;;  %vm15292_vm9 = vcmp.gt.s32.totalorder %v8787_v11, 2  ;;  %v15294_v36 = vld [vmem:[#allocation53_spill] sm:$0xff] }
 0x37b   : > { %v1987_v61 = vsel %vm15290_vm8, %v10465_v48, 0.0  ;;  %vm817_vm15 = vmand %vm784_vm13, %vm15291_vm14  ;;  %v1712_v37 = vsel %vm1680_vm10, %v15245_v14, -inf  ;;  %v15297_v16 = vld [vmem:[#allocation17_spill] sm:$0xff] }
 0x37c   : > { %vm1523_vm5 = vmand %vm1490_vm11, %vm15292_vm9  ;;  %v1799_v9 = vsel %vm15293_vm7, %v1712_v37, -inf  ;;  %vm15295_vm9 = vcmp.lt.f32.partialorder %v15294_v36, 1.0 }
 0x37d   : > { %vm1202_vm0 = vmor %vm1105_vm6, %vm1170_vm4  ;;  %vm15298_vm4 = vcmp.gt.s32.totalorder %v8787_v11, 1 }
 0x37e   : > { %vm849_vm3 = vmor %vm752_vm2, %vm817_vm15  ;;  %v7185_v58 = vsel %vm1202_vm0, 1.0, %v15045_v17  ;;  %vm15299_vm15 = vcmp.gt.s32.totalorder %v8787_v11, 0 }
 0x37f   : > { %1973 = vadd.xlane.f32.xlu1 %v1972_v54  ;;  %vm1555_vm8 = vmor %vm1458_vm1, %vm1523_vm5  ;;  %v7153_v0 = vsel %vm849_vm3, 1.0, %v15045_v17 }
 0x380   : > { %1985 = vadd.xlane.f32.xlu2 %v1984_v20  ;;  %v8028_v8 = vpop.eup %8027  ;;  %v7217_v50 = vsel %vm1555_vm8, 1.0, %v15045_v17  ;;  %v1298_v46 = vadd.f32 %v7185_v58, %v7153_v0  ;;  %vm15300_vm8 = vmmov %vm15293_vm7 }
 0x381   : > { %v10495_v55 = vsel %vm15295_vm9, %v8028_v8, 0.0 }
 0x382   : > { %1988 = vadd.xlane.f32.xlu0 %v1987_v61  ;;  %v10497_v56 = vadd.f32 %v7217_v50, %v1298_v46  ;;  %v1981_v34 = vsel %vm15293_vm7, %v10495_v55, 0.0 }
 0x384   : > { %15296 = vst [vmem:[#allocation13_spill] sm:$0xff] %v10497_v56  ;;  %vm1683_vm11 = vcmp.lt.f32.partialorder %v10497_v56, 1.0 }
 0x385   : > { %v720_v18 = vpop.permute.xlu1 %719  ;;  %v1715_v27 = vsel %vm1683_vm11, %v15284_v2, -inf  ;;  %v15313_v2 = vld [vmem:[#allocation32_spill] sm:$0xff] }
 0x386   : > { %vm785_vm13 = vcmp.eq.f32.partialorder %v720_v18, %v9398_v19  ;;  %vm753_vm14 = vcmp.gt.f32.partialorder %v720_v18, %v9398_v19  ;;  %v1808_v20 = vsel %vm15300_vm8, %v1715_v27, -inf }
 0x387   : > { %1800 = vmax.xlane.f32.xlu1 %v1799_v9  ;;  %vm818_vm1 = vmand %vm785_vm13, %vm15299_vm15 }
 0x388   : > { %vm850_vm3 = vmor %vm753_vm14, %vm818_vm1 }
 0x389   : > { %2665 = vmatmul.bf16.gmra.mxu1 %v15297_v16  ;;  %3045 = vmatmul.bf16.gmra.mxu2 %v15297_v16  ;;  %v7154_v18 = vsel %vm850_vm3, 1.0, %v15045_v17  ;;  %vm15304_vm14 = vmmov %vm15300_vm8 }
 0x38a   : > { %3393 = vmatmul.bf16.gmra.mxu3 %v15297_v16  ;;  %v15303_v16 = vld [vmem:[#allocation18_spill] sm:$0xff]  ;;  %vm15305_vm3 = vmmov %vm15300_vm8 }
 0x38e   : > { %v1073_v29 = vpop.permute.xlu1 %1072 }
 0x38f   : > { %vm1138_vm5 = vcmp.eq.f32.partialorder %v1073_v29, %v9398_v19  ;;  %1982 = vadd.xlane.f32.xlu1 %v1981_v34  ;;  %vm1106_vm6 = vcmp.gt.f32.partialorder %v1073_v29, %v9398_v19 }
 0x390   : > { %vm1171_vm2 = vmand %vm1138_vm5, %vm15298_vm4  ;;  %vm15301_vm5 = vcmp.gt.s32.totalorder %v8787_v11, 2 }
 0x391   : > { %vm1203_vm0 = vmor %vm1106_vm6, %vm1171_vm2 }
 0x392   : > { %v7186_v61 = vsel %vm1203_vm0, 1.0, %v15045_v17 }
 0x393   : > { %v1944_v54 = vpop.xlane.xlu0 %1943  ;;  %v1299_v58 = vadd.f32 %v7186_v61, %v7154_v18 }
 0x394   : > { %8029 = vrcp.f32 %v1944_v54  ;;  %v2049_v29 = vand.u32 2147483648, %v1944_v54  ;;  %vm2043_vm15 = vweird.f32 %v1944_v54 }
 0x396   : > { %v2050_v18 = vor.u32 1.1754944e-38, %v2049_v29 }
 0x397   : > { %1809 = vmax.xlane.f32.xlu1 %v1808_v20  ;;  %v1426_v37 = vpop.permute.xlu1 %1425  ;;  %v2047_v20 = vand.u32 2147483647, %v1944_v54 }
 0x398   : > { %vm1459_vm9 = vcmp.gt.f32.partialorder %v1426_v37, %v9398_v19  ;;  %vm1491_vm7 = vcmp.eq.f32.partialorder %v1426_v37, %v9398_v19 }
 0x399   : > { %vm1524_vm13 = vmand %vm1491_vm7, %vm15301_vm5  ;;  %2670 = vmatmul.bf16.gmra.mxu1 %v15303_v16  ;;  %3050 = vmatmul.bf16.gmra.mxu2 %v15303_v16  ;;  %vm2048_vm0 = vcmp.eq.f32.partialorder %v2047_v20, 8.507059e+37  ;;  %v15306_v20 = vld [vmem:[#allocation19_spill] sm:$0xff] }
 0x39a   : > { %v8030_v9 = vpop.eup %8029  ;;  %vm1556_vm6 = vmor %vm1459_vm9, %vm1524_vm13  ;;  %3398 = vmatmul.bf16.gmra.mxu3 %v15303_v16  ;;  %vm15308_vm13 = vcmp.lt.f32.partialorder %v9649_v13, 1.0 }
 0x39b   : > { %v2039_v8 = vmul.f32 %v8030_v9, %v1944_v54  ;;  %v10524_v0 = vpop.xlane.xlu0 %1770  ;;  %v7218_v50 = vsel %vm1556_vm6, 1.0, %v15045_v17  ;;  %vm2044_vm2 = vweird.f32 %v8030_v9  ;;  %vm15309_vm6 = vmmov %vm15305_vm3 }
 0x39c   : > { %v10527_v46 = vadd.f32 %v7218_v50, %v1299_v58  ;;  %vm2045_vm1 = vmor %vm2043_vm15, %vm2044_vm2 }
 0x39d   : > { %v2040_v36 = vsub.f32 1.0, %v2039_v8  ;;  %vm15311_vm2 = vmmov %vm15305_vm3 }
 0x39e   : > { %15302 = vst [vmem:[#allocation41_spill] sm:$0xff] %v10527_v46  ;;  %vm1684_vm4 = vcmp.lt.f32.partialorder %v10527_v46, 1.0 }
 0x39f   : > { %v2041_v34 = vmul.f32 %v8030_v9, %v2040_v36  ;;  %v1716_v27 = vsel %vm1684_vm4, %v9398_v19, -inf }
 0x3a0   : > { %v1811_v61 = vsel %vm15304_vm14, %v1716_v27, -inf }
 0x3a1   : > { %1812 = vmax.xlane.f32.xlu2 %v1811_v61  ;;  %v2042_v37 = vadd.f32 %v8030_v9, %v2041_v34 }
 0x3a3   : > { %v1953_v58 = vpop.xlane.xlu0 %1952  ;;  %v2046_v8 = vsel %vm2045_vm1, %v8030_v9, %v2042_v37 }
 0x3a4   : > { %8031 = vrcp.f32 %v1953_v58  ;;  %v2051_v50 = vsel %vm2048_vm0, %v2050_v18, %v2046_v8  ;;  %v15307_v18 = vmov 2   ;;  %v2092_v8 = vand.u32 2147483647, %v1953_v58 }
 0x3a5   : > { %v2052_v36 = vmul.f32 %v2051_v50, %v9455_v28  ;;  %v2094_v28 = vand.u32 2147483648, %v1953_v58  ;;  %vm2088_vm9 = vweird.f32 %v1953_v58 }
 0x3a6   : > { %vm2093_vm5 = vcmp.eq.f32.partialorder %v2092_v8, 8.507059e+37 }
 0x3a7   : > { %3102 = vperm.xlu0 %7756, %v2052_v36   ;;  %2518 = vst.msk [vmem:[%s10545_s18] sm:$0xff] %vm15305_vm3, %v2052_v36 }
 0x3a9   : > { %2675 = vmatmul.bf16.gmra.mxu1 %v15306_v20  ;;  %3055 = vmatmul.bf16.gmra.mxu2 %v15306_v20 }
 0x3aa   : > { %v8032_v54 = vpop.eup %8031  ;;  %3403 = vmatmul.bf16.gmra.mxu3 %v15306_v20 }
 0x3ab   : > { %v2084_v16 = vmul.f32 %v8032_v54, %v1953_v58  ;;  %v1768_v29 = vpop.xlane.xlu2 %1767  ;;  %v10550_v34 = vpop.xlane.xlu0 %1779  ;;  %vm2089_vm8 = vweird.f32 %v8032_v54 }
 0x3ac   : > { %v1830_v9 = vsub.f32 %v8782_v6, %v1768_v29  ;;  %vm2090_vm7 = vmor %vm2088_vm9, %vm2089_vm8  ;;  %v2095_v6 = vor.u32 1.1754944e-38, %v2094_v28 }
 0x3ad   : > { %v2085_v27 = vsub.f32 1.0, %v2084_v16 }
 0x3ae   : > { %v1878_v61 = vmul.f32 1.442695, %v1830_v9 }
 0x3af   : > { %v2086_v37 = vmul.f32 %v8032_v54, %v2085_v27  ;;  %7757 = vset.pattern.permute.xlu0 %v15307_v18 }
 0x3b0   : > { %8033 = vpow2.f32 %v1878_v61  ;;  %3450 = vperm.xlu0 %7757, %v2052_v36  }
 0x3b1   : > { %v2087_v50 = vadd.f32 %v8032_v54, %v2086_v37  ;;  %v15310_v37 = vmov 0  }
 0x3b3   : > { %v1950_v16 = vpop.xlane.xlu2 %1949  ;;  %v1962_v29 = vpop.xlane.xlu0 %1961  ;;  %v2091_v17 = vsel %vm2090_vm7, %v8032_v54, %v2087_v50 }
 0x3b4   : > { %8035 = vrcp.f32 %v1950_v16  ;;  %v2096_v9 = vsel %vm2093_vm5, %v2095_v6, %v2091_v17  ;;  %v15312_v6 = vld [vmem:[#allocation20_spill] sm:$0xff]  ;;  %v2077_v39 = vand.u32 2147483647, %v1950_v16  ;;  %vm2073_vm1 = vweird.f32 %v1950_v16  ;;  %vm15314_vm5 = vmmov %vm15311_vm2 }
 0x3b5   : > { %8037 = vrcp.f32 %v1962_v29  ;;  %v10558_v20 = vmul.f32 %v2096_v9, %v9634_v52  ;;  %vm2133_vm3 = vweird.f32 %v1962_v29 }
 0x3b6   : > { %v8034_v27 = vpop.eup %8033  ;;  %vm2078_vm9 = vcmp.eq.f32.partialorder %v2077_v39, 8.507059e+37 }
 0x3b7   : > { %v10562_v61 = vsel %vm15308_vm13, %v8034_v27, 0.0  ;;  %2521 = vst.msk [vmem:[%s10545_s18 + $0x18] sm:$0xff] %vm15311_vm2, %v10558_v20  ;;  %vm15316_vm13 = vmmov %vm15311_vm2 }
 0x3b8   : > { %v1990_v58 = vsel %vm15309_vm6, %v10562_v61, 0.0  ;;  %7758 = vset.pattern.permute.xlu0 %v15310_v37 }
 0x3b9   : > { %1991 = vadd.xlane.f32.xlu1 %v1990_v58  ;;  %2723 = vperm.xlu2 %7755, %v2052_v36   ;;  %v2079_v58 = vand.u32 2147483648, %v1950_v16  ;;  %v2139_v36 = vand.u32 2147483648, %v1962_v29 }
 0x3ba   : > { %v8036_v54 = vpop.eup %8035  ;;  %2680 = vmatmul.bf16.gmra.mxu1 %v15312_v6  ;;  %3060 = vmatmul.bf16.gmra.mxu2 %v15312_v6 }
 0x3bb   : > { %v8038_v17 = vpop.eup %8037  ;;  %v2069_v28 = vmul.f32 %v8036_v54, %v1950_v16  ;;  %v10570_v8 = vpop.xlane.xlu2 %1776  ;;  %3408 = vmatmul.bf16.gmra.mxu3 %v15312_v6  ;;  %vm2074_vm14 = vweird.f32 %v8036_v54  ;;  %v2140_v6 = vor.u32 1.1754944e-38, %v2139_v36 }
 0x3bc   : > { %v10572_v52 = vpop.xlane.xlu0 %1788  ;;  %v2129_v13 = vmul.f32 %v8038_v17, %v1962_v29  ;;  %vm2134_vm15 = vweird.f32 %v8038_v17  ;;  %vm2075_vm0 = vmor %vm2073_vm1, %vm2074_vm14 }
 0x3bd   : > { %v2070_v50 = vsub.f32 1.0, %v2069_v28  ;;  %vm2135_vm8 = vmor %vm2133_vm3, %vm2134_vm15 }
 0x3be   : > { %v2130_v9 = vsub.f32 1.0, %v2129_v13  ;;  %v2137_v13 = vand.u32 2147483647, %v1962_v29 }
 0x3bf   : > { %v2071_v27 = vmul.f32 %v8036_v54, %v2070_v50  ;;  %v2080_v50 = vor.u32 1.1754944e-38, %v2079_v58  ;;  %v1831_v58 = vsub.f32 %v15313_v2, %v10524_v0 }
 0x3c0   : > { %v2131_v11 = vmul.f32 %v8038_v17, %v2130_v9  ;;  %vm2138_vm7 = vcmp.eq.f32.partialorder %v2137_v13, 8.507059e+37  ;;  %v15317_v13 = vld [vmem:[#allocation23_spill] sm:$0xff] }
 0x3c1   : > { %7762 = vset.pattern.permute.xlu2 %v15041_v4  ;;  %v2072_v19 = vadd.f32 %v8036_v54, %v2071_v27  ;;  %v1880_v2 = vmul.f32 1.442695, %v1831_v58 }
 0x3c2   : > { %v1947_v46 = vpop.xlane.xlu1 %1946  ;;  %v2132_v21 = vadd.f32 %v8038_v17, %v2131_v11 }
 0x3c3   : > { %8039 = vrcp.f32 %v1947_v46  ;;  %v10578_v28 = vpop.xlane.xlu2 %1958  ;;  %v2076_v9 = vsel %vm2075_vm0, %v8036_v54, %v2072_v19  ;;  %v2064_v0 = vand.u32 2147483648, %v1947_v46  ;;  %vm2058_vm2 = vweird.f32 %v1947_v46 }
 0x3c4   : > { %v10580_v42 = vpop.xlane.xlu0 %1970  ;;  %8041 = vrcp.f32 %v10578_v28  ;;  %v2081_v27 = vsel %vm2078_vm9, %v2080_v50, %v2076_v9  ;;  %v2136_v45 = vsel %vm2135_vm8, %v8038_v17, %v2132_v21  ;;  %v2062_v17 = vand.u32 2147483647, %v1947_v46 }
 0x3c5   : > { %8043 = vrcp.f32 %v10580_v42  ;;  %v10585_v11 = vmul.f32 %v2081_v27, %v9885_v30  ;;  %v2141_v16 = vsel %vm2138_vm7, %v2140_v6, %v2136_v45  ;;  %v2124_v58 = vand.u32 2147483648, %v10578_v28 }
 0x3c6   : > { %v10590_v29 = vmul.f32 %v2141_v16, %v9889_v59  ;;  %8045 = vpow2.f32 %v1880_v2  ;;  %vm2063_vm15 = vcmp.eq.f32.partialorder %v2062_v17, 8.507059e+37  ;;  %vm2118_vm0 = vweird.f32 %v10578_v28 }
 0x3c7   : > { %2520 = vst.msk [vmem:[%s10545_s18 + $0x10] sm:$0xff] %vm15314_vm5, %v10585_v11  ;;  %v2125_v17 = vor.u32 1.1754944e-38, %v2124_v58  ;;  %vm2178_vm9 = vweird.f32 %v10580_v42 }
 0x3c8   : > { %2524 = vst.msk [vmem:[%s10545_s18 + $0x30] sm:$0xff] %vm15316_vm13, %v10590_v29 }
 0x3c9   : > { %v8040_v56 = vpop.eup %8039 }
 0x3ca   : > { %v8042_v33 = vpop.eup %8041  ;;  %v2054_v35 = vmul.f32 %v8040_v56, %v1947_v46  ;;  %v10592_v36 = vpop.xlane.xlu1 %1773  ;;  %2685 = vmatmul.bf16.gmra.mxu1 %v15317_v13  ;;  %3065 = vmatmul.bf16.gmra.mxu2 %v15317_v13  ;;  %vm2059_vm6 = vweird.f32 %v8040_v56 }
 0x3cb   : > { %v8044_v19 = vpop.eup %8043  ;;  %v2114_v21 = vmul.f32 %v8042_v33, %v10578_v28  ;;  %v10598_v30 = vpop.xlane.xlu2 %1785  ;;  %3413 = vmatmul.bf16.gmra.mxu3 %v15317_v13  ;;  %vm2060_vm14 = vmor %vm2058_vm2, %vm2059_vm6  ;;  %vm2119_vm1 = vweird.f32 %v8042_v33 }
 0x3cc   : > { %v10600_v45 = vpop.xlane.xlu0 %1797  ;;  %v2055_v39 = vsub.f32 1.0, %v2054_v35  ;;  %v2174_v59 = vmul.f32 %v8044_v19, %v10580_v42  ;;  %v2065_v35 = vor.u32 1.1754944e-38, %v2064_v0  ;;  %vm2179_vm3 = vweird.f32 %v8044_v19  ;;  %vm2120_vm8 = vmor %vm2118_vm0, %vm2119_vm1 }
 0x3cd   : > { %15315 = vst [vmem:[#allocation56_spill] sm:$0xff] %v10600_v45  ;;  %v2115_v54 = vsub.f32 1.0, %v2114_v21  ;;  %vm2180_vm5 = vmor %vm2178_vm9, %vm2179_vm3 }
 0x3ce   : > { %v2056_v50 = vmul.f32 %v8040_v56, %v2055_v39  ;;  %v2175_v6 = vsub.f32 1.0, %v2174_v59  ;;  %v2122_v39 = vand.u32 2147483647, %v10578_v28  ;;  %v2184_v59 = vand.u32 2147483648, %v10580_v42  ;;  %vm15318_vm2 = vmmov %vm15316_vm13 }
 0x3cf   : > { %v2116_v9 = vmul.f32 %v8042_v33, %v2115_v54  ;;  %vm15327_vm9 = vmmov %vm15318_vm2 }
 0x3d0   : > { %v2176_v27 = vmul.f32 %v8044_v19, %v2175_v6  ;;  %v2057_v16 = vadd.f32 %v8040_v56, %v2056_v50  ;;  %vm2123_vm7 = vcmp.eq.f32.partialorder %v2122_v39, 8.507059e+37  ;;  %v2185_v50 = vor.u32 1.1754944e-38, %v2184_v59 }
 0x3d1   : > { %v2117_v32 = vadd.f32 %v8042_v33, %v2116_v9 }
 0x3d2   : > { %v10610_v21 = vpop.xlane.xlu1 %1955  ;;  %v2061_v45 = vsel %vm2060_vm14, %v8040_v56, %v2057_v16  ;;  %v2177_v54 = vadd.f32 %v8044_v19, %v2176_v27  ;;  %v2182_v56 = vand.u32 2147483647, %v10580_v42  ;;  %vm15321_vm14 = vmmov %vm15318_vm2 }
 0x3d3   : > { %8047 = vrcp.f32 %v10610_v21  ;;  %v10616_v46 = vpop.xlane.xlu2 %1967  ;;  %v2066_v0 = vsel %vm2063_vm15, %v2065_v35, %v2061_v45  ;;  %v2121_v13 = vsel %vm2120_vm8, %v8042_v33, %v2117_v32  ;;  %v8046_v45 = vpop.eup %8045  ;;  %vm2103_vm0 = vweird.f32 %v10610_v21 }
 0x3d4   : > { %v10618_v2 = vpop.xlane.xlu0 %1979  ;;  %8049 = vrcp.f32 %v10616_v46  ;;  %v2067_v28 = vmul.f32 %v2066_v0, %v9997_v53  ;;  %v2126_v6 = vsel %vm2123_vm7, %v2125_v17, %v2121_v13  ;;  %v2181_v27 = vsel %vm2180_vm5, %v8044_v19, %v2177_v54  ;;  %v15322_v54 = vld [vmem:[#allocation59_spill] sm:$0xff] }
 0x3d5   : > { %8051 = vrcp.f32 %v10618_v2  ;;  %v10629_v9 = vmul.f32 %v2126_v6, %v10041_v25  ;;  %vm2183_vm6 = vcmp.eq.f32.partialorder %v2182_v56, 8.507059e+37  ;;  %vm15323_vm15 = vcmp.lt.f32.partialorder %v15322_v54, 1.0 }
 0x3d6   : > { %3106 = vperm.xlu1 %7759, %v2067_v28   ;;  %2519 = vst.msk [vmem:[%s10545_s18 + $0x8] sm:$0xff] %vm15316_vm13, %v2067_v28  ;;  %2728 = vperm.xlu0 %7758, %v2067_v28   ;;  %v2186_v16 = vsel %vm2183_vm6, %v2185_v50, %v2181_v27  ;;  %v10652_v56 = vsel %vm15323_vm15, %v8046_v45, 0.0  ;;  %v2109_v13 = vand.u32 2147483648, %v10610_v21  ;;  %v2169_v27 = vand.u32 2147483648, %v10616_v46 }
 0x3d7   : > { %2523 = vst.msk [vmem:[%s10545_s18 + $0x28] sm:$0xff] %vm15318_vm2, %v10629_v9  ;;  %v10638_v35 = vmul.f32 %v2186_v16, %v10045_v44  ;;  %v15324_v44 = vld [vmem:[#allocation30_spill] sm:$0xff]  ;;  %v2107_v45 = vand.u32 2147483647, %v10610_v21  ;;  %vm2163_vm7 = vweird.f32 %v10616_v46 }
 0x3d8   : > { %v2110_v54 = vor.u32 1.1754944e-38, %v2109_v13 }
 0x3d9   : > { %v8048_v53 = vpop.eup %8047  ;;  %15319 = vst [vmem:[#allocation21_spill] sm:$0xff] %v10638_v35  ;;  %vm2108_vm13 = vcmp.eq.f32.partialorder %v2107_v45, 8.507059e+37 }
 0x3da   : > { %v8050_v42 = vpop.eup %8049  ;;  %v2099_v33 = vmul.f32 %v8048_v53, %v10610_v21  ;;  %v10632_v32 = vpop.xlane.xlu1 %1782  ;;  %2527 = vst.msk [vmem:[%s10545_s18 + $0x48] sm:$0xff] %vm15321_vm14, %v10638_v35  ;;  %2690 = vmatmul.bf16.gmra.mxu1 %v15324_v44  ;;  %3070 = vmatmul.bf16.gmra.mxu2 %v15324_v44  ;;  %vm2104_vm1 = vweird.f32 %v8048_v53  ;;  %v2229_v21 = vand.u32 2147483648, %v10618_v2  ;;  %vm2223_vm14 = vweird.f32 %v10618_v2 }
 0x3db   : > { %v10640_v58 = vpop.eup %8051  ;;  %v2159_v25 = vmul.f32 %v8050_v42, %v10616_v46  ;;  %v10643_v39 = vpop.xlane.xlu2 %1794  ;;  %3418 = vmatmul.bf16.gmra.mxu3 %v15324_v44  ;;  %vm10664_vm3 = vmor %vm2103_vm0, %vm2104_vm1  ;;  %vm2164_vm8 = vweird.f32 %v8050_v42 }
 0x3dc   : > { %15320 = vst [vmem:[#allocation25_spill] sm:$0xff] %v10643_v39  ;;  %v2100_v19 = vsub.f32 1.0, %v2099_v33  ;;  %v2219_v59 = vmul.f32 %v10640_v58, %v10618_v2  ;;  %vm2224_vm5 = vweird.f32 %v10640_v58  ;;  %vm2165_vm6 = vmor %vm2163_vm7, %vm2164_vm8 }
 0x3dd   : > { %v2160_v0 = vsub.f32 1.0, %v2159_v25  ;;  %vm2225_vm15 = vmor %vm2223_vm14, %vm2224_vm5  ;;  %v2230_v25 = vor.u32 1.1754944e-38, %v2229_v21 }
 0x3de   : > { %v2101_v17 = vmul.f32 %v8048_v53, %v2100_v19  ;;  %v2220_v50 = vsub.f32 1.0, %v2219_v59  ;;  %7760 = vset.pattern.permute.xlu1 %v15307_v18  ;;  %7771 = vset.pattern.permute.xlu0 %v15041_v4  ;;  %v1993_v19 = vsel %vm15327_vm9, %v10652_v56, 0.0  ;;  %vm15328_vm1 = vmmov %vm15327_vm9 }
 0x3df   : > { %v2161_v6 = vmul.f32 %v8050_v42, %v2160_v0  ;;  %3454 = vperm.xlu1 %7760, %v2067_v28   ;;  %v2167_v0 = vand.u32 2147483647, %v10616_v46  ;;  %vm15332_vm8 = vmmov %vm15328_vm1 }
 0x3e0   : > { %v2221_v16 = vmul.f32 %v10640_v58, %v2220_v50  ;;  %v2102_v33 = vadd.f32 %v8048_v53, %v2101_v17  ;;  %v2170_v17 = vor.u32 1.1754944e-38, %v2169_v27 }
 0x3e1   : > { %v2162_v59 = vadd.f32 %v8050_v42, %v2161_v6  ;;  %v2227_v6 = vand.u32 2147483647, %v10618_v2  ;;  %vm2168_vm2 = vcmp.eq.f32.partialorder %v2167_v0, 8.507059e+37 }
 0x3e2   : > { %1994 = vadd.xlane.f32.xlu2 %v1993_v19  ;;  %v10673_v44 = vpop.xlane.xlu1 %1964  ;;  %v2106_v28 = vsel %vm10664_vm3, %v8048_v53, %v2102_v33  ;;  %v2222_v13 = vadd.f32 %v10640_v58, %v2221_v16  ;;  %v10689_v33 = vpop.f32.mrf.mxu1  ;;  %vm15329_vm3 = vmmov %vm15328_vm1 }
 0x3e3   : > { %8053 = vrcp.f32 %v10673_v44  ;;  %v10679_v50 = vpop.xlane.xlu2 %1976  ;;  %v2111_v46 = vsel %vm2108_vm13, %v2110_v54, %v2106_v28  ;;  %v2166_v27 = vsel %vm2165_vm6, %v8050_v42, %v2162_v59  ;;  %v10693_v19 = vpop.f32.mrf.mxu2  ;;  %vm2228_vm0 = vcmp.eq.f32.partialorder %v2227_v6, 8.507059e+37  ;;  %v15334_v6 = vld [vmem:[#allocation33_spill] sm:$0xff] }
 0x3e4   : > { %8055 = vrcp.f32 %v10679_v50  ;;  %v10686_v53 = vmul.f32 %v2111_v46, %v10191_v63  ;;  %v2171_v45 = vsel %vm2168_vm2, %v2170_v17, %v2166_v27  ;;  %v10701_v42 = vpop.f32.mrf.mxu3  ;;  %v2226_v2 = vsel %vm2225_vm15, %v10640_v58, %v2222_v13  ;;  %v3688_v13 = vld [vmem:[%s14734_s4 + $0x78] sm:$0xff] }
 0x3e5   : > { %v10699_v63 = vmul.f32 %v2171_v45, %v10203_v7  ;;  %v2231_v59 = vsel %vm2228_vm0, %v2230_v25, %v2226_v2  ;;  %v1832_v7 = vsub.f32 %v8884_v12, %v10592_v36  ;;  %v2154_v45 = vand.u32 2147483648, %v10673_v44  ;;  %3689 = vmatpush.msrb.mxu0 %v3688_v13  ;;  %v3687_v25 = vld [vmem:[%s14734_s4 + $0x70] sm:$0xff]  ;;  %vm15339_vm0 = vmmov %vm15328_vm1 }
 0x3e6   : > { %2522 = vst.msk [vmem:[%s10545_s18 + $0x20] sm:$0xff] %vm15328_vm1, %v10686_v53  ;;  %v10717_v28 = vmul.f32 %v2231_v59, %v10207_v3  ;;  %v3686_v59 = vld [vmem:[%s14734_s4 + $0x68] sm:$0xff]  ;;  %vm2148_vm7 = vweird.f32 %v10673_v44  ;;  %v2214_v13 = vand.u32 2147483648, %v10679_v50  ;;  %vm2208_vm6 = vweird.f32 %v10679_v50 }
 0x3e7   : > { %7761 = vset.pattern.permute.xlu1 %v15310_v37  ;;  %2526 = vst.msk [vmem:[%s10545_s18 + $0x40] sm:$0xff] %vm15329_vm3, %v10699_v63  ;;  %v1882_v3 = vmul.f32 1.442695, %v1832_v7  ;;  %3690 = vmatpush.msrb.mxu0 %v3687_v25  ;;  %vm15340_vm3 = vcmp.lt.f32.partialorder %v10047_v38, 1.0  ;;  %v3679_v38 = vld [vmem:[%s14734_s4 + $0x30] sm:$0xff] }
 0x3e8   : > { %2733 = vperm.xlu1 %7761, %v10585_v11   ;;  %15330 = vst [vmem:[#allocation36_spill] sm:$0xff] %v10717_v28 }
 0x3e9   : > { %v8054_v16 = vpop.eup %8053  ;;  %2530 = vst.msk [vmem:[%s10545_s18 + $0x60] sm:$0xff] %vm15332_vm8, %v10717_v28  ;;  %8057 = vpow2.f32 %v1882_v3  ;;  %3691 = vmatpush.msrb.mxu0 %v3686_v59  ;;  %v3684_v3 = vld [vmem:[%s14734_s4 + $0x58] sm:$0xff]  ;;  %v3683_v59 = vld [vmem:[%s14734_s4 + $0x50] sm:$0xff] }
 0x3ea   : > { %v10709_v0 = vpop.eup %8055  ;;  %v2144_v54 = vmul.f32 %v8054_v16, %v10673_v44  ;;  %v10714_v21 = vpop.xlane.xlu1 %1791  ;;  %2695 = vmatmul.bf16.gmra.mxu1 %v15334_v6  ;;  %3075 = vmatmul.bf16.gmra.mxu2 %v15334_v6  ;;  %vm2149_vm9 = vweird.f32 %v8054_v16 }
 0x3eb   : > { %v2204_v58 = vmul.f32 %v10709_v0, %v10679_v50  ;;  %v10721_v17 = vpop.xlane.xlu2 %1803  ;;  %3423 = vmatmul.bf16.gmra.mxu3 %v15334_v6  ;;  %v10743_v7 = vpop.f32.mrf.mxu1  ;;  %vm10746_vm5 = vmor %vm2148_vm7, %vm2149_vm9  ;;  %vm2209_vm13 = vweird.f32 %v10709_v0  ;;  %v3685_v6 = vld [vmem:[%s14734_s4 + $0x60] sm:$0xff] }
 0x3ec   : > { %15331 = vst [vmem:[#allocation38_spill] sm:$0xff] %v10721_v17  ;;  %v2145_v46 = vsub.f32 1.0, %v2144_v54  ;;  %v2152_v54 = vand.u32 2147483647, %v10673_v44  ;;  %v10759_v25 = vpop.f32.mrf.mxu3  ;;  %v2212_v17 = vand.u32 2147483647, %v10679_v50  ;;  %vm2210_vm14 = vmor %vm2208_vm6, %vm2209_vm13  ;;  %3692 = vmatpush.msrb.mxu0 %v3685_v6 }
 0x3ed   : > { %v2205_v12 = vsub.f32 1.0, %v2204_v58  ;;  %v10729_v36 = vpop.xlane.xlu0 %1806  ;;  %vm15342_vm9 = vmmov %vm15339_vm0 }
 0x3ee   : > { %15333 = vst [vmem:[#allocation49_spill] sm:$0xff] %v10729_v36  ;;  %v2146_v27 = vmul.f32 %v8054_v16, %v2145_v46  ;;  %vm2153_vm2 = vcmp.eq.f32.partialorder %v2152_v54, 8.507059e+37  ;;  %3693 = vmatpush.msrb.mxu0 %v3684_v3  ;;  %vm2213_vm15 = vcmp.eq.f32.partialorder %v2212_v17, 8.507059e+37  ;;  %v3682_v46 = vld [vmem:[%s14734_s4 + $0x48] sm:$0xff]  ;;  %v1833_v17 = vsub.f32 %v8906_v22, %v10570_v8 }
 0x3ef   : > { %v2206_v2 = vmul.f32 %v10709_v0, %v2205_v12  ;;  %v10752_v12 = vpop.f32.mrf.mxu2 }
 0x3f0   : > { %v2147_v58 = vadd.f32 %v8054_v16, %v2146_v27  ;;  %7765 = vset.pattern.permute.xlu1 %v15041_v4  ;;  %v2155_v27 = vor.u32 1.1754944e-38, %v2154_v45  ;;  %v1835_v45 = vsub.f32 %v9027_v10, %v10632_v32  ;;  %v8058_v32 = vpop.eup %8057  ;;  %3694 = vmatpush.msrb.mxu0 %v3683_v59 }
 0x3f1   : > { %v2207_v44 = vadd.f32 %v10709_v0, %v2206_v2  ;;  %v10822_v3 = vsel %vm15340_vm3, %v8058_v32, 0.0 }
 0x3f2   : > { %v10761_v28 = vpop.xlane.xlu1 %1973  ;;  %v2151_v36 = vsel %vm10746_vm5, %v8054_v16, %v2147_v58  ;;  %v2215_v16 = vor.u32 1.1754944e-38, %v2214_v13  ;;  %v3681_v13 = vld [vmem:[%s14734_s4 + $0x40] sm:$0xff]  ;;  %3695 = vmatpush.msrb.mxu0 %v3682_v46 }
 0x3f3   : > { %8059 = vrcp.f32 %v10761_v28  ;;  %v10768_v35 = vpop.xlane.xlu2 %1985  ;;  %v2156_v50 = vsel %vm2153_vm2, %v2155_v27, %v2151_v36  ;;  %v2211_v54 = vsel %vm2210_vm14, %v10709_v0, %v2207_v44  ;;  %v1888_v36 = vmul.f32 1.442695, %v1835_v45  ;;  %v10806_v44 = vpop.f32.mrf.mxu1  ;;  %v3680_v45 = vld [vmem:[%s14734_s4 + $0x38] sm:$0xff] }
 0x3f4   : > { %8061 = vrcp.f32 %v10768_v35  ;;  %v10784_v58 = vmul.f32 %v2156_v50, %v10335_v5  ;;  %v2216_v10 = vsel %vm2213_vm15, %v2215_v16, %v2211_v54  ;;  %v10829_v16 = vpop.f32.mrf.mxu3  ;;  %3696 = vmatpush.msrb.mxu0 %v3681_v13  ;;  %v1884_v54 = vmul.f32 1.442695, %v1833_v17 }
 0x3f5   : > { %v10778_v2 = vpop.xlane.xlu0 %1988  ;;  %v10795_v5 = vmul.f32 %v2216_v10, %v10346_v1  ;;  %v1996_v17 = vsel %vm15342_vm9, %v10822_v3, 0.0  ;;  %vm2193_vm7 = vweird.f32 %v10761_v28  ;;  %vm2253_vm6 = vweird.f32 %v10768_v35 }
 0x3f6   : > { %15337 = vst [vmem:[#allocation14_spill] sm:$0xff] %v10784_v58  ;;  %8063 = vrcp.f32 %v10778_v2  ;;  %3697 = vmatpush.msrb.mxu0 %v3680_v45  ;;  %vm2268_vm15 = vweird.f32 %v10778_v2 }
 0x3f7   : > { %2525 = vst.msk [vmem:[%s10545_s18 + $0x38] sm:$0xff] %vm15328_vm1, %v10784_v58  ;;  %v10816_v22 = vpop.f32.mrf.mxu2  ;;  %8065 = vpow2.f32 %v1888_v36  ;;  %v2199_v36 = vand.u32 2147483648, %v10761_v28 }
 0x3f8   : > { %15338 = vst [vmem:[#allocation24_spill] sm:$0xff] %v10795_v5  ;;  %3698 = vmatpush.msrb.mxu0 %v3679_v38 }
 0x3f9   : > { %v10797_v0 = vpop.eup %8059  ;;  %2529 = vst.msk [vmem:[%s10545_s18 + $0x58] sm:$0xff] %vm15339_vm0, %v10795_v5  ;;  %v15341_v5 = vld [vmem:[#allocation34_spill] sm:$0xff]  ;;  %v2200_v58 = vor.u32 1.1754944e-38, %v2199_v36 }
 0x3fa   : > { %v10804_v6 = vpop.eup %8061  ;;  %v2189_v27 = vmul.f32 %v10797_v0, %v10761_v28  ;;  %3110 = vperm.xlu2 %7762, %v10585_v11   ;;  %v10811_v1 = vpop.xlane.xlu1 %1800  ;;  %2700 = vmatmul.bf16.gmra.mxu1 %v15341_v5  ;;  %vm2194_vm8 = vweird.f32 %v10797_v0 }
 0x3fb   : > { %v2249_v8 = vmul.f32 %v10804_v6, %v10768_v35  ;;  %3080 = vmatmul.bf16.gmra.mxu2 %v15341_v5  ;;  %3428 = vmatmul.bf16.gmra.mxu3 %v15341_v5  ;;  %vm2254_vm5 = vweird.f32 %v10804_v6  ;;  %v2257_v5 = vand.u32 2147483647, %v10768_v35  ;;  %vm10856_vm13 = vmor %vm2193_vm7, %vm2194_vm8 }
 0x3fc   : > { %v10827_v50 = vpop.eup %8063  ;;  %v2190_v59 = vsub.f32 1.0, %v2189_v27  ;;  %v2259_v27 = vand.u32 2147483648, %v10768_v35  ;;  %3699 = vmatpush.msrb.mxu0 %v3678_v49  ;;  %vm10877_vm14 = vmor %vm2253_vm6, %vm2254_vm5  ;;  %v3676_v49 = vld [vmem:[%s14734_s4 + $0x18] sm:$0xff]  ;;  %vm15355_vm6 = vcmp.lt.f32.partialorder %v9913_v47, 1.0 }
 0x3fd   : > { %v2250_v10 = vsub.f32 1.0, %v2249_v8  ;;  %v2264_v46 = vmul.f32 %v10827_v50, %v10778_v2  ;;  %vm2269_vm2 = vweird.f32 %v10827_v50  ;;  %vm2258_vm0 = vcmp.eq.f32.partialorder %v2257_v5, 8.507059e+37  ;;  %v3675_v5 = vld [vmem:[%s14734_s4 + $0x10] sm:$0xff]  ;;  %vm15349_vm8 = vmmov %vm15342_vm9 }
 0x3fe   : > { %v2191_v32 = vmul.f32 %v10797_v0, %v2190_v59  ;;  %v2197_v59 = vand.u32 2147483647, %v10761_v28  ;;  %v3677_v28 = vld [vmem:[%s14734_s4 + $0x20] sm:$0xff]  ;;  %v2260_v36 = vor.u32 1.1754944e-38, %v2259_v27  ;;  %vm2270_vm3 = vmor %vm2268_vm15, %vm2269_vm2 }
 0x3ff   : > { %v2251_v13 = vmul.f32 %v10804_v6, %v2250_v10  ;;  %v2265_v8 = vsub.f32 1.0, %v2264_v46  ;;  %v2274_v46 = vand.u32 2147483648, %v10778_v2  ;;  %3700 = vmatpush.msrb.mxu0 %v3677_v28  ;;  %v10893_v27 = vpop.f32.mrf.mxu2  ;;  %vm15350_vm9 = vmmov %vm15349_vm8  ;;  %v3673_v28 = vld [vmem:[%s14734_s4] sm:$0xff] }
 0x400   : > { %v2192_v39 = vadd.f32 %v10797_v0, %v2191_v32  ;;  %1997 = vadd.xlane.f32.xlu0 %v1996_v17  ;;  %v8066_v32 = vpop.eup %8065  ;;  %v2272_v17 = vand.u32 2147483647, %v10778_v2  ;;  %vm2198_vm1 = vcmp.eq.f32.partialorder %v2197_v59, 8.507059e+37  ;;  %vm15351_vm7 = vmmov %vm15349_vm8 }
 0x401   : > { %v2266_v10 = vmul.f32 %v10827_v50, %v2265_v8  ;;  %v2252_v38 = vadd.f32 %v10804_v6, %v2251_v13  ;;  %v10899_v59 = vsel %vm1674_vm12, %v8066_v32, 0.0  ;;  %3701 = vmatpush.msrb.mxu0 %v3676_v49  ;;  %vm15353_vm5 = vmmov %vm15351_vm7 }
 0x402   : > { %7763 = vset.pattern.permute.xlu2 %v15307_v18  ;;  %v10869_v60 = vpop.xlane.xlu1 %1982  ;;  %v2196_v35 = vsel %vm10856_vm13, %v10797_v0, %v2192_v39  ;;  %v10887_v39 = vpop.f32.mrf.mxu1  ;;  %vm2273_vm12 = vcmp.eq.f32.partialorder %v2272_v17, 8.507059e+37  ;;  %v15354_v17 = vld [vmem:[#allocation37_spill] sm:$0xff]  ;;  %vm15356_vm15 = vmmov %vm15353_vm5 }
 0x403   : > { %8067 = vrcp.f32 %v10869_v60  ;;  %3458 = vperm.xlu2 %7763, %v10585_v11   ;;  %v2201_v0 = vsel %vm2198_vm1, %v2200_v58, %v2196_v35  ;;  %v2256_v13 = vsel %vm10877_vm14, %v10804_v6, %v2252_v38  ;;  %v2267_v2 = vadd.f32 %v10827_v50, %v2266_v10  ;;  %v10904_v6 = vpop.f32.mrf.mxu3  ;;  %3702 = vmatpush.msrb.mxu0 %v3675_v5 }
 0x404   : > { %v2275_v11 = vor.u32 1.1754944e-38, %v2274_v46  ;;  %v10902_v58 = vmul.f32 %v2201_v0, %v10450_v43  ;;  %v2261_v45 = vsel %vm2258_vm0, %v2260_v36, %v2256_v13  ;;  %8069 = vpow2.f32 %v1884_v54  ;;  %v3674_v43 = vld [vmem:[%s14734_s4 + $0x8] sm:$0xff]  ;;  %vm15359_vm0 = vmmov %vm15353_vm5 }
 0x405   : > { %v10910_v10 = vmul.f32 %v2261_v45, %v10454_v51  ;;  %v2271_v24 = vsel %vm2270_vm3, %v10827_v50, %v2267_v2  ;;  %v2005_v46 = vsel %vm15350_vm9, %v10899_v59, 0.0  ;;  %3703 = vmatpush.msrb.mxu0 %v3674_v43  ;;  %v2242_v49 = vand.u32 2147483647, %v10869_v60 }
 0x406   : > { %15347 = vst [vmem:[#allocation48_spill] sm:$0xff] %v10902_v58  ;;  %v2276_v54 = vsel %vm2273_vm12, %v2275_v11, %v2271_v24  ;;  %vm2238_vm2 = vweird.f32 %v10869_v60  ;;  %vm15364_vm3 = vcmp.lt.f32.partialorder %v9651_v15, 1.0  ;;  %vm15365_vm12 = vmmov %vm15359_vm0 }
 0x407   : > { %15348 = vst [vmem:[#allocation28_spill] sm:$0xff] %v10910_v10  ;;  %v10925_v51 = vmul.f32 %v2276_v54, %v10465_v48  ;;  %3704 = vmatpush.msrb.mxu0 %v3673_v28  ;;  %v2244_v48 = vand.u32 2147483648, %v10869_v60  ;;  %v10943_v0 = vpop.f32.mrf.mxu2  ;;  %vm2243_vm1 = vcmp.eq.f32.partialorder %v2242_v49, 8.507059e+37  ;;  %v7584_v28 = vld [vmem:[#allocation5 + $0x78] sm:$0xff] }
 0x408   : > { %2528 = vst.msk [vmem:[%s10545_s18 + $0x50] sm:$0xff] %vm15349_vm8, %v10902_v58  ;;  %2006 = vadd.xlane.f32.xlu0 %v2005_v46  ;;  %6248 = vmatpush.bf16.msrb.mxu2 %v7584_v28  ;;  %v1834_v28 = vsub.f32 %v9015_v40, %v10550_v34  ;;  %v7573_v40 = vld [vmem:[#allocation5 + $0x20] sm:$0xff] }
 0x409   : > { %2532 = vst.msk [vmem:[%s10545_s18 + $0x70] sm:$0xff] %vm15351_vm7, %v10910_v10  ;;  %v8068_v50 = vpop.eup %8067  ;;  %v2245_v45 = vor.u32 1.1754944e-38, %v2244_v48  ;;  %v7581_v34 = vld [vmem:[#allocation5 + $0x60] sm:$0xff] }
 0x40a   : > { %15352 = vst [vmem:[#allocation39_spill] sm:$0xff] %v10925_v51  ;;  %v2234_v38 = vmul.f32 %v8068_v50, %v10869_v60  ;;  %v8070_v32 = vpop.eup %8069  ;;  %2705 = vmatmul.bf16.gmra.mxu1 %v15354_v17  ;;  %v10939_v8 = vpop.f32.mrf.mxu1  ;;  %vm2239_vm13 = vweird.f32 %v8068_v50  ;;  %v10966_v60 = vld [vmem:[%s14733_s3] ss:$0 sm:$0xff] }
 0x40b   : > { %2533 = vst.msk [vmem:[%s10545_s18 + $0x78] sm:$0xff] %vm15353_vm5, %v10925_v51  ;;  %7764 = vset.pattern.permute.xlu2 %v15310_v37  ;;  %3085 = vmatmul.bf16.gmra.mxu2 %v15354_v17  ;;  %v10947_v13 = vsel %vm15355_vm6, %v8070_v32, 0.0  ;;  %v10949_v2 = vpop.f32.mrf.mxu3  ;;  %vm2240_vm14 = vmor %vm2238_vm2, %vm2239_vm13  ;;  %v10973_v32 = vld [vmem:[%s14733_s3 + $0x1] ss:$0 sm:$0xff]  ;;  %vm15367_vm6 = vcmp.lt.f32.partialorder %v10348_v31, 1.0  ;;  %v1836_v31 = vsub.f32 %v9046_v26, %v10598_v30 }
 0x40c   : > { %v2235_v35 = vsub.f32 1.0, %v2234_v38  ;;  %2738 = vperm.xlu2 %7764, %v10558_v20   ;;  %3433 = vmatmul.bf16.gmra.mxu3 %v15354_v17  ;;  %v1999_v5 = vsel %vm15356_vm15, %v10947_v13, 0.0  ;;  %v7592_v38 = vld [vmem:[#allocation5 + $0xb8] sm:$0xff]  ;;  %v2642_v17 = vadd.f32 %v10966_v60, %v10689_v33  ;;  %v7583_v33 = vld [vmem:[#allocation5 + $0x70] sm:$0xff]  ;;  %vm15366_vm13 = vmmov %vm15359_vm0 }
 0x40d   : > { %6596 = vmatpush.bf16.msrb.mxu3 %v7592_v38  ;;  %6249 = vmatpush.bf16.msrb.mxu2 %v7583_v33  ;;  %v7582_v38 = vld [vmem:[#allocation5 + $0x68] sm:$0xff]  ;;  %vm15368_vm2 = vmmov %vm15359_vm0 }
 0x40e   : > { %v2236_v36 = vmul.f32 %v8068_v50, %v2235_v35 }
 0x410   : > { %v2237_v11 = vadd.f32 %v8068_v50, %v2236_v36  ;;  %v10984_v36 = vld [vmem:[%s14733_s3 + $0x2] ss:$0 sm:$0xff] }
 0x411   : > { %6250 = vmatpush.bf16.msrb.mxu2 %v7582_v38 }
 0x412   : > { %v2241_v24 = vsel %vm2240_vm14, %v8068_v50, %v2237_v11  ;;  %2000 = vadd.xlane.f32.xlu1 %v1999_v5  ;;  %v10968_v46 = vpop.f32.mrf.mxu1  ;;  %v7576_v50 = vld [vmem:[#allocation5 + $0x38] sm:$0xff]  ;;  %v3022_v11 = vadd.f32 %v10973_v32, %v10693_v19  ;;  %v7575_v5 = vld [vmem:[#allocation5 + $0x30] sm:$0xff]  ;;  %v7574_v19 = vld [vmem:[#allocation5 + $0x28] sm:$0xff] }
 0x413   : > { %v2246_v43 = vsel %vm2243_vm1, %v2245_v45, %v2241_v24  ;;  %v10977_v48 = vpop.f32.mrf.mxu3  ;;  %5868 = vmatpush.bf16.msrb.mxu1 %v7576_v50  ;;  %v15362_v45 = vld [vmem:[#allocation40_spill] sm:$0xff]  ;;  %v7591_v24 = vld [vmem:[#allocation5 + $0xb0] sm:$0xff] }
 0x414   : > { %v10954_v54 = vpop.xlane.xlu2 %1812  ;;  %7768 = vset.pattern.permute.xlu2 %v15041_v4  ;;  %v10958_v47 = vmul.f32 %v2246_v43, %v10495_v55  ;;  %v10975_v55 = vpop.f32.mrf.mxu2  ;;  %15361 = vst [vmem:[#allocation27_spill] sm:$0xff] %v10977_v48  ;;  %v3370_v43 = vadd.f32 %v10984_v36, %v10701_v42  ;;  %6597 = vmatpush.bf16.msrb.mxu3 %v7591_v24 }
 0x415   : > { %15357 = vst [vmem:[#allocation44_spill] sm:$0xff] %v10954_v54  ;;  %v7590_v54 = vld [vmem:[#allocation5 + $0xa8] sm:$0xff]  ;;  %v11000_v42 = vpop.xlane.xlu1 %1809  ;;  %6251 = vmatpush.bf16.msrb.mxu2 %v7581_v34 }
 0x416   : > { %15358 = vst [vmem:[#allocation15_spill] sm:$0xff] %v10958_v47 }
 0x417   : > { %2531 = vst.msk [vmem:[%s10545_s18 + $0x68] sm:$0xff] %vm15359_vm0, %v10958_v47  ;;  %5869 = vmatpush.bf16.msrb.mxu1 %v7575_v5  ;;  %v7580_v5 = vld [vmem:[#allocation5 + $0x58] sm:$0xff]  ;;  %vm15369_vm0 = vcmp.lt.f32.partialorder %v10060_v62, 1.0  ;;  %v1837_v62 = vsub.f32 %v9098_v57, %v10572_v52 }
 0x418   : > { %15360 = vst [vmem:[#allocation29_spill] sm:$0xff] %v10975_v55  ;;  %v1886_v55 = vmul.f32 1.442695, %v1834_v28  ;;  %6598 = vmatpush.bf16.msrb.mxu3 %v7590_v54  ;;  %v15363_v54 = vld [vmem:[#allocation45_spill] sm:$0xff]  ;;  %v7587_v28 = vld [vmem:[#allocation5 + $0x90] sm:$0xff] }
 0x419   : > { %v3103_v35 = vpop.permute.xlu0 %3102  ;;  %6252 = vmatpush.bf16.msrb.mxu2 %v7580_v5  ;;  %v7586_v5 = vld [vmem:[#allocation5 + $0x88] sm:$0xff] }
 0x41a   : > { %2710 = vmatmul.bf16.gmra.mxu1 %v15362_v45  ;;  %v3229_v51 = vmul.f32 %v3103_v35, %v3022_v11  ;;  %v10996_v10 = vpop.f32.mrf.mxu1  ;;  %v7589_v35 = vld [vmem:[#allocation5 + $0xa0] sm:$0xff]  ;;  %8071 = vpow2.f32 %v1886_v55 }
 0x41b   : > { %3090 = vmatmul.bf16.gmra.mxu2 %v15362_v45  ;;  %5870 = vmatpush.bf16.msrb.mxu1 %v7574_v19 }
 0x41c   : > { %v2724_v49 = vpop.permute.xlu2 %2723  ;;  %3122 = vperm.xlu0 %7771, %v10629_v9   ;;  %3438 = vmatmul.bf16.gmra.mxu3 %v15362_v45  ;;  %v10998_v45 = vpop.f32.mrf.mxu2 }
 0x41d   : > { %v2881_v50 = vmul.f32 %v2724_v49, %v2642_v17  ;;  %v11002_v17 = vpop.f32.mrf.mxu3  ;;  %6599 = vmatpush.bf16.msrb.mxu3 %v7589_v35  ;;  %v7578_v35 = vld [vmem:[#allocation5 + $0x48] sm:$0xff] }
 0x41f   : > { %v3261_v58 = vadd.f32 %v3229_v51, %v2881_v50  ;;  %5871 = vmatpush.bf16.msrb.mxu1 %v7573_v40  ;;  %v7579_v50 = vld [vmem:[#allocation5 + $0x50] sm:$0xff] }
 0x420   : > { %v8072_v33 = vpop.eup %8071  ;;  %6253 = vmatpush.bf16.msrb.mxu2 %v7579_v50  ;;  %v7585_v50 = vld [vmem:[#allocation5 + $0x80] sm:$0xff] }
 0x421   : > { %v11022_v19 = vsel %vm15364_vm3, %v8072_v33, 0.0  ;;  %v7569_v33 = vld [vmem:[#allocation5] sm:$0xff] }
 0x422   : > { %v3451_v47 = vpop.permute.xlu0 %3450  ;;  %v2002_v34 = vsel %vm15365_vm12, %v11022_v19, 0.0  ;;  %vm15370_vm12 = vmmov %vm15368_vm2 }
 0x423   : > { %v3577_v48 = vmul.f32 %v3451_v47, %v3370_v43  ;;  %v7572_v47 = vld [vmem:[#allocation5 + $0x18] sm:$0xff]  ;;  %v7571_v43 = vld [vmem:[#allocation5 + $0x10] sm:$0xff] }
 0x424   : > { %7772 = vset.pattern.permute.xlu0 %v15307_v18  ;;  %v11013_v24 = vpop.f32.mrf.mxu2  ;;  %5872 = vmatpush.bf16.msrb.mxu1 %v7572_v47 }
 0x425   : > { %v3609_v49 = vadd.f32 %v3577_v48, %v3261_v58  ;;  %3470 = vperm.xlu0 %7772, %v10629_v9   ;;  %v7588_v58 = vld [vmem:[#allocation5 + $0x98] sm:$0xff]  ;;  %v11010_v48 = vpop.f32.mrf.mxu1  ;;  %v11015_v55 = vpop.f32.mrf.mxu3  ;;  %6254 = vmatpush.bf16.msrb.mxu2 %v7578_v35 }
 0x426   : > { %6600 = vmatpush.bf16.msrb.mxu3 %v7588_v58 }
 0x427   : > { %v11006_v11 = vmul.f32 0.33333334, %v3609_v49  ;;  %v7570_v49 = vld [vmem:[#allocation5 + $0x8] sm:$0xff] }
 0x428   : > { %5873 = vmatpush.bf16.msrb.mxu1 %v7571_v43  ;;  %v7577_v43 = vld [vmem:[#allocation5 + $0x40] sm:$0xff] }
 0x429   : > { %3705 = vmatmul.f32.vlgmr.msrb.gmra.mxu0 %v11006_v11  ;;  %6255 = vmatpush.bf16.msrb.mxu2 %v7577_v43 }
 0x42a   : > { %2715 = vmatmul.bf16.gmra.mxu1 %v15363_v54  ;;  %6601 = vmatpush.bf16.msrb.mxu3 %v7587_v28 }
 0x42b   : > { %3114 = vperm.xlu1 %7765, %v10558_v20   ;;  %3095 = vmatmul.bf16.gmra.mxu2 %v15363_v54 }
 0x42c   : > { %v1992_v51 = vpop.xlane.xlu1 %1991  ;;  %3443 = vmatmul.bf16.gmra.mxu3 %v15363_v54  ;;  %5874 = vmatpush.bf16.msrb.mxu1 %v7570_v49 }
 0x42d   : > { %8073 = vrcp.f32 %v1992_v51  ;;  %7777 = vset.pattern.permute.xlu0 %v15310_v37  ;;  %v2289_v15 = vand.u32 2147483648, %v1992_v51  ;;  %v2287_v54 = vand.u32 2147483647, %v1992_v51  ;;  %vm2283_vm9 = vweird.f32 %v1992_v51  ;;  %v11051_v43 = vpop.f32.mrf.mxu1 }
 0x42e   : > { %6602 = vmatpush.bf16.msrb.mxu3 %v7586_v5 }
 0x42f   : > { %vm2288_vm5 = vcmp.eq.f32.partialorder %v2287_v54, 8.507059e+37 }
 0x430   : > { %5875 = vmatpush.bf16.msrb.mxu1 %v7569_v33  ;;  %v3372_v33 = vadd.f32 %v10984_v36, %v10759_v25  ;;  %v1890_v25 = vmul.f32 1.442695, %v1836_v31  ;;  %v3375_v31 = vadd.f32 %v10984_v36, %v10829_v16 }
 0x432   : > { %6603 = vmatpush.bf16.msrb.mxu3 %v7585_v50  ;;  %v11055_v50 = vpop.f32.mrf.mxu3 }
 0x433   : > { %v8074_v38 = vpop.eup %8073  ;;  %7766 = vset.pattern.permute.xlu1 %v15307_v18 }
 0x434   : > { %v2279_v40 = vmul.f32 %v8074_v38, %v1992_v51  ;;  %3462 = vperm.xlu1 %7766, %v10558_v20   ;;  %vm2284_vm8 = vweird.f32 %v8074_v38  ;;  %v1838_v20 = vsub.f32 %v15200_v23, %v10714_v21  ;;  %v2644_v23 = vadd.f32 %v10966_v60, %v10743_v7 }
 0x435   : > { %2003 = vadd.xlane.f32.xlu2 %v2002_v34  ;;  %vm2285_vm7 = vmor %vm2283_vm9, %vm2284_vm8  ;;  %v2290_v34 = vor.u32 1.1754944e-38, %v2289_v15  ;;  %v3024_v21 = vadd.f32 %v10973_v32, %v10752_v12  ;;  %v11053_v12 = vpop.f32.mrf.mxu2  ;;  %v11066_v26 = vpop.f32.mrf.mxu1 }
 0x436   : > { %v2280_v47 = vsub.f32 1.0, %v2279_v40  ;;  %v1894_v51 = vmul.f32 1.442695, %v1838_v20  ;;  %vm15371_vm8 = vmmov %vm15368_vm2 }
 0x438   : > { %v2281_v58 = vmul.f32 %v8074_v38, %v2280_v47  ;;  %8075 = vpow2.f32 %v1894_v51 }
 0x43a   : > { %v2282_v28 = vadd.f32 %v8074_v38, %v2281_v58 }
 0x43c   : > { %v2286_v40 = vsel %vm2285_vm7, %v8074_v38, %v2282_v28  ;;  %7767 = vset.pattern.permute.xlu1 %v15310_v37 }
 0x43d   : > { %v2291_v49 = vsel %vm2288_vm5, %v2290_v34, %v2286_v40  ;;  %2743 = vperm.xlu1 %7767, %v10686_v53   ;;  %v11068_v30 = vpop.f32.mrf.mxu2 }
 0x43e   : > { %v11033_v35 = vmul.f32 %v2291_v49, %v10562_v61  ;;  %v8076_v38 = vpop.eup %8075 }
 0x43f   : > { %v11044_v61 = vsel %vm15367_vm6, %v8076_v38, 0.0 }
 0x440   : > { %2534 = vst.msk [vmem:[%s10545_s18 + $0x80] sm:$0xff] %vm15366_vm13, %v11033_v35  ;;  %v2014_v7 = vsel %vm15368_vm2, %v11044_v61, 0.0  ;;  %vm15372_vm13 = vcmp.lt.f32.partialorder %v9915_v41, 1.0 }
 0x448   : > { %v2729_v47 = vpop.permute.xlu0 %2728  ;;  %v3107_v5 = vpop.permute.xlu1 %3106 }
 0x449   : > { %v2882_v15 = vmul.f32 %v2729_v47, %v2644_v23  ;;  %v3230_v58 = vmul.f32 %v3107_v5, %v3024_v21  ;;  %v2647_v23 = vadd.f32 %v10966_v60, %v10806_v44  ;;  %v3027_v21 = vadd.f32 %v10973_v32, %v10816_v22  ;;  %v11070_v47 = vpop.f32.mrf.mxu3 }
 0x44b   : > { %v3262_v54 = vadd.f32 %v3230_v58, %v2882_v15 }
 0x44d   : > { %3118 = vperm.xlu2 %7768, %v10686_v53  }
 0x44f   : > { %2015 = vadd.xlane.f32.xlu0 %v2014_v7 }
 0x451   : > { %v3455_v28 = vpop.permute.xlu1 %3454 }
 0x452   : > { %v3578_v20 = vmul.f32 %v3455_v28, %v3372_v33 }
 0x454   : > { %v3610_v34 = vadd.f32 %v3578_v20, %v3262_v54 }
 0x455   : > { %v1995_v40 = vpop.xlane.xlu2 %1994  ;;  %7769 = vset.pattern.permute.xlu2 %v15307_v18 }
 0x456   : > { %8077 = vrcp.f32 %v1995_v40  ;;  %3466 = vperm.xlu2 %7769, %v10686_v53   ;;  %v3642_v49 = vmul.f32 0.33333334, %v3610_v34  ;;  %v2304_v22 = vand.u32 2147483648, %v1995_v40  ;;  %v2302_v28 = vand.u32 2147483647, %v1995_v40 }
 0x457   : > { %8079 = vpow2.f32 %v1890_v25  ;;  %vm2298_vm15 = vweird.f32 %v1995_v40 }
 0x458   : > { %3708 = vmatmul.f32.gmra.mxu0 %v3642_v49  ;;  %v5786_v51 = vpack.c.bf16 %v3642_v49, %v11006_v11  ;;  %v2305_v34 = vor.u32 1.1754944e-38, %v2304_v22  ;;  %vm2303_vm3 = vcmp.eq.f32.partialorder %v2302_v28, 8.507059e+37 }
 0x45a   : > { %5876 = vmatmul.bf16.vlgmr.msrb.gmra.mxu1 %v5786_v51  ;;  %6256 = vmatmul.bf16.vlgmr.msrb.gmra.mxu2 %v5786_v51  ;;  %v2734_v38 = vpop.permute.xlu1 %2733 }
 0x45b   : > { %6604 = vmatmul.bf16.vlgmr.msrb.gmra.mxu3 %v5786_v51  ;;  %v2883_v15 = vmul.f32 %v2734_v38, %v2647_v23 }
 0x45c   : > { %v8078_v53 = vpop.eup %8077 }
 0x45d   : > { %v2294_v5 = vmul.f32 %v8078_v53, %v1995_v40  ;;  %v3111_v11 = vpop.permute.xlu2 %3110  ;;  %v8080_v33 = vpop.eup %8079  ;;  %vm2299_vm14 = vweird.f32 %v8078_v53 }
 0x45e   : > { %v3231_v58 = vmul.f32 %v3111_v11, %v3027_v21  ;;  %7770 = vset.pattern.permute.xlu2 %v15310_v37  ;;  %vm2300_vm1 = vmor %vm2298_vm15, %vm2299_vm14  ;;  %v11079_v25 = vsel %vm15369_vm0, %v8080_v33, 0.0 }
 0x45f   : > { %v2295_v44 = vsub.f32 1.0, %v2294_v5  ;;  %2748 = vperm.xlu2 %7770, %v10629_v9   ;;  %v2008_v21 = vsel %vm15370_vm12, %v11079_v25, 0.0  ;;  %vm15373_vm15 = vmmov %vm15368_vm2 }
 0x460   : > { %v3263_v54 = vadd.f32 %v3231_v58, %v2883_v15  ;;  %vm15374_vm12 = vmmov %vm15368_vm2 }
 0x461   : > { %v2296_v7 = vmul.f32 %v8078_v53, %v2295_v44 }
 0x463   : > { %v2297_v20 = vadd.f32 %v8078_v53, %v2296_v7  ;;  %2763 = vperm.xlu0 %7777, %v10699_v63  }
 0x465   : > { %v3459_v9 = vpop.permute.xlu2 %3458  ;;  %v2301_v49 = vsel %vm2300_vm1, %v8078_v53, %v2297_v20 }
 0x466   : > { %v3579_v51 = vmul.f32 %v3459_v9, %v3375_v31  ;;  %v2306_v23 = vsel %vm2303_vm3, %v2305_v34, %v2301_v49 }
 0x467   : > { %v11084_v16 = vmul.f32 %v2306_v23, %v10652_v56  ;;  %2009 = vadd.xlane.f32.xlu1 %v2008_v21  ;;  %v1892_v56 = vmul.f32 1.442695, %v1837_v62 }
 0x468   : > { %v3611_v40 = vadd.f32 %v3579_v51, %v3263_v54 }
 0x469   : > { %2535 = vst.msk [vmem:[%s10545_s18 + $0x88] sm:$0xff] %vm15371_vm8, %v11084_v16 }
 0x46a   : > { %v11089_v38 = vmul.f32 0.33333334, %v3611_v40  ;;  %v1841_v40 = vsub.f32 %v15245_v14, %v10811_v1 }
 0x46b   : > { %7778 = vset.pattern.permute.xlu0 %v15041_v4 }
 0x46c   : > { %3711 = vmatmul.f32.gmra.mxu0 %v11089_v38  ;;  %3134 = vperm.xlu0 %7778, %v10699_v63  }
 0x473   : > { %v1998_v53 = vpop.xlane.xlu0 %1997 }
 0x474   : > { %8081 = vrcp.f32 %v1998_v53  ;;  %7779 = vset.pattern.permute.xlu0 %v15307_v18  ;;  %v2319_v44 = vand.u32 2147483648, %v1998_v53  ;;  %v2317_v54 = vand.u32 2147483647, %v1998_v53  ;;  %vm2313_vm7 = vweird.f32 %v1998_v53 }
 0x475   : > { %3482 = vperm.xlu0 %7779, %v10699_v63   ;;  %8083 = vpow2.f32 %v1892_v56 }
 0x476   : > { %v2320_v63 = vor.u32 1.1754944e-38, %v2319_v44  ;;  %vm2318_vm6 = vcmp.eq.f32.partialorder %v2317_v54, 8.507059e+37  ;;  %v1900_v44 = vmul.f32 1.442695, %v1841_v40  ;;  %v11148_v40 = vpop.f32.mrf.mxu3 }
 0x47a   : > { %v8082_v5 = vpop.eup %8081 }
 0x47b   : > { %v2309_v11 = vmul.f32 %v8082_v5, %v1998_v53  ;;  %v2007_v15 = vpop.xlane.xlu0 %2006  ;;  %vm2314_vm9 = vweird.f32 %v8082_v5  ;;  %v8084_v57 = vpop.eup %8083 }
 0x47c   : > { %8085 = vrcp.f32 %v2007_v15  ;;  %vm2315_vm5 = vmor %vm2313_vm7, %vm2314_vm9  ;;  %v11102_v28 = vsel %vm15372_vm13, %v8084_v57, 0.0  ;;  %v2364_v51 = vand.u32 2147483648, %v2007_v15  ;;  %v2362_v41 = vand.u32 2147483647, %v2007_v15 }
 0x47d   : > { %v2310_v58 = vsub.f32 1.0, %v2309_v11  ;;  %7786 = vset.pattern.permute.xlu0 %v15310_v37  ;;  %v2011_v23 = vsel %vm15368_vm2, %v11102_v28, 0.0  ;;  %vm2358_vm1 = vweird.f32 %v2007_v15  ;;  %vm15375_vm13 = vmmov %vm15368_vm2 }
 0x47e   : > { %v2365_v62 = vor.u32 1.1754944e-38, %v2364_v51  ;;  %vm2363_vm3 = vcmp.eq.f32.partialorder %v2362_v41, 8.507059e+37  ;;  %v11144_v41 = vpop.f32.mrf.mxu1 }
 0x47f   : > { %v2311_v22 = vmul.f32 %v8082_v5, %v2310_v58 }
 0x480   : > { %2753 = vperm.xlu1 %7767, %v10590_v29  }
 0x481   : > { %v2312_v52 = vadd.f32 %v8082_v5, %v2311_v22 }
 0x482   : > { %v8086_v33 = vpop.eup %8085 }
 0x483   : > { %v2354_v7 = vmul.f32 %v8086_v33, %v2007_v15  ;;  %v2316_v31 = vsel %vm2315_vm5, %v8082_v5, %v2312_v52  ;;  %vm2359_vm14 = vweird.f32 %v8086_v33 }
 0x484   : > { %v2321_v20 = vsel %vm2318_vm6, %v2320_v63, %v2316_v31  ;;  %vm2360_vm0 = vmor %vm2358_vm1, %vm2359_vm14  ;;  %v2739_v31 = vpop.permute.xlu2 %2738 }
 0x485   : > { %v2355_v34 = vsub.f32 1.0, %v2354_v7  ;;  %v2001_v9 = vpop.xlane.xlu1 %2000  ;;  %v11105_v49 = vmul.f32 %v2321_v20, %v10822_v3  ;;  %v2649_v7 = vadd.f32 %v10966_v60, %v10887_v39  ;;  %vm15377_vm6 = vmmov %vm15368_vm2 }
 0x486   : > { %8087 = vrcp.f32 %v2001_v9  ;;  %v2334_v15 = vand.u32 2147483648, %v2001_v9  ;;  %v2332_v14 = vand.u32 2147483647, %v2001_v9  ;;  %vm2328_vm9 = vweird.f32 %v2001_v9 }
 0x487   : > { %v2356_v21 = vmul.f32 %v8086_v33, %v2355_v34  ;;  %2536 = vst.msk [vmem:[%s10545_s18 + $0x90] sm:$0xff] %vm15373_vm15, %v11105_v49  ;;  %8089 = vpow2.f32 %v1900_v44 }
 0x488   : > { %2012 = vadd.xlane.f32.xlu2 %v2011_v23  ;;  %7773 = vset.pattern.permute.xlu1 %v15041_v4  ;;  %vm2333_vm5 = vcmp.eq.f32.partialorder %v2332_v14, 8.507059e+37  ;;  %v3032_v14 = vadd.f32 %v10973_v32, %v10943_v0 }
 0x489   : > { %3126 = vperm.xlu1 %7773, %v10590_v29   ;;  %v2357_v3 = vadd.f32 %v8086_v33, %v2356_v21  ;;  %v15378_v21 = vld [vmem:[#allocation14_spill] sm:$0xff] }
 0x48b   : > { %v2361_v53 = vsel %vm2360_vm0, %v8086_v33, %v2357_v3  ;;  %v11146_v3 = vpop.f32.mrf.mxu2  ;;  %vm15384_vm0 = vmmov %vm15377_vm6 }
 0x48c   : > { %v8088_v56 = vpop.eup %8087  ;;  %v2366_v5 = vsel %vm2363_vm3, %v2365_v62, %v2361_v53  ;;  %v15379_v53 = vld [vmem:[#allocation25_spill] sm:$0xff]  ;;  %vm15385_vm3 = vmmov %vm15384_vm0 }
 0x48d   : > { %v2324_v11 = vmul.f32 %v8088_v56, %v2001_v9  ;;  %v11117_v58 = vmul.f32 %v2366_v5, %v10899_v59  ;;  %vm2329_vm8 = vweird.f32 %v8088_v56  ;;  %v2335_v59 = vor.u32 1.1754944e-38, %v2334_v15  ;;  %v8090_v63 = vpop.eup %8089 }
 0x48e   : > { %vm2330_vm7 = vmor %vm2328_vm9, %vm2329_vm8  ;;  %v11137_v34 = vsel %vm1680_vm10, %v8090_v63, 0.0 }
 0x48f   : > { %v2325_v22 = vsub.f32 1.0, %v2324_v11  ;;  %2539 = vst.msk [vmem:[%s10545_s18 + $0xa8] sm:$0xff] %vm15374_vm12, %v11117_v58  ;;  %v2023_v23 = vsel %vm15377_vm6, %v11137_v34, 0.0  ;;  %vm15394_vm6 = vmmov %vm15384_vm0 }
 0x491   : > { %v2326_v54 = vmul.f32 %v8088_v56, %v2325_v22  ;;  %7774 = vset.pattern.permute.xlu1 %v15307_v18 }
 0x492   : > { %3474 = vperm.xlu1 %7774, %v10590_v29   ;;  %v3029_v29 = vadd.f32 %v10973_v32, %v10893_v27  ;;  %v3377_v27 = vadd.f32 %v10984_v36, %v10904_v6 }
 0x493   : > { %v2327_v1 = vadd.f32 %v8088_v56, %v2326_v54  ;;  %v2652_v54 = vadd.f32 %v10966_v60, %v10939_v8  ;;  %v3123_v8 = vpop.permute.xlu0 %3122 }
 0x495   : > { %v2331_v57 = vsel %vm2330_vm7, %v8088_v56, %v2327_v1  ;;  %v15380_v56 = vld [vmem:[#allocation43_spill] sm:$0xff] }
 0x496   : > { %v2336_v52 = vsel %vm2333_vm5, %v2335_v59, %v2331_v57  ;;  %v1839_v5 = vsub.f32 %v15380_v56, %v15379_v53  ;;  %v11159_v57 = vpop.f32.mrf.mxu1 }
 0x497   : > { %v11125_v33 = vmul.f32 %v2336_v52, %v10947_v13  ;;  %v2884_v13 = vmul.f32 %v2739_v31, %v2649_v7  ;;  %v11161_v52 = vpop.f32.mrf.mxu2  ;;  %v11163_v31 = vpop.f32.mrf.mxu3 }
 0x498   : > { %v1896_v15 = vmul.f32 1.442695, %v1839_v5 }
 0x499   : > { %2537 = vst.msk [vmem:[%s10545_s18 + $0x98] sm:$0xff] %vm15375_vm13, %v11125_v33  ;;  %vm15393_vm13 = vmmov %vm15384_vm0 }
 0x49a   : > { %7780 = vset.pattern.permute.xlu1 %v15310_v37 }
 0x49d   : > { %v3115_v9 = vpop.permute.xlu1 %3114 }
 0x49e   : > { %v3232_v51 = vmul.f32 %v3115_v9, %v3029_v29 }
 0x49f   : > { %2024 = vadd.xlane.f32.xlu0 %v2023_v23  ;;  %v15381_v23 = vld [vmem:[#allocation24_spill] sm:$0xff] }
 0x4a0   : > { %2758 = vperm.xlu2 %7770, %v15378_v21   ;;  %v3264_v39 = vadd.f32 %v3232_v51, %v2884_v13 }
 0x4a6   : > { %v3463_v62 = vpop.permute.xlu1 %3462 }
 0x4a7   : > { %v3580_v11 = vmul.f32 %v3463_v62, %v3377_v27  ;;  %v3380_v27 = vadd.f32 %v10984_v36, %v10949_v2  ;;  %v3471_v2 = vpop.permute.xlu0 %3470 }
 0x4a8   : > { %v2004_v44 = vpop.xlane.xlu2 %2003  ;;  %7775 = vset.pattern.permute.xlu2 %v15041_v4 }
 0x4a9   : > { %8091 = vrcp.f32 %v2004_v44  ;;  %3130 = vperm.xlu2 %7775, %v15378_v21   ;;  %v3612_v22 = vadd.f32 %v3580_v11, %v3264_v39  ;;  %v2349_v9 = vand.u32 2147483648, %v2004_v44  ;;  %v2347_v39 = vand.u32 2147483647, %v2004_v44 }
 0x4aa   : > { %8093 = vpow2.f32 %v1896_v15  ;;  %vm2343_vm2 = vweird.f32 %v2004_v44 }
 0x4ab   : > { %v3644_v6 = vmul.f32 0.33333334, %v3612_v22  ;;  %v2350_v56 = vor.u32 1.1754944e-38, %v2349_v9  ;;  %vm2348_vm15 = vcmp.eq.f32.partialorder %v2347_v39, 8.507059e+37  ;;  %v15382_v22 = vld [vmem:[#allocation58_spill] sm:$0xff] }
 0x4ac   : > { %vm15383_vm1 = vcmp.lt.f32.partialorder %v15382_v22, 1.0 }
 0x4ad   : > { %3714 = vmatmul.f32.gmra.mxu0 %v3644_v6  ;;  %v5787_v1 = vpack.c.bf16 %v3644_v6, %v11089_v38 }
 0x4af   : > { %v8092_v59 = vpop.eup %8091  ;;  %5881 = vmatmul.bf16.gmra.mxu1 %v5787_v1  ;;  %6261 = vmatmul.bf16.gmra.mxu2 %v5787_v1  ;;  %v2744_v7 = vpop.permute.xlu1 %2743 }
 0x4b0   : > { %v2339_v63 = vmul.f32 %v8092_v59, %v2004_v44  ;;  %v3119_v29 = vpop.permute.xlu2 %3118  ;;  %6609 = vmatmul.bf16.gmra.mxu3 %v5787_v1  ;;  %v2885_v20 = vmul.f32 %v2744_v7, %v2652_v54  ;;  %vm2344_vm10 = vweird.f32 %v8092_v59  ;;  %v8094_v62 = vpop.eup %8093  ;;  %v2654_v1 = vadd.f32 %v10966_v60, %v10968_v46  ;;  %v15387_v7 = vld [vmem:[#allocation27_spill] sm:$0xff] }
 0x4b1   : > { %v3233_v0 = vmul.f32 %v3119_v29, %v3032_v14  ;;  %7776 = vset.pattern.permute.xlu2 %v15307_v18  ;;  %vm2345_vm14 = vmor %vm2343_vm2, %vm2344_vm10  ;;  %v11172_v15 = vsel %vm15383_vm1, %v8094_v62, 0.0  ;;  %v3382_v29 = vadd.f32 %v10984_v36, %v15387_v7 }
 0x4b2   : > { %v2340_v38 = vsub.f32 1.0, %v2339_v63  ;;  %3478 = vperm.xlu2 %7776, %v15378_v21   ;;  %v2017_v14 = vsel %vm15384_vm0, %v11172_v15, 0.0  ;;  %vm15397_vm1 = vmmov %vm15384_vm0 }
 0x4b3   : > { %v3265_v13 = vadd.f32 %v3233_v0, %v2885_v20  ;;  %2778 = vperm.xlu0 %7786, %v15381_v23   ;;  %v11191_v0 = vpop.f32.mrf.mxu1  ;;  %v3582_v46 = vmul.f32 %v3471_v2, %v3382_v29 }
 0x4b4   : > { %v2341_v51 = vmul.f32 %v8092_v59, %v2340_v38  ;;  %v11193_v38 = vpop.f32.mrf.mxu2 }
 0x4b6   : > { %v2342_v53 = vadd.f32 %v8092_v59, %v2341_v51  ;;  %v11195_v51 = vpop.f32.mrf.mxu3 }
 0x4b8   : > { %v3467_v5 = vpop.permute.xlu2 %3466  ;;  %v2346_v11 = vsel %vm2345_vm14, %v8092_v59, %v2342_v53  ;;  %v15386_v59 = vld [vmem:[#allocation29_spill] sm:$0xff]  ;;  %v15388_v53 = vld [vmem:[#allocation56_spill] sm:$0xff] }
 0x4b9   : > { %v3581_v21 = vmul.f32 %v3467_v5, %v3380_v27  ;;  %v2351_v6 = vsel %vm2348_vm15, %v2350_v56, %v2346_v11  ;;  %v3034_v63 = vadd.f32 %v10973_v32, %v15386_v59  ;;  %v15389_v56 = vld [vmem:[#allocation46_spill] sm:$0xff] }
 0x4ba   : > { %7783 = vset.pattern.permute.xlu2 %v15310_v37  ;;  %v11176_v54 = vmul.f32 %v2351_v6, %v11022_v19  ;;  %v1840_v5 = vsub.f32 %v15389_v56, %v15388_v53  ;;  %v15395_v56 = vld [vmem:[#allocation54_spill] sm:$0xff] }
 0x4bb   : > { %v3613_v44 = vadd.f32 %v3581_v21, %v3265_v13  ;;  %7787 = vset.pattern.permute.xlu0 %v15041_v4  ;;  %v3234_v9 = vmul.f32 %v3123_v8, %v3034_v63  ;;  %v11201_v6 = vpop.f32.mrf.mxu1 }
 0x4bc   : > { %2538 = vst.msk [vmem:[%s10545_s18 + $0xa0] sm:$0xff] %vm15385_vm3, %v11176_v54  ;;  %2018 = vadd.xlane.f32.xlu1 %v2017_v14  ;;  %3146 = vperm.xlu0 %7787, %v15381_v23   ;;  %v1898_v8 = vmul.f32 1.442695, %v1840_v5  ;;  %v1844_v5 = vsub.f32 %v15395_v56, %v11000_v42 }
 0x4bd   : > { %v3645_v19 = vmul.f32 0.33333334, %v3613_v44  ;;  %v11203_v44 = vpop.f32.mrf.mxu2 }
 0x4be   : > { %v11205_v14 = vpop.f32.mrf.mxu3 }
 0x4bf   : > { %3717 = vmatmul.f32.gmra.mxu0 %v3645_v19 }
 0x4c0   : > { %v2749_v20 = vpop.permute.xlu2 %2748 }
 0x4c1   : > { %v2886_v13 = vmul.f32 %v2749_v20, %v2654_v1 }
 0x4c2   : > { %v2016_v27 = vpop.xlane.xlu0 %2015 }
 0x4c3   : > { %v3266_v39 = vadd.f32 %v3234_v9, %v2886_v13  ;;  %8095 = vrcp.f32 %v2016_v27  ;;  %v2409_v59 = vand.u32 2147483648, %v2016_v27  ;;  %v2407_v63 = vand.u32 2147483647, %v2016_v27 }
 0x4c4   : > { %7788 = vset.pattern.permute.xlu0 %v15307_v18  ;;  %8097 = vpow2.f32 %v1898_v8  ;;  %vm2403_vm8 = vweird.f32 %v2016_v27 }
 0x4c5   : > { %v3614_v62 = vadd.f32 %v3582_v46, %v3266_v39  ;;  %3494 = vperm.xlu0 %7788, %v15381_v23   ;;  %v2410_v7 = vor.u32 1.1754944e-38, %v2409_v59  ;;  %vm2408_vm7 = vcmp.eq.f32.partialorder %v2407_v63, 8.507059e+37  ;;  %v15390_v46 = vld [vmem:[#allocation21_spill] sm:$0xff]  ;;  %v3390_v63 = vadd.f32 %v10984_v36, %v11055_v50 }
 0x4c7   : > { %v3646_v11 = vmul.f32 0.33333334, %v3614_v62  ;;  %v15391_v62 = vld [vmem:[#allocation22_spill] sm:$0xff] }
 0x4c8   : > { %vm15392_vm5 = vcmp.lt.f32.partialorder %v15391_v62, 1.0 }
 0x4c9   : > { %3720 = vmatmul.f32.gmra.mxu0 %v3646_v11  ;;  %v5788_v21 = vpack.c.bf16 %v3646_v11, %v3645_v19  ;;  %v8096_v22 = vpop.eup %8095 }
 0x4ca   : > { %v2399_v2 = vmul.f32 %v8096_v22, %v2016_v27  ;;  %vm2404_vm12 = vweird.f32 %v8096_v22  ;;  %v8098_v20 = vpop.eup %8097 }
 0x4cb   : > { %5886 = vmatmul.bf16.gmra.mxu1 %v5788_v21  ;;  %6266 = vmatmul.bf16.gmra.mxu2 %v5788_v21  ;;  %vm2405_vm9 = vmor %vm2403_vm8, %vm2404_vm12  ;;  %v11214_v53 = vsel %vm15392_vm5, %v8098_v20, 0.0 }
 0x4cc   : > { %6614 = vmatmul.bf16.gmra.mxu3 %v5788_v21  ;;  %v2400_v1 = vsub.f32 1.0, %v2399_v2  ;;  %v2020_v27 = vsel %vm15394_vm6, %v11214_v53, 0.0  ;;  %v3042_v21 = vadd.f32 %v10973_v32, %v11053_v12  ;;  %vm15405_vm5 = vmmov %vm15384_vm0 }
 0x4cd   : > { %7795 = vset.pattern.permute.xlu0 %v15310_v37 }
 0x4ce   : > { %v2401_v23 = vmul.f32 %v8096_v22, %v2400_v1 }
 0x4d0   : > { %v2402_v19 = vadd.f32 %v8096_v22, %v2401_v23 }
 0x4d2   : > { %v2406_v29 = vsel %vm2405_vm9, %v8096_v22, %v2402_v19  ;;  %v1906_v22 = vmul.f32 1.442695, %v1844_v5 }
 0x4d3   : > { %v2411_v9 = vsel %vm2408_vm7, %v2410_v7, %v2406_v29  ;;  %vm15404_vm7 = vmmov %vm15384_vm0 }
 0x4d4   : > { %v11209_v13 = vmul.f32 %v2411_v9, %v11044_v61  ;;  %v2662_v61 = vadd.f32 %v10966_v60, %v11051_v43 }
 0x4d5   : > { %2768 = vperm.xlu1 %7780, %v15390_v46   ;;  %v2764_v39 = vpop.permute.xlu0 %2763 }
 0x4d6   : > { %2542 = vst.msk [vmem:[%s10545_s18 + $0xc0] sm:$0xff] %vm15393_vm13, %v11209_v13  ;;  %v2889_v2 = vmul.f32 %v2764_v39, %v2662_v61 }
 0x4da   : > { %v2010_v11 = vpop.xlane.xlu1 %2009 }
 0x4db   : > { %2021 = vadd.xlane.f32.xlu2 %v2020_v27  ;;  %8099 = vrcp.f32 %v2010_v11  ;;  %v2379_v19 = vand.u32 2147483648, %v2010_v11  ;;  %v2377_v12 = vand.u32 2147483647, %v2010_v11  ;;  %vm2373_vm2 = vweird.f32 %v2010_v11 }
 0x4dc   : > { %8101 = vpow2.f32 %v1906_v22  ;;  %v15398_v22 = vld [vmem:[#allocation48_spill] sm:$0xff] }
 0x4dd   : > { %7781 = vset.pattern.permute.xlu1 %v15041_v4  ;;  %v2380_v62 = vor.u32 1.1754944e-38, %v2379_v19  ;;  %vm2378_vm15 = vcmp.eq.f32.partialorder %v2377_v12, 8.507059e+37 }
 0x4de   : > { %3138 = vperm.xlu1 %7781, %v15390_v46   ;;  %v3135_v8 = vpop.permute.xlu0 %3134 }
 0x4df   : > { %v3237_v1 = vmul.f32 %v3135_v8, %v3042_v21  ;;  %v2657_v8 = vadd.f32 %v10966_v60, %v10996_v10  ;;  %v3385_v10 = vadd.f32 %v10984_v36, %v11002_v17  ;;  %v3039_v17 = vadd.f32 %v10973_v32, %v11013_v24  ;;  %v15402_v24 = vld [vmem:[#allocation26_spill] sm:$0xff] }
 0x4e0   : > { %vm15403_vm9 = vcmp.lt.f32.partialorder %v15402_v24, 1.0 }
 0x4e1   : > { %v8100_v59 = vpop.eup %8099  ;;  %v3269_v23 = vadd.f32 %v3237_v1, %v2889_v2  ;;  %v3037_v2 = vadd.f32 %v10973_v32, %v10998_v45 }
 0x4e2   : > { %v2369_v42 = vmul.f32 %v8100_v59, %v2010_v11  ;;  %vm2374_vm10 = vweird.f32 %v8100_v59  ;;  %v8102_v20 = vpop.eup %8101 }
 0x4e3   : > { %vm2375_vm14 = vmor %vm2373_vm2, %vm2374_vm10  ;;  %v11237_v5 = vsel %vm1683_vm11, %v8102_v20, 0.0  ;;  %v15401_v20 = vld [vmem:[#allocation28_spill] sm:$0xff] }
 0x4e4   : > { %v2370_v43 = vsub.f32 1.0, %v2369_v42 }
 0x4e6   : > { %v2371_v7 = vmul.f32 %v8100_v59, %v2370_v43  ;;  %7782 = vset.pattern.permute.xlu1 %v15307_v18 }
 0x4e7   : > { %3486 = vperm.xlu1 %7782, %v15390_v46   ;;  %v3483_v29 = vpop.permute.xlu0 %3482  ;;  %v2032_v46 = vsel %vm15397_vm1, %v11237_v5, 0.0  ;;  %vm15412_vm1 = vmmov %vm15384_vm0 }
 0x4e8   : > { %v3585_v9 = vmul.f32 %v3483_v29, %v3390_v63  ;;  %v2372_v39 = vadd.f32 %v8100_v59, %v2371_v7 }
 0x4ea   : > { %v11233_v27 = vadd.f32 %v3585_v9, %v3269_v23  ;;  %v2376_v50 = vsel %vm2375_vm14, %v8100_v59, %v2372_v39  ;;  %v15399_v59 = vld [vmem:[#allocation38_spill] sm:$0xff]  ;;  %vm15408_vm14 = vmmov %vm15384_vm0 }
 0x4eb   : > { %v2381_v61 = vsel %vm2378_vm15, %v2380_v62, %v2376_v50  ;;  %v15400_v23 = vld [vmem:[#allocation50_spill] sm:$0xff] }
 0x4ec   : > { %v11240_v21 = vmul.f32 %v2381_v61, %v11079_v25  ;;  %v1842_v42 = vsub.f32 %v15400_v23, %v15399_v59 }
 0x4ee   : > { %2540 = vst.msk [vmem:[%s10545_s18 + $0xb0] sm:$0xff] %vm15384_vm0, %v11240_v21  ;;  %v1902_v7 = vmul.f32 1.442695, %v1842_v42 }
 0x4ef   : > { %2033 = vadd.xlane.f32.xlu0 %v2032_v46  ;;  %7789 = vset.pattern.permute.xlu1 %v15310_v37  ;;  %v2659_v46 = vadd.f32 %v10966_v60, %v11010_v48 }
 0x4f2   : > { %v2754_v11 = vpop.permute.xlu1 %2753 }
 0x4f3   : > { %2773 = vperm.xlu2 %7783, %v15398_v22   ;;  %v2887_v63 = vmul.f32 %v2754_v11, %v2657_v8 }
 0x4fb   : > { %v2013_v25 = vpop.xlane.xlu2 %2012  ;;  %7784 = vset.pattern.permute.xlu2 %v15041_v4  ;;  %v3127_v1 = vpop.permute.xlu1 %3126 }
 0x4fc   : > { %8103 = vrcp.f32 %v2013_v25  ;;  %3142 = vperm.xlu2 %7784, %v15398_v22   ;;  %v3235_v43 = vmul.f32 %v3127_v1, %v3037_v2  ;;  %v2394_v62 = vand.u32 2147483648, %v2013_v25  ;;  %v2392_v61 = vand.u32 2147483647, %v2013_v25 }
 0x4fd   : > { %8105 = vpow2.f32 %v1902_v7  ;;  %vm2388_vm3 = vweird.f32 %v2013_v25 }
 0x4fe   : > { %v3267_v19 = vadd.f32 %v3235_v43, %v2887_v63  ;;  %v2395_v2 = vor.u32 1.1754944e-38, %v2394_v62  ;;  %vm2393_vm8 = vcmp.eq.f32.partialorder %v2392_v61, 8.507059e+37  ;;  %v3387_v43 = vadd.f32 %v10984_v36, %v11015_v55  ;;  %v15406_v55 = vld [vmem:[#allocation49_spill] sm:$0xff] }
 0x502   : > { %v8104_v12 = vpop.eup %8103 }
 0x503   : > { %v2384_v29 = vmul.f32 %v8104_v12, %v2013_v25  ;;  %v2759_v45 = vpop.permute.xlu2 %2758  ;;  %2793 = vperm.xlu0 %7795, %v15401_v20   ;;  %vm2389_vm11 = vweird.f32 %v8104_v12  ;;  %v8106_v59 = vpop.eup %8105 }
 0x504   : > { %7785 = vset.pattern.permute.xlu2 %v15307_v18  ;;  %v3475_v39 = vpop.permute.xlu1 %3474  ;;  %vm2390_vm12 = vmor %vm2388_vm3, %vm2389_vm11  ;;  %v2888_v42 = vmul.f32 %v2759_v45, %v2659_v46  ;;  %v11274_v25 = vsel %vm15403_vm9, %v8106_v59, 0.0 }
 0x505   : > { %v2385_v9 = vsub.f32 1.0, %v2384_v29  ;;  %3490 = vperm.xlu2 %7785, %v15398_v22   ;;  %v3583_v50 = vmul.f32 %v3475_v39, %v3385_v10  ;;  %v2026_v7 = vsel %vm15405_vm5, %v11274_v25, 0.0  ;;  %v15407_v39 = vld [vmem:[#allocation52_spill] sm:$0xff] }
 0x506   : > { %v1843_v62 = vsub.f32 %v15407_v39, %v15406_v55 }
 0x507   : > { %v2386_v56 = vmul.f32 %v8104_v12, %v2385_v9  ;;  %v3615_v11 = vadd.f32 %v3583_v50, %v3267_v19  ;;  %v11281_v19 = vpop.f32.mrf.mxu1 }
 0x509   : > { %v2387_v8 = vadd.f32 %v8104_v12, %v2386_v56  ;;  %v3647_v1 = vmul.f32 0.33333334, %v3615_v11  ;;  %v1904_v11 = vmul.f32 1.442695, %v1843_v62 }
 0x50b   : > { %v3131_v22 = vpop.permute.xlu2 %3130  ;;  %v2391_v23 = vsel %vm2390_vm12, %v8104_v12, %v2387_v8  ;;  %7796 = vset.pattern.permute.xlu0 %v15041_v4  ;;  %3723 = vmatmul.f32.gmra.mxu0 %v3647_v1  ;;  %v11285_v12 = vpop.f32.mrf.mxu2 }
 0x50c   : > { %v3236_v63 = vmul.f32 %v3131_v22, %v3039_v17  ;;  %v2396_v60 = vsel %vm2393_vm8, %v2395_v2, %v2391_v23  ;;  %3158 = vperm.xlu0 %7796, %v15401_v20   ;;  %v11302_v22 = vmul.f32 0.33333334, %v11233_v27  ;;  %v15409_v27 = vld [vmem:[#allocation35_spill] sm:$0xff]  ;;  %vm15413_vm8 = vmmov %vm15412_vm1 }
 0x50d   : > { %7792 = vset.pattern.permute.xlu2 %v15310_v37  ;;  %v11270_v32 = vmul.f32 %v2396_v60, %v11102_v28  ;;  %v11287_v28 = vpop.f32.mrf.mxu3  ;;  %vm15410_vm15 = vcmp.lt.f32.partialorder %v15409_v27, 1.0  ;;  %v11359_v27 = vld [vmem:[%s14733_s3] ss:$0 sm:$0xff] }
 0x50e   : > { %v3268_v48 = vadd.f32 %v3236_v63, %v2888_v42 }
 0x50f   : > { %2541 = vst.msk [vmem:[%s10545_s18 + $0xb8] sm:$0xff] %vm15404_vm7, %v11270_v32  ;;  %v11293_v46 = vpop.f32.mrf.mxu1 }
 0x511   : > { %2027 = vadd.xlane.f32.xlu1 %v2026_v7  ;;  %v15411_v7 = vld [vmem:[#allocation36_spill] sm:$0xff] }
 0x512   : > { %v2025_v10 = vpop.xlane.xlu0 %2024 }
 0x513   : > { %v3479_v29 = vpop.permute.xlu2 %3478  ;;  %8107 = vrcp.f32 %v2025_v10  ;;  %v11295_v17 = vpop.f32.mrf.mxu2  ;;  %vm2448_vm6 = vweird.f32 %v2025_v10 }
 0x514   : > { %v3584_v45 = vmul.f32 %v3479_v29, %v3387_v43  ;;  %7797 = vset.pattern.permute.xlu0 %v15307_v18  ;;  %8109 = vpow2.f32 %v1904_v11  ;;  %v15414_v11 = vld [vmem:[#allocation15_spill] sm:$0xff] }
 0x515   : > { %3506 = vperm.xlu0 %7797, %v15401_v20   ;;  %v11297_v8 = vpop.f32.mrf.mxu3  ;;  %v2454_v20 = vand.u32 2147483648, %v2025_v10 }
 0x516   : > { %v3616_v9 = vadd.f32 %v3584_v45, %v3268_v48 }
 0x517   : > { %v2455_v42 = vor.u32 1.1754944e-38, %v2454_v20 }
 0x518   : > { %v3648_v36 = vmul.f32 0.33333334, %v3616_v9 }
 0x519   : > { %v8108_v50 = vpop.eup %8107 }
 0x51a   : > { %3726 = vmatmul.f32.gmra.mxu0 %v3648_v36  ;;  %v5789_v56 = vpack.c.bf16 %v3648_v36, %v3647_v1  ;;  %v2444_v61 = vmul.f32 %v8108_v50, %v2025_v10  ;;  %vm2449_vm13 = vweird.f32 %v8108_v50  ;;  %v2452_v1 = vand.u32 2147483647, %v2025_v10  ;;  %v8110_v24 = vpop.eup %8109 }
 0x51b   : > { %vm2450_vm10 = vmor %vm2448_vm6, %vm2449_vm13  ;;  %v11315_v43 = vsel %vm15410_vm15, %v8110_v24, 0.0 }
 0x51c   : > { %5891 = vmatmul.bf16.gmra.mxu1 %v5789_v56  ;;  %6271 = vmatmul.bf16.gmra.mxu2 %v5789_v56  ;;  %v2445_v2 = vsub.f32 1.0, %v2444_v61  ;;  %vm2453_vm2 = vcmp.eq.f32.partialorder %v2452_v1, 8.507059e+37  ;;  %v2029_v10 = vsel %vm15412_vm1, %v11315_v43, 0.0  ;;  %vm15417_vm6 = vmmov %vm15412_vm1 }
 0x51d   : > { %6619 = vmatmul.bf16.gmra.mxu3 %v5789_v56  ;;  %7804 = vset.pattern.permute.xlu0 %v15310_v37 }
 0x51e   : > { %v2446_v59 = vmul.f32 %v8108_v50, %v2445_v2  ;;  %2808 = vperm.xlu0 %7804, %v11084_v16  }
 0x520   : > { %v2447_v23 = vadd.f32 %v8108_v50, %v2446_v59 }
 0x522   : > { %3729 = vmatmul.f32.gmra.mxu0 %v11302_v22  ;;  %v2451_v63 = vsel %vm2450_vm10, %v8108_v50, %v2447_v23  ;;  %v15415_v23 = vld [vmem:[#allocation44_spill] sm:$0xff]  ;;  %vm15419_vm10 = vmmov %vm15412_vm1 }
 0x523   : > { %v2456_v60 = vsel %vm2453_vm2, %v2455_v42, %v2451_v63  ;;  %v15416_v42 = vld [vmem:[#allocation57_spill] sm:$0xff] }
 0x524   : > { %v11306_v48 = vmul.f32 %v2456_v60, %v11137_v34  ;;  %v1845_v63 = vsub.f32 %v15416_v42, %v15415_v23  ;;  %v11351_v60 = vld [vmem:[%s14733_s3 + $0x1] ss:$0 sm:$0xff]  ;;  %v2667_v42 = vadd.f32 %v11359_v27, %v11144_v41 }
 0x525   : > { %v11338_v2 = vpop.permute.xlu0 %2778 }
 0x526   : > { %7805 = vset.pattern.permute.xlu0 %v15041_v4  ;;  %2545 = vst.msk [vmem:[%s10545_s18 + $0xd8] sm:$0xff] %vm15408_vm14, %v11306_v48 }
 0x527   : > { %3170 = vperm.xlu0 %7805, %v11084_v16  }
 0x52a   : > { %2783 = vperm.xlu1 %7789, %v15411_v7  }
 0x52e   : > { %2030 = vadd.xlane.f32.xlu2 %v2029_v10  ;;  %v11363_v10 = vpop.f32.mrf.mxu1 }
 0x52f   : > { %7806 = vset.pattern.permute.xlu0 %v15307_v18  ;;  %v2019_v34 = vpop.xlane.xlu1 %2018 }
 0x530   : > { %8111 = vrcp.f32 %v2019_v34  ;;  %3518 = vperm.xlu0 %7806, %v11084_v16   ;;  %v2424_v36 = vand.u32 2147483648, %v2019_v34  ;;  %v2422_v39 = vand.u32 2147483647, %v2019_v34  ;;  %vm2418_vm11 = vweird.f32 %v2019_v34 }
 0x532   : > { %7790 = vset.pattern.permute.xlu1 %v15041_v4  ;;  %v2425_v62 = vor.u32 1.1754944e-38, %v2424_v36  ;;  %vm2423_vm12 = vcmp.eq.f32.partialorder %v2422_v39, 8.507059e+37  ;;  %v11373_v36 = vld [vmem:[%s14733_s3 + $0x2] ss:$0 sm:$0xff] }
 0x533   : > { %3150 = vperm.xlu1 %7790, %v15411_v7  }
 0x536   : > { %v8112_v29 = vpop.eup %8111  ;;  %v11385_v41 = vpop.f32.mrf.mxu1 }
 0x537   : > { %v2414_v45 = vmul.f32 %v8112_v29, %v2019_v34  ;;  %vm2419_vm0 = vweird.f32 %v8112_v29  ;;  %v11365_v34 = vpop.f32.mrf.mxu2 }
 0x538   : > { %7813 = vset.pattern.permute.xlu0 %v15310_v37  ;;  %vm2420_vm3 = vmor %vm2418_vm11, %vm2419_vm0 }
 0x539   : > { %v2415_v9 = vsub.f32 1.0, %v2414_v45  ;;  %2823 = vperm.xlu0 %7813, %v11176_v54   ;;  %v11368_v45 = vpop.f32.mrf.mxu3 }
 0x53b   : > { %v2416_v55 = vmul.f32 %v8112_v29, %v2415_v9  ;;  %7791 = vset.pattern.permute.xlu1 %v15307_v18 }
 0x53c   : > { %3498 = vperm.xlu1 %7791, %v15411_v7   ;;  %v2664_v7 = vadd.f32 %v11359_v27, %v11066_v26 }
 0x53d   : > { %v2417_v16 = vadd.f32 %v8112_v29, %v2416_v55  ;;  %v3392_v55 = vadd.f32 %v11373_v36, %v11070_v47 }
 0x53f   : > { %v2421_v50 = vsel %vm2420_vm3, %v8112_v29, %v2417_v16  ;;  %v1908_v29 = vmul.f32 1.442695, %v1845_v63  ;;  %v3047_v63 = vadd.f32 %v11351_v60, %v11146_v3 }
 0x540   : > { %v2426_v56 = vsel %vm2423_vm12, %v2425_v62, %v2421_v50 }
 0x541   : > { %7814 = vset.pattern.permute.xlu0 %v15041_v4  ;;  %v11330_v61 = vmul.f32 %v2426_v56, %v11172_v15  ;;  %v11344_v15 = vpop.permute.xlu0 %3146 }
 0x542   : > { %3182 = vperm.xlu0 %7814, %v11176_v54  }
 0x543   : > { %2543 = vst.msk [vmem:[%s10545_s18 + $0xc8] sm:$0xff] %vm15413_vm8, %v11330_v61  ;;  %vm15421_vm8 = vmmov %vm15412_vm1 }
 0x544   : > { %7798 = vset.pattern.permute.xlu1 %v15310_v37 }
 0x546   : > { %2788 = vperm.xlu2 %7792, %v15414_v11  }
 0x547   : > { %v2769_v20 = vpop.permute.xlu1 %2768 }
 0x548   : > { %v2890_v16 = vmul.f32 %v2769_v20, %v2664_v7 }
 0x549   : > { %v3495_v47 = vpop.permute.xlu0 %3494 }
 0x54a   : > { %7815 = vset.pattern.permute.xlu0 %v15307_v18 }
 0x54b   : > { %3530 = vperm.xlu0 %7815, %v11176_v54   ;;  %v3044_v54 = vadd.f32 %v11351_v60, %v11068_v30 }
 0x54e   : > { %v2022_v59 = vpop.xlane.xlu2 %2021  ;;  %7793 = vset.pattern.permute.xlu2 %v15041_v4 }
 0x54f   : > { %8113 = vrcp.f32 %v2022_v59  ;;  %3154 = vperm.xlu2 %7793, %v15414_v11   ;;  %v2439_v62 = vand.u32 2147483648, %v2022_v59  ;;  %v2437_v23 = vand.u32 2147483647, %v2022_v59  ;;  %vm2433_vm7 = vweird.f32 %v2022_v59 }
 0x550   : > { %v3139_v1 = vpop.permute.xlu1 %3138  ;;  %8115 = vpow2.f32 %v1908_v29 }
 0x551   : > { %v3238_v26 = vmul.f32 %v3139_v1, %v3044_v54  ;;  %vm2438_vm13 = vcmp.eq.f32.partialorder %v2437_v23, 8.507059e+37  ;;  %v3395_v23 = vadd.f32 %v11373_v36, %v11148_v40 }
 0x553   : > { %7822 = vset.pattern.permute.xlu0 %v15310_v37  ;;  %v3270_v1 = vadd.f32 %v3238_v26, %v2890_v16 }
 0x554   : > { %2838 = vperm.xlu0 %7822, %v11270_v32  }
 0x555   : > { %v8114_v24 = vpop.eup %8113 }
 0x556   : > { %v2429_v30 = vmul.f32 %v8114_v24, %v2022_v59  ;;  %v2774_v9 = vpop.permute.xlu2 %2773  ;;  %vm2434_vm9 = vweird.f32 %v8114_v24  ;;  %v8116_v16 = vpop.eup %8115 }
 0x557   : > { %7794 = vset.pattern.permute.xlu2 %v15307_v18  ;;  %vm2435_vm5 = vmor %vm2433_vm7, %vm2434_vm9  ;;  %v2891_v3 = vmul.f32 %v2774_v9, %v2667_v42  ;;  %v2669_v42 = vadd.f32 %v11359_v27, %v11159_v57 }
 0x558   : > { %v2430_v39 = vsub.f32 1.0, %v2429_v30  ;;  %3502 = vperm.xlu2 %7794, %v15414_v11   ;;  %v2440_v11 = vor.u32 1.1754944e-38, %v2439_v62 }
 0x559   : > { %v3487_v56 = vpop.permute.xlu1 %3486 }
 0x55a   : > { %v2431_v50 = vmul.f32 %v8114_v24, %v2430_v39  ;;  %v3586_v54 = vmul.f32 %v3487_v56, %v3392_v55  ;;  %v11387_v39 = vpop.f32.mrf.mxu2 }
 0x55c   : > { %v2432_v30 = vadd.f32 %v8114_v24, %v2431_v50  ;;  %v3618_v20 = vadd.f32 %v3586_v54, %v3270_v1  ;;  %7823 = vset.pattern.permute.xlu0 %v15041_v4  ;;  %v11389_v50 = vpop.f32.mrf.mxu3  ;;  %v11410_v1 = vsel %vm1684_vm4, %v8116_v16, 0.0  ;;  %v2892_v54 = vmul.f32 %v11338_v2, %v2669_v42 }
 0x55d   : > { %3194 = vperm.xlu0 %7823, %v11270_v32   ;;  %v2035_v40 = vsel %vm15419_vm10, %v11410_v1, 0.0 }
 0x55e   : > { %v3143_v7 = vpop.permute.xlu2 %3142  ;;  %v2436_v29 = vsel %vm2435_vm5, %v8114_v24, %v2432_v30  ;;  %v3650_v55 = vmul.f32 0.33333334, %v3618_v20  ;;  %v3049_v24 = vadd.f32 %v11351_v60, %v11161_v52 }
 0x55f   : > { %v3239_v26 = vmul.f32 %v3143_v7, %v3047_v63  ;;  %v2441_v59 = vsel %vm2438_vm13, %v2440_v11, %v2436_v29  ;;  %v11418_v11 = vpop.f32.mrf.mxu1 }
 0x560   : > { %7801 = vset.pattern.permute.xlu2 %v15310_v37  ;;  %v11393_v62 = vmul.f32 %v2441_v59, %v11214_v53  ;;  %3732 = vmatmul.f32.gmra.mxu0 %v3650_v55  ;;  %v5790_v9 = vpack.c.bf16 %v3650_v55, %v11302_v22  ;;  %v3397_v53 = vadd.f32 %v11373_v36, %v11163_v31 }
 0x561   : > { %v3271_v56 = vadd.f32 %v3239_v26, %v2891_v3  ;;  %2803 = vperm.xlu2 %7801, %v11033_v35   ;;  %v3240_v22 = vmul.f32 %v11344_v15, %v3049_v24 }
 0x562   : > { %2544 = vst.msk [vmem:[%s10545_s18 + $0xd0] sm:$0xff] %vm15417_vm6, %v11393_v62  ;;  %v2034_v63 = vpop.xlane.xlu0 %2033  ;;  %5896 = vmatmul.bf16.gmra.mxu1 %v5790_v9  ;;  %6276 = vmatmul.bf16.gmra.mxu2 %v5790_v9  ;;  %v3588_v31 = vmul.f32 %v3495_v47, %v3397_v53  ;;  %v11420_v20 = vpop.f32.mrf.mxu2  ;;  %vm15422_vm6 = vmmov %vm15412_vm1 }
 0x563   : > { %8117 = vrcp.f32 %v2034_v63  ;;  %6624 = vmatmul.bf16.gmra.mxu3 %v5790_v9  ;;  %v3272_v7 = vadd.f32 %v3240_v22, %v2892_v54  ;;  %v2499_v59 = vand.u32 2147483648, %v2034_v63  ;;  %v2497_v24 = vand.u32 2147483647, %v2034_v63 }
 0x564   : > { %v11423_v3 = vpop.f32.mrf.mxu3  ;;  %vm2493_vm2 = vweird.f32 %v2034_v63  ;;  %v2677_v54 = vadd.f32 %v11359_v27, %v11281_v19  ;;  %v3405_v19 = vadd.f32 %v11373_v36, %v11287_v28 }
 0x565   : > { %7824 = vset.pattern.permute.xlu0 %v15307_v18  ;;  %v3620_v26 = vadd.f32 %v3588_v31, %v3272_v7  ;;  %vm2498_vm15 = vcmp.eq.f32.partialorder %v2497_v24, 8.507059e+37  ;;  %v3057_v31 = vadd.f32 %v11351_v60, %v11285_v12  ;;  %v15420_v7 = vld [vmem:[#allocation39_spill] sm:$0xff] }
 0x566   : > { %v3491_v57 = vpop.permute.xlu2 %3490  ;;  %2036 = vadd.xlane.f32.xlu1 %v2035_v40  ;;  %3542 = vperm.xlu0 %7824, %v11270_v32  }
 0x567   : > { %v3587_v30 = vmul.f32 %v3491_v57, %v3395_v23  ;;  %v3652_v32 = vmul.f32 0.33333334, %v3620_v26  ;;  %v2500_v23 = vor.u32 1.1754944e-38, %v2499_v59  ;;  %v11429_v42 = vpop.f32.mrf.mxu1 }
 0x569   : > { %v3619_v29 = vadd.f32 %v3587_v30, %v3271_v56  ;;  %7802 = vset.pattern.permute.xlu2 %v15041_v4  ;;  %v8118_v15 = vpop.eup %8117 }
 0x56a   : > { %3166 = vperm.xlu2 %7802, %v11033_v35   ;;  %v2489_v2 = vmul.f32 %v8118_v15, %v2034_v63  ;;  %vm2494_vm4 = vweird.f32 %v8118_v15  ;;  %v11431_v53 = vpop.f32.mrf.mxu2 }
 0x56b   : > { %v3651_v47 = vmul.f32 0.33333334, %v3619_v29  ;;  %vm2495_vm14 = vmor %vm2493_vm2, %vm2494_vm4 }
 0x56c   : > { %v2490_v55 = vsub.f32 1.0, %v2489_v2  ;;  %v11433_v22 = vpop.f32.mrf.mxu3 }
 0x56d   : > { %3735 = vmatmul.f32.gmra.mxu0 %v3651_v47  ;;  %v5791_v56 = vpack.c.bf16 %v3652_v32, %v3651_v47 }
 0x56e   : > { %v2491_v16 = vmul.f32 %v8118_v15, %v2490_v55  ;;  %7831 = vset.pattern.permute.xlu0 %v15310_v37 }
 0x56f   : > { %2853 = vperm.xlu0 %7831, %v11393_v62  }
 0x570   : > { %v2492_v9 = vadd.f32 %v8118_v15, %v2491_v16 }
 0x572   : > { %7803 = vset.pattern.permute.xlu2 %v15307_v18  ;;  %5901 = vmatmul.bf16.gmra.mxu1 %v5791_v56  ;;  %v2496_v52 = vsel %vm2495_vm14, %v8118_v15, %v2492_v9 }
 0x573   : > { %6281 = vmatmul.bf16.gmra.mxu2 %v5791_v56  ;;  %6629 = vmatmul.bf16.gmra.mxu3 %v5791_v56  ;;  %v2501_v63 = vsel %vm2498_vm15, %v2500_v23, %v2496_v52  ;;  %vm15424_vm15 = vmmov %vm15412_vm1 }
 0x574   : > { %3514 = vperm.xlu2 %7803, %v11033_v35   ;;  %v11437_v40 = vmul.f32 %v2501_v63, %v11237_v5 }
 0x575   : > { %3738 = vmatmul.f32.gmra.mxu0 %v3652_v32  ;;  %v2794_v57 = vpop.permute.xlu0 %2793 }
 0x576   : > { %2548 = vst.msk [vmem:[%s10545_s18 + $0xf0] sm:$0xff] %vm15412_vm1, %v11437_v40  ;;  %v2895_v5 = vmul.f32 %v2794_v57, %v2677_v54  ;;  %v3052_v54 = vadd.f32 %v11351_v60, %v11193_v38  ;;  %v3400_v38 = vadd.f32 %v11373_v36, %v11195_v51  ;;  %v3071_v51 = vpop.f32.mrf.mxu2 }
 0x577   : > { %7832 = vset.pattern.permute.xlu0 %v15041_v4 }
 0x578   : > { %3206 = vperm.xlu0 %7832, %v11393_v62  }
 0x57c   : > { %7810 = vset.pattern.permute.xlu2 %v15310_v37 }
 0x57d   : > { %2818 = vperm.xlu2 %7810, %v11125_v33  }
 0x57e   : > { %v3159_v35 = vpop.permute.xlu0 %3158 }
 0x57f   : > { %v3243_v30 = vmul.f32 %v3159_v35, %v3057_v31  ;;  %2798 = vperm.xlu1 %7798, %v15420_v7  }
 0x580   : > { %7833 = vset.pattern.permute.xlu0 %v15307_v18 }
 0x581   : > { %v3275_v29 = vadd.f32 %v3243_v30, %v2895_v5  ;;  %3554 = vperm.xlu0 %7833, %v11393_v62  }
 0x584   : > { %v2028_v12 = vpop.xlane.xlu1 %2027 }
 0x585   : > { %7811 = vset.pattern.permute.xlu2 %v15041_v4  ;;  %8119 = vrcp.f32 %v2028_v12  ;;  %v2469_v55 = vand.u32 2147483648, %v2028_v12  ;;  %v2467_v16 = vand.u32 2147483647, %v2028_v12  ;;  %vm2463_vm11 = vweird.f32 %v2028_v12 }
 0x586   : > { %3178 = vperm.xlu2 %7811, %v11125_v33  }
 0x587   : > { %7799 = vset.pattern.permute.xlu1 %v15041_v4  ;;  %v3507_v15 = vpop.permute.xlu0 %3506  ;;  %v2470_v56 = vor.u32 1.1754944e-38, %v2469_v55  ;;  %vm2468_vm12 = vcmp.eq.f32.partialorder %v2467_v16, 8.507059e+37 }
 0x588   : > { %v3591_v26 = vmul.f32 %v3507_v15, %v3405_v19  ;;  %3162 = vperm.xlu1 %7799, %v15420_v7  }
 0x589   : > { %7840 = vset.pattern.permute.xlu0 %v15310_v37 }
 0x58a   : > { %v11460_v2 = vadd.f32 %v3591_v26, %v3275_v29 }
 0x58b   : > { %v8120_v62 = vpop.eup %8119 }
 0x58c   : > { %v2459_v47 = vmul.f32 %v8120_v62, %v2028_v12  ;;  %vm2464_vm0 = vweird.f32 %v8120_v62 }
 0x58d   : > { %vm2465_vm3 = vmor %vm2463_vm11, %vm2464_vm0 }
 0x58e   : > { %7812 = vset.pattern.permute.xlu2 %v15307_v18  ;;  %v2460_v28 = vsub.f32 1.0, %v2459_v47 }
 0x58f   : > { %3526 = vperm.xlu2 %7812, %v11125_v33  }
 0x590   : > { %v2461_v59 = vmul.f32 %v8120_v62, %v2460_v28  ;;  %7800 = vset.pattern.permute.xlu1 %v15307_v18  ;;  %v11465_v32 = vpop.permute.xlu0 %2808 }
 0x591   : > { %3510 = vperm.xlu1 %7800, %v15420_v7  }
 0x592   : > { %v2462_v24 = vadd.f32 %v8120_v62, %v2461_v59  ;;  %v2691_v59 = vpop.f32.mrf.mxu1 }
 0x594   : > { %v2466_v9 = vsel %vm2465_vm3, %v8120_v62, %v2462_v24  ;;  %v3054_v24 = vadd.f32 %v11351_v60, %v11203_v44  ;;  %v2674_v44 = vadd.f32 %v11359_v27, %v11201_v6 }
 0x595   : > { %v2471_v23 = vsel %vm2468_vm12, %v2470_v56, %v2466_v9 }
 0x596   : > { %v11470_v33 = vmul.f32 %v2471_v23, %v11274_v25  ;;  %v2672_v25 = vadd.f32 %v11359_v27, %v11191_v0  ;;  %v2692_v23 = vadd.f32 %v11359_v27, %v2691_v59 }
 0x597   : > { %7819 = vset.pattern.permute.xlu2 %v15310_v37 }
 0x598   : > { %2833 = vperm.xlu2 %7819, %v11240_v21   ;;  %2546 = vst.msk [vmem:[%s10545_s18 + $0xe0] sm:$0xff] %vm15421_vm8, %v11470_v33 }
 0x599   : > { %7807 = vset.pattern.permute.xlu1 %v15310_v37  ;;  %v11477_v52 = vpop.permute.xlu0 %3170 }
 0x59a   : > { %2813 = vperm.xlu1 %7807, %v11105_v49  }
 0x59c   : > { %v2784_v63 = vpop.permute.xlu1 %2783 }
 0x59d   : > { %v2893_v5 = vmul.f32 %v2784_v63, %v2672_v25 }
 0x5a0   : > { %7820 = vset.pattern.permute.xlu2 %v15041_v4 }
 0x5a1   : > { %3190 = vperm.xlu2 %7820, %v11240_v21   ;;  %v2031_v57 = vpop.xlane.xlu2 %2030 }
 0x5a2   : > { %8121 = vrcp.f32 %v2031_v57  ;;  %7808 = vset.pattern.permute.xlu1 %v15041_v4  ;;  %v11487_v31 = vpop.permute.xlu0 %3518  ;;  %v2484_v15 = vand.u32 2147483648, %v2031_v57  ;;  %v2482_v47 = vand.u32 2147483647, %v2031_v57  ;;  %vm2478_vm7 = vweird.f32 %v2031_v57 }
 0x5a3   : > { %3174 = vperm.xlu1 %7808, %v11105_v49  }
 0x5a4   : > { %v2485_v16 = vor.u32 1.1754944e-38, %v2484_v15  ;;  %vm2483_vm13 = vcmp.eq.f32.partialorder %v2482_v47, 8.507059e+37 }
 0x5a5   : > { %v3151_v35 = vpop.permute.xlu1 %3150 }
 0x5a6   : > { %v3241_v30 = vmul.f32 %v3151_v35, %v3052_v54  ;;  %v3402_v35 = vadd.f32 %v11373_v36, %v11205_v14 }
 0x5a8   : > { %v8122_v7 = vpop.eup %8121  ;;  %v3273_v19 = vadd.f32 %v3241_v30, %v2893_v5 }
 0x5a9   : > { %v2474_v29 = vmul.f32 %v8122_v7, %v2031_v57  ;;  %7821 = vset.pattern.permute.xlu2 %v15307_v18  ;;  %v2789_v12 = vpop.permute.xlu2 %2788  ;;  %vm2479_vm9 = vweird.f32 %v8122_v7 }
 0x5aa   : > { %3538 = vperm.xlu2 %7821, %v11240_v21   ;;  %vm2480_vm5 = vmor %vm2478_vm7, %vm2479_vm9 }
 0x5ab   : > { %v2475_v0 = vsub.f32 1.0, %v2474_v29  ;;  %7809 = vset.pattern.permute.xlu1 %v15307_v18  ;;  %v2824_v26 = vpop.permute.xlu0 %2823 }
 0x5ac   : > { %3522 = vperm.xlu1 %7809, %v11105_v49   ;;  %v3072_v49 = vadd.f32 %v11351_v60, %v3071_v51  ;;  %v2901_v30 = vmul.f32 %v2824_v26, %v2692_v23  ;;  %v11535_v23 = vmul.f32 0.33333334, %v11460_v2 }
 0x5ad   : > { %v2476_v62 = vmul.f32 %v8122_v7, %v2475_v0  ;;  %v3419_v0 = vpop.f32.mrf.mxu3 }
 0x5ae   : > { %v3499_v28 = vpop.permute.xlu1 %3498  ;;  %v3420_v14 = vadd.f32 %v11373_v36, %v3419_v0 }
 0x5af   : > { %v2477_v55 = vadd.f32 %v8122_v7, %v2476_v62  ;;  %v3589_v21 = vmul.f32 %v3499_v28, %v3400_v38 }
 0x5b1   : > { %v3155_v56 = vpop.permute.xlu2 %3154  ;;  %v2481_v9 = vsel %vm2480_vm5, %v8122_v7, %v2477_v55  ;;  %v3621_v63 = vadd.f32 %v3589_v21, %v3273_v19  ;;  %v11517_v55 = vpop.f32.mrf.mxu1 }
 0x5b2   : > { %7828 = vset.pattern.permute.xlu2 %v15310_v37  ;;  %v2486_v57 = vsel %vm2483_vm13, %v2485_v16, %v2481_v9  ;;  %v3242_v7 = vmul.f32 %v3155_v56, %v3054_v24  ;;  %v11521_v21 = vpop.f32.mrf.mxu2  ;;  %v11523_v24 = vpop.f32.mrf.mxu0  ;;  %v2682_v56 = vadd.f32 %v11359_v27, %v11363_v10  ;;  %v3062_v9 = vadd.f32 %v11351_v60, %v11365_v34 }
 0x5b3   : > { %2848 = vperm.xlu2 %7828, %v11330_v61   ;;  %v2487_v25 = vmul.f32 %v2486_v57, %v11315_v43  ;;  %v3653_v54 = vmul.f32 0.33333334, %v3621_v63  ;;  %v2894_v43 = vmul.f32 %v2789_v12, %v2674_v44  ;;  %v3410_v34 = vadd.f32 %v11373_v36, %v11368_v45 }
 0x5b4   : > { %7816 = vset.pattern.permute.xlu1 %v15310_v37  ;;  %v3183_v5 = vpop.permute.xlu0 %3182 }
 0x5b5   : > { %2547 = vst.msk [vmem:[%s10545_s18 + $0xe8] sm:$0xff] %vm15422_vm6, %v2487_v25  ;;  %2868 = vperm.xlu0 %7840, %v2487_v25   ;;  %v3249_v29 = vmul.f32 %v3183_v5, %v3072_v49  ;;  %2828 = vperm.xlu1 %7816, %v11117_v58   ;;  %v3274_v38 = vadd.f32 %v3242_v7, %v2894_v43  ;;  %v11525_v51 = vpop.f32.mrf.mxu3 }
 0x5b6   : > { %3741 = vmatmul.f32.gmra.mxu0 %v3653_v54 }
 0x5b7   : > { %v3281_v19 = vadd.f32 %v3249_v29, %v2901_v30 }
 0x5b9   : > { %v3503_v6 = vpop.permute.xlu2 %3502 }
 0x5ba   : > { %v3590_v15 = vmul.f32 %v3503_v6, %v3402_v35 }
 0x5bb   : > { %7829 = vset.pattern.permute.xlu2 %v15041_v4 }
 0x5bc   : > { %v3622_v62 = vadd.f32 %v3590_v15, %v3274_v38  ;;  %3202 = vperm.xlu2 %7829, %v11330_v61  }
 0x5bd   : > { %7841 = vset.pattern.permute.xlu0 %v15041_v4  ;;  %7817 = vset.pattern.permute.xlu1 %v15041_v4  ;;  %v3531_v26 = vpop.permute.xlu0 %3530 }
 0x5be   : > { %3218 = vperm.xlu0 %7841, %v2487_v25   ;;  %v3654_v47 = vmul.f32 0.33333334, %v3622_v62  ;;  %v3597_v12 = vmul.f32 %v3531_v26, %v3420_v14  ;;  %3186 = vperm.xlu1 %7817, %v11117_v58   ;;  %v11583_v26 = vpop.f32.mrf.mxu1 }
 0x5c0   : > { %3744 = vmatmul.f32.gmra.mxu0 %v3654_v47  ;;  %v5792_v28 = vpack.c.bf16 %v3654_v47, %v3653_v54  ;;  %v11519_v59 = vadd.f32 %v3597_v12, %v3281_v19  ;;  %v11587_v47 = vpop.f32.mrf.mxu2  ;;  %v11590_v12 = vpop.f32.mrf.mxu3 }
 0x5c1   : > { %v2804_v16 = vpop.permute.xlu2 %2803 }
 0x5c2   : > { %5906 = vmatmul.bf16.gmra.mxu1 %v5792_v28  ;;  %6286 = vmatmul.bf16.gmra.mxu2 %v5792_v28  ;;  %v2897_v63 = vmul.f32 %v2804_v16, %v2682_v56  ;;  %v3059_v16 = vadd.f32 %v11351_v60, %v11295_v17  ;;  %v3407_v17 = vadd.f32 %v11373_v36, %v11297_v8 }
 0x5c3   : > { %6634 = vmatmul.bf16.gmra.mxu3 %v5792_v28 }
 0x5c4   : > { %7830 = vset.pattern.permute.xlu2 %v15307_v18 }
 0x5c5   : > { %3550 = vperm.xlu2 %7830, %v11330_v61   ;;  %v11540_v61 = vpop.f32.mrf.mxu0 }
 0x5c6   : > { %7842 = vset.pattern.permute.xlu0 %v15307_v18  ;;  %7818 = vset.pattern.permute.xlu1 %v15307_v18  ;;  %v11600_v56 = vpop.f32.mrf.mxu1 }
 0x5c7   : > { %3566 = vperm.xlu0 %7842, %v2487_v25   ;;  %3534 = vperm.xlu1 %7818, %v11117_v58  }
 0x5c8   : > { %3747 = vmatmul.f32.gmra.mxu0 %v11535_v23 }
 0x5c9   : > { %v3167_v49 = vpop.permute.xlu2 %3166 }
 0x5ca   : > { %v3245_v10 = vmul.f32 %v3167_v49, %v3062_v9  ;;  %v2679_v9 = vadd.f32 %v11359_v27, %v11293_v46  ;;  %v11605_v49 = vpop.f32.mrf.mxu2 }
 0x5cc   : > { %v3277_v57 = vadd.f32 %v3245_v10, %v2897_v63  ;;  %v11608_v63 = vpop.f32.mrf.mxu3 }
 0x5cd   : > { %7837 = vset.pattern.permute.xlu2 %v15310_v37  ;;  %v11550_v2 = vpop.f32.mrf.mxu0 }
 0x5ce   : > { %2863 = vperm.xlu2 %7837, %v11470_v33   ;;  %15423 = vst [vmem:[#allocation47_spill] sm:$0xff] %v11550_v2 }
 0x5cf   : > { %7849 = vset.pattern.permute.xlu0 %v15310_v37  ;;  %7825 = vset.pattern.permute.xlu1 %v15310_v37 }
 0x5d0   : > { %3804 = vperm.xlu0 %7849, %v11523_v24   ;;  %2843 = vperm.xlu1 %7825, %v11209_v13  }
 0x5d1   : > { %v3515_v58 = vpop.permute.xlu2 %3514 }
 0x5d2   : > { %v3593_v25 = vmul.f32 %v3515_v58, %v3410_v34  ;;  %v11623_v8 = vpop.f32.mrf.mxu2 }
 0x5d4   : > { %v11552_v44 = vadd.f32 %v3593_v25, %v3277_v57 }
 0x5d5   : > { %v11559_v45 = vpop.f32.mrf.mxu0 }
 0x5d6   : > { %7838 = vset.pattern.permute.xlu2 %v15041_v4 }
 0x5d7   : > { %3214 = vperm.xlu2 %7838, %v11470_v33  }
 0x5d8   : > { %7850 = vset.pattern.permute.xlu0 %v15041_v4  ;;  %7826 = vset.pattern.permute.xlu1 %v15041_v4 }
 0x5d9   : > { %4187 = vperm.xlu0 %7850, %v11523_v24   ;;  %3198 = vperm.xlu1 %7826, %v11209_v13   ;;  %v2037_v54 = vpop.xlane.xlu1 %2036  ;;  %v11612_v10 = vpop.permute.xlu2 %2818 }
 0x5da   : > { %8123 = vrcp.f32 %v2037_v54  ;;  %v2514_v29 = vand.u32 2147483648, %v2037_v54  ;;  %v2512_v19 = vand.u32 2147483647, %v2037_v54  ;;  %vm2508_vm4 = vweird.f32 %v2037_v54 }
 0x5dc   : > { %v2515_v0 = vor.u32 1.1754944e-38, %v2514_v29  ;;  %vm2513_vm14 = vcmp.eq.f32.partialorder %v2512_v19, 8.507059e+37  ;;  %v3064_v29 = vadd.f32 %v11351_v60, %v11387_v39 }
 0x5dd   : > { %v11565_v5 = vpop.f32.mrf.mxu0 }
 0x5de   : > { %v3246_v39 = vmul.f32 %v11477_v52, %v3064_v29  ;;  %v2687_v52 = vadd.f32 %v11359_v27, %v11418_v11 }
 0x5df   : > { %7839 = vset.pattern.permute.xlu2 %v15307_v18 }
 0x5e0   : > { %3562 = vperm.xlu2 %7839, %v11470_v33   ;;  %v8124_v35 = vpop.eup %8123 }
 0x5e1   : > { %7851 = vset.pattern.permute.xlu0 %v15307_v18  ;;  %v2504_v30 = vmul.f32 %v8124_v35, %v2037_v54  ;;  %7827 = vset.pattern.permute.xlu1 %v15307_v18  ;;  %vm2509_vm10 = vweird.f32 %v8124_v35 }
 0x5e2   : > { %4539 = vperm.xlu0 %7851, %v11523_v24   ;;  %3546 = vperm.xlu1 %7827, %v11209_v13   ;;  %vm2510_vm2 = vmor %vm2508_vm4, %vm2509_vm10 }
 0x5e3   : > { %v2505_v7 = vsub.f32 1.0, %v2504_v30 }
 0x5e5   : > { %v2506_v43 = vmul.f32 %v8124_v35, %v2505_v7  ;;  %v11571_v6 = vpop.f32.mrf.mxu0  ;;  %v11626_v7 = vpop.f32.mrf.mxu3 }
 0x5e7   : > { %v2507_v33 = vadd.f32 %v8124_v35, %v2506_v43  ;;  %v3179_v43 = vpop.permute.xlu2 %3178 }
 0x5e8   : > { %7846 = vset.pattern.permute.xlu2 %v15310_v37 }
 0x5e9   : > { %v2511_v38 = vsel %vm2510_vm2, %v8124_v35, %v2507_v33  ;;  %v11620_v35 = vpop.f32.mrf.mxu1  ;;  %v2684_v33 = vadd.f32 %v11359_v27, %v11385_v41 }
 0x5ea   : > { %7863 = vset.pattern.permute.xlu0 %v15310_v37  ;;  %7834 = vset.pattern.permute.xlu1 %v15310_v37  ;;  %v2516_v13 = vsel %vm2513_vm14, %v2515_v0, %v2511_v38  ;;  %v3412_v0 = vadd.f32 %v11373_v36, %v11389_v50 }
 0x5eb   : > { %3829 = vperm.xlu0 %7863, %v11571_v6   ;;  %2858 = vperm.xlu1 %7834, %v11306_v48   ;;  %v2517_v15 = vmul.f32 %v2516_v13, %v11410_v1  ;;  %v2898_v41 = vmul.f32 %v11465_v32, %v2684_v33 }
 0x5ec   : > { %v3594_v50 = vmul.f32 %v11487_v31, %v3412_v0 }
 0x5ed   : > { %2878 = vperm.xlu2 %7846, %v2517_v15   ;;  %2549 = vst.msk [vmem:[%s10545_s18 + $0xf8] sm:$0xff] %vm15424_vm15, %v2517_v15  ;;  %v11580_v62 = vpop.f32.mrf.mxu0  ;;  %v11655_v32 = vpop.f32.mrf.mxu3  ;;  %s8337_s18 = scalar_lea.hbm %s8336_s11, 256 }
 0x5ee   : > { %p8338_p4 = scmp.ne.s32.totalorder %s8336_s11, %s8337_s18  ;;  %p8343_p2 = scmp.lt.s32.totalorder %s8341_s24, %s8337_s18 }
 0x5f0   : > { %p8339_p8 = pnand %p8338_p4, %p8521_p7  ;;  %p8344_p10 = por %p8343_p2, %p8342_p9 }
 0x5f1   : > { %v2799_v14 = vpop.permute.xlu1 %2798 }
 0x5f2   : > { %v2896_v34 = vmul.f32 %v2799_v14, %v2679_v9  ;;  %v3067_v14 = vadd.f32 %v11351_v60, %v11420_v20  ;;  %v3527_v9 = vpop.permute.xlu2 %3526  ;;  %p8340_p11 = pneg %p8339_p8 }
 0x5f3   : > { %7864 = vset.pattern.permute.xlu0 %v15041_v4  ;;  %7835 = vset.pattern.permute.xlu1 %v15041_v4 }
 0x5f4   : > { %4207 = vperm.xlu0 %7864, %v11571_v6   ;;  %3210 = vperm.xlu1 %7835, %v11306_v48   ;;  %p8345_p12 = pnand %p8344_p10, %p8340_p11 }
 0x5f5   : > { %7847 = vset.pattern.permute.xlu2 %v15041_v4  ;;  %v11593_v1 = vpop.f32.mrf.mxu0 }
 0x5f6   : > { %3226 = vperm.xlu2 %7847, %v2517_v15  }
 0x5fa   : > { %v3163_v28 = vpop.permute.xlu1 %3162  ;;  %v11679_v33 = vpop.permute.xlu2 %2833 }
 0x5fb   : > { %v3244_v57 = vmul.f32 %v3163_v28, %v3059_v16  ;;  %v11653_v28 = vpop.f32.mrf.mxu2  ;;  %v3278_v16 = vadd.f32 %v3246_v39, %v2898_v41 }
 0x5fc   : > { %7865 = vset.pattern.permute.xlu0 %v15307_v18  ;;  %7836 = vset.pattern.permute.xlu1 %v15307_v18 }
 0x5fd   : > { %4559 = vperm.xlu0 %7865, %v11571_v6   ;;  %3558 = vperm.xlu1 %7836, %v11306_v48   ;;  %v11614_v25 = vpop.f32.mrf.mxu0  ;;  %v3276_v48 = vadd.f32 %v3244_v57, %v2896_v34  ;;  %v3626_v31 = vadd.f32 %v3594_v50, %v3278_v16 }
 0x5fe   : > { %7848 = vset.pattern.permute.xlu2 %v15307_v18 }
 0x5ff   : > { %3574 = vperm.xlu2 %7848, %v2517_v15   ;;  %v11646_v15 = vpop.f32.mrf.mxu1  ;;  %v3658_v20 = vmul.f32 0.33333334, %v3626_v31 }
 0x602   : > { %v3191_v31 = vpop.permute.xlu2 %3190 }
 0x603   : > { %v3511_v58 = vpop.permute.xlu1 %3510  ;;  %v11675_v29 = vpop.f32.mrf.mxu2 }
 0x604   : > { %v3592_v54 = vmul.f32 %v3511_v58, %v3407_v17  ;;  %v3069_v58 = vadd.f32 %v11351_v60, %v11431_v53  ;;  %v11677_v53 = vpop.f32.mrf.mxu3 }
 0x605   : > { %7871 = vset.pattern.permute.xlu0 %v15310_v37  ;;  %7843 = vset.pattern.permute.xlu1 %v15310_v37  ;;  %v11635_v13 = vpop.f32.mrf.mxu0 }
 0x606   : > { %3844 = vperm.xlu0 %7871, %v11614_v25   ;;  %v3624_v46 = vadd.f32 %v3592_v54, %v3276_v48  ;;  %2873 = vperm.xlu1 %7843, %v11437_v40   ;;  %15425 = vst [vmem:[#allocation51_spill] sm:$0xff] %v11635_v13  ;;  %v3415_v54 = vadd.f32 %v11373_v36, %v11423_v3 }
 0x607   : > { %7855 = vset.pattern.permute.xlu2 %v15310_v37 }
 0x608   : > { %3814 = vperm.xlu2 %7855, %v11550_v2   ;;  %v3656_v30 = vmul.f32 0.33333334, %v3624_v46  ;;  %v11669_v46 = vpop.f32.mrf.mxu1 }
 0x60a   : > { %3750 = vmatmul.f32.gmra.mxu0 %v3656_v30  ;;  %v5793_v19 = vpack.c.bf16 %v3656_v30, %v11535_v23  ;;  %v3657_v23 = vmul.f32 0.33333334, %v11552_v44  ;;  %v2689_v30 = vadd.f32 %v11359_v27, %v11429_v42 }
 0x60c   : > { %5911 = vmatmul.bf16.gmra.mxu1 %v5793_v19  ;;  %6291 = vmatmul.bf16.gmra.mxu2 %v5793_v19  ;;  %v2814_v38 = vpop.permute.xlu1 %2813  ;;  %v5794_v48 = vpack.c.bf16 %v3658_v20, %v3657_v23  ;;  %v2900_v42 = vmul.f32 %v11612_v10, %v2689_v30  ;;  %v11694_v10 = vpop.f32.mrf.mxu3  ;;  %v2694_v30 = vadd.f32 %v11359_v27, %v11517_v55 }
 0x60d   : > { %6639 = vmatmul.bf16.gmra.mxu3 %v5793_v19  ;;  %v11657_v17 = vpop.f32.mrf.mxu0  ;;  %v2899_v57 = vmul.f32 %v2814_v38, %v2687_v52  ;;  %v3248_v19 = vmul.f32 %v3179_v43, %v3069_v58  ;;  %v11692_v52 = vpop.f32.mrf.mxu2  ;;  %v3074_v58 = vadd.f32 %v11351_v60, %v11521_v21 }
 0x60e   : > { %7872 = vset.pattern.permute.xlu0 %v15041_v4  ;;  %7844 = vset.pattern.permute.xlu1 %v15041_v4 }
 0x60f   : > { %4219 = vperm.xlu0 %7872, %v11614_v25   ;;  %3222 = vperm.xlu1 %7844, %v11437_v40   ;;  %v3280_v41 = vadd.f32 %v3248_v19, %v2900_v42  ;;  %v3661_v19 = vmul.f32 0.33333334, %v11519_v59  ;;  %v3425_v59 = vadd.f32 %v11373_v36, %v11590_v12 }
 0x610   : > { %7856 = vset.pattern.permute.xlu2 %v15041_v4 }
 0x611   : > { %4195 = vperm.xlu2 %7856, %v11550_v2  }
 0x612   : > { %3753 = vmatmul.f32.gmra.mxu0 %v3657_v23  ;;  %v11690_v23 = vpop.f32.mrf.mxu1 }
 0x615   : > { %v3175_v44 = vpop.permute.xlu1 %3174  ;;  %v11681_v3 = vpop.f32.mrf.mxu0 }
 0x616   : > { %v3247_v34 = vmul.f32 %v3175_v44, %v3067_v14  ;;  %15426 = vst [vmem:[#allocation16_spill] sm:$0xff] %v11681_v3 }
 0x617   : > { %7873 = vset.pattern.permute.xlu0 %v15307_v18  ;;  %7845 = vset.pattern.permute.xlu1 %v15307_v18 }
 0x618   : > { %4571 = vperm.xlu0 %7873, %v11614_v25   ;;  %v3279_v11 = vadd.f32 %v3247_v34, %v2899_v57  ;;  %3570 = vperm.xlu1 %7845, %v11437_v40   ;;  %v3417_v40 = vadd.f32 %v11373_v36, %v11433_v22  ;;  %v11706_v34 = vpop.f32.mrf.mxu2 }
 0x619   : > { %7857 = vset.pattern.permute.xlu2 %v15307_v18 }
 0x61a   : > { %4547 = vperm.xlu2 %7857, %v11550_v2   ;;  %3756 = vmatmul.f32.gmra.mxu0 %v3658_v20  ;;  %v3596_v39 = vmul.f32 %v3527_v9, %v3417_v40  ;;  %v11697_v9 = vpop.permute.xlu0 %2838  ;;  %v11704_v57 = vpop.f32.mrf.mxu1 }
 0x61b   : > { %v11708_v20 = vpop.f32.mrf.mxu3 }
 0x61c   : > { %5916 = vmatmul.bf16.gmra.mxu1 %v5794_v48  ;;  %6296 = vmatmul.bf16.gmra.mxu2 %v5794_v48  ;;  %v3628_v50 = vadd.f32 %v3596_v39, %v3280_v41 }
 0x61d   : > { %6644 = vmatmul.bf16.gmra.mxu3 %v5794_v48  ;;  %v3539_v48 = vpop.permute.xlu2 %3538 }
 0x61e   : > { %v3523_v0 = vpop.permute.xlu1 %3522  ;;  %v3660_v16 = vmul.f32 0.33333334, %v3628_v50 }
 0x61f   : > { %v3595_v38 = vmul.f32 %v3523_v0, %v3415_v54  ;;  %v3422_v0 = vadd.f32 %v11373_v36, %v11525_v51 }
 0x620   : > { %7879 = vset.pattern.permute.xlu0 %v15310_v37  ;;  %7852 = vset.pattern.permute.xlu1 %v15310_v37  ;;  %v11733_v41 = vpop.f32.mrf.mxu2 }
 0x621   : > { %3859 = vperm.xlu0 %7879, %v11681_v3   ;;  %v3627_v22 = vadd.f32 %v3595_v38, %v3279_v11  ;;  %3809 = vperm.xlu1 %7852, %v11540_v61   ;;  %v3077_v38 = vadd.f32 %v11351_v60, %v11587_v47 }
 0x622   : > { %7861 = vset.pattern.permute.xlu2 %v15041_v4  ;;  %v3195_v54 = vpop.permute.xlu0 %3194  ;;  %v11727_v39 = vpop.f32.mrf.mxu1 }
 0x623   : > { %4203 = vperm.xlu2 %7861, %v11565_v5   ;;  %v3659_v43 = vmul.f32 0.33333334, %v3627_v22  ;;  %v2697_v22 = vadd.f32 %v11359_v27, %v11583_v26  ;;  %v11736_v51 = vpop.f32.mrf.mxu3  ;;  %v3251_v47 = vmul.f32 %v3191_v31, %v3077_v38  ;;  %v3427_v38 = vadd.f32 %v11373_v36, %v11608_v63 }
 0x625   : > { %3759 = vmatmul.f32.gmra.mxu0 %v3659_v43  ;;  %v5795_v44 = vpack.c.bf16 %v3660_v16, %v3659_v43  ;;  %v2903_v12 = vmul.f32 %v11679_v33, %v2697_v22 }
 0x627   : > { %v2829_v14 = vpop.permute.xlu1 %2828  ;;  %v3283_v31 = vadd.f32 %v3251_v47, %v2903_v12  ;;  %v11787_v12 = vld [vmem:[%s14733_s3] ss:$0 sm:$0xff] }
 0x628   : > { %v2902_v42 = vmul.f32 %v2829_v14, %v2694_v30  ;;  %v11739_v14 = vpop.permute.xlu2 %2848  ;;  %v3079_v30 = vadd.f32 %v11351_v60, %v11605_v49 }
 0x629   : > { %7880 = vset.pattern.permute.xlu0 %v15041_v4  ;;  %7853 = vset.pattern.permute.xlu1 %v15041_v4 }
 0x62a   : > { %4231 = vperm.xlu0 %7880, %v11681_v3   ;;  %4191 = vperm.xlu1 %7853, %v11540_v61   ;;  %v3252_v22 = vmul.f32 %v3195_v54, %v3079_v30 }
 0x62b   : > { %7862 = vset.pattern.permute.xlu2 %v15307_v18  ;;  %v11760_v49 = vpop.f32.mrf.mxu3 }
 0x62c   : > { %4555 = vperm.xlu2 %7862, %v11565_v5   ;;  %5921 = vmatmul.bf16.gmra.mxu1 %v5795_v44 }
 0x62d   : > { %6301 = vmatmul.bf16.gmra.mxu2 %v5795_v44  ;;  %6649 = vmatmul.bf16.gmra.mxu3 %v5795_v44  ;;  %v3543_v44 = vpop.permute.xlu0 %3542 }
 0x62e   : > { %3762 = vmatmul.f32.gmra.mxu0 %v3660_v16  ;;  %v3600_v36 = vmul.f32 %v3543_v44, %v3427_v38 }
 0x630   : > { %v3187_v11 = vpop.permute.xlu1 %3186 }
 0x631   : > { %v3250_v21 = vmul.f32 %v3187_v11, %v3074_v58  ;;  %v3599_v11 = vmul.f32 %v3539_v48, %v3425_v59  ;;  %v11753_v48 = vpop.f32.mrf.mxu1 }
 0x632   : > { %7881 = vset.pattern.permute.xlu0 %v15307_v18  ;;  %7854 = vset.pattern.permute.xlu1 %v15307_v18 }
 0x633   : > { %4583 = vperm.xlu0 %7881, %v11681_v3   ;;  %4543 = vperm.xlu1 %7854, %v11540_v61   ;;  %v11718_v40 = vpop.f32.mrf.mxu0  ;;  %v3282_v43 = vadd.f32 %v3250_v21, %v2902_v42  ;;  %v3631_v42 = vadd.f32 %v3599_v11, %v3283_v31  ;;  %v11791_v11 = vpop.f32.mrf.mxu3 }
 0x634   : > { %15427 = vst [vmem:[#allocation55_spill] sm:$0xff] %v11718_v40  ;;  %7869 = vset.pattern.permute.xlu2 %v15041_v4 }
 0x635   : > { %4215 = vperm.xlu2 %7869, %v11593_v1   ;;  %v3663_v63 = vmul.f32 0.33333334, %v3631_v42  ;;  %v2704_v42 = vadd.f32 %v11787_v12, %v11646_v15 }
 0x636   : > { %3765 = vmatmul.f32.gmra.mxu0 %v3661_v19 }
 0x639   : > { %v3535_v55 = vpop.permute.xlu1 %3534  ;;  %v11778_v47 = vpop.f32.mrf.mxu1 }
 0x63a   : > { %v3598_v50 = vmul.f32 %v3535_v55, %v3422_v0  ;;  %v2699_v0 = vadd.f32 %v11359_v27, %v11600_v56  ;;  %v11755_v55 = vpop.f32.mrf.mxu2  ;;  %v3203_v56 = vpop.permute.xlu2 %3202 }
 0x63b   : > { %7887 = vset.pattern.permute.xlu0 %v15310_v37  ;;  %7858 = vset.pattern.permute.xlu1 %v15310_v37 }
 0x63c   : > { %v3630_v16 = vadd.f32 %v3598_v50, %v3282_v43  ;;  %3819 = vperm.xlu1 %7858, %v11559_v45   ;;  %v2904_v27 = vmul.f32 %v11697_v9, %v2699_v0  ;;  %v11772_v50 = vld [vmem:[%s14733_s3 + $0x1] ss:$0 sm:$0xff] }
 0x63d   : > { %v11742_v26 = vpop.f32.mrf.mxu0  ;;  %7870 = vset.pattern.permute.xlu2 %v15307_v18  ;;  %v3082_v9 = vadd.f32 %v11772_v50, %v11623_v8  ;;  %v2702_v8 = vadd.f32 %v11787_v12, %v11620_v35 }
 0x63e   : > { %4567 = vperm.xlu2 %7870, %v11593_v1   ;;  %v3662_v58 = vmul.f32 0.33333334, %v3630_v16  ;;  %v3284_v54 = vadd.f32 %v3252_v22, %v2904_v27 }
 0x640   : > { %3768 = vmatmul.f32.gmra.mxu0 %v3662_v58  ;;  %v5796_v21 = vpack.c.bf16 %v3662_v58, %v3661_v19  ;;  %v11766_v19 = vpop.permute.xlu0 %2853  ;;  %v3632_v59 = vadd.f32 %v3600_v36, %v3284_v54  ;;  %v3084_v58 = vadd.f32 %v11772_v50, %v11653_v28 }
 0x641   : > { %v11813_v15 = vpop.f32.mrf.mxu1 }
 0x642   : > { %5926 = vmatmul.bf16.gmra.mxu1 %v5796_v21  ;;  %6306 = vmatmul.bf16.gmra.mxu2 %v5796_v21  ;;  %v2844_v33 = vpop.permute.xlu1 %2843  ;;  %v11780_v16 = vpop.f32.mrf.mxu2  ;;  %v3664_v44 = vmul.f32 0.33333334, %v3632_v59  ;;  %v3254_v27 = vmul.f32 %v3203_v56, %v3084_v58  ;;  %v2906_v59 = vmul.f32 %v11739_v14, %v2704_v42  ;;  %15429 = vst [vmem:[#allocation17_spill] sm:$0xff] %v11813_v15 }
 0x643   : > { %6654 = vmatmul.bf16.gmra.mxu3 %v5796_v21  ;;  %v3551_v30 = vpop.permute.xlu2 %3550  ;;  %v11800_v21 = vld [vmem:[%s14733_s3 + $0x2] ss:$0 sm:$0xff]  ;;  %v2905_v22 = vmul.f32 %v2844_v33, %v2702_v8  ;;  %v11818_v56 = vpop.f32.mrf.mxu3  ;;  %v3087_v58 = vadd.f32 %v11772_v50, %v11675_v29 }
 0x644   : > { %7859 = vset.pattern.permute.xlu1 %v15041_v4  ;;  %v5797_v31 = vpack.c.bf16 %v3664_v44, %v3663_v63  ;;  %v3430_v35 = vadd.f32 %v11800_v21, %v11626_v7  ;;  %v3432_v28 = vadd.f32 %v11800_v21, %v11655_v32  ;;  %v3286_v33 = vadd.f32 %v3254_v27, %v2906_v59 }
 0x645   : > { %v11758_v60 = vpop.f32.mrf.mxu0  ;;  %4199 = vperm.xlu1 %7859, %v11559_v45   ;;  %15431 = vst [vmem:[#allocation19_spill] sm:$0xff] %v11818_v56 }
 0x646   : > { %15428 = vst [vmem:[#allocation53_spill] sm:$0xff] %v11758_v60  ;;  %3874 = vperm.xlu0 %7887, %v11758_v60   ;;  %7877 = vset.pattern.permute.xlu2 %v15041_v4 }
 0x647   : > { %4227 = vperm.xlu2 %7877, %v11657_v17  }
 0x648   : > { %3771 = vmatmul.f32.gmra.mxu0 %v3663_v63  ;;  %v3207_v0 = vpop.permute.xlu0 %3206 }
 0x649   : > { %v3255_v42 = vmul.f32 %v3207_v0, %v3087_v58 }
 0x64a   : > { %v11815_v32 = vpop.f32.mrf.mxu2 }
 0x64b   : > { %v3199_v43 = vpop.permute.xlu1 %3198  ;;  %15430 = vst [vmem:[#allocation18_spill] sm:$0xff] %v11815_v32 }
 0x64c   : > { %v3253_v38 = vmul.f32 %v3199_v43, %v3082_v9  ;;  %v2864_v9 = vpop.permute.xlu2 %2863 }
 0x64d   : > { %7860 = vset.pattern.permute.xlu1 %v15307_v18 }
 0x64e   : > { %7888 = vset.pattern.permute.xlu0 %v15041_v4  ;;  %4551 = vperm.xlu1 %7860, %v11559_v45   ;;  %v3285_v63 = vadd.f32 %v3253_v38, %v2905_v22  ;;  %v11831_v22 = vpop.f32.mrf.mxu1 }
 0x64f   : > { %4243 = vperm.xlu0 %7888, %v11758_v60   ;;  %7878 = vset.pattern.permute.xlu2 %v15307_v18  ;;  %15432 = vst [vmem:[#allocation20_spill] sm:$0xff] %v11831_v22 }
 0x650   : > { %4579 = vperm.xlu2 %7878, %v11657_v17   ;;  %3774 = vmatmul.f32.gmra.mxu0 %v3664_v44  ;;  %v3602_v44 = vmul.f32 %v3551_v30, %v3432_v28  ;;  %v3555_v8 = vpop.permute.xlu0 %3554 }
 0x652   : > { %5931 = vmatmul.bf16.gmra.mxu1 %v5797_v31  ;;  %6311 = vmatmul.bf16.gmra.mxu2 %v5797_v31  ;;  %v3634_v43 = vadd.f32 %v3602_v44, %v3286_v33  ;;  %v11833_v29 = vpop.f32.mrf.mxu2  ;;  %v3089_v44 = vadd.f32 %v11772_v50, %v11692_v52  ;;  %v3437_v52 = vadd.f32 %v11800_v21, %v11694_v10 }
 0x653   : > { %6659 = vmatmul.bf16.gmra.mxu3 %v5797_v31  ;;  %v2707_v31 = vadd.f32 %v11787_v12, %v11669_v46  ;;  %15433 = vst [vmem:[#allocation32_spill] sm:$0xff] %v11833_v29  ;;  %v3094_v10 = vadd.f32 %v11772_v50, %v11733_v41 }
 0x654   : > { %v3547_v36 = vpop.permute.xlu1 %3546  ;;  %v3666_v38 = vmul.f32 0.33333334, %v3634_v43 }
 0x655   : > { %v3601_v54 = vmul.f32 %v3547_v36, %v3430_v35  ;;  %v3435_v35 = vadd.f32 %v11800_v21, %v11677_v53  ;;  %v2907_v46 = vmul.f32 %v11766_v19, %v2707_v31  ;;  %v11837_v53 = vpop.f32.mrf.mxu3  ;;  %v2709_v19 = vadd.f32 %v11787_v12, %v11690_v23 }
 0x656   : > { %7866 = vset.pattern.permute.xlu1 %v15310_v37  ;;  %15434 = vst [vmem:[#allocation23_spill] sm:$0xff] %v11837_v53  ;;  %v3092_v31 = vadd.f32 %v11772_v50, %v11706_v34 }
 0x657   : > { %7889 = vset.pattern.permute.xlu0 %v15307_v18  ;;  %v3633_v7 = vadd.f32 %v3601_v54, %v3285_v63  ;;  %3834 = vperm.xlu1 %7866, %v11580_v62   ;;  %v3603_v27 = vmul.f32 %v3555_v8, %v3435_v35  ;;  %v3287_v0 = vadd.f32 %v3255_v42, %v2907_v46  ;;  %v3215_v63 = vpop.permute.xlu2 %3214 }
 0x658   : > { %4595 = vperm.xlu0 %7889, %v11758_v60   ;;  %7885 = vset.pattern.permute.xlu2 %v15041_v4  ;;  %v2869_v36 = vpop.permute.xlu0 %2868  ;;  %v2712_v42 = vadd.f32 %v11787_v12, %v11704_v57 }
 0x659   : > { %4239 = vperm.xlu2 %7885, %v11742_v26   ;;  %v3665_v14 = vmul.f32 0.33333334, %v3633_v7  ;;  %v3635_v54 = vadd.f32 %v3603_v27, %v3287_v0  ;;  %v11845_v7 = vpop.f32.mrf.mxu1  ;;  %v3257_v0 = vmul.f32 %v3215_v63, %v3092_v31 }
 0x65a   : > { %15435 = vst [vmem:[#allocation59_spill] sm:$0xff] %v11845_v7 }
 0x65b   : > { %3777 = vmatmul.f32.gmra.mxu0 %v3665_v14  ;;  %v5798_v28 = vpack.c.bf16 %v3666_v38, %v3665_v14  ;;  %v3667_v33 = vmul.f32 0.33333334, %v3635_v54  ;;  %v11848_v14 = vpop.f32.mrf.mxu2 }
 0x65c   : > { %15436 = vst [vmem:[#allocation30_spill] sm:$0xff] %v11848_v14 }
 0x65d   : > { %v2859_v30 = vpop.permute.xlu1 %2858  ;;  %v11850_v43 = vpop.f32.mrf.mxu3 }
 0x65e   : > { %15437 = vst [vmem:[#allocation33_spill] sm:$0xff] %v11850_v43  ;;  %v2908_v23 = vmul.f32 %v2859_v30, %v2709_v19  ;;  %v2909_v30 = vmul.f32 %v2864_v9, %v2712_v42  ;;  %v3442_v19 = vadd.f32 %v11800_v21, %v11736_v51 }
 0x65f   : > { %7867 = vset.pattern.permute.xlu1 %v15041_v4  ;;  %v3563_v35 = vpop.permute.xlu2 %3562 }
 0x660   : > { %7895 = vset.pattern.permute.xlu0 %v15310_v37  ;;  %4211 = vperm.xlu1 %7867, %v11580_v62   ;;  %v3219_v58 = vpop.permute.xlu0 %3218 }
 0x661   : > { %7886 = vset.pattern.permute.xlu2 %v15307_v18  ;;  %v11864_v34 = vpop.f32.mrf.mxu1 }
 0x662   : > { %4591 = vperm.xlu2 %7886, %v11742_v26   ;;  %5936 = vmatmul.bf16.gmra.mxu1 %v5798_v28  ;;  %15438 = vst [vmem:[#allocation34_spill] sm:$0xff] %v11864_v34 }
 0x663   : > { %6316 = vmatmul.bf16.gmra.mxu2 %v5798_v28  ;;  %6664 = vmatmul.bf16.gmra.mxu3 %v5798_v28  ;;  %v3440_v28 = vadd.f32 %v11800_v21, %v11708_v20  ;;  %v11866_v57 = vpop.f32.mrf.mxu2  ;;  %v2714_v20 = vadd.f32 %v11787_v12, %v11727_v39 }
 0x664   : > { %3780 = vmatmul.f32.gmra.mxu0 %v3666_v38  ;;  %15439 = vst [vmem:[#allocation37_spill] sm:$0xff] %v11866_v57 }
 0x665   : > { %v11872_v63 = vpop.f32.mrf.mxu3 }
 0x666   : > { %v3211_v59 = vpop.permute.xlu1 %3210  ;;  %15440 = vst [vmem:[#allocation40_spill] sm:$0xff] %v11872_v63 }
 0x667   : > { %v3256_v8 = vmul.f32 %v3211_v59, %v3089_v44  ;;  %v3605_v59 = vmul.f32 %v3563_v35, %v3440_v28  ;;  %v2910_v35 = vmul.f32 %v2869_v36, %v2714_v20  ;;  %v3097_v36 = vadd.f32 %v11772_v50, %v11755_v55 }
 0x668   : > { %7868 = vset.pattern.permute.xlu1 %v15307_v18  ;;  %v3567_v41 = vpop.permute.xlu0 %3566  ;;  %v3099_v20 = vadd.f32 %v11772_v50, %v11780_v16 }
 0x669   : > { %4563 = vperm.xlu1 %7868, %v11580_v62   ;;  %v3288_v46 = vadd.f32 %v3256_v8, %v2908_v23  ;;  %v3289_v8 = vadd.f32 %v3257_v0, %v2909_v30  ;;  %v3258_v23 = vmul.f32 %v3219_v58, %v3094_v10  ;;  %v3606_v42 = vmul.f32 %v3567_v41, %v3442_v19  ;;  %v11876_v39 = vpop.f32.mrf.mxu1 }
 0x66a   : > { %7893 = vset.pattern.permute.xlu2 %v15041_v4  ;;  %15441 = vst [vmem:[#allocation45_spill] sm:$0xff] %v11876_v39  ;;  %v2717_v10 = vadd.f32 %v11787_v12, %v11753_v48  ;;  %v2719_v48 = vadd.f32 %v11787_v12, %v11778_v47  ;;  %v3447_v41 = vadd.f32 %v11800_v21, %v11791_v11 }
 0x66b   : > { %v3290_v51 = vadd.f32 %v3258_v23, %v2910_v35 }
 0x66c   : > { %3783 = vmatmul.f32.gmra.mxu0 %v3667_v33 }
 0x66d   : > { %v3638_v58 = vadd.f32 %v3606_v42, %v3290_v51 }
 0x66f   : > { %v3559_v38 = vpop.permute.xlu1 %3558 }
 0x670   : > { %v3604_v27 = vmul.f32 %v3559_v38, %v3437_v52  ;;  %v2879_v52 = vpop.permute.xlu2 %2878  ;;  %v3637_v38 = vadd.f32 %v3605_v59, %v3289_v8 }
 0x671   : > { %7874 = vset.pattern.permute.xlu1 %v15310_v37  ;;  %v11888_v30 = vpop.f32.mrf.mxu1  ;;  %v2912_v42 = vmul.f32 %v2879_v52, %v2719_v48 }
 0x672   : > { %v3636_v54 = vadd.f32 %v3604_v27, %v3288_v46  ;;  %3849 = vperm.xlu1 %7874, %v11635_v13   ;;  %v3669_v28 = vmul.f32 0.33333334, %v3637_v38  ;;  %v11878_v46 = vpop.f32.mrf.mxu2  ;;  %15444 = vst [vmem:[#allocation25_spill] sm:$0xff] %v11888_v30 }
 0x673   : > { %15442 = vst [vmem:[#allocation42_spill] sm:$0xff] %v11878_v46 }
 0x674   : > { %v3668_v44 = vmul.f32 0.33333334, %v3636_v54  ;;  %v3670_v54 = vmul.f32 0.33333334, %v3638_v58 }
 0x676   : > { %3786 = vmatmul.f32.gmra.mxu0 %v3668_v44  ;;  %v5799_v31 = vpack.c.bf16 %v3668_v44, %v3667_v33  ;;  %v11880_v33 = vpop.f32.mrf.mxu3  ;;  %v5800_v59 = vpack.c.bf16 %v3670_v54, %v3669_v28  ;;  %v3445_v44 = vadd.f32 %v11800_v21, %v11760_v49 }
 0x677   : > { %15443 = vst [vmem:[#allocation14_spill] sm:$0xff] %v11880_v33 }
 0x678   : > { %5941 = vmatmul.bf16.gmra.mxu1 %v5799_v31  ;;  %6321 = vmatmul.bf16.gmra.mxu2 %v5799_v31  ;;  %v2874_v9 = vpop.permute.xlu1 %2873  ;;  %v3227_v27 = vpop.permute.xlu2 %3226 }
 0x679   : > { %6669 = vmatmul.bf16.gmra.mxu3 %v5799_v31  ;;  %v2911_v23 = vmul.f32 %v2874_v9, %v2717_v10  ;;  %v3260_v50 = vmul.f32 %v3227_v27, %v3099_v20  ;;  %v11906_v58 = vpop.f32.mrf.mxu1 }
 0x67a   : > { %7875 = vset.pattern.permute.xlu1 %v15041_v4  ;;  %v11894_v19 = vpop.f32.mrf.mxu2  ;;  %15448 = vst [vmem:[#allocation29_spill] sm:$0xff] %v11906_v58 }
 0x67b   : > { %4223 = vperm.xlu1 %7875, %v11635_v13   ;;  %15445 = vst [vmem:[#allocation43_spill] sm:$0xff] %v11894_v19  ;;  %v3292_v12 = vadd.f32 %v3260_v50, %v2912_v42  ;;  %v11962_v50 = vpop.permute.xlu0 %3804 }
 0x67e   : > { %3789 = vmatmul.f32.gmra.mxu0 %v3669_v28  ;;  %v11898_v31 = vpop.f32.mrf.mxu3 }
 0x67f   : > { %15447 = vst [vmem:[#allocation58_spill] sm:$0xff] %v11898_v31 }
 0x680   : > { %v3575_v49 = vpop.permute.xlu2 %3574 }
 0x681   : > { %v3223_v0 = vpop.permute.xlu1 %3222  ;;  %v3608_v51 = vmul.f32 %v3575_v49, %v3447_v41  ;;  %v11923_v10 = vpop.f32.mrf.mxu1 }
 0x682   : > { %v3259_v55 = vmul.f32 %v3223_v0, %v3097_v36  ;;  %v11908_v47 = vpop.f32.mrf.mxu2  ;;  %15452 = vst [vmem:[#allocation21_spill] sm:$0xff] %v11923_v10 }
 0x683   : > { %7876 = vset.pattern.permute.xlu1 %v15307_v18  ;;  %15449 = vst [vmem:[#allocation27_spill] sm:$0xff] %v11908_v47  ;;  %v3640_v27 = vadd.f32 %v3608_v51, %v3292_v12  ;;  %v11973_v42 = vpop.permute.xlu0 %4187 }
 0x684   : > { %4575 = vperm.xlu1 %7876, %v11635_v13   ;;  %v3291_v16 = vadd.f32 %v3259_v55, %v2911_v23 }
 0x685   : > { %v3672_v52 = vmul.f32 0.33333334, %v3640_v27 }
 0x686   : > { %3792 = vmatmul.f32.gmra.mxu0 %v3670_v54  ;;  %v11912_v9 = vpop.f32.mrf.mxu3 }
 0x687   : > { %v11896_v8 = vpop.f32.mrf.mxu0  ;;  %15450 = vst [vmem:[#allocation56_spill] sm:$0xff] %v11912_v9 }
 0x688   : > { %15446 = vst [vmem:[#allocation24_spill] sm:$0xff] %v11896_v8  ;;  %5946 = vmatmul.bf16.gmra.mxu1 %v5800_v59  ;;  %6326 = vmatmul.bf16.gmra.mxu2 %v5800_v59 }
 0x689   : > { %6674 = vmatmul.bf16.gmra.mxu3 %v5800_v59 }
 0x68a   : > { %v3571_v38 = vpop.permute.xlu1 %3570  ;;  %v11925_v59 = vpop.f32.mrf.mxu2 }
 0x68b   : > { %v3607_v35 = vmul.f32 %v3571_v38, %v3445_v44  ;;  %15453 = vst [vmem:[#allocation22_spill] sm:$0xff] %v11925_v59 }
 0x68c   : > { %7882 = vset.pattern.permute.xlu1 %v15310_v37 }
 0x68d   : > { %v3639_v28 = vadd.f32 %v3607_v35, %v3291_v16  ;;  %3864 = vperm.xlu1 %7882, %v11718_v40  }
 0x68e   : > { %v11927_v44 = vpop.f32.mrf.mxu3 }
 0x68f   : > { %v11910_v11 = vpop.f32.mrf.mxu0  ;;  %v3671_v21 = vmul.f32 0.33333334, %v3639_v28  ;;  %15454 = vst [vmem:[#allocation54_spill] sm:$0xff] %v11927_v44  ;;  %v12003_v44 = vpop.permute.xlu2 %3814 }
 0x690   : > { %4251 = vperm.xlu2 %7893, %v11910_v11   ;;  %vm3996_vm0 = vcmp.eq.f32.partialorder %v12003_v44, %v11550_v2  ;;  %vm3964_vm9 = vcmp.gt.f32.partialorder %v12003_v44, %v11550_v2 }
 0x691   : > { %3795 = vmatmul.f32.gmra.mxu0 %v3671_v21  ;;  %v5801_v36 = vpack.c.bf16 %v3672_v52, %v3671_v21  ;;  %v11988_v21 = vpop.permute.xlu0 %4539 }
 0x693   : > { %v11915_v0 = vpop.permute.xlu1 %3809 }
 0x695   : > { %7883 = vset.pattern.permute.xlu1 %v15041_v4 }
 0x696   : > { %4235 = vperm.xlu1 %7883, %v11718_v40  }
 0x697   : > { %v11919_v54 = vpop.f32.mrf.mxu0  ;;  %v4196_v56 = vpop.permute.xlu2 %4195 }
 0x698   : > { %15451 = vst [vmem:[#allocation46_spill] sm:$0xff] %v11919_v54  ;;  %7894 = vset.pattern.permute.xlu2 %v15307_v18  ;;  %3889 = vperm.xlu0 %7895, %v11919_v54   ;;  %vm4348_vm1 = vcmp.eq.f32.partialorder %v4196_v56, %v11550_v2  ;;  %vm4316_vm3 = vcmp.gt.f32.partialorder %v4196_v56, %v11550_v2  ;;  %v15470_v56 = vmov 0.0  }
 0x699   : > { %5951 = vmatmul.bf16.gmra.mxu1 %v5801_v36  ;;  %6331 = vmatmul.bf16.gmra.mxu2 %v5801_v36 }
 0x69a   : > { %6679 = vmatmul.bf16.gmra.mxu3 %v5801_v36  ;;  %4603 = vperm.xlu2 %7894, %v11910_v11   ;;  %v12001_v36 = vpop.permute.xlu0 %3829 }
 0x69b   : > { %3798 = vmatmul.f32.gmra.mxu0 %v3672_v52 }
 0x69c   : > { %v11930_v20 = vpop.permute.xlu1 %4191 }
 0x69e   : > { %7884 = vset.pattern.permute.xlu1 %v15307_v18 }
 0x69f   : > { %4587 = vperm.xlu1 %7884, %v11718_v40   ;;  %v4548_v29 = vpop.permute.xlu2 %4547 }
 0x6a0   : > { %7896 = vset.pattern.permute.xlu0 %v15041_v4  ;;  %vm4700_vm11 = vcmp.eq.f32.partialorder %v4548_v29, %v11550_v2  ;;  %vm4668_vm13 = vcmp.gt.f32.partialorder %v4548_v29, %v11550_v2 }
 0x6a1   : > { %4255 = vperm.xlu0 %7896, %v11919_v54  }
 0x6a2   : > { %v11936_v55 = vpop.f32.mrf.mxu0  ;;  %7901 = vset.pattern.permute.xlu2 %v15041_v4  ;;  %v12014_v63 = vpop.permute.xlu0 %4207 }
 0x6a3   : > { %15455 = vst [vmem:[#allocation13_spill] sm:$0xff] %v11936_v55 }
 0x6a5   : > { %v11939_v48 = vpop.permute.xlu1 %4543 }
 0x6a7   : > { %7890 = vset.pattern.permute.xlu1 %v15310_v37  ;;  %v12042_v19 = vpop.permute.xlu2 %4203 }
 0x6a8   : > { %3879 = vperm.xlu1 %7890, %v11896_v8  }
 0x6a9   : > { %7897 = vset.pattern.permute.xlu0 %v15307_v18 }
 0x6aa   : > { %4607 = vperm.xlu0 %7897, %v11919_v54   ;;  %v12026_v47 = vpop.permute.xlu0 %4559 }
 0x6ab   : > { %v11945_v41 = vpop.f32.mrf.mxu0 }
 0x6ac   : > { %4263 = vperm.xlu2 %7901, %v11945_v41  }
 0x6ae   : > { %v11948_v23 = vpop.permute.xlu1 %3819 }
 0x6af   : > { %v12056_v58 = vpop.permute.xlu2 %4555 }
 0x6b0   : > { %7891 = vset.pattern.permute.xlu1 %v15041_v4 }
 0x6b1   : > { %4247 = vperm.xlu1 %7891, %v11896_v8  }
 0x6b2   : > { %7903 = vset.pattern.permute.xlu0 %v15310_v37  ;;  %v12039_v10 = vpop.permute.xlu0 %3844 }
 0x6b3   : > { %v11953_v49 = vpop.f32.mrf.mxu0 }
 0x6b4   : > { %15456 = vst [vmem:[#allocation48_spill] sm:$0xff] %v11953_v49  ;;  %7902 = vset.pattern.permute.xlu2 %v15307_v18  ;;  %3904 = vperm.xlu0 %7903, %v11953_v49  }
 0x6b5   : > { %4615 = vperm.xlu2 %7902, %v11945_v41  }
 0x6b7   : > { %v11958_v38 = vpop.permute.xlu1 %4199  ;;  %v12070_v39 = vpop.permute.xlu2 %4215 }
 0x6b9   : > { %7892 = vset.pattern.permute.xlu1 %v15307_v18 }
 0x6ba   : > { %4599 = vperm.xlu1 %7892, %v11896_v8   ;;  %v12052_v7 = vpop.permute.xlu0 %4219 }
 0x6bc   : > { %7904 = vset.pattern.permute.xlu0 %v15041_v4 }
 0x6bd   : > { %4267 = vperm.xlu0 %7904, %v11953_v49   ;;  %v11966_v16 = vpop.f32.mrf.mxu0  ;;  %7909 = vset.pattern.permute.xlu2 %v15041_v4 }
 0x6be   : > { %15457 = vst [vmem:[#allocation38_spill] sm:$0xff] %v11966_v16 }
 0x6c0   : > { %v11969_v35 = vpop.permute.xlu1 %4551 }
 0x6c2   : > { %7898 = vset.pattern.permute.xlu1 %v15310_v37  ;;  %v12067_v14 = vpop.permute.xlu0 %4571 }
 0x6c3   : > { %3894 = vperm.xlu1 %7898, %v11936_v55  }
 0x6c5   : > { %7905 = vset.pattern.permute.xlu0 %v15307_v18  ;;  %v11976_v51 = vpop.f32.mrf.mxu0 }
 0x6c6   : > { %4619 = vperm.xlu0 %7905, %v11953_v49   ;;  %4275 = vperm.xlu2 %7909, %v11976_v51  }
 0x6c9   : > { %v11980_v28 = vpop.permute.xlu1 %3834 }
 0x6ca   : > { %v12080_v15 = vpop.permute.xlu0 %3859 }
 0x6cb   : > { %7899 = vset.pattern.permute.xlu1 %v15041_v4  ;;  %15465 = vst [vmem:[#allocation15_spill] sm:$0xff] %v12080_v15 }
 0x6cc   : > { %4259 = vperm.xlu1 %7899, %v11936_v55  }
 0x6cd   : > { %v11984_v12 = vpop.f32.mrf.mxu0 }
 0x6ce   : > { %15458 = vst [vmem:[#allocation50_spill] sm:$0xff] %v11984_v12  ;;  %7911 = vset.pattern.permute.xlu0 %v15310_v37  ;;  %7910 = vset.pattern.permute.xlu2 %v15307_v18 }
 0x6cf   : > { %3919 = vperm.xlu0 %7911, %v11984_v12   ;;  %4627 = vperm.xlu2 %7910, %v11976_v51  }
 0x6d2   : > { %v11992_v27 = vpop.permute.xlu1 %4211  ;;  %v12104_v44 = vpop.permute.xlu0 %4231 }
 0x6d3   : > { %15471 = vst [vmem:[#allocation44_spill] sm:$0xff] %v12104_v44 }
 0x6d4   : > { %7900 = vset.pattern.permute.xlu1 %v15307_v18 }
 0x6d5   : > { %4611 = vperm.xlu1 %7900, %v11936_v55  }
 0x6d7   : > { %7912 = vset.pattern.permute.xlu0 %v15041_v4  ;;  %7917 = vset.pattern.permute.xlu2 %v15041_v4 }
 0x6d8   : > { %4279 = vperm.xlu0 %7912, %v11984_v12   ;;  %v11999_v52 = vpop.f32.mrf.mxu0 }
 0x6d9   : > { %15459 = vst [vmem:[#allocation28_spill] sm:$0xff] %v11999_v52 }
 0x6da   : > { %v12121_v44 = vpop.permute.xlu0 %4583 }
 0x6db   : > { %v12005_v31 = vpop.permute.xlu1 %4563 }
 0x6dd   : > { %7906 = vset.pattern.permute.xlu1 %v15310_v37 }
 0x6de   : > { %3909 = vperm.xlu1 %7906, %v11966_v16  }
 0x6e0   : > { %7913 = vset.pattern.permute.xlu0 %v15307_v18 }
 0x6e1   : > { %4631 = vperm.xlu0 %7913, %v11984_v12   ;;  %v12011_v33 = vpop.f32.mrf.mxu0  ;;  %v15466_v12 = vld [vmem:[#allocation31_spill] sm:$0xff] }
 0x6e2   : > { %15460 = vst [vmem:[#allocation26_spill] sm:$0xff] %v12011_v33  ;;  %4287 = vperm.xlu2 %7917, %v12011_v33   ;;  %vm15467_vm12 = vcmp.gt.s32.totalorder %v15466_v12, 1  ;;  %vm15468_vm7 = vcmp.gt.s32.totalorder %v15466_v12, 0  ;;  %vm15469_vm6 = vcmp.gt.s32.totalorder %v15466_v12, 2 }
 0x6e3   : > { %vm4380_vm8 = vmand %vm4348_vm1, %vm15467_vm12  ;;  %vm4346_vm1 = vcmp.eq.f32.partialorder %v11973_v42, %v11523_v24 }
 0x6e4   : > { %v12016_v43 = vpop.permute.xlu1 %3849  ;;  %vm4028_vm5 = vmand %vm3996_vm0, %vm15468_vm7  ;;  %vm3994_vm0 = vcmp.eq.f32.partialorder %v11962_v50, %v11523_v24 }
 0x6e5   : > { %vm4732_vm10 = vmand %vm4700_vm11, %vm15469_vm6  ;;  %vm4698_vm11 = vcmp.eq.f32.partialorder %v11988_v21, %v11523_v24 }
 0x6e6   : > { %7907 = vset.pattern.permute.xlu1 %v15041_v4  ;;  %vm4412_vm4 = vmor %vm4316_vm3, %vm4380_vm8  ;;  %vm4314_vm3 = vcmp.gt.f32.partialorder %v11973_v42, %v11523_v24 }
 0x6e7   : > { %4271 = vperm.xlu1 %7907, %v11966_v16   ;;  %vm4060_vm2 = vmor %vm3964_vm9, %vm4028_vm5  ;;  %vm3962_vm9 = vcmp.gt.f32.partialorder %v11962_v50, %v11523_v24 }
 0x6e8   : > { %vm4764_vm14 = vmor %vm4668_vm13, %vm4732_vm10  ;;  %v7349_v49 = vsel %vm4060_vm2, 1.0, %v15470_v56  ;;  %vm4666_vm13 = vcmp.gt.f32.partialorder %v11988_v21, %v11523_v24  ;;  %v12154_v21 = vpop.permute.xlu0 %3874 }
 0x6e9   : > { %7919 = vset.pattern.permute.xlu0 %v15310_v37  ;;  %v12021_v9 = vpop.f32.mrf.mxu0  ;;  %v7413_v29 = vsel %vm4764_vm14, 1.0, %v15470_v56  ;;  %vm4378_vm8 = vmand %vm4346_vm1, %vm15467_vm12  ;;  %vm4317_vm12 = vcmp.gt.f32.partialorder %v11958_v38, %v11559_v45 }
 0x6ea   : > { %15461 = vst [vmem:[#allocation49_spill] sm:$0xff] %v12021_v9  ;;  %7918 = vset.pattern.permute.xlu2 %v15307_v18  ;;  %3934 = vperm.xlu0 %7919, %v12021_v9   ;;  %vm4026_vm5 = vmand %vm3994_vm0, %vm15468_vm7  ;;  %vm4349_vm0 = vcmp.eq.f32.partialorder %v11958_v38, %v11559_v45  ;;  %vm3965_vm7 = vcmp.gt.f32.partialorder %v11948_v23, %v11559_v45 }
 0x6eb   : > { %4639 = vperm.xlu2 %7918, %v12011_v33   ;;  %vm4730_vm10 = vmand %vm4698_vm11, %vm15469_vm6  ;;  %vm3997_vm11 = vcmp.eq.f32.partialorder %v11948_v23, %v11559_v45  ;;  %vm4669_vm6 = vcmp.gt.f32.partialorder %v11969_v35, %v11559_v45 }
 0x6ec   : > { %vm4410_vm2 = vmor %vm4314_vm3, %vm4378_vm8  ;;  %vm4701_vm3 = vcmp.eq.f32.partialorder %v11969_v35, %v11559_v45  ;;  %vm15475_vm8 = vcmp.gt.s32.totalorder %v15466_v12, 1 }
 0x6ed   : > { %v12028_v53 = vpop.permute.xlu1 %4223  ;;  %vm4058_vm14 = vmor %vm3962_vm9, %vm4026_vm5  ;;  %v7379_v50 = vsel %vm4410_vm2, 1.0, %v15470_v56  ;;  %vm15476_vm5 = vcmp.gt.s32.totalorder %v15466_v12, 0 }
 0x6ee   : > { %vm4762_vm1 = vmor %vm4666_vm13, %vm4730_vm10  ;;  %vm15477_vm10 = vcmp.gt.s32.totalorder %v15466_v12, 2 }
 0x6ef   : > { %7908 = vset.pattern.permute.xlu1 %v15307_v18  ;;  %vm4381_vm9 = vmand %vm4349_vm0, %vm15475_vm8  ;;  %vm4352_vm0 = vcmp.eq.f32.partialorder %v11992_v27, %v11580_v62  ;;  %vm4320_vm8 = vcmp.gt.f32.partialorder %v11992_v27, %v11580_v62 }
 0x6f0   : > { %4623 = vperm.xlu1 %7908, %v11966_v16   ;;  %vm4029_vm13 = vmand %vm3997_vm11, %vm15476_vm5  ;;  %vm4000_vm11 = vcmp.eq.f32.partialorder %v11980_v28, %v11580_v62  ;;  %v12189_v35 = vpop.permute.xlu0 %4243  ;;  %vm3968_vm5 = vcmp.gt.f32.partialorder %v11980_v28, %v11580_v62 }
 0x6f1   : > { %vm4413_vm2 = vmor %vm4317_vm12, %vm4381_vm9  ;;  %15478 = vst [vmem:[#allocation39_spill] sm:$0xff] %v12189_v35  ;;  %vm15479_vm9 = vcmp.gt.s32.totalorder %v15466_v12, 1 }
 0x6f2   : > { %7920 = vset.pattern.permute.xlu0 %v15041_v4  ;;  %v7382_v23 = vsel %vm4413_vm2, 1.0, %v15470_v56 }
 0x6f3   : > { %4291 = vperm.xlu0 %7920, %v12021_v9   ;;  %v12034_v22 = vpop.f32.mrf.mxu0  ;;  %7925 = vset.pattern.permute.xlu2 %v15041_v4 }
 0x6f4   : > { %15462 = vst [vmem:[#allocation52_spill] sm:$0xff] %v12034_v22 }
 0x6f6   : > { %v12037_v59 = vpop.permute.xlu1 %4575 }
 0x6f8   : > { %7914 = vset.pattern.permute.xlu1 %v15310_v37 }
 0x6f9   : > { %3924 = vperm.xlu1 %7914, %v11999_v52  }
 0x6fb   : > { %7921 = vset.pattern.permute.xlu0 %v15307_v18  ;;  %v12046_v30 = vpop.f32.mrf.mxu0 }
 0x6fc   : > { %15463 = vst [vmem:[#allocation35_spill] sm:$0xff] %v12046_v30  ;;  %4643 = vperm.xlu0 %7921, %v12021_v9   ;;  %4299 = vperm.xlu2 %7925, %v12046_v30   ;;  %v12086_v9 = vpop.permute.xlu2 %4567 }
 0x6ff   : > { %v12050_v46 = vpop.permute.xlu1 %3864 }
 0x701   : > { %7915 = vset.pattern.permute.xlu1 %v15041_v4 }
 0x702   : > { %4283 = vperm.xlu1 %7915, %v11999_v52  }
 0x703   : > { %v12058_v57 = vpop.f32.mrf.mxu0 }
 0x704   : > { %15464 = vst [vmem:[#allocation36_spill] sm:$0xff] %v12058_v57  ;;  %7927 = vset.pattern.permute.xlu0 %v15310_v37  ;;  %7926 = vset.pattern.permute.xlu2 %v15307_v18  ;;  %v12108_v54 = vpop.permute.xlu2 %4227 }
 0x705   : > { %3949 = vperm.xlu0 %7927, %v12058_v57   ;;  %4651 = vperm.xlu2 %7926, %v12046_v30  }
 0x708   : > { %v12064_v34 = vpop.permute.xlu1 %4235 }
 0x70a   : > { %7916 = vset.pattern.permute.xlu1 %v15307_v18 }
 0x70b   : > { %4635 = vperm.xlu1 %7916, %v11999_v52  }
 0x70d   : > { %7928 = vset.pattern.permute.xlu0 %v15041_v4  ;;  %7933 = vset.pattern.permute.xlu2 %v15310_v37 }
 0x70e   : > { %4303 = vperm.xlu0 %7928, %v12058_v57  }
 0x711   : > { %v12075_v32 = vpop.permute.xlu1 %4587 }
 0x713   : > { %7922 = vset.pattern.permute.xlu1 %v15310_v37 }
 0x714   : > { %3939 = vperm.xlu1 %7922, %v12034_v22  }
 0x716   : > { %7929 = vset.pattern.permute.xlu0 %v15307_v18 }
 0x717   : > { %4655 = vperm.xlu0 %7929, %v12058_v57   ;;  %v7381_v57 = vsel %vm4412_vm4, 1.0, %v15470_v56  ;;  %vm15473_vm4 = vcmask 23552  }
 0x718   : > { %v4508_v60 = vadd.f32 %v7381_v57, %v7349_v49  ;;  %v12132_v57 = vpop.permute.xlu2 %4579 }
 0x71a   : > { %v12099_v52 = vpop.permute.xlu1 %3879  ;;  %v12112_v3 = vadd.f32 %v7413_v29, %v4508_v60  ;;  %v12145_v29 = vpop.f32.mrf.mxu0 }
 0x71b   : > { %15474 = vst [vmem:[#allocation41_spill] sm:$0xff] %v12145_v29 }
 0x71c   : > { %7923 = vset.pattern.permute.xlu1 %v15041_v4  ;;  %15472 = vst [vmem:[#allocation57_spill] sm:$0xff] %v12112_v3  ;;  %vm14886_vm15 = vcmp.lt.f32.partialorder %v12112_v3, 1.0 }
 0x71d   : > { %4295 = vperm.xlu1 %7923, %v12034_v22   ;;  %v4924_v60 = vsel %vm14886_vm15, %v11550_v2, -inf }
 0x71e   : > { %v4960_v42 = vsel %vm15473_vm4, %v4924_v60, -inf  ;;  %v7347_v60 = vsel %vm4058_vm14, 1.0, %v15470_v56  ;;  %vm4733_vm4 = vmand %vm4701_vm3, %vm15477_vm10  ;;  %vm4704_vm3 = vcmp.eq.f32.partialorder %v12005_v31, %v11580_v62  ;;  %vm4672_vm10 = vcmp.gt.f32.partialorder %v12005_v31, %v11580_v62 }
 0x71f   : > { %vm4061_vm14 = vmor %vm3965_vm7, %vm4029_vm13  ;;  %vm15480_vm13 = vcmp.gt.s32.totalorder %v15466_v12, 0 }
 0x720   : > { %v12168_v3 = vpop.permute.xlu2 %4239  ;;  %vm4384_vm7 = vmand %vm4352_vm0, %vm15479_vm9  ;;  %vm15483_vm9 = vcmask 23552  }
 0x723   : > { %v12110_v15 = vpop.permute.xlu1 %4247 }
 0x725   : > { %7924 = vset.pattern.permute.xlu1 %v15307_v18 }
 0x726   : > { %4647 = vperm.xlu1 %7924, %v12034_v22   ;;  %v4506_v22 = vadd.f32 %v7379_v50, %v7347_v60 }
 0x728   : > { %v12211_v28 = vpop.permute.xlu2 %4591 }
 0x72c   : > { %v12138_v49 = vpop.permute.xlu1 %4599 }
 0x72e   : > { %7930 = vset.pattern.permute.xlu1 %v15310_v37  ;;  %4961 = vmax.xlane.f32.xlu2 %v4960_v42  ;;  %v7411_v42 = vsel %vm4762_vm1, 1.0, %v15470_v56  ;;  %vm4765_vm1 = vmor %vm4669_vm6, %vm4733_vm4  ;;  %vm15481_vm4 = vcmp.gt.s32.totalorder %v15466_v12, 2 }
 0x72f   : > { %3954 = vperm.xlu1 %7930, %v12145_v29   ;;  %v12176_v2 = vadd.f32 %v7411_v42, %v4506_v22  ;;  %v7350_v22 = vsel %vm4061_vm14, 1.0, %v15470_v56  ;;  %v7414_v50 = vsel %vm4765_vm1, 1.0, %v15470_v56  ;;  %vm4032_vm6 = vmand %vm4000_vm11, %vm15480_vm13  ;;  %vm4355_vm11 = vcmp.eq.f32.partialorder %v12028_v53, %v11635_v13 }
 0x730   : > { %v4509_v60 = vadd.f32 %v7382_v23, %v7350_v22  ;;  %vm4736_vm2 = vmand %vm4704_vm3, %vm15481_vm4  ;;  %vm4003_vm3 = vcmp.eq.f32.partialorder %v12016_v43, %v11635_v13  ;;  %vm15484_vm13 = vcmp.gt.s32.totalorder %v15466_v12, 1  ;;  %vm15485_vm4 = vcmp.gt.s32.totalorder %v15466_v12, 0 }
 0x731   : > { %vm14885_vm12 = vcmp.lt.f32.partialorder %v12176_v2, 1.0  ;;  %vm4416_vm14 = vmor %vm4320_vm8, %vm4384_vm7  ;;  %vm4707_vm8 = vcmp.eq.f32.partialorder %v12037_v59, %v11635_v13 }
 0x732   : > { %v4922_v27 = vsel %vm14885_vm12, %v11523_v24, -inf  ;;  %v12209_v35 = vadd.f32 %v7414_v50, %v4509_v60  ;;  %vm4064_vm1 = vmor %vm3968_vm5, %vm4032_vm6  ;;  %v7385_v23 = vsel %vm4416_vm14, 1.0, %v15470_v56  ;;  %vm4323_vm5 = vcmp.gt.f32.partialorder %v12028_v53, %v11635_v13 }
 0x733   : > { %vm4768_vm0 = vmor %vm4672_vm10, %vm4736_vm2  ;;  %v4954_v31 = vsel %vm15483_vm9, %v4922_v27, -inf  ;;  %v7353_v22 = vsel %vm4064_vm1, 1.0, %v15470_v56  ;;  %vm3971_vm10 = vcmp.gt.f32.partialorder %v12016_v43, %v11635_v13  ;;  %v12234_v27 = vpop.permute.xlu0 %4595  ;;  %vm4675_vm14 = vcmp.gt.f32.partialorder %v12037_v59, %v11635_v13 }
 0x734   : > { %15482 = vst [vmem:[#allocation31_spill] sm:$0xff] %v12209_v35  ;;  %vm14882_vm7 = vcmp.lt.f32.partialorder %v12209_v35, 1.0  ;;  %vm4387_vm6 = vmand %vm4355_vm11, %vm15484_vm13  ;;  %v7417_v50 = vsel %vm4768_vm0, 1.0, %v15470_v56  ;;  %v4512_v60 = vadd.f32 %v7385_v23, %v7353_v22  ;;  %vm15486_vm1 = vcmp.gt.s32.totalorder %v15466_v12, 2 }
 0x735   : > { %v12174_v38 = vpop.permute.xlu1 %3894  ;;  %vm4035_vm2 = vmand %vm4003_vm3, %vm15485_vm4  ;;  %v4925_v53 = vsel %vm14882_vm7, %v11559_v45, -inf  ;;  %vm4347_vm11 = vcmp.eq.f32.partialorder %v11930_v20, %v11540_v61  ;;  %vm15488_vm4 = vcmask 23552   ;;  %vm15494_vm12 = vcmp.gt.s32.totalorder %v15466_v12, 2 }
 0x736   : > { %vm4739_vm9 = vmand %vm4707_vm8, %vm15486_vm1  ;;  %v12244_v43 = vadd.f32 %v7417_v50, %v4512_v60  ;;  %vm4358_vm8 = vcmp.eq.f32.partialorder %v12064_v34, %v11718_v40  ;;  %v4963_v59 = vsel %vm15488_vm4, %v4925_v53, -inf  ;;  %vm3995_vm1 = vcmp.eq.f32.partialorder %v11915_v0, %v11540_v61 }
 0x737   : > { %7931 = vset.pattern.permute.xlu1 %v15041_v4  ;;  %vm4419_vm0 = vmor %vm4323_vm5, %vm4387_vm6  ;;  %vm4006_vm5 = vcmp.eq.f32.partialorder %v12050_v46, %v11718_v40  ;;  %vm15489_vm6 = vcmp.gt.s32.totalorder %v15466_v12, 1 }
 0x738   : > { %4307 = vperm.xlu1 %7931, %v12145_v29   ;;  %15487 = vst [vmem:[#allocation60_spill] sm:$0xff] %v12244_v43  ;;  %vm4067_vm3 = vmor %vm3971_vm10, %vm4035_vm2  ;;  %v7388_v22 = vsel %vm4419_vm0, 1.0, %v15470_v56  ;;  %vm4710_vm2 = vcmp.eq.f32.partialorder %v12075_v32, %v11718_v40 }
 0x739   : > { %vm4771_vm13 = vmor %vm4675_vm14, %vm4739_vm9  ;;  %vm14889_vm14 = vcmp.lt.f32.partialorder %v12244_v43, 1.0  ;;  %v7356_v60 = vsel %vm4067_vm3, 1.0, %v15470_v56  ;;  %vm4326_vm9 = vcmp.gt.f32.partialorder %v12064_v34, %v11718_v40  ;;  %vm4678_vm3 = vcmp.gt.f32.partialorder %v12075_v32, %v11718_v40 }
 0x73a   : > { %vm12261_vm10 = vmand %vm4347_vm11, %vm15489_vm6  ;;  %v7420_v53 = vsel %vm4771_vm13, 1.0, %v15470_v56  ;;  %vm3974_vm11 = vcmp.gt.f32.partialorder %v12050_v46, %v11718_v40  ;;  %v4928_v34 = vsel %vm14889_vm14, %v11580_v62, -inf  ;;  %vm15509_vm14 = vcmp.gt.s32.totalorder %v15466_v12, 2 }
 0x73b   : > { %vm15492_vm0 = vmmov %vm15489_vm6  ;;  %vm15493_vm6 = vcmp.gt.s32.totalorder %v15466_v12, 0 }
 0x73c   : > { %vm4390_vm4 = vmand %vm4358_vm8, %vm15492_vm0 }
 0x73d   : > { %vm4038_vm7 = vmand %vm4006_vm5, %vm15493_vm6  ;;  %vm4315_vm5 = vcmp.gt.f32.partialorder %v11930_v20, %v11540_v61  ;;  %v15502_v20 = vmov 0 }
 0x73e   : > { %v12207_v42 = vpop.permute.xlu1 %4259  ;;  %vm4742_vm15 = vmand %vm4710_vm2, %vm15494_vm12  ;;  %vm4699_vm12 = vcmp.eq.f32.partialorder %v11939_v48, %v11540_v61 }
 0x73f   : > { %vm15495_vm13 = vmmov %vm15493_vm6 }
 0x740   : > { %7932 = vset.pattern.permute.xlu1 %v15307_v18  ;;  %vm12291_vm8 = vmand %vm3995_vm1, %vm15495_vm13  ;;  %vm4361_vm1 = vcmp.eq.f32.partialorder %v12110_v15, %v11896_v8  ;;  %vm15501_vm13 = vcmask 23552  }
 0x741   : > { %4955 = vmax.xlane.f32.xlu0 %v4954_v31  ;;  %4659 = vperm.xlu1 %7932, %v12145_v29   ;;  %v12248_v31 = vpop.permute.xlu2 %4251  ;;  %v12280_v29 = vpop.permute.xlu0 %3889  ;;  %vm4422_vm0 = vmor %vm4326_vm9, %vm4390_vm4 }
 0x742   : > { %vm4070_vm2 = vmor %vm3974_vm11, %vm4038_vm7  ;;  %vm15504_vm7 = vcmp.gt.s32.totalorder %v15466_v12, 2 }
 0x743   : > { %vm12302_vm6 = vmor %vm4678_vm3, %vm4742_vm15  ;;  %vm4009_vm15 = vcmp.eq.f32.partialorder %v12099_v52, %v11896_v8  ;;  %v7359_v50 = vsel %vm4070_vm2, 1.0, %v15470_v56  ;;  %vm4329_vm3 = vcmp.gt.f32.partialorder %v12110_v15, %v11896_v8  ;;  %vm4681_vm2 = vcmp.gt.f32.partialorder %v12138_v49, %v11896_v8 }
 0x744   : > { %vm12313_vm9 = vmor %vm4315_vm5, %vm12261_vm10  ;;  %vm4713_vm10 = vcmp.eq.f32.partialorder %v12138_v49, %v11896_v8  ;;  %vm15507_vm5 = vcmp.gt.s32.totalorder %v15466_v12, 1 }
 0x745   : > { %v15503_v20 = vsel %vm12313_vm9, 4294967295, %v15502_v20  ;;  %vm12324_vm4 = vmand %vm4699_vm12, %vm15504_vm7  ;;  %vm3977_vm12 = vcmp.gt.f32.partialorder %v12099_v52, %v11896_v8 }
 0x746   : > { %3824 = vperm.xlu2 %7933, %v11565_v5   ;;  %vm4745_vm11 = vmand %vm4713_vm10, %vm15509_vm14  ;;  %vm4364_vm14 = vcmp.eq.f32.partialorder %v12207_v42, %v11936_v55  ;;  %vm15514_vm10 = vcmask 23552  }
 0x747   : > { %v12250_v23 = vpop.permute.xlu1 %4611  ;;  %vm12359_vm9 = vmor %vm4681_vm2, %vm4745_vm11  ;;  %vm4012_vm11 = vcmp.eq.f32.partialorder %v12174_v38, %v11936_v55  ;;  %vm4332_vm2 = vcmp.gt.f32.partialorder %v12207_v42, %v11936_v55 }
 0x749   : > { %4964 = vmax.xlane.f32.xlu0 %v4963_v59  ;;  %7936 = vset.pattern.permute.xlu1 %v15310_v37  ;;  %v4515_v59 = vadd.f32 %v7388_v22, %v7356_v60  ;;  %v4972_v60 = vsel %vm15501_vm13, %v4928_v34, -inf  ;;  %vm15508_vm13 = vcmp.gt.s32.totalorder %v15466_v12, 0  ;;  %v12357_v22 = vpop.permute.xlu0 %4255  ;;  %v7426_v34 = vsel %vm12359_vm9, 1.0, %v15470_v56 }
 0x74a   : > { %vm4041_vm7 = vmand %vm4009_vm15, %vm15508_vm13  ;;  %vm4667_vm15 = vcmp.gt.f32.partialorder %v11939_v48, %v11540_v61 }
 0x74b   : > { %v12298_v32 = vadd.f32 %v7420_v53, %v4515_v59  ;;  %v12317_v53 = vpop.permute.xlu2 %4603  ;;  %v7391_v59 = vsel %vm4422_vm0, 1.0, %v15470_v56  ;;  %vm4393_vm0 = vmand %vm4361_vm1, %vm15507_vm5 }
 0x74c   : > { %v4518_v35 = vadd.f32 %v7391_v59, %v7359_v50  ;;  %vm4425_vm5 = vmor %vm4329_vm3, %vm4393_vm0 }
 0x74d   : > { %15498 = vst [vmem:[#allocation61_spill] sm:$0xff] %v12298_v32  ;;  %vm15510_vm1 = vcmp.lt.f32.partialorder %v12298_v32, 1.0  ;;  %vm4073_vm13 = vmor %vm3977_vm12, %vm4041_vm7  ;;  %v7394_v48 = vsel %vm4425_vm5, 1.0, %v15470_v56  ;;  %vm4716_vm12 = vcmp.eq.f32.partialorder %v12250_v23, %v11936_v55  ;;  %vm15517_vm7 = vnez %v15503_v20 }
 0x74e   : > { %3839 = vperm.xlu2 %7933, %v11593_v1   ;;  %v4931_v15 = vsel %vm15510_vm1, %v11635_v13, -inf  ;;  %vm4763_vm0 = vmor %vm4667_vm15, %vm12324_vm4  ;;  %v7380_v46 = vsel %vm15517_vm7, 1.0, %v15470_v56  ;;  %vm15518_vm1 = vcmp.gt.s32.totalorder %v15466_v12, 1  ;;  %vm3980_vm4 = vcmp.gt.f32.partialorder %v12174_v38, %v11936_v55 }
 0x74f   : > { %vm15519_vm5 = vcmp.gt.s32.totalorder %v15466_v12, 0  ;;  %v7412_v38 = vsel %vm4763_vm0, 1.0, %v15470_v56 }
 0x750   : > { %v12309_v43 = vpop.permute.xlu1 %3909  ;;  %vm4044_vm15 = vmand %vm4012_vm11, %vm15519_vm5 }
 0x751   : > { %4973 = vmax.xlane.f32.xlu0 %v4972_v60  ;;  %v7423_v60 = vsel %vm12302_vm6, 1.0, %v15470_v56  ;;  %vm3963_vm6 = vcmp.gt.f32.partialorder %v11915_v0, %v11540_v61  ;;  %v4981_v0 = vsel %vm15514_vm10, %v4931_v15, -inf  ;;  %vm4076_vm11 = vmor %vm3980_vm4, %vm4044_vm15  ;;  %vm4015_vm0 = vcmp.eq.f32.partialorder %v12309_v43, %v11966_v16 }
 0x752   : > { %v12353_v52 = vadd.f32 %v7423_v60, %v4518_v35  ;;  %vm12368_vm3 = vmor %vm3963_vm6, %vm12291_vm8  ;;  %v7362_v60 = vsel %vm4073_vm13, 1.0, %v15470_v56  ;;  %vm4684_vm13 = vcmp.gt.f32.partialorder %v12250_v23, %v11936_v55  ;;  %vm3983_vm15 = vcmp.gt.f32.partialorder %v12309_v43, %v11966_v16 }
 0x753   : > { %v12372_v59 = vpop.permute.xlu2 %4263  ;;  %vm4396_vm6 = vmand %vm4364_vm14, %vm15518_vm1  ;;  %v4521_v20 = vadd.f32 %v7394_v48, %v7362_v60  ;;  %v7348_v15 = vsel %vm12368_vm3, 1.0, %v15470_v56  ;;  %vm15520_vm14 = vcmp.gt.s32.totalorder %v15466_v12, 2  ;;  %vm15522_vm1 = vcmask 23552   ;;  %v12415_v48 = vpop.permute.xlu0 %4607 }
 0x754   : > { %15511 = vst [vmem:[#allocation62_spill] sm:$0xff] %v12353_v52  ;;  %vm14908_vm8 = vcmp.lt.f32.partialorder %v12353_v52, 1.0  ;;  %vm4748_vm10 = vmand %vm4716_vm12, %vm15520_vm14 }
 0x755   : > { %v4934_v42 = vsel %vm14908_vm8, %v11718_v40, -inf  ;;  %vm4428_vm9 = vmor %vm4332_vm2, %vm4396_vm6  ;;  %v12409_v49 = vadd.f32 %v7426_v34, %v4521_v20  ;;  %v7365_v34 = vsel %vm4076_vm11, 1.0, %v15470_v56  ;;  %vm15523_vm6 = vcmp.gt.s32.totalorder %v15466_v12, 1  ;;  %v15583_v40 = vld [vmem:[#allocation15_spill] sm:$0xff] }
 0x756   : > { %3854 = vperm.xlu2 %7933, %v11657_v17   ;;  %vm4780_vm3 = vmor %vm4684_vm13, %vm4748_vm10  ;;  %v4990_v23 = vsel %vm15522_vm1, %v4934_v42, -inf  ;;  %v7397_v60 = vsel %vm4428_vm9, 1.0, %v15470_v56  ;;  %vm15524_vm13 = vcmp.gt.s32.totalorder %v15466_v12, 0  ;;  %vm15525_vm11 = vcmp.gt.s32.totalorder %v15466_v12, 2 }
 0x757   : > { %15521 = vst [vmem:[#allocation63_spill] sm:$0xff] %v12409_v49  ;;  %vm14907_vm12 = vcmp.lt.f32.partialorder %v12409_v49, 1.0  ;;  %v7429_v20 = vsel %vm4780_vm3, 1.0, %v15470_v56  ;;  %vm4047_vm14 = vmand %vm4015_vm0, %vm15524_vm13  ;;  %vm4353_vm8 = vcmp.eq.f32.partialorder %v12070_v39, %v11593_v1 }
 0x758   : > { %vm4079_vm3 = vmor %vm3983_vm15, %vm4047_vm14  ;;  %vm3999_vm14 = vcmp.eq.f32.partialorder %v12001_v36, %v11571_v6 }
 0x759   : > { %4982 = vmax.xlane.f32.xlu0 %v4981_v0  ;;  %v4272_v50 = vpop.permute.xlu1 %4271  ;;  %v4507_v0 = vadd.f32 %v7380_v46, %v7348_v15  ;;  %v4524_v15 = vadd.f32 %v7397_v60, %v7365_v34  ;;  %v7368_v34 = vsel %vm4079_vm3, 1.0, %v15470_v56  ;;  %vm4702_vm3 = vcmp.eq.f32.partialorder %v12056_v58, %v11565_v5 }
 0x75a   : > { %vm4367_vm7 = vcmp.eq.f32.partialorder %v4272_v50, %v11966_v16  ;;  %vm4335_vm2 = vcmp.gt.f32.partialorder %v4272_v50, %v11966_v16  ;;  %v4937_v50 = vsel %vm14907_vm12, %v11896_v8, -inf  ;;  %vm4354_vm12 = vcmp.eq.f32.partialorder %v12052_v7, %v11614_v25 }
 0x75b   : > { %v12413_v35 = vadd.f32 %v7412_v38, %v4507_v0  ;;  %v12421_v46 = vpop.permute.xlu2 %4615  ;;  %vm4399_vm4 = vmand %vm4367_vm7, %vm15523_vm6  ;;  %v12441_v42 = vadd.f32 %v7429_v20, %v4524_v15  ;;  %vm15527_vm6 = vcmask 23552   ;;  %v12452_v60 = vpop.permute.xlu0 %3904 }
 0x75c   : > { %vm4431_vm7 = vmor %vm4335_vm2, %vm4399_vm4 }
 0x75d   : > { %vm14914_vm10 = vcmp.lt.f32.partialorder %v12413_v35, 1.0  ;;  %15526 = vst [vmem:[#allocation64_spill] sm:$0xff] %v12441_v42  ;;  %v7400_v38 = vsel %vm4431_vm7, 1.0, %v15470_v56  ;;  %vm14905_vm13 = vcmp.lt.f32.partialorder %v12441_v42, 1.0 }
 0x75e   : > { %3869 = vperm.xlu2 %7933, %v11742_v26   ;;  %v4923_v43 = vsel %vm14914_vm10, %v11540_v61, -inf  ;;  %v4527_v15 = vadd.f32 %v7400_v38, %v7368_v34 }
 0x761   : > { %4991 = vmax.xlane.f32.xlu0 %v4990_v23 }
 0x762   : > { %v4624_v52 = vpop.permute.xlu1 %4623 }
 0x763   : > { %vm4719_vm5 = vcmp.eq.f32.partialorder %v4624_v52, %v11966_v16  ;;  %vm4687_vm9 = vcmp.gt.f32.partialorder %v4624_v52, %v11966_v16  ;;  %v4999_v52 = vsel %vm15527_vm6, %v4937_v50, -inf  ;;  %v12450_v23 = vpop.permute.xlu2 %4275  ;;  %v4940_v50 = vsel %vm14905_vm13, %v11936_v55, -inf  ;;  %v12466_v8 = vpop.permute.xlu0 %4267 }
 0x764   : > { %vm4751_vm1 = vmand %vm4719_vm5, %vm15525_vm11  ;;  %vm4350_vm11 = vcmp.eq.f32.partialorder %v12042_v19, %v11565_v5 }
 0x765   : > { %vm4783_vm0 = vmor %vm4687_vm9, %vm4751_vm1  ;;  %vm4351_vm9 = vcmp.eq.f32.partialorder %v12014_v63, %v11571_v6  ;;  %vm15537_vm1 = vcmp.gt.s32.totalorder %v15466_v12, 0 }
 0x766   : > { %3884 = vperm.xlu2 %7933, %v11910_v11   ;;  %vm15528_vm5 = vmmov %vm15527_vm6  ;;  %v7432_v20 = vsel %vm4783_vm0, 1.0, %v15470_v56  ;;  %vm15540_vm0 = vcmp.gt.s32.totalorder %v15466_v12, 1 }
 0x767   : > { %v4957_v0 = vsel %vm15528_vm5, %v4923_v43, -inf  ;;  %vm15530_vm2 = vmmov %vm15528_vm5  ;;  %vm4703_vm5 = vcmp.eq.f32.partialorder %v12026_v47, %v11571_v6 }
 0x768   : > { %v5008_v43 = vsel %vm15530_vm2, %v4940_v50, -inf  ;;  %vm15531_vm15 = vmmov %vm15530_vm2  ;;  %vm4318_vm2 = vcmp.gt.f32.partialorder %v12042_v19, %v11565_v5 }
 0x769   : > { %5000 = vmax.xlane.f32.xlu0 %v4999_v52  ;;  %v12460_v52 = vadd.f32 %v7432_v20, %v4527_v15  ;;  %vm12514_vm7 = vmand %vm3999_vm14, %vm15537_vm1  ;;  %vm4670_vm1 = vcmp.gt.f32.partialorder %v12056_v58, %v11565_v5  ;;  %v15550_v58 = vmov 0 }
 0x76a   : > { %vm12522_vm6 = vmand %vm4351_vm9, %vm15540_vm0 }
 0x76b   : > { %4958 = vmax.xlane.f32.xlu1 %v4957_v0  ;;  %15529 = vst [vmem:[#allocation65_spill] sm:$0xff] %v12460_v52  ;;  %vm14904_vm4 = vcmp.lt.f32.partialorder %v12460_v52, 1.0  ;;  %v12464_v49 = vpop.permute.xlu2 %4627  ;;  %v12476_v20 = vpop.permute.xlu0 %4619 }
 0x76c   : > { %v4943_v38 = vsel %vm14904_vm4, %v11966_v16, -inf  ;;  %v12478_v15 = vpop.permute.xlu1 %3924  ;;  %v12485_v52 = vpop.f32.mrf.mxu0  ;;  %vm15545_vm4 = vcmp.gt.s32.totalorder %v15466_v12, 2 }
 0x76d   : > { %v5017_v0 = vsel %vm15531_vm15, %v4943_v38, -inf  ;;  %15534 = vst [vmem:[#allocation68_spill] sm:$0xff] %v12485_v52  ;;  %vm15544_vm15 = vmmov %vm15540_vm0 }
 0x76e   : > { %3899 = vperm.xlu2 %7933, %v11945_v41   ;;  %vm4382_vm14 = vmand %vm4350_vm11, %vm15544_vm15  ;;  %vm4002_vm11 = vcmp.eq.f32.partialorder %v12039_v10, %v11614_v25 }
 0x76f   : > { %vm4734_vm9 = vmand %vm4702_vm3, %vm15545_vm4  ;;  %vm4319_vm3 = vcmp.gt.f32.partialorder %v12014_v63, %v11571_v6  ;;  %v15561_v63 = vmov 0 }
 0x770   : > { %vm15546_vm0 = vmmov %vm15545_vm4 }
 0x771   : > { %5009 = vmax.xlane.f32.xlu0 %v5008_v43  ;;  %vm12540_vm13 = vmand %vm4703_vm5, %vm15546_vm0  ;;  %vm15554_vm5 = vcmp.gt.s32.totalorder %v15466_v12, 1 }
 0x772   : > { %vm12552_vm15 = vmor %vm4318_vm2, %vm4382_vm14 }
 0x773   : > { %v12473_v34 = vpop.permute.xlu2 %4287  ;;  %v12483_v43 = vpop.permute.xlu0 %3919  ;;  %v15551_v58 = vsel %vm12552_vm15, 4294967295, %v15550_v58  ;;  %vm12557_vm4 = vmor %vm4670_vm1, %vm4734_vm9  ;;  %vm4705_vm1 = vcmp.eq.f32.partialorder %v12086_v9, %v11593_v1 }
 0x774   : > { %15532 = vst [vmem:[#allocation66_spill] sm:$0xff] %v12473_v34  ;;  %vm12565_vm0 = vmand %vm4354_vm12, %vm15554_vm5  ;;  %vm4671_vm12 = vcmp.gt.f32.partialorder %v12026_v47, %v11571_v6  ;;  %v15564_v47 = vmov 0 }
 0x775   : > { %vm15557_vm2 = vmmov %vm15554_vm5  ;;  %vm15560_vm5 = vcmp.gt.s32.totalorder %v15466_v12, 0 }
 0x776   : > { %3914 = vperm.xlu2 %7933, %v11976_v51   ;;  %vm12571_vm14 = vmand %vm4353_vm8, %vm15557_vm2  ;;  %vm4706_vm8 = vcmp.eq.f32.partialorder %v12067_v14, %v11614_v25 }
 0x777   : > { %vm15563_vm2 = vmmov %vm15560_vm5 }
 0x778   : > { %vm12597_vm15 = vmor %vm4319_vm3, %vm12522_vm6 }
 0x779   : > { %5018 = vmax.xlane.f32.xlu0 %v5017_v0  ;;  %v12490_v0 = vpop.permute.xlu1 %4283  ;;  %v15565_v47 = vsel %vm12597_vm15, 4294967295, %v15564_v47 }
 0x77b   : > { %v12481_v50 = vpop.permute.xlu2 %4639  ;;  %v12492_v16 = vpop.permute.xlu0 %4279 }
 0x77c   : > { %15533 = vst [vmem:[#allocation67_spill] sm:$0xff] %v12481_v50  ;;  %v15552_v50 = vmov 0 }
 0x77d   : > { %v15553_v50 = vsel %vm12557_vm4, 4294967295, %v15552_v50  ;;  %vm3967_vm4 = vcmp.gt.f32.partialorder %v12001_v36, %v11571_v6 }
 0x77e   : > { %3929 = vperm.xlu2 %7933, %v12011_v33   ;;  %v15555_v33 = vmov 0 }
 0x77f   : > { %v15556_v33 = vsel %vm12565_vm0, 4294967295, %v15555_v33  ;;  %vm12585_vm0 = vmand %vm4002_vm11, %vm15560_vm5  ;;  %vm15566_vm11 = vnez %v15551_v58  ;;  %vm4673_vm5 = vcmp.gt.f32.partialorder %v12086_v9, %v11593_v1  ;;  %v15575_v9 = vmov 0  ;;  %v15577_v58 = vld [vmem:[#allocation16_spill] sm:$0xff] }
 0x780   : > { %v15562_v63 = vsel %vm12585_vm0, 4294967295, %v15561_v63  ;;  %v7383_v36 = vsel %vm15566_vm11, 1.0, %v15470_v56  ;;  %vm15567_vm0 = vcmp.gt.s32.totalorder %v15466_v12, 2  ;;  %vm15597_vm15 = vnez %v15556_v33 }
 0x781   : > { %v12498_v55 = vpop.permute.xlu1 %4635  ;;  %v15605_v33 = vmov 0 }
 0x783   : > { %v12488_v38 = vpop.permute.xlu2 %4299 }
 0x784   : > { %15535 = vst [vmem:[#allocation69_spill] sm:$0xff] %v12488_v38 }
 0x786   : > { %3944 = vperm.xlu2 %7933, %v12046_v30   ;;  %v12500_v30 = vpop.permute.xlu0 %4631 }
 0x78b   : > { %v12496_v42 = vpop.permute.xlu2 %4651 }
 0x78c   : > { %15536 = vst [vmem:[#allocation70_spill] sm:$0xff] %v12496_v42  ;;  %v15547_v42 = vmov 0 }
 0x78d   : > { %v15548_v42 = vsel %vm12540_vm13, 4294967295, %v15547_v42  ;;  %vm4321_vm13 = vcmp.gt.f32.partialorder %v12070_v39, %v11593_v1  ;;  %v15572_v39 = vmov 0 }
 0x78e   : > { %3959 = vperm.xlu2 %7933, %v12485_v52   ;;  %v12548_v19 = vpop.permute.xlu0 %3934  ;;  %vm15571_vm6 = vnez %v15548_v42 }
 0x78f   : > { %15549 = vst [vmem:[#allocation72_spill] sm:$0xff] %v12548_v19  ;;  %vm12617_vm3 = vmor %vm4671_vm12, %vm15571_vm6  ;;  %vm4356_vm12 = vcmp.eq.f32.partialorder %v12108_v54, %v11657_v17  ;;  %v15585_v19 = vmov 0  ;;  %vm15588_vm6 = vcmp.gt.s32.totalorder %v15466_v12, 1 }
 0x790   : > { %v15573_v39 = vsel %vm12617_vm3, 4294967295, %v15572_v39  ;;  %vm3970_vm3 = vcmp.gt.f32.partialorder %v12039_v10, %v11614_v25 }
 0x796   : > { %7934 = vset.pattern.permute.xlu2 %v15041_v4  ;;  %v15538_v4 = vmov 0 }
 0x797   : > { %4311 = vperm.xlu2 %7934, %v12485_v52   ;;  %v15539_v4 = vsel %vm12514_vm7, 4294967295, %v15538_v4 }
 0x79f   : > { %7935 = vset.pattern.permute.xlu2 %v15307_v18  ;;  %v15569_v18 = vmov 0 }
 0x7a0   : > { %4663 = vperm.xlu2 %7935, %v12485_v52   ;;  %v12528_v52 = vpop.permute.xlu1 %3939 }
 0x7a1   : > { %v12508_v38 = vpop.xlane.xlu2 %4961  ;;  %15543 = vst [vmem:[#allocation71_spill] sm:$0xff] %v12528_v52  ;;  %v15558_v52 = vmov 0 }
 0x7a2   : > { %v15559_v52 = vsel %vm12571_vm14, 4294967295, %v15558_v52 }
 0x7a8   : > { %7937 = vset.pattern.permute.xlu2 %v15310_v37  ;;  %v15578_v37 = vld [vmem:[#allocation44_spill] sm:$0xff] }
 0x7a9   : > { %v3825_v34 = vpop.permute.xlu2 %3824 }
 0x7aa   : > { %vm3966_vm9 = vcmp.gt.f32.partialorder %v3825_v34, %v11565_v5  ;;  %vm3998_vm10 = vcmp.eq.f32.partialorder %v3825_v34, %v11565_v5 }
 0x7ab   : > { %vm4030_vm14 = vmand %vm3998_vm10, %vm15563_vm2 }
 0x7ac   : > { %vm4062_vm7 = vmor %vm3966_vm9, %vm4030_vm14  ;;  %vm15568_vm14 = vnez %v15539_v4  ;;  %v12629_v4 = vpop.permute.xlu1 %4295 }
 0x7ad   : > { %vm4737_vm10 = vmand %vm4705_vm1, %vm15567_vm0  ;;  %v7351_v34 = vsel %vm4062_vm7, 1.0, %v15470_v56  ;;  %vm4357_vm7 = vcmp.eq.f32.partialorder %v15578_v37, %v15577_v58  ;;  %15579 = vst [vmem:[#allocation16_spill] sm:$0xff] %v12629_v4  ;;  %vm4005_vm1 = vcmp.eq.f32.partialorder %v15583_v40, %v15577_v58 }
 0x7ae   : > { %vm12611_vm9 = vmor %vm3967_vm4, %vm15568_vm14  ;;  %v4510_v32 = vadd.f32 %v7383_v36, %v7351_v34  ;;  %vm15580_vm4 = vnez %v15559_v52  ;;  %v15589_v52 = vmov 0  ;;  %v12658_v34 = vpop.permute.xlu0 %4291 }
 0x7af   : > { %v15570_v18 = vsel %vm12611_vm9, 4294967295, %v15569_v18  ;;  %vm15574_vm2 = vmmov %vm15567_vm0  ;;  %vm15596_vm9 = vcmask 23552  }
 0x7b0   : > { %vm12623_vm11 = vmand %vm4706_vm8, %vm15574_vm2  ;;  %vm15584_vm8 = vnez %v15553_v50  ;;  %v15592_v50 = vmov 0 }
 0x7b1   : > { %v15576_v9 = vsel %vm12623_vm11, 4294967295, %v15575_v9  ;;  %vm12633_vm0 = vmor %vm4321_vm13, %vm15580_vm4  ;;  %v7415_v13 = vsel %vm15584_vm8, 1.0, %v15470_v56  ;;  %v3840_v4 = vpop.permute.xlu2 %3839  ;;  %vm15591_vm4 = vcmp.gt.s32.totalorder %v15466_v12, 0 }
 0x7b2   : > { %vm12644_vm14 = vmor %vm4673_vm5, %vm4737_vm10  ;;  %v12648_v36 = vadd.f32 %v7415_v13, %v4510_v32  ;;  %vm15595_vm10 = vcmp.gt.s32.totalorder %v15466_v12, 0  ;;  %v7386_v10 = vsel %vm12633_vm0, 1.0, %v15470_v56  ;;  %vm15607_vm0 = vnez %v15576_v9 }
 0x7b3   : > { %v15586_v19 = vsel %vm12644_vm14, 4294967295, %v15585_v19  ;;  %vm12654_vm2 = vmand %vm4357_vm7, %vm15588_vm6  ;;  %vm3969_vm7 = vcmp.gt.f32.partialorder %v3840_v4, %v11593_v1  ;;  %vm15598_vm14 = vcmp.gt.f32.partialorder %v12052_v7, %v11614_v25 }
 0x7b4   : > { %15587 = vst [vmem:[#allocation44_spill] sm:$0xff] %v12648_v36  ;;  %v15590_v52 = vsel %vm12654_vm2, 4294967295, %v15589_v52  ;;  %vm12662_vm5 = vmand %vm4005_vm1, %vm15591_vm4  ;;  %vm14921_vm2 = vcmp.lt.f32.partialorder %v12648_v36, 1.0  ;;  %vm4674_vm1 = vcmp.gt.f32.partialorder %v12067_v14, %v11614_v25  ;;  %vm4708_vm4 = vcmp.eq.f32.partialorder %v12132_v57, %v11657_v17 }
 0x7b5   : > { %v15593_v50 = vsel %vm12662_vm5, 4294967295, %v15592_v50  ;;  %vm15594_vm8 = vmmov %vm15588_vm6  ;;  %vm4001_vm6 = vcmp.eq.f32.partialorder %v3840_v4, %v11593_v1  ;;  %v4926_v13 = vsel %vm14921_vm2, %v11565_v5, -inf  ;;  %v15646_v4 = vmov 0 }
 0x7b6   : > { %vm4388_vm13 = vmand %vm4356_vm12, %vm15594_vm8  ;;  %vm4359_vm12 = vcmp.eq.f32.partialorder %v12168_v3, %v11742_v26  ;;  %v4966_v32 = vsel %vm15596_vm9, %v4926_v13, -inf  ;;  %vm4709_vm9 = vcmp.eq.f32.partialorder %v12121_v44, %v15577_v58 }
 0x7b7   : > { %vm4033_vm5 = vmand %vm4001_vm6, %vm15595_vm10  ;;  %vm15601_vm10 = vcmp.gt.f32.partialorder %v12108_v54, %v11657_v17  ;;  %4967 = vmax.xlane.f32.xlu1 %v4966_v32  ;;  %v15608_v54 = vmov 0 }
 0x7b8   : > { %vm4065_vm8 = vmor %vm3969_vm7, %vm4033_vm5  ;;  %vm15610_vm7 = vcmp.gt.s32.totalorder %v15466_v12, 2 }
 0x7b9   : > { %vm12692_vm11 = vmor %vm15598_vm14, %vm15597_vm15  ;;  %v7354_v7 = vsel %vm4065_vm8, 1.0, %v15470_v56  ;;  %vm15604_vm15 = vnez %v15562_v63  ;;  %v3855_v32 = vpop.permute.xlu2 %3854 }
 0x7ba   : > { %vm12702_vm6 = vmor %vm15601_vm10, %vm4388_vm13  ;;  %vm4676_vm13 = vcmp.gt.f32.partialorder %v12132_v57, %v11657_v17  ;;  %v4513_v63 = vadd.f32 %v7386_v10, %v7354_v7  ;;  %vm15611_vm10 = vcmp.gt.s32.totalorder %v15466_v12, 1  ;;  %v15623_v7 = vmov 0 }
 0x7bb   : > { %vm12711_vm14 = vmor %vm3970_vm3, %vm15604_vm15  ;;  %vm4327_vm3 = vcmp.gt.f32.partialorder %v12168_v3, %v11742_v26  ;;  %vm4711_vm15 = vcmp.eq.f32.partialorder %v12211_v28, %v11742_v26  ;;  %v12751_v3 = vpop.permute.xlu1 %4647  ;;  %v7387_v42 = vsel %vm12692_vm11, 1.0, %v15470_v56 }
 0x7bc   : > { %v15606_v33 = vsel %vm12711_vm14, 4294967295, %v15605_v33  ;;  %vm12717_vm5 = vmor %vm4674_vm1, %vm15607_vm0  ;;  %vm15612_vm0 = vnez %v15586_v19  ;;  %15617 = vst [vmem:[#allocation15_spill] sm:$0xff] %v12751_v3  ;;  %v15639_v3 = vmov 0 }
 0x7bd   : > { %v15609_v54 = vsel %vm12717_vm5, 4294967295, %v15608_v54  ;;  %vm4740_vm8 = vmand %vm4708_vm4, %vm15610_vm7  ;;  %v7418_v9 = vsel %vm15612_vm0, 1.0, %v15470_v56  ;;  %vm15613_vm4 = vnez %v15565_v47 }
 0x7be   : > { %vm4391_vm1 = vmand %vm4359_vm12, %vm15611_vm10  ;;  %v7384_v57 = vsel %vm15613_vm4, 1.0, %v15470_v56  ;;  %v12753_v13 = vadd.f32 %v7418_v9, %v4513_v63  ;;  %vm15619_vm12 = vnez %v15570_v18  ;;  %v15625_v63 = vld [vmem:[#allocation53_spill] sm:$0xff]  ;;  %v12795_v9 = vpop.permute.xlu0 %4643  ;;  %vm15633_vm4 = vcmp.gt.s32.totalorder %v15466_v12, 0 }
 0x7bf   : > { %vm15614_vm2 = vmmov %vm15610_vm7  ;;  %v7352_v19 = vsel %vm15619_vm12, 1.0, %v15470_v56 }
 0x7c0   : > { %vm12747_vm5 = vmand %vm4709_vm9, %vm15614_vm2  ;;  %15618 = vst [vmem:[#allocation73_spill] sm:$0xff] %v12753_v13  ;;  %vm15622_vm2 = vnez %v15573_v39  ;;  %v15631_v39 = vmov 0 }
 0x7c1   : > { %vm12760_vm0 = vmor %vm4676_vm13, %vm4740_vm8  ;;  %v7416_v10 = vsel %vm15622_vm2, 1.0, %v15470_v56  ;;  %vm3972_vm13 = vcmp.gt.f32.partialorder %v3855_v32, %v11657_v17  ;;  %vm4004_vm8 = vcmp.eq.f32.partialorder %v3855_v32, %v11657_v17  ;;  %v15635_v32 = vld [vmem:[#allocation39_spill] sm:$0xff]  ;;  %v3870_v18 = vpop.permute.xlu2 %3869 }
 0x7c2   : > { %vm12767_vm9 = vmor %vm4327_vm3, %vm4391_vm1  ;;  %vm15629_vm3 = vnez %v15590_v52  ;;  %vm15630_vm1 = vcmp.gt.f32.partialorder %v15578_v37, %v15577_v58  ;;  %v4511_v37 = vadd.f32 %v7384_v57, %v7352_v19 }
 0x7c3   : > { %v15624_v7 = vsel %vm12767_vm9, 4294967295, %v15623_v7  ;;  %vm15626_vm12 = vmmov %vm15610_vm7  ;;  %vm15634_vm9 = vcmp.lt.f32.partialorder %v12753_v13, 1.0  ;;  %v7389_v13 = vsel %vm12702_vm6, 1.0, %v15470_v56  ;;  %vm15645_vm6 = vcmp.gt.f32.partialorder %v12121_v44, %v15577_v58 }
 0x7c4   : > { %vm12775_vm7 = vmand %vm4711_vm15, %vm15626_vm12  ;;  %v4929_v52 = vsel %vm15634_vm9, %v11593_v1, -inf  ;;  %vm15637_vm15 = vnez %v15593_v50  ;;  %vm15638_vm12 = vcmp.gt.f32.partialorder %v15583_v40, %v15577_v58  ;;  %v12829_v50 = vadd.f32 %v7416_v10, %v4511_v37  ;;  %v12898_v37 = vpop.permute.xlu1 %3954 }
 0x7c5   : > { %vm12787_vm2 = vmor %vm15630_vm1, %vm15629_vm3  ;;  %vm4360_vm3 = vcmp.eq.f32.partialorder %v15635_v32, %v15625_v63 }
 0x7c6   : > { %v15632_v39 = vsel %vm12787_vm2, 4294967295, %v15631_v39  ;;  %vm4036_vm10 = vmand %vm4004_vm8, %vm15633_vm4  ;;  %vm15636_vm2 = vcmask 23552   ;;  %v12950_v57 = vpop.permute.xlu0 %3949 }
 0x7c7   : > { %vm4068_vm1 = vmor %vm3972_vm13, %vm4036_vm10  ;;  %v4975_v36 = vsel %vm15636_vm2, %v4929_v52, -inf  ;;  %vm15642_vm10 = vcmp.eq.f32.partialorder %v12154_v21, %v15625_v63  ;;  %vm4712_vm13 = vcmp.eq.f32.partialorder %v12234_v27, %v15625_v63  ;;  %vm15648_vm2 = vcmp.gt.f32.partialorder %v12211_v28, %v11742_v26 }
 0x7c8   : > { %vm12810_vm14 = vmor %vm15638_vm12, %vm15637_vm15  ;;  %v7357_v40 = vsel %vm4068_vm1, 1.0, %v15470_v56  ;;  %4976 = vmax.xlane.f32.xlu1 %v4975_v36  ;;  %vm4362_vm12 = vcmp.eq.f32.partialorder %v12248_v31, %v11910_v11  ;;  %vm15651_vm1 = vcmp.gt.s32.totalorder %v15466_v12, 1  ;;  %v7421_v28 = vsel %vm12760_vm0, 1.0, %v15470_v56 }
 0x7c9   : > { %v15640_v3 = vsel %vm12810_vm14, 4294967295, %v15639_v3  ;;  %vm15641_vm9 = vmmov %vm15633_vm4  ;;  %v4516_v36 = vadd.f32 %v7389_v13, %v7357_v40  ;;  %vm15669_vm14 = vcmask 23552   ;;  %v15689_v13 = vmov 0 }
 0x7ca   : > { %vm12822_vm4 = vmand %vm15642_vm10, %vm15641_vm9  ;;  %vm15654_vm10 = vcmp.gt.s32.totalorder %v15466_v12, 2 }
 0x7cb   : > { %vm12836_vm8 = vmor %vm15645_vm6, %vm12747_vm5  ;;  %vm4714_vm5 = vcmp.eq.f32.partialorder %v12317_v53, %v11910_v11  ;;  %v12873_v10 = vadd.f32 %v7421_v28, %v4516_v36  ;;  %vm15657_vm6 = vnez %v15606_v33 }
 0x7cc   : > { %v15647_v4 = vsel %vm12836_vm8, 4294967295, %v15646_v4  ;;  %vm12845_vm15 = vmor %vm15648_vm2, %vm12775_vm7  ;;  %v7355_v47 = vsel %vm15657_vm6, 1.0, %v15470_v56 }
 0x7cd   : > { %vm12853_vm9 = vmand %vm4360_vm3, %vm15651_vm1  ;;  %vm14925_vm0 = vcmp.lt.f32.partialorder %v12873_v10, 1.0  ;;  %v4514_v36 = vadd.f32 %v7387_v42, %v7355_v47 }
 0x7ce   : > { %vm12869_vm3 = vmand %vm4712_vm13, %vm15654_vm10  ;;  %vm15668_vm13 = vcmp.gt.s32.totalorder %v15466_v12, 0  ;;  %v4932_v40 = vsel %vm14925_vm0, %v11657_v17, -inf }
 0x7cf   : > { %vm15658_vm11 = vmmov %vm15651_vm1  ;;  %vm15661_vm1 = vnez %v15609_v54 }
 0x7d0   : > { %vm12882_vm2 = vmand %vm4362_vm12, %vm15658_vm11  ;;  %v7419_v52 = vsel %vm15661_vm1, 1.0, %v15470_v56  ;;  %vm3975_vm12 = vcmp.gt.f32.partialorder %v3870_v18, %v11742_v26  ;;  %vm4007_vm11 = vcmp.eq.f32.partialorder %v3870_v18, %v11742_v26  ;;  %vm15665_vm1 = vcmp.gt.f32.partialorder %v15635_v32, %v15625_v63 }
 0x7d1   : > { %vm15662_vm6 = vmmov %vm15654_vm10  ;;  %v4984_v32 = vsel %vm15669_vm14, %v4932_v40, -inf  ;;  %vm15675_vm14 = vcmp.gt.f32.partialorder %v12248_v31, %v11910_v11  ;;  %v12953_v18 = vadd.f32 %v7419_v52, %v4514_v36  ;;  %v15681_v31 = vmov 0 }
 0x7d2   : > { %vm12894_vm7 = vmand %vm4714_vm5, %vm15662_vm6  ;;  %vm15670_vm5 = vcmp.lt.f32.partialorder %v12829_v50, 1.0  ;;  %vm15671_vm6 = vnez %v15624_v7  ;;  %v15678_v7 = vld [vmem:[#allocation46_spill] sm:$0xff]  ;;  %4985 = vmax.xlane.f32.xlu1 %v4984_v32  ;;  %v15696_v32 = vmov 0 }
 0x7d3   : > { %vm12908_vm10 = vmor %vm15665_vm1, %vm12853_vm9  ;;  %vm4365_vm9 = vcmp.eq.f32.partialorder %v12372_v59, %v11945_v41  ;;  %v4927_v44 = vsel %vm15670_vm5, %v11571_v6, -inf  ;;  %v7392_v28 = vsel %vm15671_vm6, 1.0, %v15470_v56  ;;  %vm15683_vm6 = vcmp.gt.f32.partialorder %v12317_v53, %v11910_v11 }
 0x7d4   : > { %vm4039_vm8 = vmand %vm4007_vm11, %vm15668_vm13  ;;  %vm15672_vm13 = vcmp.gt.f32.partialorder %v12154_v21, %v15625_v63  ;;  %v7393_v47 = vsel %vm12908_vm10, 1.0, %v15470_v56 }
 0x7d5   : > { %vm4071_vm1 = vmor %vm3975_vm12, %vm4039_vm8  ;;  %vm4011_vm12 = vcmp.eq.f32.partialorder %v12280_v29, %v15678_v7 }
 0x7d6   : > { %vm12935_vm11 = vmor %vm15672_vm13, %vm12822_vm4  ;;  %v7360_v21 = vsel %vm4071_vm1, 1.0, %v15470_v56  ;;  %vm15679_vm4 = vnez %v15632_v39  ;;  %vm4717_vm13 = vcmp.eq.f32.partialorder %v12421_v46, %v11945_v41 }
 0x7d7   : > { %vm12944_vm8 = vmor %vm15675_vm14, %vm12882_vm2  ;;  %v7390_v14 = vsel %vm15679_vm4, 1.0, %v15470_v56  ;;  %vm15680_vm2 = vcmp.gt.f32.partialorder %v12234_v27, %v15625_v63  ;;  %v4519_v39 = vadd.f32 %v7392_v28, %v7360_v21  ;;  %vm4333_vm14 = vcmp.gt.f32.partialorder %v12372_v59, %v11945_v41  ;;  %v13039_v28 = vpop.permute.xlu1 %4307 }
 0x7d8   : > { %vm12963_vm5 = vmor %vm15680_vm2, %vm12869_vm3  ;;  %vm15686_vm3 = vcmp.gt.s32.totalorder %v15466_v12, 1  ;;  %vm4363_vm2 = vcmp.eq.f32.partialorder %v12357_v22, %v15678_v7  ;;  %v7424_v27 = vsel %vm12845_vm15, 1.0, %v15470_v56 }
 0x7d9   : > { %v15682_v31 = vsel %vm12963_vm5, 4294967295, %v15681_v31  ;;  %vm12972_vm1 = vmor %vm15683_vm6, %vm12894_vm7  ;;  %vm15687_vm7 = vnez %v15640_v3  ;;  %vm15688_vm6 = vcmp.gt.s32.totalorder %v15466_v12, 0  ;;  %v13003_v33 = vadd.f32 %v7424_v27, %v4519_v39  ;;  %v3885_v3 = vpop.permute.xlu2 %3884 }
 0x7da   : > { %vm4397_vm4 = vmand %vm4365_vm9, %vm15686_vm3  ;;  %v7358_v53 = vsel %vm15687_vm7, 1.0, %v15470_v56  ;;  %vm15691_vm9 = vcmask 23552   ;;  %vm15692_vm3 = vcmp.gt.s32.totalorder %v15466_v12, 2  ;;  %vm4010_vm7 = vcmp.eq.f32.partialorder %v3885_v3, %v11910_v11 }
 0x7db   : > { %vm12998_vm0 = vmand %vm4011_vm12, %vm15688_vm6  ;;  %v4969_v59 = vsel %vm15691_vm9, %v4927_v44, -inf  ;;  %v4517_v40 = vadd.f32 %v7390_v14, %v7358_v53  ;;  %vm15695_vm12 = vnez %v15647_v4  ;;  %vm15698_vm9 = vcmp.gt.s32.totalorder %v15466_v12, 1 }
 0x7dc   : > { %v15690_v13 = vsel %vm12998_vm0, 4294967295, %v15689_v13  ;;  %vm13007_vm15 = vmand %vm4717_vm13, %vm15692_vm3  ;;  %4970 = vmax.xlane.f32.xlu2 %v4969_v59  ;;  %v7422_v36 = vsel %vm15695_vm12, 1.0, %v15470_v56  ;;  %vm3978_vm3 = vcmp.gt.f32.partialorder %v3885_v3, %v11910_v11  ;;  %vm14926_vm0 = vcmp.lt.f32.partialorder %v13003_v33, 1.0  ;;  %v15710_v59 = vld [vmem:[#allocation48_spill] sm:$0xff] }
 0x7dd   : > { %vm13015_vm6 = vmor %vm4333_vm14, %vm4397_vm4  ;;  %vm4685_vm14 = vcmp.gt.f32.partialorder %v12421_v46, %v11945_v41  ;;  %vm15701_vm4 = vcmp.gt.s32.totalorder %v15466_v12, 0  ;;  %v4935_v4 = vsel %vm14926_vm0, %v11742_v26, -inf  ;;  %vm15702_vm13 = vcmask 23552   ;;  %v13085_v46 = vpop.permute.xlu0 %4303 }
 0x7de   : > { %v15697_v32 = vsel %vm13015_vm6, 4294967295, %v15696_v32  ;;  %vm13021_vm5 = vmand %vm4363_vm2, %vm15698_vm9  ;;  %vm4331_vm2 = vcmp.gt.f32.partialorder %v12357_v22, %v15678_v7  ;;  %v4993_v21 = vsel %vm15702_vm13, %v4935_v4, -inf  ;;  %vm15703_vm6 = vcmp.lt.f32.partialorder %v12953_v18, 1.0 }
 0x7df   : > { %vm4042_vm12 = vmand %vm4010_vm7, %vm15701_vm4  ;;  %v4930_v14 = vsel %vm15703_vm6, %v11614_v25, -inf  ;;  %v13045_v39 = vadd.f32 %v7422_v36, %v4517_v40  ;;  %v7395_v27 = vsel %vm12944_vm8, 1.0, %v15470_v56  ;;  %vm3979_vm7 = vcmp.gt.f32.partialorder %v12280_v29, %v15678_v7  ;;  %4994 = vmax.xlane.f32.xlu1 %v4993_v21 }
 0x7e0   : > { %vm4074_vm9 = vmor %vm3978_vm3, %vm4042_vm12  ;;  %vm4683_vm4 = vcmp.gt.f32.partialorder %v12415_v48, %v15678_v7  ;;  %vm15704_vm3 = vcmp.gt.s32.totalorder %v15466_v12, 2  ;;  %vm15705_vm13 = vcmp.eq.f32.partialorder %v12415_v48, %v15678_v7  ;;  %vm4368_vm6 = vcmp.eq.f32.partialorder %v12450_v23, %v11976_v51 }
 0x7e1   : > { %vm4747_vm12 = vmand %vm15705_vm13, %vm15704_vm3  ;;  %v7363_v53 = vsel %vm4074_vm9, 1.0, %v15470_v56  ;;  %vm4014_vm10 = vcmp.eq.f32.partialorder %v12452_v60, %v15710_v59  ;;  %v7427_v19 = vsel %vm12972_vm1, 1.0, %v15470_v56  ;;  %v7361_v3 = vsel %vm12935_vm11, 1.0, %v15470_v56  ;;  %v3900_v42 = vpop.permute.xlu2 %3899 }
 0x7e2   : > { %vm13068_vm8 = vmor %vm4685_vm14, %vm13007_vm15  ;;  %v4522_v48 = vadd.f32 %v7395_v27, %v7363_v53  ;;  %vm15711_vm15 = vnez %v15690_v13  ;;  %vm15717_vm1 = vcmp.gt.s32.totalorder %v15466_v12, 1  ;;  %vm14928_vm11 = vcmp.lt.f32.partialorder %v13045_v39, 1.0 }
 0x7e3   : > { %vm13079_vm9 = vmor %vm4331_vm2, %vm13021_vm5  ;;  %vm15716_vm2 = vcmask 23552   ;;  %v4520_v13 = vadd.f32 %v7393_v47, %v7361_v3  ;;  %v4933_v27 = vsel %vm14928_vm11, %v15577_v58, -inf  ;;  %vm15730_vm11 = vcmp.eq.f32.partialorder %v12466_v8, %v15710_v59 }
 0x7e4   : > { %vm13095_vm14 = vmor %vm3979_vm7, %vm15711_vm15  ;;  %v4978_v36 = vsel %vm15716_vm2, %v4930_v14, -inf  ;;  %v13104_v44 = vadd.f32 %v7427_v19, %v4522_v48  ;;  %vm15720_vm7 = vnez %v15682_v31  ;;  %vm4013_vm15 = vcmp.eq.f32.partialorder %v3900_v42, %v11945_v41 }
 0x7e5   : > { %vm13099_vm5 = vmor %vm4683_vm4, %vm4747_vm12  ;;  %4979 = vmax.xlane.f32.xlu2 %v4978_v36  ;;  %v7425_v4 = vsel %vm15720_vm7, 1.0, %v15470_v56  ;;  %vm15721_vm4 = vcmp.gt.s32.totalorder %v15466_v12, 0  ;;  %vm15725_vm12 = vcmask 23552   ;;  %v7396_v29 = vsel %vm13079_vm9, 1.0, %v15470_v56 }
 0x7e6   : > { %vm13108_vm3 = vmand %vm4368_vm6, %vm15717_vm1  ;;  %vm3981_vm6 = vcmp.gt.f32.partialorder %v3900_v42, %v11945_v41  ;;  %vm14927_vm2 = vcmp.lt.f32.partialorder %v13104_v44, 1.0  ;;  %v13140_v53 = vadd.f32 %v7425_v4, %v4520_v13  ;;  %vm15726_vm1 = vnez %v15697_v32  ;;  %v13200_v4 = vpop.permute.xlu0 %4655 }
 0x7e7   : > { %vm13118_vm13 = vmand %vm4014_vm10, %vm15721_vm4  ;;  %v4938_v31 = vsel %vm14927_vm2, %v11910_v11, -inf  ;;  %v7398_v47 = vsel %vm15726_vm1, 1.0, %v15470_v56  ;;  %vm4334_vm2 = vcmp.gt.f32.partialorder %v12466_v8, %v15710_v59  ;;  %vm15729_vm1 = vcmp.gt.s32.totalorder %v15466_v12, 1 }
 0x7e8   : > { %vm15724_vm7 = vmmov %vm15721_vm4  ;;  %v5002_v14 = vsel %vm15725_vm12, %v4938_v31, -inf  ;;  %vm15728_vm12 = vcmp.eq.f32.partialorder %v12464_v49, %v11976_v51  ;;  %v7430_v8 = vsel %vm13068_vm8, 1.0, %v15470_v56  ;;  %v7364_v54 = vsel %vm13095_vm14, 1.0, %v15470_v56  ;;  %v15745_v31 = vld [vmem:[#allocation28_spill] sm:$0xff] }
 0x7e9   : > { %vm4045_vm0 = vmand %vm4013_vm15, %vm15724_vm7  ;;  %vm3982_vm15 = vcmp.gt.f32.partialorder %v12452_v60, %v15710_v59  ;;  %vm4688_vm7 = vcmp.gt.f32.partialorder %v12464_v49, %v11976_v51  ;;  %5003 = vmax.xlane.f32.xlu1 %v5002_v14  ;;  %v13162_v60 = vpop.permute.xlu1 %4659  ;;  %v3915_v21 = vpop.permute.xlu2 %3914  ;;  %vm15747_vm14 = vcmask 23552  }
 0x7ea   : > { %vm4077_vm4 = vmor %vm3981_vm6, %vm4045_vm0  ;;  %vm15727_vm0 = vcmp.gt.s32.totalorder %v15466_v12, 2  ;;  %vm3984_vm9 = vcmp.gt.f32.partialorder %v3915_v21, %v11976_v51 }
 0x7eb   : > { %vm4752_vm6 = vmand %vm15728_vm12, %vm15727_vm0  ;;  %v7366_v48 = vsel %vm4077_vm4, 1.0, %v15470_v56  ;;  %vm15731_vm0 = vcmp.gt.f32.partialorder %v12450_v23, %v11976_v51  ;;  %vm4718_vm4 = vcmp.eq.f32.partialorder %v12476_v20, %v15710_v59  ;;  %v15738_v23 = vld [vmem:[#allocation47_spill] sm:$0xff] }
 0x7ec   : > { %vm4398_vm10 = vmand %vm15730_vm11, %vm15729_vm1  ;;  %v4525_v32 = vadd.f32 %v7398_v47, %v7366_v48  ;;  %v5052_v36 = vsub.f32 %v15738_v23, %v12508_v38  ;;  %v4523_v48 = vadd.f32 %v7396_v29, %v7364_v54 }
 0x7ed   : > { %vm13169_vm12 = vmor %vm15731_vm0, %vm13108_vm3  ;;  %vm15739_vm3 = vcmask 23552   ;;  %vm4370_vm0 = vcmp.eq.f32.partialorder %v12490_v0, %v15745_v31 }
 0x7ee   : > { %vm13180_vm11 = vmor %vm3982_vm15, %vm13118_vm13  ;;  %v4987_v52 = vsel %vm15739_vm3, %v4933_v27, -inf  ;;  %v13191_v42 = vadd.f32 %v7430_v8, %v4525_v32  ;;  %vm4686_vm15 = vcmp.gt.f32.partialorder %v12476_v20, %v15710_v59  ;;  %vm15746_vm3 = vcmp.gt.s32.totalorder %v15466_v12, 0 }
 0x7ef   : > { %vm13184_vm1 = vmor %vm4688_vm7, %vm4752_vm6  ;;  %4988 = vmax.xlane.f32.xlu2 %v4987_v52  ;;  %vm15742_vm7 = vcmp.gt.s32.totalorder %v15466_v12, 2  ;;  %v7428_v27 = vsel %vm13099_vm5, 1.0, %v15470_v56  ;;  %v5086_v47 = vmul.f32 1.442695, %v5052_v36  ;;  %v7401_v32 = vsel %vm13169_vm12, 1.0, %v15470_v56 }
 0x7f0   : > { %vm13196_vm8 = vmor %vm4334_vm2, %vm4398_vm10  ;;  %vm4016_vm2 = vcmp.eq.f32.partialorder %v3915_v21, %v11976_v51  ;;  %vm4909_vm10 = vcmp.lt.f32.partialorder %v13191_v42, 1.0  ;;  %vm4722_vm5 = vcmp.eq.f32.partialorder %v12498_v55, %v15745_v31  ;;  %vm4338_vm12 = vcmp.gt.f32.partialorder %v12490_v0, %v15745_v31 }
 0x7f1   : > { %vm13207_vm6 = vmand %vm4718_vm4, %vm15742_vm7  ;;  %v4941_v14 = vsel %vm4909_vm10, %v11945_v41, -inf  ;;  %vm4018_vm4 = vcmp.eq.f32.partialorder %v12478_v15, %v15745_v31  ;;  %v4959_v20 = vpop.xlane.xlu1 %4958  ;;  %v13255_v36 = vadd.f32 %v7428_v27, %v4523_v48  ;;  %v7433_v29 = vsel %vm13184_vm1, 1.0, %v15470_v56 }
 0x7f2   : > { %vm4048_vm13 = vmand %vm4016_vm2, %vm15746_vm3  ;;  %v5011_v22 = vsel %vm15747_vm14, %v4941_v14, -inf  ;;  %v5051_v52 = vsub.f32 %v11540_v61, %v4959_v20  ;;  %vm15752_vm14 = vcmp.gt.s32.totalorder %v15466_v12, 2  ;;  %8125 = vpow2.f32 %v5086_v47  ;;  %v4956_v61 = vpop.xlane.xlu0 %4955 }
 0x7f3   : > { %vm4080_vm7 = vmor %vm3984_vm9, %vm4048_vm13  ;;  %5012 = vmax.xlane.f32.xlu1 %v5011_v22  ;;  %vm15750_vm13 = vcmp.lt.f32.partialorder %v13140_v53, 1.0  ;;  %vm15751_vm9 = vcmp.gt.s32.totalorder %v15466_v12, 1  ;;  %v5050_v14 = vsub.f32 %v11523_v24, %v4956_v61 }
 0x7f4   : > { %vm13238_vm2 = vmor %vm4686_vm15, %vm13207_vm6  ;;  %v7369_v8 = vsel %vm4080_vm7, 1.0, %v15470_v56  ;;  %v4936_v49 = vsel %vm15750_vm13, %v15625_v63, -inf  ;;  %vm3986_vm6 = vcmp.gt.f32.partialorder %v12478_v15, %v15745_v31  ;;  %v7399_v15 = vsel %vm13196_vm8, 1.0, %v15470_v56 }
 0x7f5   : > { %vm4402_vm15 = vmand %vm4370_vm0, %vm15751_vm9  ;;  %v4528_v23 = vadd.f32 %v7401_v32, %v7369_v8  ;;  %vm4690_vm0 = vcmp.gt.f32.partialorder %v12498_v55, %v15745_v31  ;;  %vm15753_vm9 = vcmask 23552   ;;  %v5084_v3 = vmul.f32 1.442695, %v5051_v52  ;;  %v15757_v52 = vld [vmem:[#allocation57_spill] sm:$0xff] }
 0x7f6   : > { %vm4050_vm7 = vmand %vm4018_vm4, %vm15746_vm3  ;;  %v4996_v21 = vsel %vm15753_vm9, %v4936_v49, -inf  ;;  %v7367_v55 = vsel %vm13180_vm11, 1.0, %v15470_v56  ;;  %v7431_v0 = vsel %vm13238_vm2, 1.0, %v15470_v56  ;;  %v15755_v49 = vld [vmem:[#allocation50_spill] sm:$0xff]  ;;  %v5082_v24 = vmul.f32 1.442695, %v5050_v14 }
 0x7f7   : > { %vm4754_vm13 = vmand %vm4722_vm5, %vm15752_vm14  ;;  %v13273_v38 = vadd.f32 %v7433_v29, %v4528_v23  ;;  %4997 = vmax.xlane.f32.xlu2 %v4996_v21  ;;  %vm14929_vm5 = vcmp.lt.f32.partialorder %v13255_v36, 1.0  ;;  %8127 = vpow2.f32 %v5084_v3  ;;  %v4526_v47 = vadd.f32 %v7399_v15, %v7367_v55 }
 0x7f8   : > { %vm4434_vm4 = vmor %vm4338_vm12, %vm4402_vm15  ;;  %v4939_v19 = vsel %vm14929_vm5, %v15678_v7, -inf  ;;  %v8126_v22 = vpop.eup %8125  ;;  %vm4369_vm11 = vcmp.eq.f32.partialorder %v12492_v16, %v15755_v49  ;;  %vm4017_vm12 = vcmp.eq.f32.partialorder %v12483_v43, %v15755_v49  ;;  %vm15758_vm15 = vcmp.lt.f32.partialorder %v15757_v52, 1.0  ;;  %v15771_v52 = vld [vmem:[#allocation72_spill] sm:$0xff] }
 0x7f9   : > { %vm4082_vm1 = vmor %vm3986_vm6, %vm4050_vm7  ;;  %vm14930_vm3 = vcmp.lt.f32.partialorder %v13273_v38, 1.0  ;;  %v7403_v54 = vsel %vm4434_vm4, 1.0, %v15470_v56  ;;  %v13299_v32 = vadd.f32 %v7431_v0, %v4526_v47  ;;  %v13309_v29 = vsel %vm15758_vm15, %v8126_v22, 0.0 }
 0x7fa   : > { %vm4786_vm14 = vmor %vm4690_vm0, %vm4754_vm13  ;;  %v4944_v13 = vsel %vm14930_vm3, %v11976_v51, -inf  ;;  %v7371_v48 = vsel %vm4082_vm1, 1.0, %v15470_v56  ;;  %vm4721_vm6 = vcmp.eq.f32.partialorder %v12500_v30, %v15755_v49  ;;  %vm15759_vm7 = vcmp.lt.f32.partialorder %v12413_v35, 1.0 }
 0x7fb   : > { %vm15754_vm8 = vmmov %vm15753_vm9  ;;  %v7435_v40 = vsel %vm4786_vm14, 1.0, %v15470_v56  ;;  %v4530_v8 = vadd.f32 %v7403_v54, %v7371_v48  ;;  %vm14933_vm0 = vcmp.lt.f32.partialorder %v13299_v32, 1.0  ;;  %vm4337_vm13 = vcmp.gt.f32.partialorder %v12492_v16, %v15755_v49 }
 0x7fc   : > { %v5020_v27 = vsel %vm15754_vm8, %v4944_v13, -inf  ;;  %vm15756_vm2 = vmmov %vm15754_vm8  ;;  %vm15760_vm9 = vcmp.gt.s32.totalorder %v15466_v12, 1  ;;  %vm3985_vm14 = vcmp.gt.f32.partialorder %v12483_v43, %v15755_v49  ;;  %vm15762_vm8 = vcmp.gt.s32.totalorder %v15466_v12, 0  ;;  %v4965_v43 = vpop.xlane.xlu0 %4964 }
 0x7fd   : > { %5021 = vmax.xlane.f32.xlu1 %v5020_v27  ;;  %v5005_v20 = vsel %vm15756_vm2, %v4939_v19, -inf  ;;  %v8128_v23 = vpop.eup %8127  ;;  %v13311_v21 = vadd.f32 %v7435_v40, %v4530_v8  ;;  %vm4401_vm4 = vmand %vm4369_vm11, %vm15760_vm9  ;;  %8129 = vpow2.f32 %v5082_v24  ;;  %vm15764_vm5 = vcmp.gt.s32.totalorder %v15466_v12, 2 }
 0x7fe   : > { %v13317_v15 = vsel %vm15759_vm7, %v8128_v23, 0.0  ;;  %vm15761_vm1 = vmmov %vm15756_vm2  ;;  %vm4689_vm7 = vcmp.gt.f32.partialorder %v12500_v30, %v15755_v49  ;;  %v4942_v16 = vsel %vm14933_vm0, %v15710_v59, -inf  ;;  %v5053_v27 = vsub.f32 %v11559_v45, %v4965_v43 }
 0x7ff   : > { %5006 = vmax.xlane.f32.xlu2 %v5005_v20  ;;  %v5181_v61 = vsel %vm15761_vm1, %v13317_v15, 0.0  ;;  %vm4049_vm2 = vmand %vm4017_vm12, %vm15762_vm8  ;;  %vm14931_vm9 = vcmp.lt.f32.partialorder %v13311_v21, 1.0 }
 0x800   : > { %5182 = vadd.xlane.f32.xlu0 %v5181_v61  ;;  %vm15763_vm15 = vmmov %vm15761_vm1  ;;  %v4946_v30 = vsel %vm14931_vm9, %v15745_v31, -inf  ;;  %v5088_v48 = vmul.f32 1.442695, %v5053_v27 }
 0x801   : > { %v5184_v35 = vsel %vm15763_vm15, %v13309_v29, 0.0  ;;  %vm4753_vm11 = vmand %vm4721_vm6, %vm15764_vm5 }
 0x802   : > { %vm4433_vm1 = vmor %vm4337_vm13, %vm4401_vm4  ;;  %8131 = vpow2.f32 %v5088_v48 }
 0x803   : > { %vm4081_vm12 = vmor %vm3985_vm14, %vm4049_vm2  ;;  %v7402_v55 = vsel %vm4433_vm1, 1.0, %v15470_v56  ;;  %v8130_v13 = vpop.eup %8129 }
 0x804   : > { %vm4785_vm8 = vmor %vm4689_vm7, %vm4753_vm11  ;;  %v7370_v0 = vsel %vm4081_vm12, 1.0, %v15470_v56  ;;  %v4974_v8 = vpop.xlane.xlu0 %4973  ;;  %vm15772_vm11 = vcmp.gt.s32.totalorder %v15466_v12, 1 }
 0x805   : > { %5185 = vadd.xlane.f32.xlu1 %v5184_v35  ;;  %vm15765_vm3 = vmmov %vm15763_vm15  ;;  %v7434_v14 = vsel %vm4785_vm8, 1.0, %v15470_v56  ;;  %v4529_v47 = vadd.f32 %v7402_v55, %v7370_v0  ;;  %v5056_v24 = vsub.f32 %v11580_v62, %v4974_v8  ;;  %vm15773_vm8 = vcmp.gt.s32.totalorder %v15466_v12, 0  ;;  %v15775_v62 = vld [vmem:[#allocation31_spill] sm:$0xff]  ;;  %v13391_v0 = vpop.permute.xlu2 %3929 }
 0x806   : > { %v5014_v3 = vsel %vm15765_vm3, %v4942_v16, -inf  ;;  %vm15766_vm5 = vmmov %vm15765_vm3  ;;  %vm15767_vm3 = vcmp.lt.f32.partialorder %v12176_v2, 1.0  ;;  %v15769_v2 = vld [vmem:[#allocation49_spill] sm:$0xff]  ;;  %vm15776_vm9 = vcmp.lt.f32.partialorder %v15775_v62, 1.0  ;;  %v15778_v55 = vld [vmem:[#allocation51_spill] sm:$0xff] }
 0x807   : > { %5015 = vmax.xlane.f32.xlu2 %v5014_v3  ;;  %v5026_v54 = vsel %vm15766_vm5, %v4946_v30, -inf  ;;  %v13351_v19 = vsel %vm15767_vm3, %v8130_v13, 0.0  ;;  %v13353_v22 = vadd.f32 %v7434_v14, %v4529_v47  ;;  %vm15768_vm6 = vmmov %vm15766_vm5  ;;  %vm4372_vm4 = vcmp.eq.f32.partialorder %v12658_v34, %v15769_v2  ;;  %v15779_v14 = vld [vmem:[#allocation60_spill] sm:$0xff] }
 0x808   : > { %5027 = vmax.xlane.f32.xlu0 %v5026_v54  ;;  %v5178_v40 = vsel %vm15768_vm6, %v13351_v19, 0.0  ;;  %v5094_v20 = vmul.f32 1.442695, %v5056_v24  ;;  %vm15770_vm14 = vmmov %vm15766_vm5  ;;  %vm4020_vm2 = vcmp.eq.f32.partialorder %v15771_v52, %v15769_v2  ;;  %v8132_v61 = vpop.eup %8131  ;;  %vm4724_vm15 = vcmp.eq.f32.partialorder %v12795_v9, %v15769_v2  ;;  %v15782_v24 = vld [vmem:[#allocation55_spill] sm:$0xff] }
 0x809   : > { %vm14932_vm13 = vcmp.lt.f32.partialorder %v13353_v22, 1.0  ;;  %vm4340_vm7 = vcmp.gt.f32.partialorder %v12658_v34, %v15769_v2  ;;  %vm4404_vm1 = vmand %vm4372_vm4, %vm15772_vm11  ;;  %vm3988_vm12 = vcmp.gt.f32.partialorder %v15771_v52, %v15769_v2  ;;  %vm4692_vm3 = vcmp.gt.f32.partialorder %v12795_v9, %v15769_v2  ;;  %v15783_v52 = vld [vmem:[#allocation36_spill] sm:$0xff] }
 0x80a   : > { %v4945_v45 = vsel %vm14932_vm13, %v15755_v49, -inf  ;;  %vm4052_vm5 = vmand %vm4020_vm2, %vm15773_vm8  ;;  %8133 = vpow2.f32 %v5094_v20  ;;  %vm15774_vm6 = vcmp.gt.s32.totalorder %v15466_v12, 2  ;;  %v13383_v35 = vsel %vm15776_vm9, %v8132_v61, 0.0 }
 0x80b   : > { %v5023_v23 = vsel %vm15770_vm14, %v4945_v45, -inf  ;;  %vm4756_vm14 = vmand %vm4724_vm15, %vm15774_vm6  ;;  %vm15777_vm11 = vcmask 23552   ;;  %vm15780_vm9 = vcmp.lt.f32.partialorder %v15779_v14, 1.0  ;;  %vm4375_vm2 = vcmp.eq.f32.partialorder %v13085_v46, %v15783_v52 }
 0x80c   : > { %vm4436_vm13 = vmor %vm4340_vm7, %vm4404_vm1  ;;  %v4983_v34 = vpop.xlane.xlu0 %4982  ;;  %v5187_v16 = vsel %vm15777_vm11, %v13383_v35, 0.0  ;;  %vm4023_vm7 = vcmp.eq.f32.partialorder %v12950_v57, %v15783_v52  ;;  %vm4727_vm1 = vcmp.eq.f32.partialorder %v13200_v4, %v15783_v52  ;;  %vm15785_vm8 = vcmp.gt.s32.totalorder %v15466_v12, 1 }
 0x80d   : > { %vm4084_vm0 = vmor %vm3988_vm12, %vm4052_vm5  ;;  %v7405_v43 = vsel %vm4436_vm13, 1.0, %v15470_v56  ;;  %v5059_v13 = vsub.f32 %v15778_v55, %v4983_v34  ;;  %vm4343_vm12 = vcmp.gt.f32.partialorder %v13085_v46, %v15783_v52  ;;  %vm15786_vm6 = vcmp.gt.s32.totalorder %v15466_v12, 0 }
 0x80e   : > { %vm4788_vm4 = vmor %vm4692_vm3, %vm4756_vm14  ;;  %v7373_v9 = vsel %vm4084_vm0, 1.0, %v15470_v56  ;;  %vm3991_vm3 = vcmp.gt.f32.partialorder %v12950_v57, %v15783_v52 }
 0x80f   : > { %5179 = vadd.xlane.f32.xlu2 %v5178_v40  ;;  %v7437_v30 = vsel %vm4788_vm4, 1.0, %v15470_v56  ;;  %v4532_v54 = vadd.f32 %v7405_v43, %v7373_v9  ;;  %v5100_v48 = vmul.f32 1.442695, %v5059_v13  ;;  %vm15781_vm13 = vmmov %vm15777_vm11  ;;  %vm4695_vm4 = vcmp.gt.f32.partialorder %v13200_v4, %v15783_v52  ;;  %v15791_v13 = vld [vmem:[#allocation24_spill] sm:$0xff] }
 0x810   : > { %v8134_v3 = vpop.eup %8133  ;;  %vm15784_vm15 = vmmov %vm15777_vm11  ;;  %vm15787_vm11 = vcmp.gt.s32.totalorder %v15466_v12, 2 }
 0x811   : > { %v13395_v27 = vsel %vm15780_vm9, %v8134_v3, 0.0  ;;  %v13397_v47 = vadd.f32 %v7437_v30, %v4532_v54  ;;  %8135 = vpow2.f32 %v5100_v48  ;;  %vm4407_vm5 = vmand %vm4375_vm2, %vm15785_vm8  ;;  %vm15790_vm8 = vcmask 23552   ;;  %v15792_v48 = vld [vmem:[#allocation62_spill] sm:$0xff] }
 0x812   : > { %v5196_v40 = vsel %vm15781_vm13, %v13395_v27, 0.0  ;;  %vm4055_vm14 = vmand %vm4023_vm7, %vm15786_vm6  ;;  %vm15793_vm7 = vcmp.lt.f32.partialorder %v15792_v48, 1.0 }
 0x813   : > { %vm14934_vm0 = vcmp.lt.f32.partialorder %v13397_v47, 1.0  ;;  %vm4759_vm9 = vmand %vm4727_vm1, %vm15787_vm11 }
 0x814   : > { %v4992_v8 = vpop.xlane.xlu0 %4991  ;;  %v4948_v20 = vsel %vm14934_vm0, %v15769_v2, -inf  ;;  %vm4087_vm0 = vmor %vm3991_vm3, %vm4055_vm14  ;;  %vm15800_vm14 = vcmp.gt.s32.totalorder %v15466_v12, 1 }
 0x815   : > { %v5062_v45 = vsub.f32 %v15782_v24, %v4992_v8  ;;  %v5032_v62 = vsel %vm15784_vm15, %v4948_v20, -inf  ;;  %vm4439_vm15 = vmor %vm4343_vm12, %vm4407_vm5  ;;  %v7376_v30 = vsel %vm4087_vm0, 1.0, %v15470_v56 }
 0x816   : > { %vm4791_vm2 = vmor %vm4695_vm4, %vm4759_vm9  ;;  %v7408_v3 = vsel %vm4439_vm15, 1.0, %v15470_v56 }
 0x817   : > { %5024 = vmax.xlane.f32.xlu2 %v5023_v23  ;;  %v13406_v23 = vpop.permute.xlu2 %3944  ;;  %v5106_v61 = vmul.f32 1.442695, %v5062_v45  ;;  %v8136_v34 = vpop.eup %8135  ;;  %v7440_v55 = vsel %vm4791_vm2, 1.0, %v15470_v56  ;;  %v4535_v14 = vadd.f32 %v7408_v3, %v7376_v30  ;;  %vm15795_vm1 = vmmov %vm15790_vm8 }
 0x818   : > { %vm15801_vm11 = vmmov %vm15795_vm1 }
 0x819   : > { %8137 = vpow2.f32 %v5106_v61  ;;  %v13443_v8 = vadd.f32 %v7440_v55, %v4535_v14 }
 0x81b   : > { %15794 = vst [vmem:[#allocation53_spill] sm:$0xff] %v13443_v8  ;;  %vm14936_vm0 = vcmp.lt.f32.partialorder %v13443_v8, 1.0 }
 0x81c   : > { %v5001_v9 = vpop.xlane.xlu0 %5000  ;;  %v4951_v3 = vsel %vm14936_vm0, %v15783_v52, -inf }
 0x81d   : > { %v5065_v54 = vsub.f32 %v15791_v13, %v5001_v9  ;;  %v15798_v9 = vld [vmem:[#allocation71_spill] sm:$0xff]  ;;  %v5041_v30 = vsel %vm15801_vm11, %v4951_v3, -inf }
 0x81f   : > { %5188 = vadd.xlane.f32.xlu2 %v5187_v16  ;;  %v15788_v16 = vld [vmem:[#allocation61_spill] sm:$0xff]  ;;  %v13431_v46 = vpop.permute.xlu2 %3959  ;;  %v8138_v4 = vpop.eup %8137  ;;  %v5112_v24 = vmul.f32 1.442695, %v5065_v54 }
 0x820   : > { %vm15789_vm13 = vcmp.lt.f32.partialorder %v15788_v16, 1.0  ;;  %v15796_v16 = vld [vmem:[#allocation52_spill] sm:$0xff] }
 0x821   : > { %v13429_v43 = vsel %vm15789_vm13, %v8136_v34, 0.0  ;;  %8139 = vpow2.f32 %v5112_v24  ;;  %vm4021_vm5 = vcmp.eq.f32.partialorder %v15798_v9, %v15796_v16  ;;  %vm3989_vm9 = vcmp.gt.f32.partialorder %v15798_v9, %v15796_v16  ;;  %v15804_v24 = vld [vmem:[#allocation44_spill] sm:$0xff] }
 0x822   : > { %v5205_v57 = vsel %vm15790_vm8, %v13429_v43, 0.0  ;;  %vm15802_vm13 = vcmp.gt.s32.totalorder %v15466_v12, 0  ;;  %vm15803_vm8 = vcmp.gt.s32.totalorder %v15466_v12, 2 }
 0x823   : > { %vm4053_vm15 = vmand %vm4021_vm5, %vm15802_vm13 }
 0x827   : > { %5197 = vadd.xlane.f32.xlu2 %v5196_v40  ;;  %v13441_v40 = vsel %vm15793_vm7, %v8138_v4, 0.0  ;;  %v8140_v13 = vpop.eup %8139 }
 0x828   : > { %v5214_v20 = vsel %vm15795_vm1, %v13441_v40, 0.0 }
 0x82a   : > { %v4968_v45 = vpop.xlane.xlu1 %4967 }
 0x82b   : > { %v5054_v61 = vsub.f32 %v11565_v5, %v4968_v45  ;;  %v15799_v5 = vld [vmem:[#allocation15_spill] sm:$0xff] }
 0x82c   : > { %vm4725_vm3 = vcmp.eq.f32.partialorder %v15799_v5, %v15796_v16  ;;  %vm4693_vm2 = vcmp.gt.f32.partialorder %v15799_v5, %v15796_v16 }
 0x82d   : > { %v5090_v34 = vmul.f32 1.442695, %v5054_v61  ;;  %vm4757_vm7 = vmand %vm4725_vm3, %vm15803_vm8 }
 0x82e   : > { %vm4789_vm5 = vmor %vm4693_vm2, %vm4757_vm7  ;;  %vm15812_vm7 = vcmp.gt.s32.totalorder %v15466_v12, 1 }
 0x82f   : > { %5033 = vmax.xlane.f32.xlu2 %v5032_v62  ;;  %v13448_v62 = vpop.permute.xlu2 %4311  ;;  %8141 = vpow2.f32 %v5090_v34 }
 0x835   : > { %v8142_v54 = vpop.eup %8141 }
 0x837   : > { %5206 = vadd.xlane.f32.xlu2 %v5205_v57  ;;  %v15797_v57 = vld [vmem:[#allocation16_spill] sm:$0xff]  ;;  %v13474_v48 = vpop.permute.xlu2 %4663 }
 0x838   : > { %vm4373_vm12 = vcmp.eq.f32.partialorder %v15797_v57, %v15796_v16  ;;  %vm4341_vm6 = vcmp.gt.f32.partialorder %v15797_v57, %v15796_v16  ;;  %v15808_v57 = vld [vmem:[#allocation26_spill] sm:$0xff] }
 0x839   : > { %vm4405_vm4 = vmand %vm4373_vm12, %vm15800_vm14  ;;  %vm15805_vm14 = vcmp.lt.f32.partialorder %v15804_v24, 1.0  ;;  %vm4019_vm3 = vcmp.eq.f32.partialorder %v13391_v0, %v15808_v57 }
 0x83a   : > { %vm4437_vm1 = vmor %vm4341_vm6, %vm4405_vm4  ;;  %v13478_v45 = vsel %vm15805_vm14, %v8142_v54, 0.0 }
 0x83b   : > { %v4977_v4 = vpop.xlane.xlu1 %4976  ;;  %vm4085_vm12 = vmor %vm3989_vm9, %vm4053_vm15  ;;  %v7406_v34 = vsel %vm4437_vm1, 1.0, %v15470_v56  ;;  %vm3987_vm9 = vcmp.gt.f32.partialorder %v13391_v0, %v15808_v57  ;;  %vm15811_vm15 = vcmp.gt.s32.totalorder %v15466_v12, 0  ;;  %v15815_v0 = vld [vmem:[#allocation67_spill] sm:$0xff] }
 0x83c   : > { %v5057_v55 = vsub.f32 %v11593_v1, %v4977_v4  ;;  %v5190_v1 = vsel %vm15801_vm11, %v13478_v45, 0.0  ;;  %v7374_v3 = vsel %vm4085_vm12, 1.0, %v15470_v56  ;;  %vm15809_vm6 = vmmov %vm15801_vm11  ;;  %v7438_v4 = vsel %vm4789_vm5, 1.0, %v15470_v56 }
 0x83d   : > { %5191 = vadd.xlane.f32.xlu0 %v5190_v1  ;;  %vm4051_vm2 = vmand %vm4019_vm3, %vm15811_vm15  ;;  %vm4723_vm14 = vcmp.eq.f32.partialorder %v15815_v0, %v15808_v57 }
 0x83e   : > { %v5096_v14 = vmul.f32 1.442695, %v5057_v55  ;;  %vm4083_vm5 = vmor %vm3987_vm9, %vm4051_vm2 }
 0x83f   : > { %5215 = vadd.xlane.f32.xlu2 %v5214_v20  ;;  %v15806_v20 = vld [vmem:[#allocation63_spill] sm:$0xff]  ;;  %vm15816_vm11 = vmmov %vm15809_vm6 }
 0x840   : > { %8143 = vpow2.f32 %v5096_v14  ;;  %vm15807_vm13 = vcmp.lt.f32.partialorder %v15806_v20, 1.0 }
 0x841   : > { %v13484_v61 = vsel %vm15807_vm13, %v8140_v13, 0.0  ;;  %v4533_v13 = vadd.f32 %v7406_v34, %v7374_v3 }
 0x842   : > { %v5223_v5 = vsel %vm15809_vm6, %v13484_v61, 0.0  ;;  %vm4691_vm6 = vcmp.gt.f32.partialorder %v15815_v0, %v15808_v57 }
 0x843   : > { %v13500_v14 = vadd.f32 %v7438_v4, %v4533_v13  ;;  %v15818_v13 = vld [vmem:[#allocation41_spill] sm:$0xff] }
 0x844   : > { %vm4376_vm2 = vcmp.eq.f32.partialorder %v13039_v28, %v15818_v13 }
 0x845   : > { %v4986_v9 = vpop.xlane.xlu1 %4985  ;;  %vm4917_vm3 = vcmp.lt.f32.partialorder %v13500_v14, 1.0 }
 0x846   : > { %v5060_v55 = vsub.f32 %v11657_v17, %v4986_v9  ;;  %v8144_v54 = vpop.eup %8143  ;;  %v15813_v17 = vld [vmem:[#allocation73_spill] sm:$0xff] }
 0x847   : > { %5042 = vmax.xlane.f32.xlu2 %v5041_v30  ;;  %v15810_v30 = vld [vmem:[#allocation66_spill] sm:$0xff]  ;;  %vm15814_vm12 = vcmp.lt.f32.partialorder %v15813_v17, 1.0 }
 0x848   : > { %vm4371_vm4 = vcmp.eq.f32.partialorder %v15810_v30, %v15808_v57  ;;  %vm4339_vm8 = vcmp.gt.f32.partialorder %v15810_v30, %v15808_v57  ;;  %v5102_v24 = vmul.f32 1.442695, %v5060_v55  ;;  %v13508_v20 = vsel %vm15814_vm12, %v8144_v54, 0.0 }
 0x849   : > { %vm4403_vm1 = vmand %vm4371_vm4, %vm15812_vm7  ;;  %v5199_v3 = vsel %vm15816_vm11, %v13508_v20, 0.0  ;;  %vm15817_vm4 = vcmp.gt.s32.totalorder %v15466_v12, 2  ;;  %v4949_v55 = vsel %vm4917_vm3, %v15796_v16, -inf  ;;  %vm15820_vm12 = vcmp.gt.s32.totalorder %v15466_v12, 1 }
 0x84a   : > { %5200 = vadd.xlane.f32.xlu0 %v5199_v3  ;;  %vm4435_vm13 = vmor %vm4339_vm8, %vm4403_vm1  ;;  %8145 = vpow2.f32 %v5102_v24  ;;  %vm4024_vm8 = vcmp.eq.f32.partialorder %v12898_v37, %v15818_v13  ;;  %vm4344_vm1 = vcmp.gt.f32.partialorder %v13039_v28, %v15818_v13 }
 0x84b   : > { %vm4755_vm15 = vmand %vm4723_vm14, %vm15817_vm4  ;;  %v7404_v30 = vsel %vm4435_vm13, 1.0, %v15470_v56  ;;  %vm3992_vm4 = vcmp.gt.f32.partialorder %v12898_v37, %v15818_v13 }
 0x84c   : > { %vm4787_vm9 = vmor %vm4691_vm6, %vm4755_vm15  ;;  %vm15822_vm6 = vcmp.lt.f32.partialorder %v12829_v50, 1.0 }
 0x84d   : > { %vm15819_vm7 = vmmov %vm15816_vm11  ;;  %vm15821_vm11 = vcmp.gt.s32.totalorder %v15466_v12, 0 }
 0x84e   : > { %vm4408_vm14 = vmand %vm4376_vm2, %vm15820_vm12  ;;  %vm4696_vm2 = vcmp.gt.f32.partialorder %v13162_v60, %v15818_v13  ;;  %vm15825_vm12 = vcmp.lt.f32.partialorder %v12873_v10, 1.0 }
 0x84f   : > { %5224 = vadd.xlane.f32.xlu2 %v5223_v5  ;;  %v4971_v1 = vpop.xlane.xlu2 %4970  ;;  %v7372_v5 = vsel %vm4083_vm5, 1.0, %v15470_v56  ;;  %vm4728_vm5 = vcmp.eq.f32.partialorder %v13162_v60, %v15818_v13  ;;  %vm4056_vm13 = vmand %vm4024_vm8, %vm15821_vm11 }
 0x850   : > { %v5055_v34 = vsub.f32 %v11571_v6, %v4971_v1  ;;  %v4531_v54 = vadd.f32 %v7404_v30, %v7372_v5  ;;  %v8146_v0 = vpop.eup %8145  ;;  %vm4440_vm15 = vmor %vm4344_vm1, %vm4408_vm14  ;;  %v13561_v30 = vpop.xlane.xlu0 %5009 }
 0x851   : > { %v13557_v50 = vsel %vm15825_vm12, %v8146_v0, 0.0  ;;  %vm15832_vm12 = vcmp.gt.s32.totalorder %v15466_v12, 1 }
 0x852   : > { %v5092_v9 = vmul.f32 1.442695, %v5055_v34  ;;  %v4995_v4 = vpop.xlane.xlu1 %4994  ;;  %v7436_v34 = vsel %vm4787_vm9, 1.0, %v15470_v56  ;;  %vm15823_vm9 = vmmov %vm15819_vm7 }
 0x853   : > { %v5063_v6 = vsub.f32 %v11742_v26, %v4995_v4  ;;  %v5035_v26 = vsel %vm15819_vm7, %v4949_v55, -inf  ;;  %vm15824_vm7 = vcmp.gt.s32.totalorder %v15466_v12, 2  ;;  %vm15826_vm14 = vmmov %vm15823_vm9 }
 0x854   : > { %8147 = vpow2.f32 %v5092_v9  ;;  %5036 = vmax.xlane.f32.xlu0 %v5035_v26  ;;  %v13539_v9 = vadd.f32 %v7436_v34, %v4531_v54  ;;  %vm4760_vm8 = vmand %vm4728_vm5, %vm15824_vm7  ;;  %v5208_v55 = vsel %vm15826_vm14, %v13557_v50, 0.0  ;;  %v15827_v54 = vld [vmem:[#allocation35_spill] sm:$0xff]  ;;  %vm15831_vm7 = vcmp.lt.f32.partialorder %v13003_v33, 1.0 }
 0x855   : > { %v5108_v24 = vmul.f32 1.442695, %v5063_v6  ;;  %v7409_v6 = vsel %vm4440_vm15, 1.0, %v15470_v56  ;;  %vm4792_vm1 = vmor %vm4696_vm2, %vm4760_vm8  ;;  %vm4022_vm5 = vcmp.eq.f32.partialorder %v13406_v23, %v15827_v54  ;;  %vm15829_vm15 = vcmp.gt.s32.totalorder %v15466_v12, 0 }
 0x856   : > { %vm4915_vm11 = vcmp.lt.f32.partialorder %v13539_v9, 1.0  ;;  %vm15830_vm2 = vmmov %vm15826_vm14 }
 0x857   : > { %8149 = vpow2.f32 %v5108_v24  ;;  %v4947_v10 = vsel %vm4915_vm11, %v15808_v57, -inf }
 0x858   : > { %v4980_v1 = vpop.xlane.xlu2 %4979 }
 0x859   : > { %v5058_v17 = vsub.f32 %v11614_v25, %v4980_v1 }
 0x85a   : > { %v8148_v3 = vpop.eup %8147 }
 0x85b   : > { %v13545_v5 = vsel %vm15822_vm6, %v8148_v3, 0.0  ;;  %v5098_v28 = vmul.f32 1.442695, %v5058_v17  ;;  %vm4088_vm6 = vmor %vm3992_vm4, %vm4056_vm13  ;;  %v15828_v17 = vld [vmem:[#allocation69_spill] sm:$0xff]  ;;  %vm3990_vm4 = vcmp.gt.f32.partialorder %v13406_v23, %v15827_v54 }
 0x85c   : > { %v5004_v25 = vpop.xlane.xlu1 %5003  ;;  %v5193_v4 = vsel %vm15823_vm9, %v13545_v5, 0.0  ;;  %5209 = vadd.xlane.f32.xlu0 %v5208_v55  ;;  %v7377_v24 = vsel %vm4088_vm6, 1.0, %v15470_v56  ;;  %vm4374_vm13 = vcmp.eq.f32.partialorder %v15828_v17, %v15827_v54  ;;  %vm4054_vm9 = vmand %vm4022_vm5, %vm15829_vm15  ;;  %vm4342_vm8 = vcmp.gt.f32.partialorder %v15828_v17, %v15827_v54 }
 0x85d   : > { %5194 = vadd.xlane.f32.xlu1 %v5193_v4  ;;  %8151 = vpow2.f32 %v5098_v28  ;;  %v8150_v1 = vpop.eup %8149  ;;  %v4536_v0 = vadd.f32 %v7409_v6, %v7377_v24  ;;  %v5066_v34 = vsub.f32 %v11910_v11, %v5004_v25  ;;  %v5029_v28 = vsel %vm15830_vm2, %v4947_v10, -inf  ;;  %vm4406_vm6 = vmand %vm4374_vm13, %vm15832_vm12  ;;  %v15834_v6 = vld [vmem:[#allocation70_spill] sm:$0xff]  ;;  %v13604_v10 = vpop.xlane.xlu0 %5018 }
 0x85e   : > { %v13583_v4 = vsel %vm15831_vm7, %v8150_v1, 0.0  ;;  %vm4086_vm14 = vmor %vm3990_vm4, %vm4054_vm9  ;;  %vm4694_vm13 = vcmp.gt.f32.partialorder %v15834_v6, %v15827_v54  ;;  %vm15837_vm7 = vcmp.gt.s32.totalorder %v15466_v12, 2 }
 0x85f   : > { %v5114_v25 = vmul.f32 1.442695, %v5066_v34  ;;  %vm15835_vm5 = vmmov %vm15830_vm2  ;;  %vm15836_vm2 = vcmp.lt.f32.partialorder %v12953_v18, 1.0  ;;  %v7375_v55 = vsel %vm4086_vm14, 1.0, %v15470_v56  ;;  %vm15841_vm14 = vcmp.lt.f32.partialorder %v13045_v39, 1.0 }
 0x860   : > { %v5217_v33 = vsel %vm15835_vm5, %v13583_v4, 0.0  ;;  %vm4438_vm15 = vmor %vm4342_vm8, %vm4406_vm6 }
 0x861   : > { %v7407_v17 = vsel %vm4438_vm15, 1.0, %v15470_v56  ;;  %vm15838_vm9 = vmmov %vm15835_vm5 }
 0x862   : > { %v4989_v37 = vpop.xlane.xlu2 %4988 }
 0x863   : > { %v5061_v60 = vsub.f32 %v15577_v58, %v4989_v37  ;;  %v7441_v58 = vsel %vm4792_vm1, 1.0, %v15470_v56  ;;  %v8152_v37 = vpop.eup %8151  ;;  %vm4726_vm1 = vcmp.eq.f32.partialorder %v15834_v6, %v15827_v54 }
 0x864   : > { %v13589_v23 = vadd.f32 %v7441_v58, %v4536_v0  ;;  %5218 = vadd.xlane.f32.xlu0 %v5217_v33  ;;  %vm4758_vm12 = vmand %vm4726_vm1, %vm15837_vm7  ;;  %v4534_v58 = vadd.f32 %v7407_v17, %v7375_v55 }
 0x865   : > { %v5104_v3 = vmul.f32 1.442695, %v5061_v60  ;;  %5030 = vmax.xlane.f32.xlu1 %v5029_v28  ;;  %v13597_v60 = vsel %vm15836_vm2, %v8152_v37, 0.0  ;;  %vm4790_vm8 = vmor %vm4694_vm13, %vm4758_vm12  ;;  %vm15842_vm2 = vcmp.gt.s32.totalorder %v15466_v12, 1 }
 0x866   : > { %v5013_v26 = vpop.xlane.xlu1 %5012  ;;  %15833 = vst [vmem:[#allocation39_spill] sm:$0xff] %v13589_v23  ;;  %vm14935_vm4 = vcmp.lt.f32.partialorder %v13589_v23, 1.0  ;;  %v5202_v18 = vsel %vm15838_vm9, %v13597_v60, 0.0  ;;  %vm15840_vm1 = vmmov %vm15835_vm5  ;;  %v7439_v6 = vsel %vm4790_vm8, 1.0, %v15470_v56  ;;  %vm15844_vm8 = vcmp.gt.s32.totalorder %v15466_v12, 0 }
 0x867   : > { %8153 = vpow2.f32 %v5104_v3  ;;  %v5069_v1 = vsub.f32 %v11945_v41, %v5013_v26  ;;  %v4952_v0 = vsel %vm14935_vm4, %v15818_v13, -inf  ;;  %v15839_v41 = vld [vmem:[#allocation68_spill] sm:$0xff]  ;;  %v13625_v33 = vadd.f32 %v7439_v6, %v4534_v58  ;;  %vm15843_vm12 = vmmov %vm15840_vm1 }
 0x868   : > { %8155 = vpow2.f32 %v5114_v25  ;;  %vm4377_vm6 = vcmp.eq.f32.partialorder %v13448_v62, %v15839_v41  ;;  %v5044_v37 = vsel %vm15840_vm1, %v4952_v0, -inf  ;;  %vm4025_vm5 = vcmp.eq.f32.partialorder %v13431_v46, %v15839_v41 }
 0x869   : > { %v5120_v3 = vmul.f32 1.442695, %v5069_v1  ;;  %vm4345_vm15 = vcmp.gt.f32.partialorder %v13448_v62, %v15839_v41  ;;  %vm4409_vm13 = vmand %vm4377_vm6, %vm15842_vm2  ;;  %vm4729_vm7 = vcmp.eq.f32.partialorder %v13474_v48, %v15839_v41  ;;  %vm3993_vm9 = vcmp.gt.f32.partialorder %v13431_v46, %v15839_v41 }
 0x86a   : > { %v4998_v11 = vpop.xlane.xlu2 %4997  ;;  %vm4057_vm1 = vmand %vm4025_vm5, %vm15844_vm8  ;;  %vm15845_vm6 = vcmp.lt.f32.partialorder %v13104_v44, 1.0  ;;  %vm4697_vm4 = vcmp.gt.f32.partialorder %v13474_v48, %v15839_v41  ;;  %vm15847_vm8 = vcmask 23552  }
 0x86b   : > { %v5064_v26 = vsub.f32 %v15625_v63, %v4998_v11  ;;  %8157 = vpow2.f32 %v5120_v3  ;;  %vm4441_vm2 = vmor %vm4345_vm15, %vm4409_vm13 }
 0x86c   : > { %5045 = vmax.xlane.f32.xlu0 %v5044_v37  ;;  %vm4089_vm5 = vmor %vm3993_vm9, %vm4057_vm1  ;;  %v7410_v48 = vsel %vm4441_vm2, 1.0, %v15470_v56  ;;  %vm15850_vm1 = vcmp.lt.f32.partialorder %v13140_v53, 1.0 }
 0x86d   : > { %5203 = vadd.xlane.f32.xlu1 %v5202_v18  ;;  %v8154_v34 = vpop.eup %8153  ;;  %v5110_v39 = vmul.f32 1.442695, %v5064_v26  ;;  %vm15848_vm13 = vmmov %vm15847_vm8 }
 0x86e   : > { %v13623_v25 = vsel %vm15841_vm14, %v8154_v34, 0.0  ;;  %v8156_v55 = vpop.eup %8155  ;;  %vm4918_vm14 = vcmp.lt.f32.partialorder %v13625_v33, 1.0  ;;  %v7378_v34 = vsel %vm4089_vm5, 1.0, %v15470_v56 }
 0x86f   : > { %v5211_v17 = vsel %vm15843_vm12, %v13623_v25, 0.0  ;;  %v13647_v62 = vsel %vm15845_vm6, %v8156_v55, 0.0  ;;  %vm15846_vm12 = vcmp.gt.s32.totalorder %v15466_v12, 2  ;;  %v4950_v18 = vsel %vm4918_vm14, %v15827_v54, -inf }
 0x870   : > { %v5022_v24 = vpop.xlane.xlu1 %5021  ;;  %vm4761_vm0 = vmand %vm4729_vm7, %vm15846_vm12  ;;  %v5226_v44 = vsel %vm15847_vm8, %v13647_v62, 0.0  ;;  %v5038_v3 = vsel %vm15848_vm13, %v4950_v18, -inf }
 0x871   : > { %v5072_v11 = vsub.f32 %v11976_v51, %v5022_v24  ;;  %v8158_v46 = vpop.eup %8157  ;;  %vm4793_vm15 = vmor %vm4697_vm4, %vm4761_vm0 }
 0x872   : > { %v13614_v28 = vpop.xlane.xlu2 %5006  ;;  %v13667_v6 = vsel %vm4909_vm10, %v8158_v46, 0.0  ;;  %vm15849_vm10 = vmmov %vm15847_vm8 }
 0x873   : > { %v5183_v1 = vpop.xlane.xlu0 %5182  ;;  %v5126_v24 = vmul.f32 1.442695, %v5072_v11  ;;  %v5067_v55 = vsub.f32 %v15678_v7, %v13614_v28  ;;  %v4537_v11 = vadd.f32 %v7410_v48, %v7378_v34  ;;  %v5235_v13 = vsel %vm15849_vm10, %v13667_v6, 0.0  ;;  %vm15852_vm13 = vmmov %vm15847_vm8 }
 0x874   : > { %8159 = vrcp.f32 %v5183_v1  ;;  %5227 = vadd.xlane.f32.xlu0 %v5226_v44  ;;  %v5298_v18 = vand.u32 2147483647, %v5183_v1  ;;  %vm5294_vm4 = vweird.f32 %v5183_v1 }
 0x875   : > { %5212 = vadd.xlane.f32.xlu1 %v5211_v17  ;;  %v7442_v17 = vsel %vm4793_vm15, 1.0, %v15470_v56  ;;  %vm15851_vm15 = vcmp.lt.f32.partialorder %v13273_v38, 1.0 }
 0x876   : > { %vm5299_vm6 = vcmp.eq.f32.partialorder %v5298_v18, 8.507059e+37 }
 0x878   : > { %v13633_v63 = vpop.xlane.xlu1 %5185 }
 0x879   : > { %8161 = vrcp.f32 %v13633_v63  ;;  %v5315_v42 = vand.u32 2147483648, %v13633_v63  ;;  %vm5309_vm2 = vweird.f32 %v13633_v63 }
 0x87a   : > { %v13654_v51 = vpop.xlane.xlu2 %5015  ;;  %8163 = vpow2.f32 %v5110_v39  ;;  %v8160_v0 = vpop.eup %8159  ;;  %v5300_v39 = vand.u32 2147483648, %v5183_v1 }
 0x87b   : > { %v5290_v12 = vmul.f32 %v8160_v0, %v5183_v1  ;;  %8165 = vpow2.f32 %v5126_v24  ;;  %vm5295_vm0 = vweird.f32 %v8160_v0  ;;  %v13680_v1 = vadd.f32 %v7442_v17, %v4537_v11 }
 0x87c   : > { %vm5296_vm9 = vmor %vm5294_vm4, %vm5295_vm0  ;;  %v5301_v56 = vor.u32 1.1754944e-38, %v5300_v39  ;;  %5236 = vadd.xlane.f32.xlu0 %v5235_v13 }
 0x87d   : > { %v5291_v26 = vsub.f32 1.0, %v5290_v12  ;;  %5039 = vmax.xlane.f32.xlu1 %v5038_v3  ;;  %v5313_v12 = vand.u32 2147483647, %v13633_v63  ;;  %vm4921_vm0 = vcmp.lt.f32.partialorder %v13680_v1, 1.0  ;;  %vm15853_vm4 = vmmov %vm15847_vm8 }
 0x87e   : > { %vm15854_vm10 = vmmov %vm15853_vm4  ;;  %v4953_v18 = vsel %vm4921_vm0, %v15839_v41, -inf }
 0x87f   : > { %v8162_v58 = vpop.eup %8161  ;;  %v5292_v23 = vmul.f32 %v8160_v0, %v5291_v26  ;;  %vm5314_vm5 = vcmp.eq.f32.partialorder %v5313_v12, 8.507059e+37 }
 0x880   : > { %v5305_v37 = vmul.f32 %v8162_v58, %v13633_v63  ;;  %v8164_v44 = vpop.eup %8163  ;;  %vm5310_vm7 = vweird.f32 %v8162_v58 }
 0x881   : > { %v5293_v7 = vadd.f32 %v8160_v0, %v5292_v23  ;;  %v13678_v48 = vsel %vm15850_vm1, %v8164_v44, 0.0  ;;  %v8166_v34 = vpop.eup %8165  ;;  %v5116_v23 = vmul.f32 1.442695, %v5067_v55  ;;  %vm5311_vm12 = vmor %vm5309_vm2, %vm5310_vm7 }
 0x882   : > { %v5306_v24 = vsub.f32 1.0, %v5305_v37  ;;  %v5180_v46 = vpop.xlane.xlu2 %5179  ;;  %v5316_v37 = vor.u32 1.1754944e-38, %v5315_v42  ;;  %v5220_v13 = vsel %vm15847_vm8, %v13678_v48, 0.0  ;;  %vm15860_vm8 = vmmov %vm15853_vm4 }
 0x883   : > { %8167 = vrcp.f32 %v5180_v46  ;;  %v5297_v26 = vsel %vm5296_vm9, %v8160_v0, %v5293_v7  ;;  %v13697_v0 = vsel %vm15851_vm15, %v8166_v34, 0.0  ;;  %v5283_v12 = vand.u32 2147483647, %v5180_v46  ;;  %vm15855_vm9 = vmmov %vm15853_vm4 }
 0x884   : > { %v5307_v28 = vmul.f32 %v8162_v58, %v5306_v24  ;;  %v5302_v53 = vsel %vm5299_vm6, %v5301_v56, %v5297_v26  ;;  %8169 = vpow2.f32 %v5116_v23  ;;  %v5244_v38 = vsel %vm15853_vm4, %v13697_v0, 0.0 }
 0x885   : > { %v13693_v39 = vmul.f32 %v5302_v53, %v13317_v15  ;;  %5221 = vadd.xlane.f32.xlu1 %v5220_v13  ;;  %5245 = vadd.xlane.f32.xlu0 %v5244_v38  ;;  %v5047_v42 = vsel %vm15855_vm9, %v4953_v18, -inf  ;;  %vm5279_vm1 = vweird.f32 %v5180_v46  ;;  %v15856_v56 = vmov 1  }
 0x886   : > { %v5308_v3 = vadd.f32 %v8162_v58, %v5307_v28  ;;  %vm5284_vm2 = vcmp.eq.f32.partialorder %v5283_v12, 8.507059e+37 }
 0x887   : > { %5964 = vperm.xlu2 %7937, %v13693_v39   ;;  %5755 = vst.msk [vmem:[%s13688_s14 + $0x8] sm:$0xff] %vm15852_vm13, %v13693_v39 }
 0x888   : > { %v5312_v63 = vsel %vm5311_vm12, %v8162_v58, %v5308_v3  ;;  %vm15857_vm12 = vcmp.lt.f32.partialorder %v13255_v36, 1.0  ;;  %v15861_v36 = vld [vmem:[#allocation13_spill] sm:$0xff] }
 0x889   : > { %v5317_v55 = vsel %vm5314_vm5, %v5316_v37, %v5312_v63  ;;  %v8168_v11 = vpop.eup %8167  ;;  %vm15859_vm5 = vmmov %vm15853_vm4 }
 0x88a   : > { %v13705_v17 = vmul.f32 %v5317_v55, %v13309_v29  ;;  %v5275_v15 = vmul.f32 %v8168_v11, %v5180_v46  ;;  %v13707_v44 = vpop.xlane.xlu2 %5024  ;;  %vm5280_vm7 = vweird.f32 %v8168_v11  ;;  %v5285_v29 = vand.u32 2147483648, %v5180_v46  ;;  %v8170_v28 = vpop.eup %8169  ;;  %vm15862_vm9 = vmmov %vm15859_vm5 }
 0x88b   : > { %vm5281_vm6 = vmor %vm5279_vm1, %vm5280_vm7  ;;  %v13721_v23 = vsel %vm15857_vm12, %v8170_v28, 0.0 }
 0x88c   : > { %5756 = vst.msk [vmem:[%s13688_s14 + $0x10] sm:$0xff] %vm15854_vm10, %v13705_v17  ;;  %v5276_v58 = vsub.f32 1.0, %v5275_v15  ;;  %v5286_v34 = vor.u32 1.1754944e-38, %v5285_v29  ;;  %v5229_v46 = vsel %vm15859_vm5, %v13721_v23, 0.0  ;;  %v5068_v15 = vsub.f32 %v15861_v36, %v13561_v30 }
 0x88d   : > { %5048 = vmax.xlane.f32.xlu1 %v5047_v42 }
 0x88e   : > { %v5277_v24 = vmul.f32 %v8168_v11, %v5276_v58  ;;  %v5118_v29 = vmul.f32 1.442695, %v5068_v15 }
 0x88f   : > { %7938 = vset.pattern.permute.xlu2 %v15856_v56 }
 0x890   : > { %v5278_v7 = vadd.f32 %v8168_v11, %v5277_v24 }
 0x892   : > { %v5189_v3 = vpop.xlane.xlu2 %5188  ;;  %v5282_v26 = vsel %vm5281_vm6, %v8168_v11, %v5278_v7 }
 0x893   : > { %8171 = vrcp.f32 %v5189_v3  ;;  %v5287_v37 = vsel %vm5284_vm2, %v5286_v34, %v5282_v26  ;;  %v5330_v38 = vand.u32 2147483648, %v5189_v3  ;;  %vm5324_vm13 = vweird.f32 %v5189_v3 }
 0x894   : > { %v13724_v53 = vmul.f32 %v5287_v37, %v13351_v19  ;;  %v5328_v19 = vand.u32 2147483647, %v5189_v3 }
 0x895   : > { %5230 = vadd.xlane.f32.xlu1 %v5229_v46  ;;  %v5331_v12 = vor.u32 1.1754944e-38, %v5330_v38 }
 0x896   : > { %15858 = vst [vmem:[#allocation46_spill] sm:$0xff] %v13724_v53  ;;  %vm5329_vm10 = vcmp.eq.f32.partialorder %v5328_v19, 8.507059e+37 }
 0x897   : > { %5754 = vst.msk [vmem:[%s13688_s14] sm:$0xff] %vm15860_vm8, %v13724_v53  ;;  %vm15865_vm8 = vmmov %vm15859_vm5 }
 0x899   : > { %v8172_v13 = vpop.eup %8171 }
 0x89a   : > { %v5320_v63 = vmul.f32 %v8172_v13, %v5189_v3  ;;  %v5198_v55 = vpop.xlane.xlu2 %5197  ;;  %vm5325_vm15 = vweird.f32 %v8172_v13 }
 0x89b   : > { %8173 = vrcp.f32 %v5198_v55  ;;  %vm5326_vm4 = vmor %vm5324_vm13, %vm5325_vm15  ;;  %v5375_v3 = vand.u32 2147483648, %v5198_v55  ;;  %v5373_v46 = vand.u32 2147483647, %v5198_v55  ;;  %vm5369_vm1 = vweird.f32 %v5198_v55 }
 0x89c   : > { %v5321_v11 = vsub.f32 1.0, %v5320_v63  ;;  %8175 = vpow2.f32 %v5118_v29 }
 0x89d   : > { %vm5374_vm2 = vcmp.eq.f32.partialorder %v5373_v46, 8.507059e+37 }
 0x89e   : > { %v5322_v58 = vmul.f32 %v8172_v13, %v5321_v11  ;;  %v5376_v11 = vor.u32 1.1754944e-38, %v5375_v3 }
 0x8a0   : > { %v5323_v18 = vadd.f32 %v8172_v13, %v5322_v58  ;;  %v15863_v58 = vld [vmem:[#allocation64_spill] sm:$0xff] }
 0x8a1   : > { %v8174_v24 = vpop.eup %8173  ;;  %vm15864_vm12 = vcmp.lt.f32.partialorder %v15863_v58, 1.0 }
 0x8a2   : > { %v5365_v42 = vmul.f32 %v8174_v24, %v5198_v55  ;;  %v13733_v7 = vpop.xlane.xlu2 %5033  ;;  %v5327_v28 = vsel %vm5326_vm4, %v8172_v13, %v5323_v18  ;;  %vm5370_vm7 = vweird.f32 %v8174_v24  ;;  %v8176_v15 = vpop.eup %8175 }
 0x8a3   : > { %v5332_v34 = vsel %vm5329_vm10, %v5331_v12, %v5327_v28  ;;  %vm5371_vm6 = vmor %vm5369_vm1, %vm5370_vm7  ;;  %v13746_v19 = vsel %vm15864_vm12, %v8176_v15, 0.0 }
 0x8a4   : > { %v5366_v26 = vsub.f32 1.0, %v5365_v42  ;;  %v13736_v30 = vmul.f32 %v5332_v34, %v13383_v35  ;;  %v5232_v55 = vsel %vm15865_vm8, %v13746_v19, 0.0  ;;  %v13754_v34 = vpop.xlane.xlu0 %5027  ;;  %vm15868_vm12 = vmmov %vm15859_vm5 }
 0x8a6   : > { %v5367_v37 = vmul.f32 %v8174_v24, %v5366_v26  ;;  %5757 = vst.msk [vmem:[%s13688_s14 + $0x18] sm:$0xff] %vm15862_vm9, %v13736_v30  ;;  %vm15867_vm9 = vmmov %vm15859_vm5 }
 0x8a8   : > { %v5368_v63 = vadd.f32 %v8174_v24, %v5367_v37 }
 0x8aa   : > { %v5207_v36 = vpop.xlane.xlu2 %5206  ;;  %v5372_v13 = vsel %vm5371_vm6, %v8174_v24, %v5368_v63 }
 0x8ab   : > { %8177 = vrcp.f32 %v5207_v36  ;;  %v5377_v35 = vsel %vm5374_vm2, %v5376_v11, %v5372_v13  ;;  %v5418_v28 = vand.u32 2147483647, %v5207_v36  ;;  %vm5414_vm13 = vweird.f32 %v5207_v36 }
 0x8ac   : > { %v13742_v38 = vmul.f32 %v5377_v35, %v13395_v27  ;;  %v5420_v27 = vand.u32 2147483648, %v5207_v36 }
 0x8ad   : > { %vm5419_vm10 = vcmp.eq.f32.partialorder %v5418_v28, 8.507059e+37 }
 0x8ae   : > { %5760 = vst.msk [vmem:[%s13688_s14 + $0x30] sm:$0xff] %vm15859_vm5, %v13742_v38  ;;  %5959 = vperm.xlu1 %7936, %v13724_v53   ;;  %v5421_v3 = vor.u32 1.1754944e-38, %v5420_v27 }
 0x8b0   : > { %5233 = vadd.xlane.f32.xlu2 %v5232_v55 }
 0x8b1   : > { %v8178_v18 = vpop.eup %8177 }
 0x8b2   : > { %v5410_v24 = vmul.f32 %v8178_v18, %v5207_v36  ;;  %v5216_v29 = vpop.xlane.xlu2 %5215  ;;  %vm5415_vm15 = vweird.f32 %v8178_v18 }
 0x8b3   : > { %8179 = vrcp.f32 %v5216_v29  ;;  %vm5416_vm4 = vmor %vm5414_vm13, %vm5415_vm15  ;;  %v5465_v55 = vand.u32 2147483648, %v5216_v29  ;;  %v5463_v36 = vand.u32 2147483647, %v5216_v29  ;;  %vm5459_vm1 = vweird.f32 %v5216_v29 }
 0x8b4   : > { %v5411_v12 = vsub.f32 1.0, %v5410_v24  ;;  %v5192_v24 = vpop.xlane.xlu0 %5191 }
 0x8b5   : > { %8181 = vrcp.f32 %v5192_v24  ;;  %vm5464_vm2 = vcmp.eq.f32.partialorder %v5463_v36, 8.507059e+37  ;;  %vm5339_vm8 = vweird.f32 %v5192_v24 }
 0x8b6   : > { %v5412_v42 = vmul.f32 %v8178_v18, %v5411_v12  ;;  %5974 = vperm.xlu1 %7936, %v13736_v30  }
 0x8b8   : > { %v5413_v26 = vadd.f32 %v8178_v18, %v5412_v42 }
 0x8b9   : > { %v8180_v37 = vpop.eup %8179 }
 0x8ba   : > { %v5455_v46 = vmul.f32 %v8180_v37, %v5216_v29  ;;  %v13757_v63 = vpop.xlane.xlu2 %5042  ;;  %v5417_v11 = vsel %vm5416_vm4, %v8178_v18, %v5413_v26  ;;  %vm5460_vm7 = vweird.f32 %v8180_v37  ;;  %v5466_v18 = vor.u32 1.1754944e-38, %v5465_v55 }
 0x8bb   : > { %15866 = vst [vmem:[#allocation48_spill] sm:$0xff] %v13757_v63  ;;  %v5422_v13 = vsel %vm5419_vm10, %v5421_v3, %v5417_v11  ;;  %vm5461_vm6 = vmor %vm5459_vm1, %vm5460_vm7  ;;  %v8182_v26 = vpop.eup %8181 }
 0x8bc   : > { %v5456_v15 = vsub.f32 1.0, %v5455_v46  ;;  %v13760_v35 = vmul.f32 %v5422_v13, %v13429_v43  ;;  %v5335_v3 = vmul.f32 %v8182_v26, %v5192_v24  ;;  %v5345_v13 = vand.u32 2147483648, %v5192_v24 }
 0x8bd   : > { %v5201_v46 = vpop.xlane.xlu0 %5200  ;;  %vm5340_vm5 = vweird.f32 %v8182_v26 }
 0x8be   : > { %v5457_v58 = vmul.f32 %v8180_v37, %v5456_v15  ;;  %5763 = vst.msk [vmem:[%s13688_s14 + $0x48] sm:$0xff] %vm15867_vm9, %v13760_v35  ;;  %7939 = vset.pattern.permute.xlu1 %v15856_v56  ;;  %v5336_v11 = vsub.f32 1.0, %v5335_v3  ;;  %vm5341_vm15 = vmor %vm5339_vm8, %vm5340_vm5  ;;  %v5390_v63 = vand.u32 2147483648, %v5201_v46 }
 0x8c0   : > { %v5458_v12 = vadd.f32 %v8180_v37, %v5457_v58  ;;  %v5343_v58 = vand.u32 2147483647, %v5192_v24 }
 0x8c2   : > { %v5225_v27 = vpop.xlane.xlu2 %5224  ;;  %v5462_v42 = vsel %vm5461_vm6, %v8180_v37, %v5458_v12  ;;  %v5337_v37 = vmul.f32 %v8182_v26, %v5336_v11  ;;  %vm5344_vm4 = vcmp.eq.f32.partialorder %v5343_v58, 8.507059e+37  ;;  %vm15870_vm6 = vmmov %vm15868_vm12 }
 0x8c3   : > { %8183 = vrcp.f32 %v5225_v27  ;;  %v5467_v43 = vsel %vm5464_vm2, %v5466_v18, %v5462_v42  ;;  %v5510_v12 = vand.u32 2147483648, %v5225_v27  ;;  %v5346_v42 = vor.u32 1.1754944e-38, %v5345_v13  ;;  %vm15871_vm5 = vmmov %vm15870_vm6 }
 0x8c4   : > { %v13767_v28 = vmul.f32 %v5467_v43, %v13441_v40  ;;  %8185 = vrcp.f32 %v5201_v46  ;;  %v5070_v40 = vsub.f32 %v15710_v59, %v13654_v51  ;;  %v5338_v36 = vadd.f32 %v8182_v26, %v5337_v37 }
 0x8c5   : > { %v5508_v3 = vand.u32 2147483647, %v5225_v27  ;;  %vm5504_vm10 = vweird.f32 %v5225_v27  ;;  %v5511_v59 = vor.u32 1.1754944e-38, %v5510_v12  ;;  %v15869_v13 = vmov 0  }
 0x8c6   : > { %5766 = vst.msk [vmem:[%s13688_s14 + $0x60] sm:$0xff] %vm15868_vm12, %v13767_v28  ;;  %v5342_v11 = vsel %vm5341_vm15, %v8182_v26, %v5338_v36  ;;  %v5122_v37 = vmul.f32 1.442695, %v5070_v40  ;;  %vm5384_vm2 = vweird.f32 %v5201_v46  ;;  %vm15872_vm15 = vmmov %vm15871_vm5 }
 0x8c7   : > { %v13775_v52 = vpop.xlane.xlu0 %5036  ;;  %vm5509_vm9 = vcmp.eq.f32.partialorder %v5508_v3, 8.507059e+37 }
 0x8c8   : > { %6338 = vperm.xlu2 %7938, %v13724_v53  }
 0x8c9   : > { %v8184_v29 = vpop.eup %8183 }
 0x8ca   : > { %v5500_v15 = vmul.f32 %v8184_v29, %v5225_v27  ;;  %v8186_v18 = vpop.eup %8185  ;;  %vm5505_vm13 = vweird.f32 %v8184_v29 }
 0x8cb   : > { %v5380_v8 = vmul.f32 %v8186_v18, %v5201_v46  ;;  %vm5506_vm7 = vmor %vm5504_vm10, %vm5505_vm13  ;;  %vm5385_vm1 = vweird.f32 %v8186_v18  ;;  %vm15873_vm13 = vcmp.lt.f32.partialorder %v13299_v32, 1.0 }
 0x8cc   : > { %v5501_v55 = vsub.f32 1.0, %v5500_v15  ;;  %v5347_v15 = vsel %vm5344_vm4, %v5346_v42, %v5342_v11  ;;  %vm5386_vm12 = vmor %vm5384_vm2, %vm5385_vm1 }
 0x8cd   : > { %v5381_v51 = vsub.f32 1.0, %v5380_v8  ;;  %v13778_v24 = vmul.f32 %v5347_v15, %v13478_v45  ;;  %v5388_v8 = vand.u32 2147483647, %v5201_v46  ;;  %vm15874_vm10 = vmmov %vm15871_vm5 }
 0x8ce   : > { %v5502_v43 = vmul.f32 %v8184_v29, %v5501_v55 }
 0x8cf   : > { %v5382_v58 = vmul.f32 %v8186_v18, %v5381_v51  ;;  %5758 = vst.msk [vmem:[%s13688_s14 + $0x20] sm:$0xff] %vm15870_vm6, %v13778_v24  ;;  %vm5389_vm8 = vcmp.eq.f32.partialorder %v5388_v8, 8.507059e+37 }
 0x8d0   : > { %v5503_v53 = vadd.f32 %v8184_v29, %v5502_v43  ;;  %7940 = vset.pattern.permute.xlu2 %v15869_v13  ;;  %v5195_v27 = vpop.xlane.xlu1 %5194 }
 0x8d1   : > { %5979 = vperm.xlu2 %7940, %v13778_v24   ;;  %v5383_v36 = vadd.f32 %v8186_v18, %v5382_v58  ;;  %8187 = vrcp.f32 %v5195_v27  ;;  %v5358_v58 = vand.u32 2147483647, %v5195_v27 }
 0x8d2   : > { %v5507_v55 = vsel %vm5506_vm7, %v8184_v29, %v5503_v53  ;;  %8189 = vpow2.f32 %v5122_v37  ;;  %v5391_v53 = vor.u32 1.1754944e-38, %v5390_v63  ;;  %v5210_v29 = vpop.xlane.xlu0 %5209  ;;  %vm5354_vm7 = vweird.f32 %v5195_v27 }
 0x8d3   : > { %v5512_v26 = vsel %vm5509_vm9, %v5511_v59, %v5507_v55  ;;  %v5387_v40 = vsel %vm5386_vm12, %v8186_v18, %v5383_v36  ;;  %8191 = vrcp.f32 %v5210_v29  ;;  %v5360_v55 = vand.u32 2147483648, %v5195_v27 }
 0x8d4   : > { %v13786_v45 = vmul.f32 %v5512_v26, %v13484_v61  ;;  %v5392_v12 = vsel %vm5389_vm8, %v5391_v53, %v5387_v40  ;;  %v5435_v53 = vand.u32 2147483648, %v5210_v29  ;;  %vm5359_vm6 = vcmp.eq.f32.partialorder %v5358_v58, 8.507059e+37  ;;  %vm15876_vm8 = vmmov %vm15874_vm10 }
 0x8d5   : > { %v13792_v42 = vmul.f32 %v5392_v12, %v13508_v20  ;;  %v5361_v40 = vor.u32 1.1754944e-38, %v5360_v55  ;;  %v5433_v12 = vand.u32 2147483647, %v5210_v29  ;;  %vm5429_vm2 = vweird.f32 %v5210_v29 }
 0x8d6   : > { %5769 = vst.msk [vmem:[%s13688_s14 + $0x78] sm:$0xff] %vm15871_vm5, %v13786_v45 }
 0x8d7   : > { %v8188_v46 = vpop.eup %8187  ;;  %5761 = vst.msk [vmem:[%s13688_s14 + $0x38] sm:$0xff] %vm15872_vm15, %v13792_v42  ;;  %vm5434_vm5 = vcmp.eq.f32.partialorder %v5433_v12, 8.507059e+37  ;;  %vm15877_vm15 = vmmov %vm15876_vm8 }
 0x8d8   : > { %v5031_v43 = vpop.xlane.xlu1 %5030  ;;  %v8190_v61 = vpop.eup %8189  ;;  %v5350_v3 = vmul.f32 %v8188_v46, %v5195_v27  ;;  %vm5355_vm4 = vweird.f32 %v8188_v46 }
 0x8d9   : > { %7941 = vset.pattern.permute.xlu2 %v15856_v56  ;;  %v5075_v11 = vsub.f32 %v15808_v57, %v5031_v43  ;;  %v8192_v63 = vpop.eup %8191  ;;  %v13803_v20 = vsel %vm15873_vm13, %v8190_v61, 0.0  ;;  %vm5356_vm1 = vmor %vm5354_vm7, %vm5355_vm4 }
 0x8da   : > { %v5351_v15 = vsub.f32 1.0, %v5350_v3  ;;  %v5425_v59 = vmul.f32 %v8192_v63, %v5210_v29  ;;  %v13799_v51 = vpop.xlane.xlu0 %5218  ;;  %v5238_v8 = vsel %vm15874_vm10, %v13803_v20, 0.0  ;;  %vm5430_vm9 = vweird.f32 %v8192_v63 }
 0x8db   : > { %v5132_v18 = vmul.f32 1.442695, %v5075_v11  ;;  %v15875_v11 = vld [vmem:[#allocation38_spill] sm:$0xff]  ;;  %vm5431_vm12 = vmor %vm5429_vm2, %vm5430_vm9  ;;  %v5478_v12 = vand.u32 2147483647, %v13799_v51  ;;  %vm5474_vm4 = vweird.f32 %v13799_v51 }
 0x8dc   : > { %v5352_v37 = vmul.f32 %v8188_v46, %v5351_v15  ;;  %v5426_v26 = vsub.f32 1.0, %v5425_v59  ;;  %v5071_v15 = vsub.f32 %v15875_v11, %v13604_v10  ;;  %v5436_v59 = vor.u32 1.1754944e-38, %v5435_v53 }
 0x8dd   : > { %8193 = vpow2.f32 %v5132_v18  ;;  %vm5479_vm9 = vcmp.eq.f32.partialorder %v5478_v12, 8.507059e+37 }
 0x8de   : > { %8195 = vrcp.f32 %v13799_v51  ;;  %v5353_v57 = vadd.f32 %v8188_v46, %v5352_v37  ;;  %v5427_v36 = vmul.f32 %v8192_v63, %v5426_v26  ;;  %v5124_v9 = vmul.f32 1.442695, %v5071_v15 }
 0x8e0   : > { %5239 = vadd.xlane.f32.xlu1 %v5238_v8  ;;  %v5204_v32 = vpop.xlane.xlu1 %5203  ;;  %v5428_v43 = vadd.f32 %v8192_v63, %v5427_v36  ;;  %v5357_v61 = vsel %vm5356_vm1, %v8188_v46, %v5353_v57 }
 0x8e1   : > { %8197 = vrcp.f32 %v5204_v32  ;;  %v5362_v27 = vsel %vm5359_vm6, %v5361_v40, %v5357_v61  ;;  %v5480_v40 = vand.u32 2147483648, %v13799_v51  ;;  %v5403_v11 = vand.u32 2147483647, %v5204_v32 }
 0x8e2   : > { %v13810_v37 = vpop.xlane.xlu0 %5045  ;;  %v13817_v58 = vmul.f32 %v5362_v27, %v13545_v5  ;;  %v5432_v29 = vsel %vm5431_vm12, %v8192_v63, %v5428_v43  ;;  %vm5399_vm1 = vweird.f32 %v5204_v32  ;;  %vm15880_vm12 = vmmov %vm15876_vm8 }
 0x8e3   : > { %v8194_v3 = vpop.eup %8193  ;;  %v5437_v26 = vsel %vm5434_vm5, %v5436_v59, %v5432_v29  ;;  %v5481_v27 = vor.u32 1.1754944e-38, %v5480_v40  ;;  %vm5404_vm2 = vcmp.eq.f32.partialorder %v5403_v11, 8.507059e+37 }
 0x8e4   : > { %v8196_v18 = vpop.eup %8195  ;;  %v13814_v55 = vsel %vm4915_vm11, %v8194_v3, 0.0  ;;  %5759 = vst.msk [vmem:[%s13688_s14 + $0x28] sm:$0xff] %vm15877_vm15, %v13817_v58  ;;  %v13826_v36 = vmul.f32 %v5437_v26, %v13557_v50  ;;  %vm15878_vm11 = vmmov %vm15876_vm8  ;;  %v5405_v3 = vand.u32 2147483648, %v5204_v32 }
 0x8e5   : > { %v5470_v46 = vmul.f32 %v8196_v18, %v13799_v51  ;;  %v5253_v10 = vsel %vm15876_vm8, %v13814_v55, 0.0  ;;  %vm5475_vm13 = vweird.f32 %v8196_v18 }
 0x8e6   : > { %5254 = vadd.xlane.f32.xlu0 %v5253_v10  ;;  %5764 = vst.msk [vmem:[%s13688_s14 + $0x50] sm:$0xff] %vm15878_vm11, %v13826_v36  ;;  %vm5476_vm7 = vmor %vm5474_vm4, %vm5475_vm13 }
 0x8e7   : > { %v8198_v57 = vpop.eup %8197  ;;  %v5471_v8 = vsub.f32 1.0, %v5470_v46  ;;  %v5406_v46 = vor.u32 1.1754944e-38, %v5405_v3  ;;  %vm15883_vm11 = vmmov %vm15876_vm8 }
 0x8e8   : > { %v5395_v5 = vmul.f32 %v8198_v57, %v5204_v32  ;;  %v13828_v53 = vpop.xlane.xlu1 %5212  ;;  %vm5400_vm10 = vweird.f32 %v8198_v57 }
 0x8e9   : > { %v5472_v63 = vmul.f32 %v8196_v18, %v5471_v8  ;;  %8199 = vrcp.f32 %v13828_v53  ;;  %vm5401_vm6 = vmor %vm5399_vm1, %vm5400_vm10  ;;  %v5448_v11 = vand.u32 2147483647, %v13828_v53  ;;  %vm5444_vm13 = vweird.f32 %v13828_v53 }
 0x8ea   : > { %v5396_v43 = vsub.f32 1.0, %v5395_v5  ;;  %8201 = vpow2.f32 %v5124_v9  ;;  %v13837_v15 = vpop.xlane.xlu0 %5227 }
 0x8eb   : > { %v5473_v61 = vadd.f32 %v8196_v18, %v5472_v63  ;;  %8203 = vrcp.f32 %v13837_v15 }
 0x8ec   : > { %v5397_v50 = vmul.f32 %v8198_v57, %v5396_v43 }
 0x8ed   : > { %v5477_v29 = vsel %vm5476_vm7, %v8196_v18, %v5473_v61  ;;  %vm5449_vm7 = vcmp.eq.f32.partialorder %v5448_v11, 8.507059e+37 }
 0x8ee   : > { %v5398_v59 = vadd.f32 %v8198_v57, %v5397_v50  ;;  %v5482_v10 = vsel %vm5479_vm9, %v5481_v27, %v5477_v29  ;;  %vm5519_vm9 = vweird.f32 %v13837_v15 }
 0x8ef   : > { %v8200_v26 = vpop.eup %8199  ;;  %v13841_v8 = vmul.f32 %v5482_v10, %v13583_v4  ;;  %v15881_v4 = vld [vmem:[#allocation65_spill] sm:$0xff]  ;;  %v5525_v10 = vand.u32 2147483648, %v13837_v15 }
 0x8f0   : > { %v5040_v51 = vpop.xlane.xlu1 %5039  ;;  %v5402_v9 = vsel %vm5401_vm6, %v8198_v57, %v5398_v59  ;;  %v8202_v5 = vpop.eup %8201  ;;  %v5440_v63 = vmul.f32 %v8200_v26, %v13828_v53  ;;  %vm15882_vm5 = vcmp.lt.f32.partialorder %v15881_v4, 1.0  ;;  %vm5445_vm15 = vweird.f32 %v8200_v26 }
 0x8f1   : > { %v5078_v40 = vsub.f32 %v15827_v54, %v5040_v51  ;;  %v5407_v12 = vsel %vm5404_vm2, %v5406_v46, %v5402_v9  ;;  %5767 = vst.msk [vmem:[%s13688_s14 + $0x68] sm:$0xff] %vm15880_vm12, %v13841_v8  ;;  %v8204_v18 = vpop.eup %8203  ;;  %v13856_v50 = vsel %vm15882_vm5, %v8202_v5, 0.0  ;;  %vm5446_vm10 = vmor %vm5444_vm13, %vm5445_vm15  ;;  %v5523_v5 = vand.u32 2147483647, %v13837_v15 }
 0x8f2   : > { %v13846_v32 = vmul.f32 %v5407_v12, %v13597_v60  ;;  %v5441_v43 = vsub.f32 1.0, %v5440_v63  ;;  %v5515_v57 = vmul.f32 %v8204_v18, %v13837_v15  ;;  %v13852_v3 = vpop.xlane.xlu0 %5236  ;;  %v5450_v60 = vand.u32 2147483648, %v13828_v53  ;;  %vm15884_vm2 = vmmov %vm15876_vm8 }
 0x8f3   : > { %v5138_v61 = vmul.f32 1.442695, %v5078_v40  ;;  %v5241_v29 = vsel %vm15883_vm11, %v13856_v50, 0.0  ;;  %vm5520_vm4 = vweird.f32 %v8204_v18  ;;  %vm5524_vm6 = vcmp.eq.f32.partialorder %v5523_v5, 8.507059e+37  ;;  %vm15885_vm12 = vmmov %vm15884_vm2 }
 0x8f4   : > { %15879 = vst [vmem:[#allocation47_spill] sm:$0xff] %v13846_v32  ;;  %v5442_v54 = vmul.f32 %v8200_v26, %v5441_v43  ;;  %v5516_v27 = vsub.f32 1.0, %v5515_v57  ;;  %v5451_v9 = vor.u32 1.1754944e-38, %v5450_v60  ;;  %vm5521_vm1 = vmor %vm5519_vm9, %vm5520_vm4 }
 0x8f5   : > { %5762 = vst.msk [vmem:[%s13688_s14 + $0x40] sm:$0xff] %vm15876_vm8, %v13846_v32  ;;  %8205 = vpow2.f32 %v5138_v61  ;;  %v5526_v61 = vor.u32 1.1754944e-38, %v5525_v10  ;;  %v5568_v10 = vand.u32 2147483647, %v13852_v3  ;;  %vm15887_vm5 = vmmov %vm15884_vm2  ;;  %vm5564_vm8 = vweird.f32 %v13852_v3 }
 0x8f6   : > { %8207 = vrcp.f32 %v13852_v3  ;;  %v5443_v59 = vadd.f32 %v8200_v26, %v5442_v54  ;;  %v5517_v46 = vmul.f32 %v8204_v18, %v5516_v27 }
 0x8f7   : > { %vm5569_vm13 = vcmp.eq.f32.partialorder %v5568_v10, 8.507059e+37 }
 0x8f8   : > { %v13868_v51 = vpop.xlane.xlu1 %5221  ;;  %v5518_v63 = vadd.f32 %v8204_v18, %v5517_v46  ;;  %v5447_v53 = vsel %vm5446_vm10, %v8200_v26, %v5443_v59 }
 0x8f9   : > { %8209 = vrcp.f32 %v13868_v51  ;;  %6346 = vperm.xlu1 %7939, %v13705_v17   ;;  %v5452_v12 = vsel %vm5449_vm7, %v5451_v9, %v5447_v53  ;;  %v5495_v53 = vand.u32 2147483648, %v13868_v51  ;;  %vm5489_vm4 = vweird.f32 %v13868_v51 }
 0x8fa   : > { %5242 = vadd.xlane.f32.xlu2 %v5241_v29  ;;  %v5246_v57 = vpop.xlane.xlu0 %5245  ;;  %v13879_v54 = vmul.f32 %v5452_v12, %v13623_v25  ;;  %v5522_v60 = vsel %vm5521_vm1, %v8204_v18, %v5518_v63  ;;  %v5570_v25 = vand.u32 2147483648, %v13852_v3  ;;  %vm15888_vm1 = vmmov %vm15884_vm2 }
 0x8fb   : > { %v8206_v40 = vpop.eup %8205  ;;  %8211 = vrcp.f32 %v5246_v57  ;;  %v5527_v26 = vsel %vm5524_vm6, %v5526_v61, %v5522_v60  ;;  %v5493_v60 = vand.u32 2147483647, %v13868_v51  ;;  %vm5609_vm6 = vweird.f32 %v5246_v57 }
 0x8fc   : > { %v8208_v43 = vpop.eup %8207  ;;  %v13876_v4 = vsel %vm4918_vm14, %v8206_v40, 0.0  ;;  %5765 = vst.msk [vmem:[%s13688_s14 + $0x58] sm:$0xff] %vm15885_vm12, %v13879_v54  ;;  %v13888_v59 = vmul.f32 %v5527_v26, %v13647_v62  ;;  %v5571_v12 = vor.u32 1.1754944e-38, %v5570_v25 }
 0x8fd   : > { %v5560_v11 = vmul.f32 %v8208_v43, %v13852_v3  ;;  %v5262_v15 = vsel %vm15884_vm2, %v13876_v4, 0.0  ;;  %vm5565_vm14 = vweird.f32 %v8208_v43  ;;  %v5496_v3 = vor.u32 1.1754944e-38, %v5495_v53 }
 0x8fe   : > { %5263 = vadd.xlane.f32.xlu0 %v5262_v15  ;;  %15886 = vst [vmem:[#allocation28_spill] sm:$0xff] %v13888_v59  ;;  %vm5566_vm15 = vmor %vm5564_vm8, %vm5565_vm14  ;;  %vm5494_vm9 = vcmp.eq.f32.partialorder %v5493_v60, 8.507059e+37 }
 0x8ff   : > { %v8210_v27 = vpop.eup %8209  ;;  %v5561_v33 = vsub.f32 1.0, %v5560_v11  ;;  %5770 = vst.msk [vmem:[%s13688_s14 + $0x80] sm:$0xff] %vm15887_vm5, %v13888_v59  ;;  %vm15890_vm14 = vmmov %vm15888_vm1 }
 0x900   : > { %v5485_v18 = vmul.f32 %v8210_v27, %v13868_v51  ;;  %v5049_v29 = vpop.xlane.xlu1 %5048  ;;  %vm5490_vm11 = vweird.f32 %v8210_v27  ;;  %vm15891_vm5 = vmmov %vm15888_vm1 }
 0x901   : > { %v5562_v46 = vmul.f32 %v8208_v43, %v5561_v33  ;;  %v5081_v9 = vsub.f32 %v15839_v41, %v5049_v29  ;;  %7942 = vset.pattern.permute.xlu1 %v15869_v13  ;;  %v8212_v62 = vpop.eup %8211  ;;  %vm5491_vm10 = vmor %vm5489_vm4, %vm5490_vm11 }
 0x902   : > { %v5486_v5 = vsub.f32 1.0, %v5485_v18  ;;  %5984 = vperm.xlu1 %7942, %v13817_v58   ;;  %v5605_v41 = vmul.f32 %v8212_v62, %v5246_v57  ;;  %v5615_v18 = vand.u32 2147483648, %v5246_v57  ;;  %vm5610_vm7 = vweird.f32 %v8212_v62  ;;  %vm15893_vm8 = vmmov %vm15888_vm1 }
 0x903   : > { %v5563_v63 = vadd.f32 %v8208_v43, %v5562_v46  ;;  %v5144_v40 = vmul.f32 1.442695, %v5081_v9  ;;  %v5613_v46 = vand.u32 2147483647, %v5246_v57  ;;  %vm5611_vm2 = vmor %vm5609_vm6, %vm5610_vm7 }
 0x904   : > { %v5487_v61 = vmul.f32 %v8210_v27, %v5486_v5  ;;  %v5606_v26 = vsub.f32 1.0, %v5605_v41  ;;  %vm15894_vm4 = vmmov %vm15888_vm1 }
 0x905   : > { %8213 = vpow2.f32 %v5144_v40  ;;  %v5567_v11 = vsel %vm5566_vm15, %v8208_v43, %v5563_v63  ;;  %v5616_v63 = vor.u32 1.1754944e-38, %v5615_v18  ;;  %vm5614_vm12 = vcmp.eq.f32.partialorder %v5613_v46, 8.507059e+37  ;;  %vm15898_vm7 = vmmov %vm15888_vm1 }
 0x906   : > { %v5488_v15 = vadd.f32 %v8210_v27, %v5487_v61  ;;  %v5572_v33 = vsel %vm5569_vm13, %v5571_v12, %v5567_v11  ;;  %v5607_v25 = vmul.f32 %v8212_v62, %v5606_v26 }
 0x907   : > { %v13904_v29 = vmul.f32 %v5572_v33, %v13667_v6 }
 0x908   : > { %v5231_v10 = vpop.xlane.xlu1 %5230  ;;  %v5492_v9 = vsel %vm5491_vm10, %v8210_v27, %v5488_v15  ;;  %v5608_v51 = vadd.f32 %v8212_v62, %v5607_v25  ;;  %v5073_v15 = vsub.f32 %v15755_v49, %v13707_v44  ;;  %v13940_v25 = vld [vmem:[%s14736_s6] ss:$0 sm:$0xff]  ;;  %vm15896_vm10 = vcmp.lt.f32.partialorder %v13353_v22, 1.0 }
 0x909   : > { %8215 = vrcp.f32 %v5231_v10  ;;  %5773 = vst.msk [vmem:[%s13688_s14 + $0x98] sm:$0xff] %vm15888_vm1, %v13904_v29  ;;  %v5497_v43 = vsel %vm5494_vm9, %v5496_v3, %v5492_v9  ;;  %v5538_v60 = vand.u32 2147483647, %v5231_v10  ;;  %vm5534_vm15 = vweird.f32 %v5231_v10  ;;  %v13931_v3 = vpop.permute.xlu2 %5964  ;;  %v15895_v44 = vld [vmem:[#allocation17_spill] sm:$0xff] }
 0x90a   : > { %v13910_v6 = vmul.f32 %v5497_v43, %v13678_v48  ;;  %v5612_v27 = vsel %vm5611_vm2, %v8212_v62, %v5608_v51  ;;  %v5540_v62 = vand.u32 2147483648, %v5231_v10  ;;  %v5128_v49 = vmul.f32 1.442695, %v5073_v15  ;;  %v13951_v43 = vld [vmem:[%s14736_s6 + $0x1] ss:$0 sm:$0xff] }
 0x90b   : > { %v8214_v5 = vpop.eup %8213  ;;  %v5617_v57 = vsel %vm5614_vm12, %v5616_v63, %v5612_v27  ;;  %vm5539_vm13 = vcmp.eq.f32.partialorder %v5538_v60, 8.507059e+37  ;;  %v5878_v46 = vadd.f32 %v13940_v25, %v15895_v44  ;;  %v15897_v27 = vld [vmem:[#allocation18_spill] sm:$0xff]  ;;  %v5074_v60 = vsub.f32 %v15745_v31, %v13754_v34  ;;  %vm15901_vm12 = vmmov %vm15894_vm4 }
 0x90c   : > { %15889 = vst [vmem:[#allocation50_spill] sm:$0xff] %v13910_v6  ;;  %v13914_v53 = vsel %vm4921_vm0, %v8214_v5, 0.0  ;;  %v13922_v12 = vmul.f32 %v5617_v57, %v13697_v0  ;;  %v5541_v0 = vor.u32 1.1754944e-38, %v5540_v62  ;;  %8217 = vpow2.f32 %v5128_v49 }
 0x90d   : > { %v5271_v40 = vsel %vm15890_vm14, %v13914_v53, 0.0  ;;  %5768 = vst.msk [vmem:[%s13688_s14 + $0x70] sm:$0xff] %vm15891_vm5, %v13910_v6  ;;  %v5130_v44 = vmul.f32 1.442695, %v5074_v60  ;;  %vm15902_vm14 = vcmp.lt.f32.partialorder %v13311_v21, 1.0  ;;  %vm15903_vm5 = vmmov %vm15894_vm4  ;;  %v13993_v21 = vpop.f32.mrf.mxu1 }
 0x90e   : > { %5272 = vadd.xlane.f32.xlu0 %v5271_v40  ;;  %15892 = vst [vmem:[#allocation57_spill] sm:$0xff] %v13922_v12  ;;  %v6258_v40 = vadd.f32 %v13951_v43, %v15897_v27 }
 0x90f   : > { %v8216_v61 = vpop.eup %8215  ;;  %5776 = vst.msk [vmem:[%s13688_s14 + $0xb0] sm:$0xff] %vm15893_vm8, %v13922_v12 }
 0x910   : > { %v5530_v48 = vmul.f32 %v8216_v61, %v5231_v10  ;;  %vm5535_vm0 = vweird.f32 %v8216_v61 }
 0x911   : > { %vm5536_vm11 = vmor %vm5534_vm15, %vm5535_vm0 }
 0x912   : > { %6350 = vperm.xlu2 %7941, %v13736_v30   ;;  %v5531_v1 = vsub.f32 1.0, %v5530_v48 }
 0x914   : > { %v5532_v41 = vmul.f32 %v8216_v61, %v5531_v1 }
 0x916   : > { %v5533_v11 = vadd.f32 %v8216_v61, %v5532_v41 }
 0x918   : > { %v5537_v26 = vsel %vm5536_vm11, %v8216_v61, %v5533_v11 }
 0x919   : > { %v5542_v33 = vsel %vm5539_vm13, %v5541_v0, %v5537_v26  ;;  %v15900_v26 = vld [vmem:[#allocation45_spill] sm:$0xff] }
 0x91a   : > { %7943 = vset.pattern.permute.xlu2 %v15869_v13  ;;  %v13935_v18 = vmul.f32 %v5542_v33, %v13721_v23  ;;  %v8218_v23 = vpop.eup %8217  ;;  %v5888_v33 = vadd.f32 %v13940_v25, %v15900_v26  ;;  %v13996_v26 = vpop.f32.mrf.mxu1 }
 0x91b   : > { %5989 = vperm.xlu2 %7943, %v13742_v38   ;;  %v13955_v5 = vsel %vm15896_vm10, %v8218_v23, 0.0  ;;  %vm15905_vm10 = vmmov %vm15903_vm5 }
 0x91c   : > { %5771 = vst.msk [vmem:[%s13688_s14 + $0x88] sm:$0xff] %vm15894_vm4, %v13935_v18  ;;  %v5247_v1 = vsel %vm15898_vm7, %v13955_v5, 0.0 }
 0x920   : > { %v5960_v10 = vpop.permute.xlu1 %5959 }
 0x921   : > { %v6117_v9 = vmul.f32 %v5960_v10, %v5878_v46 }
 0x922   : > { %6690 = vperm.xlu0 %7929, %v13693_v39  }
 0x923   : > { %v5234_v51 = vpop.xlane.xlu2 %5233 }
 0x924   : > { %8219 = vrcp.f32 %v5234_v51  ;;  %v5555_v41 = vand.u32 2147483648, %v5234_v51  ;;  %v5553_v15 = vand.u32 2147483647, %v5234_v51  ;;  %vm5549_vm1 = vweird.f32 %v5234_v51 }
 0x925   : > { %8221 = vpow2.f32 %v5130_v44 }
 0x926   : > { %v5556_v49 = vor.u32 1.1754944e-38, %v5555_v41  ;;  %vm5554_vm2 = vcmp.eq.f32.partialorder %v5553_v15, 8.507059e+37 }
 0x92a   : > { %v8220_v63 = vpop.eup %8219  ;;  %7963 = vset.pattern.permute.xlu0 %v15869_v13 }
 0x92b   : > { %v5545_v57 = vmul.f32 %v8220_v63, %v5234_v51  ;;  %v6339_v61 = vpop.permute.xlu2 %6338  ;;  %5969 = vperm.xlu0 %7963, %v13705_v17   ;;  %vm5550_vm9 = vweird.f32 %v8220_v63  ;;  %v8222_v51 = vpop.eup %8221 }
 0x92c   : > { %v6465_v48 = vmul.f32 %v6339_v61, %v6258_v40  ;;  %5248 = vadd.xlane.f32.xlu1 %v5247_v1  ;;  %vm5551_vm6 = vmor %vm5549_vm1, %vm5550_vm9  ;;  %v13981_v23 = vsel %vm15902_vm14, %v8222_v51, 0.0 }
 0x92d   : > { %v5546_v62 = vsub.f32 1.0, %v5545_v57  ;;  %vm15908_vm1 = vmmov %vm15903_vm5 }
 0x92e   : > { %v13963_v22 = vadd.f32 %v6465_v48, %v6117_v9 }
 0x92f   : > { %v5547_v11 = vmul.f32 %v8220_v63, %v5546_v62 }
 0x930   : > { %15899 = vst [vmem:[#allocation49_spill] sm:$0xff] %v13963_v22 }
 0x931   : > { %v5548_v0 = vadd.f32 %v8220_v63, %v5547_v11 }
 0x933   : > { %v5980_v46 = vpop.permute.xlu2 %5979  ;;  %v5552_v10 = vsel %vm5551_vm6, %v8220_v63, %v5548_v0  ;;  %6004 = vperm.xlu0 %7963, %v13760_v35   ;;  %v5250_v63 = vsel %vm15903_vm5, %v13981_v23, 0.0  ;;  %vm15911_vm6 = vcmp.lt.f32.partialorder %v13397_v47, 1.0 }
 0x934   : > { %v13969_v9 = vmul.f32 %v5980_v46, %v5888_v33  ;;  %v5557_v31 = vsel %vm5554_vm2, %v5556_v49, %v5552_v10  ;;  %v5076_v33 = vsub.f32 %v15769_v2, %v13733_v7  ;;  %vm15913_vm2 = vmmov %vm15908_vm1 }
 0x935   : > { %v13973_v34 = vmul.f32 %v5557_v31, %v13746_v19  ;;  %v13987_v19 = vpop.permute.xlu1 %5974 }
 0x937   : > { %5772 = vst.msk [vmem:[%s13688_s14 + $0x90] sm:$0xff] %vm15901_vm12, %v13973_v34 }
 0x93b   : > { %6019 = vperm.xlu0 %7963, %v13767_v28  }
 0x943   : > { %6034 = vperm.xlu0 %7963, %v13786_v45  }
 0x944   : > { %5251 = vadd.xlane.f32.xlu2 %v5250_v63 }
 0x945   : > { %5994 = vperm.xlu1 %7942, %v13792_v42  }
 0x94b   : > { %6049 = vperm.xlu0 %7963, %v13973_v34  }
 0x94d   : > { %7944 = vset.pattern.permute.xlu1 %v15856_v56 }
 0x94e   : > { %6354 = vperm.xlu1 %7944, %v13778_v24  }
 0x953   : > { %v5240_v27 = vpop.xlane.xlu1 %5239 }
 0x954   : > { %8223 = vrcp.f32 %v5240_v27  ;;  %v5585_v1 = vand.u32 2147483648, %v5240_v27  ;;  %v5583_v41 = vand.u32 2147483647, %v5240_v27  ;;  %vm5579_vm0 = vweird.f32 %v5240_v27 }
 0x956   : > { %7946 = vset.pattern.permute.xlu1 %v15869_v13  ;;  %v5586_v0 = vor.u32 1.1754944e-38, %v5585_v1  ;;  %vm5584_vm11 = vcmp.eq.f32.partialorder %v5583_v41, 8.507059e+37 }
 0x959   : > { %v5255_v40 = vpop.xlane.xlu0 %5254 }
 0x95a   : > { %v8224_v57 = vpop.eup %8223  ;;  %8225 = vrcp.f32 %v5255_v40  ;;  %v5660_v46 = vand.u32 2147483648, %v5255_v40  ;;  %v5658_v51 = vand.u32 2147483647, %v5255_v40  ;;  %vm5654_vm4 = vweird.f32 %v5255_v40 }
 0x95b   : > { %v5575_v61 = vmul.f32 %v8224_v57, %v5240_v27  ;;  %vm5580_vm8 = vweird.f32 %v8224_v57  ;;  %v5134_v27 = vmul.f32 1.442695, %v5076_v33  ;;  %v15909_v33 = vld [vmem:[#allocation34_spill] sm:$0xff] }
 0x95c   : > { %5999 = vperm.xlu2 %7943, %v13846_v32   ;;  %vm5581_vm15 = vmor %vm5579_vm0, %vm5580_vm8  ;;  %v5661_v2 = vor.u32 1.1754944e-38, %v5660_v46  ;;  %vm5659_vm9 = vcmp.eq.f32.partialorder %v5658_v51, 8.507059e+37 }
 0x95d   : > { %v5576_v48 = vsub.f32 1.0, %v5575_v61  ;;  %8227 = vpow2.f32 %v5134_v27 }
 0x95f   : > { %v5577_v62 = vmul.f32 %v8224_v57, %v5576_v48 }
 0x960   : > { %v8226_v60 = vpop.eup %8225 }
 0x961   : > { %v5578_v11 = vadd.f32 %v8224_v57, %v5577_v62  ;;  %v5650_v15 = vmul.f32 %v8226_v60, %v5255_v40  ;;  %vm5655_vm13 = vweird.f32 %v8226_v60 }
 0x962   : > { %vm5656_vm7 = vmor %vm5654_vm4, %vm5655_vm13 }
 0x963   : > { %v5651_v49 = vsub.f32 1.0, %v5650_v15  ;;  %v5582_v44 = vsel %vm5581_vm15, %v8224_v57, %v5578_v11  ;;  %v15906_v57 = vld [vmem:[#allocation30_spill] sm:$0xff]  ;;  %v14016_v11 = vpop.f32.mrf.mxu1  ;;  %vm15916_vm15 = vmmov %vm15908_vm1 }
 0x964   : > { %7945 = vset.pattern.permute.xlu2 %v15856_v56  ;;  %v5587_v10 = vsel %vm5584_vm11, %v5586_v0, %v5582_v44  ;;  %v6263_v48 = vadd.f32 %v13951_v43, %v15906_v57  ;;  %v15910_v44 = vld [vmem:[#allocation37_spill] sm:$0xff] }
 0x965   : > { %6358 = vperm.xlu2 %7945, %v13817_v58   ;;  %v5652_v31 = vmul.f32 %v8226_v60, %v5651_v49  ;;  %v14003_v63 = vmul.f32 %v5587_v10, %v13803_v20  ;;  %v5885_v49 = vadd.f32 %v13940_v25, %v15909_v33 }
 0x967   : > { %15904 = vst [vmem:[#allocation72_spill] sm:$0xff] %v14003_v63  ;;  %v5653_v61 = vadd.f32 %v8226_v60, %v5652_v31  ;;  %v6120_v51 = vmul.f32 %v13987_v19, %v5885_v49  ;;  %v15914_v49 = vld [vmem:[#allocation29_spill] sm:$0xff] }
 0x968   : > { %5774 = vst.msk [vmem:[%s13688_s14 + $0xa0] sm:$0xff] %vm15905_vm10, %v14003_v63  ;;  %vm15917_vm10 = vmmov %vm15908_vm1 }
 0x969   : > { %v5657_v7 = vsel %vm5656_vm7, %v8226_v60, %v5653_v61  ;;  %v8228_v60 = vpop.eup %8227  ;;  %vm15918_vm7 = vmmov %vm15908_vm1 }
 0x96a   : > { %v5662_v1 = vsel %vm5659_vm9, %v5661_v2, %v5657_v7  ;;  %v14027_v31 = vsel %vm15911_vm6, %v8228_v60, 0.0 }
 0x96b   : > { %v6347_v62 = vpop.permute.xlu1 %6346  ;;  %v14011_v20 = vmul.f32 %v5662_v1, %v13814_v55  ;;  %v6265_v55 = vadd.f32 %v13951_v43, %v15910_v44  ;;  %v14030_v2 = vpop.f32.mrf.mxu1  ;;  %v5077_v1 = vsub.f32 %v15796_v16, %v13775_v52  ;;  %v5893_v44 = vadd.f32 %v13940_v25, %v15914_v49 }
 0x96c   : > { %v14013_v41 = vmul.f32 %v6347_v62, %v6263_v48  ;;  %v5256_v48 = vsel %vm15913_vm2, %v14027_v31, 0.0 }
 0x96d   : > { %15907 = vst [vmem:[#allocation31_spill] sm:$0xff] %v14011_v20  ;;  %v5243_v40 = vpop.xlane.xlu2 %5242  ;;  %7948 = vset.pattern.permute.xlu2 %v15869_v13 }
 0x96e   : > { %8229 = vrcp.f32 %v5243_v40  ;;  %5779 = vst.msk [vmem:[%s13688_s14 + $0xc8] sm:$0xff] %vm15908_vm1, %v14011_v20  ;;  %v5600_v7 = vand.u32 2147483648, %v5243_v40  ;;  %v5598_v47 = vand.u32 2147483647, %v5243_v40  ;;  %vm5594_vm14 = vweird.f32 %v5243_v40 }
 0x970   : > { %vm5599_vm8 = vcmp.eq.f32.partialorder %v5598_v47, 8.507059e+37 }
 0x971   : > { %v5264_v15 = vpop.xlane.xlu0 %5263 }
 0x972   : > { %8231 = vrcp.f32 %v5264_v15  ;;  %v5703_v49 = vand.u32 2147483647, %v5264_v15  ;;  %vm5699_vm11 = vweird.f32 %v5264_v15 }
 0x974   : > { %v8230_v0 = vpop.eup %8229  ;;  %vm5704_vm4 = vcmp.eq.f32.partialorder %v5703_v49, 8.507059e+37 }
 0x975   : > { %v5590_v46 = vmul.f32 %v8230_v0, %v5243_v40  ;;  %v6351_v10 = vpop.permute.xlu2 %6350  ;;  %vm5595_vm12 = vweird.f32 %v8230_v0  ;;  %v14045_v40 = vpop.f32.mrf.mxu1 }
 0x976   : > { %v6468_v27 = vmul.f32 %v6351_v10, %v6265_v55  ;;  %vm5596_vm5 = vmor %vm5594_vm14, %vm5595_vm12  ;;  %v5601_v55 = vor.u32 1.1754944e-38, %v5600_v7 }
 0x977   : > { %v5591_v61 = vsub.f32 1.0, %v5590_v46  ;;  %v5136_v46 = vmul.f32 1.442695, %v5077_v1 }
 0x978   : > { %v14032_v57 = vadd.f32 %v6468_v27, %v6120_v51  ;;  %5257 = vadd.xlane.f32.xlu1 %v5256_v48  ;;  %v8232_v60 = vpop.eup %8231  ;;  %v5705_v48 = vand.u32 2147483648, %v5264_v15 }
 0x979   : > { %v5592_v62 = vmul.f32 %v8230_v0, %v5591_v61  ;;  %v5695_v19 = vmul.f32 %v8232_v60, %v5264_v15  ;;  %vm5700_vm0 = vweird.f32 %v8232_v60  ;;  %8233 = vpow2.f32 %v5136_v46 }
 0x97a   : > { %15912 = vst [vmem:[#allocation51_spill] sm:$0xff] %v14032_v57  ;;  %vm5701_vm13 = vmor %vm5699_vm11, %vm5700_vm0  ;;  %v5706_v1 = vor.u32 1.1754944e-38, %v5705_v48  ;;  %v15925_v57 = vld [vmem:[#allocation36_spill] sm:$0xff] }
 0x97b   : > { %v5593_v33 = vadd.f32 %v8230_v0, %v5592_v62  ;;  %v5696_v10 = vsub.f32 1.0, %v5695_v19 }
 0x97d   : > { %v5990_v51 = vpop.permute.xlu2 %5989  ;;  %v5597_v27 = vsel %vm5596_vm5, %v8230_v0, %v5593_v33  ;;  %v5697_v61 = vmul.f32 %v8232_v60, %v5696_v10 }
 0x97e   : > { %v14040_v52 = vmul.f32 %v5990_v51, %v5893_v44  ;;  %v5602_v16 = vsel %vm5599_vm8, %v5601_v55, %v5597_v27  ;;  %v14057_v55 = vpop.f32.mrf.mxu1 }
 0x97f   : > { %v14043_v62 = vmul.f32 %v5602_v16, %v13856_v50  ;;  %v5698_v7 = vadd.f32 %v8232_v60, %v5697_v61  ;;  %v8234_v19 = vpop.eup %8233 }
 0x980   : > { %v14061_v15 = vsel %vm4917_vm3, %v8234_v19, 0.0  ;;  %vm15920_vm3 = vmmov %vm15918_vm7 }
 0x981   : > { %15915 = vst [vmem:[#allocation60_spill] sm:$0xff] %v14043_v62  ;;  %6064 = vperm.xlu0 %7963, %v14043_v62   ;;  %v5273_v0 = vpop.xlane.xlu0 %5272  ;;  %v5702_v50 = vsel %vm5701_vm13, %v8232_v60, %v5698_v7  ;;  %v5259_v60 = vsel %vm15918_vm7, %v14061_v15, 0.0  ;;  %vm15929_vm0 = vmmov %vm15920_vm3 }
 0x982   : > { %5775 = vst.msk [vmem:[%s13688_s14 + $0xa8] sm:$0xff] %vm15916_vm15, %v14043_v62  ;;  %8235 = vrcp.f32 %v5273_v0  ;;  %v5707_v47 = vsel %vm5704_vm4, %v5706_v1, %v5702_v50  ;;  %v5750_v51 = vand.u32 2147483648, %v5273_v0  ;;  %v5748_v27 = vand.u32 2147483647, %v5273_v0  ;;  %v14076_v50 = vpop.permute.xlu1 %5984  ;;  %vm15936_vm13 = vmmov %vm15929_vm0 }
 0x983   : > { %v14052_v33 = vmul.f32 %v5707_v47, %v13876_v4  ;;  %vm5744_vm1 = vweird.f32 %v5273_v0  ;;  %v15921_v47 = vld [vmem:[#allocation59_spill] sm:$0xff] }
 0x984   : > { %v5751_v61 = vor.u32 1.1754944e-38, %v5750_v51  ;;  %vm5749_vm2 = vcmp.eq.f32.partialorder %v5748_v27, 8.507059e+37  ;;  %v5883_v19 = vadd.f32 %v13940_v25, %v15921_v47  ;;  %v5900_v51 = vadd.f32 %v13940_v25, %v13996_v26 }
 0x985   : > { %5782 = vst.msk [vmem:[%s13688_s14 + $0xe0] sm:$0xff] %vm15917_vm10, %v14052_v33 }
 0x986   : > { %v14065_v48 = vpop.f32.mrf.mxu1 }
 0x988   : > { %v8236_v44 = vpop.eup %8235 }
 0x989   : > { %v5740_v46 = vmul.f32 %v8236_v44, %v5273_v0  ;;  %vm5745_vm9 = vweird.f32 %v8236_v44 }
 0x98a   : > { %vm5746_vm6 = vmor %vm5744_vm1, %vm5745_vm9 }
 0x98b   : > { %v5741_v10 = vsub.f32 1.0, %v5740_v46  ;;  %vm15941_vm9 = vmmov %vm15929_vm0 }
 0x98d   : > { %v5742_v4 = vmul.f32 %v8236_v44, %v5741_v10 }
 0x98e   : > { %5260 = vadd.xlane.f32.xlu2 %v5259_v60  ;;  %v5914_v0 = vpop.f32.mrf.mxu1 }
 0x98f   : > { %v5743_v16 = vadd.f32 %v8236_v44, %v5742_v4 }
 0x991   : > { %6009 = vperm.xlu1 %7946, %v13826_v36   ;;  %v5747_v14 = vsel %vm5746_vm6, %v8236_v44, %v5743_v16  ;;  %vm15945_vm6 = vmmov %vm15929_vm0 }
 0x992   : > { %v5752_v49 = vsel %vm5749_vm2, %v5751_v61, %v5747_v14 }
 0x993   : > { %v14069_v7 = vmul.f32 %v5752_v49, %v13914_v53 }
 0x994   : > { %v14071_v1 = vpop.permute.xlu0 %6690 }
 0x995   : > { %15919 = vst [vmem:[#allocation55_spill] sm:$0xff] %v14069_v7 }
 0x996   : > { %5785 = vst.msk [vmem:[%s13688_s14 + $0xf8] sm:$0xff] %vm15920_vm3, %v14069_v7  ;;  %v14088_v60 = vpop.f32.mrf.mxu1  ;;  %v15932_v7 = vld [vmem:[#allocation53_spill] sm:$0xff] }
 0x997   : > { %15923 = vst [vmem:[#allocation24_spill] sm:$0xff] %v14088_v60  ;;  %vm15933_vm15 = vcmp.lt.f32.partialorder %v15932_v7, 1.0  ;;  %v15937_v7 = vld [vmem:[#allocation25_spill] sm:$0xff] }
 0x999   : > { %7947 = vset.pattern.permute.xlu1 %v15856_v56 }
 0x99a   : > { %6366 = vperm.xlu1 %7947, %v13792_v42  }
 0x99d   : > { %v5970_v44 = vpop.permute.xlu0 %5969 }
 0x99e   : > { %v6119_v46 = vmul.f32 %v5970_v44, %v5883_v19  ;;  %v5908_v19 = vadd.f32 %v13940_v25, %v14045_v40 }
 0x99f   : > { %v5249_v10 = vpop.xlane.xlu1 %5248 }
 0x9a0   : > { %v14083_v53 = vadd.f32 %v14013_v41, %v6119_v46  ;;  %8237 = vrcp.f32 %v5249_v10  ;;  %v5630_v49 = vand.u32 2147483648, %v5249_v10  ;;  %v5628_v41 = vand.u32 2147483647, %v5249_v10  ;;  %v15924_v46 = vld [vmem:[#allocation48_spill] sm:$0xff] }
 0x9a1   : > { %vm5624_vm14 = vweird.f32 %v5249_v10 }
 0x9a2   : > { %15922 = vst [vmem:[#allocation61_spill] sm:$0xff] %v14083_v53  ;;  %7950 = vset.pattern.permute.xlu1 %v15869_v13  ;;  %v5079_v53 = vsub.f32 %v15925_v57, %v15924_v46  ;;  %vm5629_vm8 = vcmp.eq.f32.partialorder %v5628_v41, 8.507059e+37  ;;  %v5915_v57 = vadd.f32 %v13940_v25, %v5914_v0 }
 0x9a5   : > { %v6005_v4 = vpop.permute.xlu0 %6004 }
 0x9a6   : > { %6014 = vperm.xlu2 %7948, %v13879_v54   ;;  %v8238_v27 = vpop.eup %8237  ;;  %v14091_v16 = vmul.f32 %v6005_v4, %v5900_v51  ;;  %v5631_v51 = vor.u32 1.1754944e-38, %v5630_v49 }
 0x9a7   : > { %v5620_v61 = vmul.f32 %v8238_v27, %v5249_v10  ;;  %vm5625_vm12 = vweird.f32 %v8238_v27  ;;  %v5140_v10 = vmul.f32 1.442695, %v5079_v53 }
 0x9a8   : > { %vm5626_vm5 = vmor %vm5624_vm14, %vm5625_vm12 }
 0x9a9   : > { %v5621_v14 = vsub.f32 1.0, %v5620_v61  ;;  %v14101_v61 = vpop.f32.mrf.mxu1  ;;  %8239 = vpow2.f32 %v5140_v10  ;;  %v15931_v10 = vld [vmem:[#allocation42_spill] sm:$0xff] }
 0x9aa   : > { %15927 = vst [vmem:[#allocation52_spill] sm:$0xff] %v14101_v61 }
 0x9ab   : > { %v5622_v47 = vmul.f32 %v8238_v27, %v5621_v14 }
 0x9ad   : > { %v5623_v44 = vadd.f32 %v8238_v27, %v5622_v47  ;;  %v6020_v26 = vpop.permute.xlu0 %6019 }
 0x9ae   : > { %7949 = vset.pattern.permute.xlu2 %v15856_v56  ;;  %v14098_v4 = vmul.f32 %v6020_v26, %v5908_v19  ;;  %v5898_v26 = vadd.f32 %v13940_v25, %v13993_v21  ;;  %v15934_v21 = vld [vmem:[#allocation41_spill] sm:$0xff] }
 0x9af   : > { %6370 = vperm.xlu2 %7949, %v13846_v32   ;;  %v5627_v14 = vsel %vm5626_vm5, %v8238_v27, %v5623_v44  ;;  %v8240_v44 = vpop.eup %8239  ;;  %v5080_v61 = vsub.f32 %v15934_v21, %v13810_v37  ;;  %vm15946_vm5 = vmmov %vm15929_vm0 }
 0x9b0   : > { %15926 = vst [vmem:[#allocation62_spill] sm:$0xff] %v14098_v4  ;;  %v5632_v40 = vsel %vm5629_vm8, %v5631_v51, %v5627_v14 }
 0x9b1   : > { %v14104_v47 = vmul.f32 %v5632_v40, %v13955_v5  ;;  %v5922_v27 = vpop.f32.mrf.mxu1 }
 0x9b2   : > { %v5923_v5 = vadd.f32 %v13940_v25, %v5922_v27 }
 0x9b3   : > { %15928 = vst [vmem:[#allocation16_spill] sm:$0xff] %v14104_v47 }
 0x9b4   : > { %5777 = vst.msk [vmem:[%s13688_s14 + $0xb8] sm:$0xff] %vm15929_vm0, %v14104_v47 }
 0x9b5   : > { %v6035_v46 = vpop.permute.xlu0 %6034 }
 0x9b6   : > { %v14110_v49 = vmul.f32 %v6035_v46, %v5915_v57  ;;  %v6268_v57 = vadd.f32 %v13951_v43, %v15931_v10 }
 0x9b7   : > { %v5252_v19 = vpop.xlane.xlu2 %5251  ;;  %7952 = vset.pattern.permute.xlu2 %v15869_v13  ;;  %v14113_v41 = vpop.permute.xlu1 %5994 }
 0x9b8   : > { %15930 = vst [vmem:[#allocation71_spill] sm:$0xff] %v14110_v49  ;;  %8241 = vrcp.f32 %v5252_v19  ;;  %v14126_v49 = vsel %vm15933_vm15, %v8240_v44, 0.0  ;;  %v5645_v27 = vand.u32 2147483648, %v5252_v19  ;;  %vm5639_vm4 = vweird.f32 %v5252_v19 }
 0x9b9   : > { %v5890_v44 = vadd.f32 %v13940_v25, %v15937_v7 }
 0x9ba   : > { %v5646_v37 = vor.u32 1.1754944e-38, %v5645_v27 }
 0x9bd   : > { %v6050_v51 = vpop.permute.xlu0 %6049 }
 0x9be   : > { %v8242_v53 = vpop.eup %8241  ;;  %v14118_v14 = vmul.f32 %v6050_v51, %v5923_v5  ;;  %v5643_v5 = vand.u32 2147483647, %v5252_v19 }
 0x9bf   : > { %v5635_v0 = vmul.f32 %v8242_v53, %v5252_v19  ;;  %v6000_v40 = vpop.permute.xlu2 %5999  ;;  %vm5640_vm11 = vweird.f32 %v8242_v53 }
 0x9c0   : > { %v14122_v46 = vmul.f32 %v6000_v40, %v5898_v26  ;;  %v6355_v32 = vpop.permute.xlu1 %6354  ;;  %v5265_v26 = vsel %vm15936_vm13, %v14126_v49, 0.0  ;;  %vm5641_vm10 = vmor %vm5639_vm4, %vm5640_vm11  ;;  %vm5644_vm7 = vcmp.eq.f32.partialorder %v5643_v5, 8.507059e+37  ;;  %v14159_v5 = vpop.f32.mrf.mxu2 }
 0x9c1   : > { %v5636_v22 = vsub.f32 1.0, %v5635_v0  ;;  %v6469_v4 = vmul.f32 %v6355_v32, %v6268_v57  ;;  %v15938_v32 = vld [vmem:[#allocation43_spill] sm:$0xff]  ;;  %vm15952_vm13 = vmmov %vm15946_vm5 }
 0x9c2   : > { %v6270_v40 = vadd.f32 %v13951_v43, %v15938_v32 }
 0x9c3   : > { %v5637_v60 = vmul.f32 %v8242_v53, %v5636_v22  ;;  %v14131_v51 = vadd.f32 %v6469_v4, %v13969_v9  ;;  %v5142_v22 = vmul.f32 1.442695, %v5080_v61  ;;  %v6122_v4 = vmul.f32 %v14076_v50, %v5890_v44 }
 0x9c4   : > { %5266 = vadd.xlane.f32.xlu1 %v5265_v26  ;;  %v15942_v61 = vmov 2  }
 0x9c5   : > { %15935 = vst [vmem:[#allocation15_spill] sm:$0xff] %v14131_v51  ;;  %v5638_v0 = vadd.f32 %v8242_v53, %v5637_v60  ;;  %8243 = vpow2.f32 %v5142_v22 }
 0x9c7   : > { %v6359_v10 = vpop.permute.xlu2 %6358  ;;  %v5642_v9 = vsel %vm5641_vm10, %v8242_v53, %v5638_v0  ;;  %v15943_v53 = vld [vmem:[#allocation39_spill] sm:$0xff] }
 0x9c8   : > { %v6470_v57 = vmul.f32 %v6359_v10, %v6270_v40  ;;  %v5647_v21 = vsel %vm5644_vm7, %v5646_v37, %v5642_v9  ;;  %vm15944_vm1 = vcmp.lt.f32.partialorder %v15943_v53, 1.0  ;;  %v14165_v26 = vpop.f32.mrf.mxu2  ;;  %v5903_v53 = vadd.f32 %v13940_v25, %v14016_v11 }
 0x9c9   : > { %v14141_v60 = vmul.f32 %v5647_v21, %v13981_v23 }
 0x9ca   : > { %v14143_v19 = vadd.f32 %v6470_v57, %v6122_v4 }
 0x9cb   : > { %15939 = vst [vmem:[#allocation44_spill] sm:$0xff] %v14141_v60  ;;  %6079 = vperm.xlu0 %7963, %v14141_v60   ;;  %v8244_v27 = vpop.eup %8243 }
 0x9cc   : > { %15940 = vst [vmem:[#allocation63_spill] sm:$0xff] %v14143_v19  ;;  %v14153_v50 = vsel %vm15944_vm1, %v8244_v27, 0.0  ;;  %vm15957_vm1 = vmmov %vm15946_vm5 }
 0x9cd   : > { %5778 = vst.msk [vmem:[%s13688_s14 + $0xc0] sm:$0xff] %vm15941_vm9, %v14141_v60  ;;  %v5268_v23 = vsel %vm15945_vm6, %v14153_v50, 0.0 }
 0x9d3   : > { %7976 = vset.pattern.permute.xlu0 %v15942_v61 }
 0x9d4   : > { %6710 = vperm.xlu0 %7976, %v13742_v38  }
 0x9d8   : > { %5269 = vadd.xlane.f32.xlu2 %v5268_v23 }
 0x9dc   : > { %7977 = vset.pattern.permute.xlu0 %v15856_v56 }
 0x9dd   : > { %6342 = vperm.xlu0 %7977, %v13693_v39   ;;  %6024 = vperm.xlu1 %7950, %v13841_v8   ;;  %v14170_v39 = vpop.f32.mrf.mxu2 }
 0x9e5   : > { %6362 = vperm.xlu0 %7977, %v13742_v38   ;;  %7951 = vset.pattern.permute.xlu1 %v15856_v56  ;;  %v14177_v9 = vpop.f32.mrf.mxu2 }
 0x9e6   : > { %6378 = vperm.xlu1 %7951, %v13826_v36  }
 0x9eb   : > { %v5258_v0 = vpop.xlane.xlu1 %5257 }
 0x9ec   : > { %8245 = vrcp.f32 %v5258_v0  ;;  %v5675_v32 = vand.u32 2147483648, %v5258_v0  ;;  %v5673_v37 = vand.u32 2147483647, %v5258_v0  ;;  %vm5669_vm3 = vweird.f32 %v5258_v0 }
 0x9ed   : > { %6374 = vperm.xlu0 %7977, %v13760_v35   ;;  %v14191_v23 = vpop.f32.mrf.mxu2 }
 0x9ee   : > { %6390 = vperm.xlu1 %7951, %v13841_v8   ;;  %v5676_v10 = vor.u32 1.1754944e-38, %v5675_v32  ;;  %vm5674_vm14 = vcmp.eq.f32.partialorder %v5673_v37, 8.507059e+37  ;;  %v15947_v32 = vld [vmem:[#allocation21_spill] sm:$0xff]  ;;  %v15948_v37 = vld [vmem:[#allocation22_spill] sm:$0xff] }
 0x9f0   : > { %6029 = vperm.xlu2 %7952, %v13910_v6  }
 0x9f2   : > { %v8246_v7 = vpop.eup %8245 }
 0x9f3   : > { %v5665_v44 = vmul.f32 %v8246_v7, %v5258_v0  ;;  %vm5670_vm2 = vweird.f32 %v8246_v7 }
 0x9f4   : > { %vm5671_vm12 = vmor %vm5669_vm3, %vm5670_vm2 }
 0x9f5   : > { %6386 = vperm.xlu0 %7977, %v13767_v28   ;;  %v5666_v38 = vsub.f32 1.0, %v5665_v44 }
 0x9f6   : > { %7954 = vset.pattern.permute.xlu1 %v15869_v13 }
 0x9f7   : > { %v5667_v40 = vmul.f32 %v8246_v7, %v5666_v38  ;;  %6039 = vperm.xlu1 %7954, %v13888_v59  }
 0x9f8   : > { %7953 = vset.pattern.permute.xlu2 %v15856_v56 }
 0x9f9   : > { %6382 = vperm.xlu2 %7953, %v13879_v54   ;;  %v5668_v22 = vadd.f32 %v8246_v7, %v5667_v40  ;;  %v5895_v40 = vadd.f32 %v13940_v25, %v15947_v32 }
 0x9fb   : > { %v5672_v4 = vsel %vm5671_vm12, %v8246_v7, %v5668_v22  ;;  %v6275_v22 = vadd.f32 %v13951_v43, %v15948_v37  ;;  %v6124_v19 = vmul.f32 %v14113_v41, %v5895_v40 }
 0x9fc   : > { %v5677_v57 = vsel %vm5674_vm14, %v5676_v10, %v5672_v4  ;;  %vm15965_vm14 = vmmov %vm15957_vm1 }
 0x9fd   : > { %6398 = vperm.xlu0 %7977, %v13786_v45   ;;  %v14181_v21 = vmul.f32 %v5677_v57, %v14027_v31 }
 0x9ff   : > { %7955 = vset.pattern.permute.xlu1 %v15856_v56  ;;  %5780 = vst.msk [vmem:[%s13688_s14 + $0xd0] sm:$0xff] %vm15946_vm5, %v14181_v21 }
 0xa00   : > { %6402 = vperm.xlu1 %7955, %v13888_v59  }
 0xa01   : > { %v5261_v27 = vpop.xlane.xlu2 %5260  ;;  %6394 = vperm.xlu2 %7953, %v13910_v6  }
 0xa02   : > { %8247 = vrcp.f32 %v5261_v27  ;;  %v5690_v10 = vand.u32 2147483648, %v5261_v27  ;;  %v5688_v57 = vand.u32 2147483647, %v5261_v27  ;;  %vm5684_vm0 = vweird.f32 %v5261_v27 }
 0xa03   : > { %v6010_v0 = vpop.permute.xlu1 %6009 }
 0xa04   : > { %v14193_v7 = vmul.f32 %v6010_v0, %v5903_v53  ;;  %v14207_v0 = vpop.f32.mrf.mxu2  ;;  %v5691_v32 = vor.u32 1.1754944e-38, %v5690_v10  ;;  %vm5689_vm11 = vcmp.eq.f32.partialorder %v5688_v57, 8.507059e+37  ;;  %v14265_v10 = vpop.f32.mrf.mxu3 }
 0xa05   : > { %6410 = vperm.xlu0 %7977, %v13973_v34   ;;  %15955 = vst [vmem:[#allocation35_spill] sm:$0xff] %v14265_v10 }
 0xa08   : > { %v8248_v31 = vpop.eup %8247  ;;  %7958 = vset.pattern.permute.xlu1 %v15869_v13 }
 0xa09   : > { %v5680_v44 = vmul.f32 %v8248_v31, %v5261_v27  ;;  %v14197_v38 = vpop.permute.xlu2 %6014  ;;  %7956 = vset.pattern.permute.xlu2 %v15869_v13  ;;  %6054 = vperm.xlu1 %7958, %v13904_v29   ;;  %vm5685_vm8 = vweird.f32 %v8248_v31 }
 0xa0a   : > { %6044 = vperm.xlu2 %7956, %v13935_v18   ;;  %vm5686_vm15 = vmor %vm5684_vm0, %vm5685_vm8 }
 0xa0b   : > { %v5681_v11 = vsub.f32 1.0, %v5680_v44  ;;  %v6278_v44 = vadd.f32 %v13951_v43, %v14159_v5 }
 0xa0c   : > { %v6367_v53 = vpop.permute.xlu1 %6366 }
 0xa0d   : > { %v5682_v4 = vmul.f32 %v8248_v31, %v5681_v11  ;;  %6422 = vperm.xlu0 %7977, %v14043_v62   ;;  %v6472_v51 = vmul.f32 %v6367_v53, %v6275_v22 }
 0xa0f   : > { %v5683_v59 = vadd.f32 %v8248_v31, %v5682_v4  ;;  %v14212_v37 = vadd.f32 %v6472_v51, %v6124_v19 }
 0xa11   : > { %15949 = vst [vmem:[#allocation26_spill] sm:$0xff] %v14212_v37  ;;  %v6371_v11 = vpop.permute.xlu2 %6370  ;;  %v5687_v6 = vsel %vm5686_vm15, %v8248_v31, %v5683_v59  ;;  %7959 = vset.pattern.permute.xlu1 %v15856_v56  ;;  %v14228_v59 = vpop.f32.mrf.mxu2 }
 0xa12   : > { %v6473_v62 = vmul.f32 %v6371_v11, %v6278_v44  ;;  %7957 = vset.pattern.permute.xlu2 %v15856_v56  ;;  %v5692_v41 = vsel %vm5689_vm11, %v5691_v32, %v5687_v6  ;;  %6414 = vperm.xlu1 %7959, %v13904_v29   ;;  %v14267_v11 = vpop.f32.mrf.mxu1 }
 0xa13   : > { %6406 = vperm.xlu2 %7957, %v13935_v18   ;;  %v14219_v5 = vmul.f32 %v5692_v41, %v14061_v15 }
 0xa14   : > { %v14222_v27 = vadd.f32 %v6473_v62, %v14122_v46  ;;  %v14251_v46 = vpop.permute.xlu0 %6064 }
 0xa15   : > { %15950 = vst [vmem:[#allocation66_spill] sm:$0xff] %v14219_v5  ;;  %6434 = vperm.xlu0 %7977, %v14141_v60  }
 0xa16   : > { %15951 = vst [vmem:[#allocation73_spill] sm:$0xff] %v14222_v27 }
 0xa17   : > { %5781 = vst.msk [vmem:[%s13688_s14 + $0xd8] sm:$0xff] %vm15952_vm13, %v14219_v5 }
 0xa18   : > { %15954 = vst [vmem:[#allocation67_spill] sm:$0xff] %v14251_v46 }
 0xa19   : > { %v14235_v6 = vpop.f32.mrf.mxu2 }
 0xa1a   : > { %7964 = vset.pattern.permute.xlu1 %v15942_v61 }
 0xa1b   : > { %7960 = vset.pattern.permute.xlu2 %v15869_v13  ;;  %6694 = vperm.xlu1 %7964, %v13705_v17   ;;  %v15953_v17 = vld [vmem:[#allocation46_spill] sm:$0xff] }
 0xa1c   : > { %6059 = vperm.xlu2 %7960, %v14003_v63  }
 0xa1d   : > { %6446 = vperm.xlu0 %7977, %v14219_v5  }
 0xa21   : > { %v14243_v62 = vpop.f32.mrf.mxu2 }
 0xa23   : > { %7965 = vset.pattern.permute.xlu1 %v15869_v13 }
 0xa24   : > { %7961 = vset.pattern.permute.xlu2 %v15856_v56  ;;  %6069 = vperm.xlu1 %7965, %v13922_v12  }
 0xa25   : > { %7978 = vset.pattern.permute.xlu0 %v15869_v13  ;;  %6418 = vperm.xlu2 %7961, %v14003_v63   ;;  %v15962_v63 = vld [vmem:[#allocation56_spill] sm:$0xff] }
 0xa26   : > { %6094 = vperm.xlu0 %7978, %v14219_v5   ;;  %v15961_v5 = vld [vmem:[#allocation27_spill] sm:$0xff] }
 0xa29   : > { %v14249_v15 = vpop.f32.mrf.mxu2 }
 0xa2c   : > { %7966 = vset.pattern.permute.xlu1 %v15856_v56 }
 0xa2d   : > { %7962 = vset.pattern.permute.xlu2 %v15942_v61  ;;  %6426 = vperm.xlu1 %7966, %v13922_v12   ;;  %v6273_v12 = vadd.f32 %v13951_v43, %v15961_v5 }
 0xa2e   : > { %6686 = vperm.xlu2 %7962, %v15953_v17  }
 0xa31   : > { %v14259_v31 = vpop.f32.mrf.mxu2 }
 0xa35   : > { %7970 = vset.pattern.permute.xlu1 %v15942_v61 }
 0xa36   : > { %7967 = vset.pattern.permute.xlu2 %v15869_v13  ;;  %6702 = vperm.xlu1 %7970, %v13778_v24  }
 0xa37   : > { %6074 = vperm.xlu2 %7967, %v14104_v47   ;;  %v5267_v51 = vpop.xlane.xlu1 %5266 }
 0xa38   : > { %8249 = vrcp.f32 %v5267_v51  ;;  %v5720_v4 = vand.u32 2147483648, %v5267_v51  ;;  %v5718_v53 = vand.u32 2147483647, %v5267_v51  ;;  %vm5714_vm10 = vweird.f32 %v5267_v51 }
 0xa39   : > { %v14269_v17 = vpop.f32.mrf.mxu2 }
 0xa3a   : > { %v5721_v41 = vor.u32 1.1754944e-38, %v5720_v4  ;;  %vm5719_vm9 = vcmp.eq.f32.partialorder %v5718_v53, 8.507059e+37  ;;  %v15958_v4 = vld [vmem:[#allocation20_spill] sm:$0xff] }
 0xa3b   : > { %v15959_v53 = vld [vmem:[#allocation32_spill] sm:$0xff] }
 0xa3d   : > { %v14257_v19 = vpop.permute.xlu0 %6079 }
 0xa3e   : > { %v8250_v40 = vpop.eup %8249  ;;  %7971 = vset.pattern.permute.xlu1 %v15869_v13 }
 0xa3f   : > { %v5710_v22 = vmul.f32 %v8250_v40, %v5267_v51  ;;  %7968 = vset.pattern.permute.xlu2 %v15856_v56  ;;  %6084 = vperm.xlu1 %7971, %v14011_v20   ;;  %vm5715_vm4 = vweird.f32 %v8250_v40 }
 0xa40   : > { %6430 = vperm.xlu2 %7968, %v14104_v47   ;;  %vm5716_vm7 = vmor %vm5714_vm10, %vm5715_vm4 }
 0xa41   : > { %v5711_v24 = vsub.f32 1.0, %v5710_v22 }
 0xa43   : > { %v5712_v57 = vmul.f32 %v8250_v40, %v5711_v24 }
 0xa45   : > { %v5713_v44 = vadd.f32 %v8250_v40, %v5712_v57  ;;  %v14278_v57 = vpop.f32.mrf.mxu3 }
 0xa46   : > { %v6711_v32 = vpop.permute.xlu0 %6710  ;;  %15956 = vst [vmem:[#allocation69_spill] sm:$0xff] %v14278_v57  ;;  %v14296_v57 = vpop.f32.mrf.mxu2 }
 0xa47   : > { %7972 = vset.pattern.permute.xlu1 %v15856_v56  ;;  %v5717_v46 = vsel %vm5716_vm7, %v8250_v40, %v5713_v44  ;;  %v14286_v40 = vld [vmem:[%s14736_s6 + $0x2] ss:$0 sm:$0xff] }
 0xa48   : > { %7969 = vset.pattern.permute.xlu2 %v15942_v61  ;;  %6438 = vperm.xlu1 %7972, %v14011_v20   ;;  %v5722_v22 = vsel %vm5719_vm9, %v5721_v41, %v5717_v46  ;;  %v5880_v46 = vadd.f32 %v13940_v25, %v15958_v4  ;;  %v15960_v41 = vld [vmem:[#allocation23_spill] sm:$0xff]  ;;  %v5913_v4 = vadd.f32 %v13940_v25, %v14065_v48 }
 0xa49   : > { %6698 = vperm.xlu2 %7969, %v13736_v30   ;;  %v14276_v51 = vmul.f32 %v5722_v22, %v14126_v49  ;;  %v6260_v30 = vadd.f32 %v13951_v43, %v15959_v53  ;;  %v14292_v49 = vpop.f32.mrf.mxu1  ;;  %v6608_v22 = vadd.f32 %v14286_v40, %v15960_v41  ;;  %v6621_v60 = vadd.f32 %v14286_v40, %v15962_v63 }
 0xa4a   : > { %v6118_v27 = vmul.f32 %v13931_v3, %v5880_v46 }
 0xa4b   : > { %v5270_v24 = vpop.xlane.xlu2 %5269  ;;  %5783 = vst.msk [vmem:[%s13688_s14 + $0xe8] sm:$0xff] %vm15957_vm1, %v14276_v51  ;;  %v6814_v53 = vmul.f32 %v14071_v1, %v6608_v22 }
 0xa4c   : > { %8251 = vrcp.f32 %v5270_v24  ;;  %v5735_v1 = vand.u32 2147483648, %v5270_v24  ;;  %v5733_v22 = vand.u32 2147483647, %v5270_v24  ;;  %vm5729_vm2 = vweird.f32 %v5270_v24 }
 0xa4d   : > { %v14312_v48 = vpop.f32.mrf.mxu3 }
 0xa4e   : > { %v14329_v63 = vpop.f32.mrf.mxu2  ;;  %vm5734_vm12 = vcmp.eq.f32.partialorder %v5733_v22, 8.507059e+37  ;;  %v6280_v22 = vadd.f32 %v13951_v43, %v14165_v26 }
 0xa4f   : > { %v6343_v44 = vpop.permute.xlu0 %6342  ;;  %v14299_v37 = vpop.permute.xlu1 %6024 }
 0xa50   : > { %v6466_v10 = vmul.f32 %v6343_v44, %v6260_v30  ;;  %7979 = vset.pattern.permute.xlu1 %v15942_v61 }
 0xa51   : > { %7973 = vset.pattern.permute.xlu2 %v15869_v13  ;;  %6714 = vperm.xlu1 %7979, %v13792_v42  }
 0xa52   : > { %v8252_v20 = vpop.eup %8251  ;;  %v6498_v47 = vadd.f32 %v6466_v10, %v6118_v27  ;;  %6089 = vperm.xlu2 %7973, %v14181_v21  }
 0xa53   : > { %v5725_v41 = vmul.f32 %v8252_v20, %v5270_v24  ;;  %v6030_v3 = vpop.permute.xlu2 %6029  ;;  %vm5730_vm6 = vweird.f32 %v8252_v20 }
 0xa54   : > { %v6846_v46 = vadd.f32 %v6814_v53, %v6498_v47  ;;  %v14308_v30 = vmul.f32 %v6030_v3, %v5913_v4  ;;  %v6283_v47 = vadd.f32 %v13951_v43, %v14170_v39  ;;  %v5905_v4 = vadd.f32 %v13940_v25, %v14030_v2  ;;  %vm14332_vm3 = vmor %vm5729_vm2, %vm5730_vm6 }
 0xa55   : > { %v5726_v44 = vsub.f32 1.0, %v5725_v41  ;;  %v6285_v53 = vadd.f32 %v13951_v43, %v14177_v9  ;;  %v6819_v39 = vmul.f32 %v6711_v32, %v6621_v60 }
 0xa56   : > { %v6878_v27 = vmul.f32 0.33333334, %v6846_v46  ;;  %v14327_v46 = vpop.f32.mrf.mxu1  ;;  %v6128_v9 = vmul.f32 %v14197_v38, %v5905_v4 }
 0xa57   : > { %v5727_v10 = vmul.f32 %v8252_v20, %v5726_v44  ;;  %v6363_v42 = vpop.permute.xlu0 %6362 }
 0xa58   : > { %6910 = vst [vmem:[%s14320_s20 + $0x8] sm:$0xff] %v6878_v27  ;;  %v6471_v5 = vmul.f32 %v6363_v42, %v6273_v12  ;;  %v6379_v3 = vpop.permute.xlu1 %6378  ;;  %v5736_v12 = vor.u32 1.1754944e-38, %v5735_v1 }
 0xa59   : > { %v5728_v41 = vadd.f32 %v8252_v20, %v5727_v10  ;;  %v6475_v2 = vmul.f32 %v6379_v3, %v6283_v47  ;;  %7980 = vset.pattern.permute.xlu1 %v15869_v13 }
 0xa5a   : > { %v6503_v27 = vadd.f32 %v6471_v5, %v14040_v52  ;;  %7974 = vset.pattern.permute.xlu2 %v15856_v56  ;;  %6099 = vperm.xlu1 %7980, %v14052_v33   ;;  %v5910_v5 = vadd.f32 %v13940_v25, %v14057_v55  ;;  %v14374_v25 = vpop.f32.mrf.mxu2 }
 0xa5b   : > { %v6383_v60 = vpop.permute.xlu2 %6382  ;;  %v5732_v32 = vsel %vm14332_vm3, %v8252_v20, %v5728_v41  ;;  %v14344_v1 = vadd.f32 %v6475_v2, %v14193_v7  ;;  %6442 = vperm.xlu2 %7974, %v14181_v21   ;;  %v14358_v7 = vpop.f32.mrf.mxu3 }
 0xa5c   : > { %v6851_v24 = vadd.f32 %v6819_v39, %v6503_v27  ;;  %v6476_v52 = vmul.f32 %v6383_v60, %v6285_v53  ;;  %v5737_v10 = vsel %vm5734_vm12, %v5736_v12, %v5732_v32  ;;  %v6293_v53 = vadd.f32 %v13951_v43, %v14228_v59 }
 0xa5d   : > { %v14348_v38 = vmul.f32 %v5737_v10, %v14153_v50  ;;  %v6290_v50 = vadd.f32 %v13951_v43, %v14207_v0  ;;  %v6130_v41 = vmul.f32 %v14299_v37, %v5910_v5 }
 0xa5e   : > { %v6883_v42 = vmul.f32 0.33333334, %v6851_v24  ;;  %v14352_v47 = vadd.f32 %v6476_v52, %v6128_v9  ;;  %v14372_v12 = vpop.f32.mrf.mxu1  ;;  %v14393_v9 = vld [vmem:[%s14736_s6] ss:$0 sm:$0xff] }
 0xa5f   : > { %5784 = vst.msk [vmem:[%s13688_s14 + $0xf0] sm:$0xff] %vm15965_vm14, %v14348_v38  ;;  %6109 = vperm.xlu0 %7978, %v14348_v38   ;;  %v6375_v20 = vpop.permute.xlu0 %6374 }
 0xa60   : > { %6915 = vst [vmem:[%s14320_s20 + $0x30] sm:$0xff] %v6883_v42  ;;  %v6474_v4 = vmul.f32 %v6375_v20, %v6280_v22  ;;  %v6391_v26 = vpop.permute.xlu1 %6390  ;;  %v14408_v42 = vld [vmem:[%s14736_s6 + $0x1] ss:$0 sm:$0xff] }
 0xa61   : > { %v6478_v39 = vmul.f32 %v6391_v26, %v6290_v50  ;;  %v6295_v20 = vadd.f32 %v14408_v42, %v14235_v6  ;;  %v6300_v6 = vadd.f32 %v14408_v42, %v14249_v15 }
 0xa62   : > { %v14369_v3 = vadd.f32 %v6474_v4, %v14091_v16  ;;  %7981 = vset.pattern.permute.xlu1 %v15856_v56  ;;  %v6288_v16 = vadd.f32 %v13951_v43, %v14191_v23  ;;  %v15967_v43 = vld [vmem:[#allocation52_spill] sm:$0xff]  ;;  %v14414_v50 = vpop.f32.mrf.mxu2 }
 0xa63   : > { %v6395_v44 = vpop.permute.xlu2 %6394  ;;  %v14376_v55 = vadd.f32 %v6478_v39, %v6130_v41  ;;  %7975 = vset.pattern.permute.xlu2 %v15942_v61  ;;  %6450 = vperm.xlu1 %7981, %v14052_v33   ;;  %v14387_v27 = vpop.f32.mrf.mxu3  ;;  %v5920_v23 = vadd.f32 %v14393_v9, %v15967_v43  ;;  %v15969_v41 = vld [vmem:[#allocation71_spill] sm:$0xff] }
 0xa64   : > { %v6479_v0 = vmul.f32 %v6395_v44, %v6293_v53  ;;  %6706 = vperm.xlu2 %7975, %v13817_v58   ;;  %v15966_v58 = vld [vmem:[#allocation24_spill] sm:$0xff]  ;;  %v6298_v53 = vadd.f32 %v14408_v42, %v14243_v62  ;;  %v15970_v62 = vld [vmem:[#allocation55_spill] sm:$0xff] }
 0xa65   : > { %v5918_v60 = vadd.f32 %v14393_v9, %v15966_v58 }
 0xa66   : > { %v14384_v37 = vadd.f32 %v6479_v0, %v14308_v30  ;;  %v15968_v30 = vld [vmem:[#allocation62_spill] sm:$0xff]  ;;  %v14412_v5 = vpop.f32.mrf.mxu1 }
 0xa67   : > { %7985 = vset.pattern.permute.xlu0 %v15856_v56  ;;  %v6387_v59 = vpop.permute.xlu0 %6386 }
 0xa68   : > { %v6477_v2 = vmul.f32 %v6387_v59, %v6288_v16  ;;  %6458 = vperm.xlu0 %7985, %v14348_v38  }
 0xa69   : > { %v6040_v24 = vpop.permute.xlu1 %6039 }
 0xa6a   : > { %v14400_v32 = vadd.f32 %v6477_v2, %v15968_v30  ;;  %v6133_v52 = vmul.f32 %v6040_v24, %v5918_v60  ;;  %v6317_v43 = vpop.f32.mrf.mxu2  ;;  %v5925_v30 = vadd.f32 %v14393_v9, %v14267_v11  ;;  %v6308_v11 = vadd.f32 %v14408_v42, %v14296_v57 }
 0xa6b   : > { %v6045_v10 = vpop.permute.xlu2 %6044  ;;  %7987 = vset.pattern.permute.xlu1 %v15942_v61 }
 0xa6c   : > { %v6134_v22 = vmul.f32 %v6045_v10, %v5920_v23  ;;  %7982 = vset.pattern.permute.xlu2 %v15869_v13  ;;  %6726 = vperm.xlu1 %7987, %v13826_v36   ;;  %v14419_v36 = vpop.f32.mrf.mxu3 }
 0xa6d   : > { %6104 = vperm.xlu2 %7982, %v14276_v51  }
 0xa6e   : > { %v5937_v60 = vpop.f32.mrf.mxu1 }
 0xa6f   : > { %v6399_v4 = vpop.permute.xlu0 %6398 }
 0xa70   : > { %v6480_v26 = vmul.f32 %v6399_v4, %v6295_v20  ;;  %7986 = vset.pattern.permute.xlu0 %v15942_v61 }
 0xa71   : > { %6722 = vperm.xlu0 %7986, %v13760_v35   ;;  %v6303_v35 = vadd.f32 %v14408_v42, %v14259_v31 }
 0xa72   : > { %v14426_v39 = vadd.f32 %v6480_v26, %v15969_v41  ;;  %v6403_v0 = vpop.permute.xlu1 %6402  ;;  %v14459_v4 = vpop.f32.mrf.mxu2  ;;  %v6305_v26 = vadd.f32 %v14408_v42, %v14269_v17 }
 0xa73   : > { %v6407_v44 = vpop.permute.xlu2 %6406  ;;  %v6481_v59 = vmul.f32 %v6403_v0, %v6298_v53 }
 0xa74   : > { %v6482_v16 = vmul.f32 %v6407_v44, %v6300_v6  ;;  %7988 = vset.pattern.permute.xlu1 %v15869_v13  ;;  %v14442_v31 = vpop.f32.mrf.mxu3 }
 0xa75   : > { %v14433_v58 = vadd.f32 %v6481_v59, %v6133_v52  ;;  %7983 = vset.pattern.permute.xlu2 %v15856_v56  ;;  %6114 = vperm.xlu1 %7988, %v15970_v62  }
 0xa76   : > { %v14431_v2 = vadd.f32 %v6482_v16, %v6134_v22  ;;  %6454 = vperm.xlu2 %7983, %v14276_v51   ;;  %v14457_v20 = vpop.f32.mrf.mxu1 }
 0xa77   : > { %v6411_v15 = vpop.permute.xlu0 %6410 }
 0xa78   : > { %v6483_v23 = vmul.f32 %v6411_v15, %v6303_v35  ;;  %v15972_v15 = vld [vmem:[#allocation19_spill] sm:$0xff] }
 0xa79   : > { %6734 = vperm.xlu0 %7986, %v13767_v28   ;;  %v15971_v28 = vld [vmem:[#allocation47_spill] sm:$0xff] }
 0xa7a   : > { %v14440_v13 = vadd.f32 %v6483_v23, %v14118_v14  ;;  %v5928_v14 = vadd.f32 %v14393_v9, %v14292_v49  ;;  %v6318_v49 = vadd.f32 %v14408_v42, %v6317_v43  ;;  %v14480_v23 = vpop.f32.mrf.mxu2 }
 0xa7b   : > { %v6060_v24 = vpop.permute.xlu2 %6059  ;;  %v6055_v52 = vpop.permute.xlu1 %6054 }
 0xa7c   : > { %v6136_v10 = vmul.f32 %v6055_v52, %v5925_v30  ;;  %v6137_v53 = vmul.f32 %v6060_v24, %v5928_v14  ;;  %v14463_v41 = vpop.f32.mrf.mxu3  ;;  %v15973_v24 = vld [vmem:[#allocation33_spill] sm:$0xff] }
 0xa7d   : > { %7989 = vset.pattern.permute.xlu1 %v15856_v56  ;;  %v6611_v52 = vadd.f32 %v14286_v40, %v15973_v24 }
 0xa7e   : > { %7984 = vset.pattern.permute.xlu2 %v15942_v61  ;;  %6462 = vperm.xlu1 %7989, %v15970_v62   ;;  %v14478_v43 = vpop.f32.mrf.mxu1 }
 0xa7f   : > { %v14449_v22 = vpop.permute.xlu0 %6422  ;;  %6718 = vperm.xlu2 %7984, %v15971_v28  }
 0xa81   : > { %6746 = vperm.xlu0 %7986, %v13786_v45   ;;  %v5938_v45 = vadd.f32 %v14393_v9, %v5937_v60  ;;  %v6606_v60 = vadd.f32 %v14286_v40, %v15972_v15 }
 0xa83   : > { %v6419_v56 = vpop.permute.xlu2 %6418  ;;  %v6141_v59 = vmul.f32 %v14257_v19, %v5938_v45 }
 0xa84   : > { %v6485_v6 = vmul.f32 %v6419_v56, %v6308_v11  ;;  %v6415_v44 = vpop.permute.xlu1 %6414  ;;  %v15975_v56 = vld [vmem:[#allocation50_spill] sm:$0xff] }
 0xa85   : > { %v6484_v57 = vmul.f32 %v6415_v44, %v6305_v26  ;;  %v15976_v26 = vld [vmem:[#allocation28_spill] sm:$0xff] }
 0xa86   : > { %v14467_v0 = vadd.f32 %v6485_v6, %v6137_v53  ;;  %7990 = vset.pattern.permute.xlu1 %v15942_v61  ;;  %v15977_v53 = vld [vmem:[#allocation61_spill] sm:$0xff]  ;;  %v15978_v44 = vld [vmem:[#allocation60_spill] sm:$0xff] }
 0xa87   : > { %v6435_v16 = vpop.permute.xlu0 %6434  ;;  %v14471_v35 = vadd.f32 %v6484_v57, %v6136_v10  ;;  %6730 = vperm.xlu2 %7984, %v13879_v54   ;;  %6738 = vperm.xlu1 %7990, %v13841_v8   ;;  %v15974_v54 = vld [vmem:[#allocation49_spill] sm:$0xff]  ;;  %v5944_v57 = vpop.f32.mrf.mxu1 }
 0xa88   : > { %v6489_v17 = vmul.f32 %v6435_v16, %v6318_v49  ;;  %v6324_v16 = vpop.f32.mrf.mxu2 }
 0xa89   : > { %6758 = vperm.xlu0 %7986, %v13973_v34   ;;  %v14487_v34 = vpop.f32.mrf.mxu3 }
 0xa8a   : > { %v14482_v61 = vadd.f32 %v6489_v17, %v6141_v59  ;;  %v5945_v59 = vadd.f32 %v14393_v9, %v5944_v57  ;;  %v6325_v17 = vadd.f32 %v14408_v42, %v6324_v16 }
 0xa8b   : > { %v6687_v19 = vpop.permute.xlu2 %6686 }
 0xa8c   : > { %v6813_v30 = vmul.f32 %v6687_v19, %v6606_v60 }
 0xa8d   : > { %v6695_v10 = vpop.permute.xlu1 %6694 }
 0xa8e   : > { %v6845_v8 = vadd.f32 %v6813_v30, %v15974_v54  ;;  %v6815_v28 = vmul.f32 %v6695_v10, %v6611_v52  ;;  %v15979_v52 = vld [vmem:[#allocation44_spill] sm:$0xff]  ;;  %v5935_v54 = vadd.f32 %v14393_v9, %v14412_v5 }
 0xa8f   : > { %v6447_v14 = vpop.permute.xlu0 %6446  ;;  %6742 = vperm.xlu2 %7984, %v15975_v56   ;;  %6750 = vperm.xlu1 %7990, %v15976_v26   ;;  %v15980_v26 = vld [vmem:[#allocation72_spill] sm:$0xff] }
 0xa90   : > { %v6877_v11 = vmul.f32 0.33333334, %v6845_v8  ;;  %v6847_v6 = vadd.f32 %v6815_v28, %v15977_v53  ;;  %v6492_v30 = vmul.f32 %v6447_v14, %v6325_v17  ;;  %v6315_v8 = vadd.f32 %v14408_v42, %v14414_v50  ;;  %v15981_v53 = vld [vmem:[#allocation57_spill] sm:$0xff] }
 0xa91   : > { %6770 = vperm.xlu0 %7986, %v15978_v44   ;;  %v14499_v19 = vpop.f32.mrf.mxu3  ;;  %v6313_v14 = vadd.f32 %v14408_v42, %v14374_v25  ;;  %v15982_v44 = vld [vmem:[#allocation66_spill] sm:$0xff] }
 0xa92   : > { %6909 = vst [vmem:[%s14320_s20] sm:$0xff] %v6877_v11  ;;  %v6879_v45 = vmul.f32 0.33333334, %v6847_v6 }
 0xa93   : > { %v6075_v49 = vpop.permute.xlu2 %6074 }
 0xa94   : > { %6911 = vst [vmem:[%s14320_s20 + $0x10] sm:$0xff] %v6879_v45  ;;  %v6140_v11 = vmul.f32 %v6075_v49, %v5935_v54  ;;  %v15983_v45 = vld [vmem:[#allocation40_spill] sm:$0xff] }
 0xa95   : > { %v6613_v49 = vadd.f32 %v14286_v40, %v15983_v45 }
 0xa96   : > { %v6070_v15 = vpop.permute.xlu1 %6069 }
 0xa97   : > { %6754 = vperm.xlu2 %7984, %v13935_v18   ;;  %6762 = vperm.xlu1 %7990, %v13904_v29   ;;  %v5933_v29 = vadd.f32 %v14393_v9, %v14372_v12 }
 0xa98   : > { %v6095_v60 = vpop.permute.xlu0 %6094 }
 0xa99   : > { %v6144_v24 = vmul.f32 %v6095_v60, %v5945_v59  ;;  %6782 = vperm.xlu0 %7986, %v15979_v52   ;;  %v6139_v6 = vmul.f32 %v6070_v15, %v5933_v29  ;;  %v14519_v57 = vpop.f32.mrf.mxu3  ;;  %v15984_v59 = vld [vmem:[#allocation51_spill] sm:$0xff]  ;;  %v15985_v60 = vld [vmem:[#allocation14_spill] sm:$0xff]  ;;  %v15986_v15 = vld [vmem:[#allocation16_spill] sm:$0xff] }
 0xa9b   : > { %v14506_v10 = vadd.f32 %v6492_v30, %v6144_v24  ;;  %v6431_v28 = vpop.permute.xlu2 %6430  ;;  %v6616_v30 = vadd.f32 %v14286_v40, %v15985_v60  ;;  %v15987_v24 = vld [vmem:[#allocation31_spill] sm:$0xff] }
 0xa9c   : > { %v6488_v18 = vmul.f32 %v6431_v28, %v6315_v8  ;;  %v15988_v28 = vld [vmem:[#allocation15_spill] sm:$0xff] }
 0xa9d   : > { %v15990_v60 = vld [vmem:[#allocation63_spill] sm:$0xff] }
 0xa9e   : > { %v14508_v56 = vadd.f32 %v6488_v18, %v6140_v11 }
 0xa9f   : > { %6766 = vperm.xlu2 %7984, %v15980_v26   ;;  %6774 = vperm.xlu1 %7990, %v15981_v53   ;;  %v6427_v5 = vpop.permute.xlu1 %6426 }
 0xaa0   : > { %v6487_v50 = vmul.f32 %v6427_v5, %v6313_v14  ;;  %v6323_v5 = vadd.f32 %v14408_v42, %v14480_v23  ;;  %v15989_v23 = vld [vmem:[#allocation58_spill] sm:$0xff] }
 0xaa1   : > { %6794 = vperm.xlu0 %7986, %v15982_v44   ;;  %v14531_v18 = vpop.f32.mrf.mxu3 }
 0xaa2   : > { %v14521_v16 = vadd.f32 %v6487_v50, %v6139_v6 }
 0xaa3   : > { %v6699_v12 = vpop.permute.xlu2 %6698 }
 0xaa4   : > { %v6816_v25 = vmul.f32 %v6699_v12, %v6613_v49 }
 0xaa6   : > { %v6848_v17 = vadd.f32 %v6816_v25, %v15984_v59  ;;  %v6618_v25 = vadd.f32 %v14286_v40, %v15989_v23 }
 0xaa7   : > { %6778 = vperm.xlu2 %7984, %v15986_v15   ;;  %6786 = vperm.xlu1 %7990, %v15987_v24   ;;  %v15991_v15 = vld [vmem:[#allocation54_spill] sm:$0xff] }
 0xaa8   : > { %v6880_v52 = vmul.f32 0.33333334, %v6848_v17  ;;  %v6703_v54 = vpop.permute.xlu1 %6702 }
 0xaa9   : > { %6806 = vperm.xlu0 %7986, %v14348_v38   ;;  %v6817_v8 = vmul.f32 %v6703_v54, %v6616_v30  ;;  %v14536_v53 = vpop.f32.mrf.mxu3  ;;  %v5943_v38 = vadd.f32 %v14393_v9, %v14478_v43  ;;  %v15992_v54 = vld [vmem:[#allocation26_spill] sm:$0xff] }
 0xaaa   : > { %6912 = vst [vmem:[%s14320_s20 + $0x18] sm:$0xff] %v6880_v52 }
 0xaab   : > { %v6849_v11 = vadd.f32 %v6817_v8, %v15988_v28 }
 0xaac   : > { %v6090_v29 = vpop.permute.xlu2 %6089 }
 0xaad   : > { %v6881_v14 = vmul.f32 0.33333334, %v6849_v11  ;;  %v6143_v50 = vmul.f32 %v6090_v29, %v5943_v38 }
 0xaaf   : > { %6913 = vst [vmem:[%s14320_s20 + $0x20] sm:$0xff] %v6881_v14  ;;  %6790 = vperm.xlu2 %7984, %v14181_v21   ;;  %6798 = vperm.xlu1 %7990, %v14052_v33   ;;  %v5940_v33 = vadd.f32 %v14393_v9, %v14457_v20  ;;  %v6320_v21 = vadd.f32 %v14408_v42, %v14459_v4 }
 0xab0   : > { %v6623_v20 = vadd.f32 %v14286_v40, %v15991_v15  ;;  %v15994_v15 = vld [vmem:[#allocation73_spill] sm:$0xff] }
 0xab1   : > { %v6085_v26 = vpop.permute.xlu1 %6084 }
 0xab2   : > { %v6142_v49 = vmul.f32 %v6085_v26, %v5940_v33 }
 0xab5   : > { %v6443_v6 = vpop.permute.xlu2 %6442 }
 0xab6   : > { %v6491_v44 = vmul.f32 %v6443_v6, %v6323_v5  ;;  %v5947_v5 = vpop.f32.mrf.mxu1  ;;  %v6327_v6 = vpop.f32.mrf.mxu2 }
 0xab7   : > { %6802 = vperm.xlu2 %7984, %v14276_v51   ;;  %6810 = vperm.xlu1 %7990, %v15970_v62   ;;  %v14554_v51 = vpop.f32.mrf.mxu3  ;;  %v6328_v33 = vadd.f32 %v14408_v42, %v6327_v6 }
 0xab8   : > { %v14544_v45 = vadd.f32 %v6491_v44, %v6143_v50  ;;  %v5948_v44 = vadd.f32 %v14393_v9, %v5947_v5 }
 0xaba   : > { %v6439_v43 = vpop.permute.xlu1 %6438 }
 0xabb   : > { %v6490_v12 = vmul.f32 %v6439_v43, %v6320_v21 }
 0xabd   : > { %v14552_v59 = vadd.f32 %v6490_v12, %v6142_v49  ;;  %v15993_v12 = vld [vmem:[#allocation35_spill] sm:$0xff] }
 0xabe   : > { %v6707_v62 = vpop.permute.xlu2 %6706  ;;  %v6626_v23 = vadd.f32 %v14286_v40, %v15993_v12 }
 0xabf   : > { %v6818_v17 = vmul.f32 %v6707_v62, %v6618_v25  ;;  %v14563_v11 = vpop.f32.mrf.mxu3 }
 0xac1   : > { %v6850_v30 = vadd.f32 %v6818_v17, %v15990_v60 }
 0xac3   : > { %v6882_v24 = vmul.f32 0.33333334, %v6850_v30  ;;  %v6715_v4 = vpop.permute.xlu1 %6714 }
 0xac4   : > { %v6820_v52 = vmul.f32 %v6715_v4, %v6623_v20 }
 0xac5   : > { %6914 = vst [vmem:[%s14320_s20 + $0x28] sm:$0xff] %v6882_v24  ;;  %v6631_v24 = vadd.f32 %v14286_v40, %v14312_v48 }
 0xac6   : > { %v6852_v8 = vadd.f32 %v6820_v52, %v15992_v54 }
 0xac7   : > { %v14561_v28 = vpop.permute.xlu2 %6104  ;;  %v14570_v50 = vpop.f32.mrf.mxu3 }
 0xac8   : > { %v6884_v29 = vmul.f32 0.33333334, %v6852_v8  ;;  %v6633_v8 = vadd.f32 %v14286_v40, %v14358_v7 }
 0xaca   : > { %6916 = vst [vmem:[%s14320_s20 + $0x38] sm:$0xff] %v6884_v29  ;;  %v15995_v29 = vld [vmem:[#allocation69_spill] sm:$0xff] }
 0xacc   : > { %v6100_v14 = vpop.permute.xlu1 %6099 }
 0xacd   : > { %v6145_v43 = vmul.f32 %v6100_v14, %v5948_v44  ;;  %v6628_v14 = vadd.f32 %v14286_v40, %v15995_v29 }
 0xacf   : > { %v14580_v30 = vpop.f32.mrf.mxu3 }
 0xad0   : > { %v14566_v26 = vpop.permute.xlu2 %6454 }
 0xad1   : > { %v14568_v38 = vpop.permute.xlu0 %6109 }
 0xad5   : > { %v6451_v21 = vpop.permute.xlu1 %6450 }
 0xad6   : > { %v6493_v49 = vmul.f32 %v6451_v21, %v6328_v33 }
 0xad7   : > { %v14594_v12 = vpop.f32.mrf.mxu3 }
 0xad8   : > { %v14576_v25 = vadd.f32 %v6493_v49, %v6145_v43 }
 0xad9   : > { %v6719_v62 = vpop.permute.xlu2 %6718 }
 0xada   : > { %v14578_v17 = vpop.permute.xlu0 %6458  ;;  %v6821_v60 = vmul.f32 %v6719_v62, %v6626_v23 }
 0xadc   : > { %v6853_v20 = vadd.f32 %v6821_v60, %v15994_v15  ;;  %v6636_v60 = vadd.f32 %v14286_v40, %v14387_v27  ;;  %v6643_v27 = vadd.f32 %v14286_v40, %v14463_v41  ;;  %v6651_v41 = vadd.f32 %v14286_v40, %v14519_v57 }
 0xade   : > { %v6885_v4 = vmul.f32 0.33333334, %v6853_v20  ;;  %v6727_v52 = vpop.permute.xlu1 %6726 }
 0xadf   : > { %v6823_v54 = vmul.f32 %v6727_v52, %v6631_v24  ;;  %v6670_v52 = vpop.f32.mrf.mxu3 }
 0xae0   : > { %6917 = vst [vmem:[%s14320_s20 + $0x40] sm:$0xff] %v6885_v4 }
 0xae1   : > { %v6855_v5 = vadd.f32 %v6823_v54, %v14344_v1  ;;  %v6731_v6 = vpop.permute.xlu2 %6730  ;;  %v6641_v1 = vadd.f32 %v14286_v40, %v14442_v31  ;;  %v6648_v31 = vadd.f32 %v14286_v40, %v14499_v19  ;;  %v6638_v19 = vadd.f32 %v14286_v40, %v14419_v36 }
 0xae2   : > { %v6824_v44 = vmul.f32 %v6731_v6, %v6633_v8 }
 0xae3   : > { %v6723_v33 = vpop.permute.xlu0 %6722  ;;  %v6887_v21 = vmul.f32 0.33333334, %v6855_v5 }
 0xae4   : > { %v6822_v43 = vmul.f32 %v6723_v33, %v6628_v14  ;;  %v6856_v48 = vadd.f32 %v6824_v44, %v14352_v47 }
 0xae5   : > { %6919 = vst [vmem:[%s14320_s20 + $0x50] sm:$0xff] %v6887_v21 }
 0xae6   : > { %v6854_v49 = vadd.f32 %v6822_v43, %v14369_v3  ;;  %v6888_v7 = vmul.f32 0.33333334, %v6856_v48  ;;  %v6656_v43 = vadd.f32 %v14286_v40, %v14536_v53  ;;  %v6310_v53 = vadd.f32 %v14408_v42, %v14329_v63 }
 0xae7   : > { %v14596_v62 = vpop.permute.xlu1 %6114  ;;  %v14620_v48 = vpop.f32.mrf.mxu3  ;;  %v6658_v63 = vadd.f32 %v14286_v40, %v14554_v51 }
 0xae8   : > { %v6886_v23 = vmul.f32 0.33333334, %v6854_v49  ;;  %6920 = vst [vmem:[%s14320_s20 + $0x58] sm:$0xff] %v6888_v7 }
 0xae9   : > { %v6743_v47 = vpop.permute.xlu2 %6742 }
 0xaea   : > { %6918 = vst [vmem:[%s14320_s20 + $0x48] sm:$0xff] %v6886_v23  ;;  %v6827_v15 = vmul.f32 %v6743_v47, %v6641_v1 }
 0xaeb   : > { %v6735_v20 = vpop.permute.xlu0 %6734 }
 0xaec   : > { %v6825_v3 = vmul.f32 %v6735_v20, %v6636_v60  ;;  %v6859_v24 = vadd.f32 %v6827_v15, %v14384_v37  ;;  %v5930_v20 = vadd.f32 %v14393_v9, %v14327_v46 }
 0xaee   : > { %v6857_v4 = vadd.f32 %v6825_v3, %v14400_v32  ;;  %v6891_v54 = vmul.f32 0.33333334, %v6859_v24  ;;  %v6486_v3 = vmul.f32 %v14449_v22, %v6310_v53 }
 0xaf0   : > { %v6889_v8 = vmul.f32 0.33333334, %v6857_v4  ;;  %6923 = vst [vmem:[%s14320_s20 + $0x70] sm:$0xff] %v6891_v54  ;;  %v14609_v29 = vpop.permute.xlu1 %6462  ;;  %v6646_v4 = vadd.f32 %v14286_v40, %v14487_v34 }
 0xaf1   : > { %v6755_v14 = vpop.permute.xlu2 %6754 }
 0xaf2   : > { %6921 = vst [vmem:[%s14320_s20 + $0x60] sm:$0xff] %v6889_v8  ;;  %v6830_v5 = vmul.f32 %v6755_v14, %v6648_v31  ;;  %v14643_v31 = vpop.f32.mrf.mxu3 }
 0xaf3   : > { %v6747_v37 = vpop.permute.xlu0 %6746 }
 0xaf4   : > { %v6828_v6 = vmul.f32 %v6747_v37, %v6643_v27  ;;  %v6862_v32 = vadd.f32 %v6830_v5, %v14431_v2 }
 0xaf6   : > { %v6860_v44 = vadd.f32 %v6828_v6, %v14426_v39  ;;  %v6894_v33 = vmul.f32 0.33333334, %v6862_v32 }
 0xaf8   : > { %v6892_v21 = vmul.f32 0.33333334, %v6860_v44  ;;  %6926 = vst [vmem:[%s14320_s20 + $0x88] sm:$0xff] %v6894_v33  ;;  %v6653_v44 = vadd.f32 %v14286_v40, %v14531_v18  ;;  %v6671_v33 = vadd.f32 %v14286_v40, %v6670_v52 }
 0xaf9   : > { %v6767_v49 = vpop.permute.xlu2 %6766  ;;  %v6739_v7 = vpop.permute.xlu1 %6738 }
 0xafa   : > { %6924 = vst [vmem:[%s14320_s20 + $0x78] sm:$0xff] %v6892_v21  ;;  %v6833_v2 = vmul.f32 %v6767_v49, %v6656_v43  ;;  %v6826_v39 = vmul.f32 %v6739_v7, %v6638_v19  ;;  %v6329_v21 = vpop.f32.mrf.mxu2  ;;  %v6666_v19 = vadd.f32 %v14286_v40, %v14580_v30 }
 0xafb   : > { %v6759_v23 = vpop.permute.xlu0 %6758  ;;  %v6330_v18 = vadd.f32 %v14408_v42, %v6329_v21 }
 0xafc   : > { %v6831_v1 = vmul.f32 %v6759_v23, %v6651_v41  ;;  %v6865_v36 = vadd.f32 %v6833_v2, %v14467_v0  ;;  %v6858_v60 = vadd.f32 %v6826_v39, %v14376_v55  ;;  %v6663_v55 = vadd.f32 %v14286_v40, %v14570_v50  ;;  %v15996_v0 = vld [vmem:[#allocation67_spill] sm:$0xff]  ;;  %v6677_v39 = vpop.f32.mrf.mxu3 }
 0xafe   : > { %v6863_v47 = vadd.f32 %v6831_v1, %v14440_v13  ;;  %v6897_v57 = vmul.f32 0.33333334, %v6865_v36  ;;  %v6890_v15 = vmul.f32 0.33333334, %v6858_v60  ;;  %v6138_v13 = vmul.f32 %v15996_v0, %v5930_v20 }
 0xaff   : > { %v6494_v36 = vmul.f32 %v14566_v26, %v6330_v18 }
 0xb00   : > { %v6895_v24 = vmul.f32 0.33333334, %v6863_v47  ;;  %6929 = vst [vmem:[%s14320_s20 + $0xa0] sm:$0xff] %v6897_v57  ;;  %v6518_v27 = vadd.f32 %v6486_v3, %v6138_v13  ;;  %v6661_v57 = vadd.f32 %v14286_v40, %v14563_v11 }
 0xb01   : > { %6922 = vst [vmem:[%s14320_s20 + $0x68] sm:$0xff] %v6890_v15  ;;  %v6779_v54 = vpop.permute.xlu2 %6778  ;;  %v6751_v8 = vpop.permute.xlu1 %6750  ;;  %v6678_v15 = vadd.f32 %v14286_v40, %v6677_v39 }
 0xb02   : > { %6927 = vst [vmem:[%s14320_s20 + $0x90] sm:$0xff] %v6895_v24  ;;  %v6836_v46 = vmul.f32 %v6779_v54, %v6663_v55  ;;  %v6829_v22 = vmul.f32 %v6751_v8, %v6646_v4  ;;  %v6332_v3 = vpop.f32.mrf.mxu2 }
 0xb03   : > { %v6771_v34 = vpop.permute.xlu0 %6770  ;;  %v6333_v13 = vadd.f32 %v14408_v42, %v6332_v3 }
 0xb04   : > { %v6834_v14 = vmul.f32 %v6771_v34, %v6658_v63  ;;  %v6868_v50 = vadd.f32 %v6836_v46, %v14508_v56  ;;  %v6861_v51 = vadd.f32 %v6829_v22, %v14433_v58  ;;  %v5949_v56 = vpop.f32.mrf.mxu1  ;;  %v6680_v54 = vpop.f32.mrf.mxu3 }
 0xb05   : > { %v5950_v1 = vadd.f32 %v14393_v9, %v5949_v56  ;;  %v6495_v34 = vmul.f32 %v14578_v17, %v6333_v13 }
 0xb06   : > { %v6866_v5 = vadd.f32 %v6834_v14, %v6518_v27  ;;  %v6900_v37 = vmul.f32 0.33333334, %v6868_v50  ;;  %v6893_v6 = vmul.f32 0.33333334, %v6861_v51  ;;  %v6668_v14 = vadd.f32 %v14286_v40, %v14594_v12 }
 0xb07   : > { %v6146_v20 = vmul.f32 %v14561_v28, %v5950_v1  ;;  %v6681_v50 = vadd.f32 %v14286_v40, %v6680_v54 }
 0xb08   : > { %v6898_v32 = vmul.f32 0.33333334, %v6866_v5  ;;  %6932 = vst [vmem:[%s14320_s20 + $0xb8] sm:$0xff] %v6900_v37 }
 0xb09   : > { %6925 = vst [vmem:[%s14320_s20 + $0x80] sm:$0xff] %v6893_v6  ;;  %v6791_v43 = vpop.permute.xlu2 %6790  ;;  %v6763_v41 = vpop.permute.xlu1 %6762  ;;  %v6526_v24 = vadd.f32 %v6494_v36, %v6146_v20 }
 0xb0a   : > { %6930 = vst [vmem:[%s14320_s20 + $0xa8] sm:$0xff] %v6898_v32  ;;  %v6839_v58 = vmul.f32 %v6791_v43, %v6671_v33  ;;  %v6832_v49 = vmul.f32 %v6763_v41, %v6653_v44  ;;  %v6676_v33 = vadd.f32 %v14286_v40, %v14643_v31  ;;  %v6334_v21 = vpop.f32.mrf.mxu2 }
 0xb0b   : > { %v6783_v7 = vpop.permute.xlu0 %6782  ;;  %v6335_v41 = vadd.f32 %v14408_v42, %v6334_v21 }
 0xb0c   : > { %v6837_v2 = vmul.f32 %v6783_v7, %v6666_v19  ;;  %v6871_v52 = vadd.f32 %v6839_v58, %v14544_v45  ;;  %v6864_v23 = vadd.f32 %v6832_v49, %v14471_v35  ;;  %v6673_v35 = vadd.f32 %v14286_v40, %v14620_v48  ;;  %v5952_v11 = vpop.f32.mrf.mxu1 }
 0xb0d   : > { %v5953_v22 = vadd.f32 %v14393_v9, %v5952_v11  ;;  %v6496_v49 = vmul.f32 %v14609_v29, %v6335_v41 }
 0xb0e   : > { %v6869_v30 = vadd.f32 %v6837_v2, %v14482_v61  ;;  %v6903_v60 = vmul.f32 0.33333334, %v6871_v52  ;;  %v6896_v53 = vmul.f32 0.33333334, %v6864_v23 }
 0xb10   : > { %v6901_v47 = vmul.f32 0.33333334, %v6869_v30  ;;  %6935 = vst [vmem:[%s14320_s20 + $0xd0] sm:$0xff] %v6903_v60 }
 0xb11   : > { %6928 = vst [vmem:[%s14320_s20 + $0x98] sm:$0xff] %v6896_v53  ;;  %v6803_v61 = vpop.permute.xlu2 %6802  ;;  %v6775_v45 = vpop.permute.xlu1 %6774 }
 0xb12   : > { %6933 = vst [vmem:[%s14320_s20 + $0xc0] sm:$0xff] %v6901_v47  ;;  %v6842_v26 = vmul.f32 %v6803_v61, %v6678_v15  ;;  %v6835_v4 = vmul.f32 %v6775_v45, %v6661_v57 }
 0xb13   : > { %v6795_v55 = vpop.permute.xlu0 %6794 }
 0xb14   : > { %v6840_v63 = vmul.f32 %v6795_v55, %v6673_v35  ;;  %v6874_v0 = vadd.f32 %v6842_v26, %v6526_v24  ;;  %v6867_v28 = vadd.f32 %v6835_v4, %v14521_v16  ;;  %v6147_v16 = vmul.f32 %v14568_v38, %v5953_v22  ;;  %v5954_v43 = vpop.f32.mrf.mxu1 }
 0xb15   : > { %v5955_v58 = vadd.f32 %v14393_v9, %v5954_v43 }
 0xb16   : > { %v6872_v48 = vadd.f32 %v6840_v63, %v14506_v10  ;;  %v6906_v8 = vmul.f32 0.33333334, %v6874_v0  ;;  %v6899_v46 = vmul.f32 0.33333334, %v6867_v28  ;;  %v6527_v37 = vadd.f32 %v6495_v34, %v6147_v16 }
 0xb17   : > { %v6148_v2 = vmul.f32 %v14596_v62, %v5955_v58 }
 0xb18   : > { %v6904_v27 = vmul.f32 0.33333334, %v6872_v48  ;;  %6938 = vst [vmem:[%s14320_s20 + $0xe8] sm:$0xff] %v6906_v8 }
 0xb19   : > { %6931 = vst [vmem:[%s14320_s20 + $0xb0] sm:$0xff] %v6899_v46  ;;  %v6787_v10 = vpop.permute.xlu1 %6786 }
 0xb1a   : > { %6936 = vst [vmem:[%s14320_s20 + $0xd8] sm:$0xff] %v6904_v27  ;;  %v6838_v51 = vmul.f32 %v6787_v10, %v6668_v14 }
 0xb1b   : > { %v6807_v5 = vpop.permute.xlu0 %6806 }
 0xb1c   : > { %v6843_v6 = vmul.f32 %v6807_v5, %v6681_v50  ;;  %v6870_v17 = vadd.f32 %v6838_v51, %v14552_v59  ;;  %v6682_v59 = vpop.f32.mrf.mxu3 }
 0xb1d   : > { %v6683_v7 = vadd.f32 %v14286_v40, %v6682_v59 }
 0xb1e   : > { %v6875_v32 = vadd.f32 %v6843_v6, %v6527_v37  ;;  %v6902_v44 = vmul.f32 0.33333334, %v6870_v17 }
 0xb20   : > { %v6907_v12 = vmul.f32 0.33333334, %v6875_v32  ;;  %6934 = vst [vmem:[%s14320_s20 + $0xc8] sm:$0xff] %v6902_v44 }
 0xb21   : > { %v6799_v38 = vpop.permute.xlu1 %6798 }
 0xb22   : > { %6939 = vst [vmem:[%s14320_s20 + $0xf0] sm:$0xff] %v6907_v12  ;;  %v6841_v19 = vmul.f32 %v6799_v38, %v6676_v33 }
 0xb24   : > { %v6873_v56 = vadd.f32 %v6841_v19, %v14576_v25  ;;  %v6528_v25 = vadd.f32 %v6496_v49, %v6148_v2 }
 0xb26   : > { %v6905_v31 = vmul.f32 0.33333334, %v6873_v56 }
 0xb28   : > { %6937 = vst [vmem:[%s14320_s20 + $0xe0] sm:$0xff] %v6905_v31 }
 0xb29   : > { %v6811_v42 = vpop.permute.xlu1 %6810 }
 0xb2a   : > { %v6844_v18 = vmul.f32 %v6811_v42, %v6683_v7 }
 0xb2c   : > { %v6876_v9 = vadd.f32 %v6844_v18, %v6528_v25 }
 0xb2e   : > { %v6908_v29 = vmul.f32 0.33333334, %v6876_v9 }
 0xb30   : > { %6940 = vst [vmem:[%s14320_s20 + $0xf8] sm:$0xff] %v6908_v29 }
 0xb31   : > { %8348 = shalt.err (!%p8345_p12)
}
 0xb32   : > { %s8402_s17 = smov 128   ;;  %s8403_s20 = smov 8  }
 0xb33   : > { %7600 = dma.vmem_to_hbm [thread:$0]  (%p8521_p7), %s6965_s13, 4096, %s6967_s15, %s6942_s25, %s8402_s17, %s8402_s17, %s8403_s20  }
 0xb34 PF: > { %s6989_s19 = sand.u32 1, %s8379_s30   ;;  %p15997_p13 = scmp.ge.s32.totalorder %s8391_s12, 2 }
 0xb35   : > { %s6990_s22 = scalar_lea.sflag [#allocation4], %s6989_s19 }
 0xb36   : > { %p7611_p0 = pnand %p15997_p13, %p8489_p6 }
 0xb38   : > { %p7612_p3 = pneg %p7611_p0 }
 0xb3a   : > { %8374 = dma.done.wait (%p7612_p3), %s6990_s22, 4096  }
 0xb3b   : > { %8376 = vsyncadd (%p7612_p3), %s6990_s22, 4294963200  ;;  %s15998_s14 = sld [smem:[#allocation11_spill]]  ;;  %p24_p5 = scmp.ge.s32.totalorder %s8507_s23, 4  }
 0xb3c   : > { %s15999_s11 = sld [smem:[#allocation12_spill]]  ;;  %s16000_s30 = smov %s8383_s10 }
 0xb3d   : > { %s16002_s12 = smov %s8507_s23  ;;  %26 = sbr.rel (!%p24_p5) target bundleno = 8 (0x8), region = 125 }
 0xb41   : > { %s16001_s10 = smov %s15998_s14 }
 0xb42   :  { %7012 = vsyncpa [#allocation3], 1 }
 0xb43   :  { %7014 = vsyncpa [#allocation3 + $0x1], 1 }
 0xb44   :  { %7015 = vsyncpa [#allocation6], 1 }
 0xb45   :  { %7016 = vsyncpa [#allocation4], 1 }
 0xb46   :  { %7018 = vsyncpa [#allocation4 + $0x1], 1 }

</bundles_post_ra>
